<compile_context>
chip_gen: v5e
topology: v5e:2x2
jax: 0.10.0
libtpu: 0.0.40
codegen_flags: <defaults>
</compile_context>

<pallas_src>
import functools
import math

import jax
import jax.numpy as jnp
from jax.experimental import pallas as pl
from jax.experimental.pallas import tpu as pltpu

IN_CHANNELS = 64
_EPS = 1e-5


def _vmem_limit_bytes():
    """Scoped-VMEM limit derived from the hardware; conservative fallback."""
    try:
        cap = int(pltpu.get_tpu_info().vmem_capacity_bytes)
        return max(16 * 1024 * 1024, min(64 * 1024 * 1024, cap // 2))
    except Exception:
        return 32 * 1024 * 1024


# ----------------------------------------------------------------------------
# Stage 1 kernel: conv1 (packed im2col matmul) + bias + GroupNorm(8,32) + ReLU
# ----------------------------------------------------------------------------
def _stage1_kernel(p_ref, w_ref, b_ref, g_ref, be_ref, avg_ref, o_ref, *, eps):
    """p_ref  : (1, R, Kp)   bf16 row-packed patches (pack=4 rows -> 128 lanes)
       w_ref  : (Kp, 128)    bf16 block-diagonal conv weight (zero K padding)
       b/g/be : (1, 128)     f32 bias / gamma / beta, tiled pack times
       avg_ref: (128, 128)   f32 precomputed group-averaging matrix
       o_ref  : (1, R, 128)  bf16 lane-dense output (bit-identical to NDHWC)."""
    # bf16 x bf16 -> f32 accumulate on the MXU.
    y = jnp.dot(p_ref[0], w_ref[...], preferred_element_type=jnp.float32)
    y = y + b_ref[...]                                     # (R, 128) f32

    # GroupNorm stats: per-column sums, folded to per-group means with a
    # single (2, kc) x (kc, kc) matmul against the precomputed averaging mat.
    stats = jnp.concatenate(
        [jnp.sum(y, axis=0, keepdims=True),
         jnp.sum(y * y, axis=0, keepdims=True)], axis=0)   # (2, 128)
    folded = jnp.dot(stats, avg_ref[...], preferred_element_type=jnp.float32)
    mean = folded[0:1]
    var = jnp.maximum(folded[1:2] - mean * mean, 0.0)      # clamp cancellation
    inv = jax.lax.rsqrt(var + eps)
    scale = inv * g_ref[...]
    shift = be_ref[...] - mean * scale
    o_ref[0] = jnp.maximum(y * scale + shift, 0.0).astype(o_ref.dtype)


# ----------------------------------------------------------------------------
# Stage 2 kernel: conv2 (in-VMEM LHS construction, Toeplitz-width weight)
#                 + bias + GroupNorm(8,64) + ReLU + full-depth MaxPool
# Specialized to D2 = H = W = 8 (asserted in the wrapper).
# ----------------------------------------------------------------------------
def _stage2_kernel(x_ref, w_ref, b_ref, g_ref, be_ref, avg_ref, o_ref, *, eps):
    """x_ref  : (1, 4, 10, 8, 384) bf16 padded slab: (depth tap i, padded H,
                output depth d2, padded_W*C lanes).
       w_ref  : (3072, 256) bf16 Toeplitz(width) weight; rows (i, j, w_in, c),
                cols (w_out_rel, c_out).
       b/g/be : (1, 256) f32 channel vectors tiled over the 4 w_out_rel slots.
       avg_ref: (256, 256) f32 precomputed group-averaging matrix.
       o_ref  : (1, 2, 8, 256) f32 pooled output: (width half, H, w_rel*64+c)."""
    xs = x_ref[0]                                          # (4, 10, 8, 384)

    # Build the conv LHS in VMEM (no HBM im2col).  Width taps are handled by
    # the Toeplitz weight inside each 256-lane (2-tile) window; height taps
    # are outer-dim slices; depth taps index the leading axis.  Every slice
    # and concatenation below is (8, 128)-tile aligned.
    halves = []
    for q in range(2):                                     # output w = 4*q + w_rel
        pieces = [xs[i, j:j + 8, :, 128 * q:128 * q + 256]
                  for i in range(4) for j in range(3)]     # each (8, 8, 256)
        halves.append(jnp.concatenate(pieces, axis=-1).reshape(64, 3072))
    lhs = jnp.concatenate(halves, axis=0)                  # (128, 3072) bf16

    y = jnp.dot(lhs, w_ref[...], preferred_element_type=jnp.float32)
    y = y + b_ref[...]                                     # (128, 256) f32

    stats = jnp.concatenate(
        [jnp.sum(y, axis=0, keepdims=True),
         jnp.sum(y * y, axis=0, keepdims=True)], axis=0)   # (2, 256)
    folded = jnp.dot(stats, avg_ref[...], preferred_element_type=jnp.float32)
    mean = folded[0:1]
    var = jnp.maximum(folded[1:2] - mean * mean, 0.0)
    inv = jax.lax.rsqrt(var + eps)
    scale = inv * g_ref[...]
    shift = be_ref[...] - mean * scale
    y = jnp.maximum(y * scale + shift, 0.0)

    # MaxPool3d((8,1,1)): rows are (half, h, d2) -> reduce over d2.
    o_ref[0] = jnp.max(y.reshape(2, 8, 8, 256), axis=2).astype(o_ref.dtype)


# ----------------------------------------------------------------------------
# pallas_call wrappers (grid over batch; weights / norm constants invariant)
# ----------------------------------------------------------------------------
def _stage1_call(p1, w_bd, bias, gamma, beta, avg):
    n, r, kp = p1.shape
    kc = w_bd.shape[1]
    return pl.pallas_call(
        functools.partial(_stage1_kernel, eps=_EPS),
        out_shape=jax.ShapeDtypeStruct((n, r, kc), jnp.bfloat16),
        grid_spec=pltpu.PrefetchScalarGridSpec(
            num_scalar_prefetch=0,
            grid=(n,),
            in_specs=[
                pl.BlockSpec((1, r, kp), lambda i: (i, 0, 0)),
                pl.BlockSpec((kp, kc), lambda i: (0, 0)),
                pl.BlockSpec((1, kc), lambda i: (0, 0)),
                pl.BlockSpec((1, kc), lambda i: (0, 0)),
                pl.BlockSpec((1, kc), lambda i: (0, 0)),
                pl.BlockSpec((kc, kc), lambda i: (0, 0)),
            ],
            out_specs=pl.BlockSpec((1, r, kc), lambda i: (i, 0, 0)),
        ),
        compiler_params=pltpu.CompilerParams(
            dimension_semantics=("parallel",),
            vmem_limit_bytes=_vmem_limit_bytes(),
        ),
    )(p1, w_bd, bias, gamma, beta, avg)


def _stage2_call(xs2, w_toe, bias, gamma, beta, avg):
    n = xs2.shape[0]
    kk, kc = w_toe.shape                                   # 3072, 256
    return pl.pallas_call(
        functools.partial(_stage2_kernel, eps=_EPS),
        out_shape=jax.ShapeDtypeStruct((n, 2, 8, kc), jnp.float32),
        grid_spec=pltpu.PrefetchScalarGridSpec(
            num_scalar_prefetch=0,
            grid=(n,),
            in_specs=[
                pl.BlockSpec((1, 4, 10, 8, 384), lambda i: (i, 0, 0, 0, 0)),
                pl.BlockSpec((kk, kc), lambda i: (0, 0)),
                pl.BlockSpec((1, kc), lambda i: (0, 0)),
                pl.BlockSpec((1, kc), lambda i: (0, 0)),
                pl.BlockSpec((1, kc), lambda i: (0, 0)),
                pl.BlockSpec((kc, kc), lambda i: (0, 0)),
            ],
            out_specs=pl.BlockSpec((1, 2, 8, kc), lambda i: (i, 0, 0, 0)),
        ),
        compiler_params=pltpu.CompilerParams(
            dimension_semantics=("parallel",),
            vmem_limit_bytes=_vmem_limit_bytes(),
        ),
    )(xs2, w_toe, bias, gamma, beta, avg)


# ----------------------------------------------------------------------------
# Host-side glue: im2col (stage 1 only), weight re-layouts, GN constants
# ----------------------------------------------------------------------------
def _im2col_ndhwc(x, ksize, stride, pad):
    """im2col for NDHWC input; patch features ordered (kd, kh, kw, Cin)."""
    kd, kh, kw = ksize
    sd, sh, sw = stride
    pd, ph, pw = pad
    n, d, h, w, c = x.shape
    do = (d + 2 * pd - kd) // sd + 1
    ho = (h + 2 * ph - kh) // sh + 1
    wo = (w + 2 * pw - kw) // sw + 1
    xp = jnp.pad(x, ((0, 0), (pd, pd), (ph, ph), (pw, pw), (0, 0)))
    taps = []
    for i in range(kd):
        for j in range(kh):
            for k in range(kw):
                taps.append(xp[:, i:i + sd * (do - 1) + 1:sd,
                                  j:j + sh * (ho - 1) + 1:sh,
                                  k:k + sw * (wo - 1) + 1:sw, :])
    patches = jnp.concatenate(taps, axis=-1)
    return patches.reshape(n, do * ho * wo, kd * kh * kw * c), (do, ho, wo)


def _block_diag_weight(w, pack, k_pad):
    """PyTorch (Cout,Cin,kd,kh,kw) -> (kd*kh*kw*Cin, Cout) columnized weight,
    replicated block-diagonally `pack` times, with K zero-padded to k_pad."""
    cout = w.shape[0]
    w2 = jnp.transpose(w, (2, 3, 4, 1, 0)).reshape(-1, cout)
    wbd = jnp.kron(jnp.eye(pack, dtype=w2.dtype), w2)
    return jnp.pad(wbd, ((0, k_pad - wbd.shape[0]), (0, 0)))


def _toeplitz_width_weight(w, w_win, w_out):
    """PyTorch (Cout,Cin,kd,kh,kw) -> (kd*kh*w_win*Cin, w_out*Cout) weight with
    the width-tap structure folded in (Toeplitz over a w_win input window)."""
    cout, cin, kd, kh, kw = w.shape
    wt = jnp.transpose(w, (2, 3, 4, 1, 0))                 # (kd,kh,kw,Cin,Cout)
    m = jnp.zeros((kd, kh, w_win, cin, w_out, cout), w.dtype)
    for k in range(kw):
        for wo in range(w_out):
            m = m.at[:, :, wo + k, :, wo, :].set(wt[:, :, k])
    return m.reshape(kd * kh * w_win * cin, w_out * cout)


def _tile_row(v, reps):
    return jnp.tile(v, reps).reshape(1, -1).astype(jnp.float32)


def _group_avg_mat(kc, channels, groups, n_per_group):
    c = jnp.arange(kc)
    g = (c % channels) // (channels // groups)
    same = (g[:, None] == g[None, :]).astype(jnp.float32)
    return same * (1.0 / float(n_per_group))


# ----------------------------------------------------------------------------
# Full forward
# ----------------------------------------------------------------------------
def doppler_encoder_group_forward(x, params):
    """x: (N, 2, D, H, W) NCDHW float32.  Returns (N, 64, H, W) NCHW float32."""
    n, cin, d, h, w = x.shape
    assert cin == 2 and h == 8 and w == 8, "kernel specialized to Cin=2, H=W=8"
    xl = jnp.transpose(x, (0, 2, 3, 4, 1)).astype(jnp.bfloat16)   # NDHWC, bf16

    # ---- stage 1: conv1 (5,3,3)/s(4,1,1)/p(2,1,1) + GN(8,32) + ReLU ---------
    c1, pack1 = 32, 4                                      # 4 rows -> 128 lanes
    p1, (d1, h1, w1) = _im2col_ndhwc(xl, (5, 3, 3), (4, 1, 1), (2, 1, 1))
    s1, k1 = d1 * h1 * w1, p1.shape[-1]                    # 2048, 90
    kp1 = ((pack1 * k1 + 127) // 128) * 128                # 360 -> 384 (dense K)
    p1 = p1.reshape(n, s1 // pack1, pack1 * k1)
    p1 = jnp.pad(p1, ((0, 0), (0, 0), (0, kp1 - pack1 * k1)))
    w1_bd = _block_diag_weight(params["w1"], pack1, kp1).astype(jnp.bfloat16)
    y1 = _stage1_call(
        p1, w1_bd,
        _tile_row(params["b1"], pack1),
        _tile_row(params["g1"], pack1),
        _tile_row(params["be1"], pack1),
        _group_avg_mat(pack1 * c1, c1, 8, s1 * (c1 // 8)))
    # packed (N, 512, 128) bf16 == NDHWC (N, 32, 8, 8, 32), bit-identical.

    # ---- stage 2 prep: tiny padded slab (no HBM im2col for stage 2) ---------
    c2 = IN_CHANNELS
    d2 = (d1 + 2 - 4) // 4 + 1
    assert d2 == 8 and h1 == 8 and w1 == 8, "stage-2 kernel needs D2=H=W=8"
    y1 = y1.reshape(n, d1, h1, w1, c1)                     # NDHWC (free reshape)
    yp = jnp.pad(y1, ((0, 0), (1, 0), (1, 1), (1, 3), (0, 0)))  # D/H/W conv pads
    yp = yp[:, :4 * d2]                                    # padded depths 0..31
    yp = yp.reshape(n, d2, 4, h1 + 2, (w1 + 4) * c1)       # (N, d2, i, hp, 384)
    xs2 = jnp.transpose(yp, (0, 2, 3, 1, 4))               # (N, i, hp, d2, 384)

    # ---- stage 2: conv2 + GN(8,64) + ReLU + MaxPool3d((8,1,1)) + squeeze ----
    w2_toe = _toeplitz_width_weight(params["w2"], 8, 4).astype(jnp.bfloat16)
    out = _stage2_call(
        xs2, w2_toe,
        _tile_row(params["b2"], 4),
        _tile_row(params["g2"], 4),
        _tile_row(params["be2"], 4),
        _group_avg_mat(4 * c2, c2, 8, d2 * h1 * w1 * (c2 // 8)))

    # (N, width-half, H, w_rel*64 + c) -> PyTorch NCHW
    out = out.reshape(n, 2, 8, 4, c2)
    return jnp.transpose(out, (0, 4, 2, 1, 3)).reshape(n, c2, 8, 8)


def init_params(key):
    # Deterministic, PyTorch-Conv3d-style uniform(-1/sqrt(fan_in), 1/sqrt(fan_in)).
    k = jax.random.split(key, 4)
    fan1 = 2 * 5 * 3 * 3
    fan2 = 32 * 4 * 3 * 3
    lim1 = 1.0 / math.sqrt(fan1)
    lim2 = 1.0 / math.sqrt(fan2)
    return {
        "w1": jax.random.uniform(k[0], (32, 2, 5, 3, 3), jnp.float32, -lim1, lim1),
        "b1": jax.random.uniform(k[1], (32,), jnp.float32, -lim1, lim1),
        "w2": jax.random.uniform(k[2], (IN_CHANNELS, 32, 4, 3, 3), jnp.float32, -lim2, lim2),
        "b2": jax.random.uniform(k[3], (IN_CHANNELS,), jnp.float32, -lim2, lim2),
        # GroupNorm affine params (PyTorch default init: weight=1, bias=0)
        "g1": jnp.ones((32,), jnp.float32),
        "be1": jnp.zeros((32,), jnp.float32),
        "g2": jnp.ones((IN_CHANNELS,), jnp.float32),
        "be2": jnp.zeros((IN_CHANNELS,), jnp.float32),
    }


if __name__ == "__main__":
    key = jax.random.PRNGKey(0)
    kx, kp = jax.random.split(key)
    # (N=2, Cin=2, D=128, H=8, W=8): depth pipeline 128 -> 32 -> 8 -> pool -> 1
    x = jax.random.normal(kx, (2, 2, 128, 8, 8), dtype=jnp.float32)
    params = init_params(kp)

    out = jax.jit(doppler_encoder_group_forward)(x, params)
    out = jax.block_until_ready(out)
    assert out.shape == (2, IN_CHANNELS, 8, 8), out.shape
    assert bool(jnp.isfinite(out).all())
    print("KERNEL_OK")
</pallas_src>

<mosaic_0001>
module attributes {stable_mosaic.version = 11 : i64} {
  func.func @_stage1_kernel(%arg0: i32, %arg1: memref<1x512x384xbf16, #tpu.memory_space<vmem>>, %arg2: memref<384x128xbf16, #tpu.memory_space<vmem>>, %arg3: memref<1x128xf32, #tpu.memory_space<vmem>>, %arg4: memref<1x128xf32, #tpu.memory_space<vmem>>, %arg5: memref<1x128xf32, #tpu.memory_space<vmem>>, %arg6: memref<128x128xf32, #tpu.memory_space<vmem>>, %arg7: memref<1x512x128xbf16, #tpu.memory_space<vmem>>) attributes {dimension_semantics = [#tpu.dimension_semantics<parallel>], iteration_bounds = array<i64: 2>, scalar_prefetch = 0 : i64, scratch_operands = 0 : i64, tpu.core_type = #tpu.core_type<tc>, window_params = [{transform_indices = @transform_0, window_bounds = array<i64: 1, 512, 384>}, {pipeline_mode = #tpu.pipeline_mode<synchronous>, transform_indices = @transform_1, window_bounds = array<i64: 384, 128>}, {pipeline_mode = #tpu.pipeline_mode<synchronous>, transform_indices = @transform_2, window_bounds = array<i64: 1, 128>}, {pipeline_mode = #tpu.pipeline_mode<synchronous>, transform_indices = @transform_3, window_bounds = array<i64: 1, 128>}, {pipeline_mode = #tpu.pipeline_mode<synchronous>, transform_indices = @transform_4, window_bounds = array<i64: 1, 128>}, {pipeline_mode = #tpu.pipeline_mode<synchronous>, transform_indices = @transform_5, window_bounds = array<i64: 128, 128>}, {transform_indices = @transform_6, window_bounds = array<i64: 1, 512, 128>}]} {
    %c0 = arith.constant 0 : index
    %c0_0 = arith.constant 0 : index
    %c0_1 = arith.constant 0 : index
    %0 = vector.load %arg1[%c0, %c0_0, %c0_1] : memref<1x512x384xbf16, #tpu.memory_space<vmem>>, vector<1x512x384xbf16>
    %1 = vector.shape_cast %0 : vector<1x512x384xbf16> to vector<512x384xbf16>
    %c0_2 = arith.constant 0 : index
    %c0_3 = arith.constant 0 : index
    %2 = vector.load %arg2[%c0_2, %c0_3] : memref<384x128xbf16, #tpu.memory_space<vmem>>, vector<384x128xbf16>
    %cst = arith.constant dense<0.000000e+00> : vector<512x128xf32>
    %3 = tpu.matmul %1, %2, %cst {dimension_numbers = #tpu.dot_dimension_numbers<[1], [0], [0], [1], [0, 0, 1, 1], [], []>} : vector<512x384xbf16>, vector<384x128xbf16>, vector<512x128xf32> -> vector<512x128xf32>
    %c0_4 = arith.constant 0 : index
    %c0_5 = arith.constant 0 : index
    %4 = vector.load %arg3[%c0_4, %c0_5] : memref<1x128xf32, #tpu.memory_space<vmem>>, vector<1x128xf32>
    %5 = vector.broadcast %4 : vector<1x128xf32> to vector<512x128xf32>
    %6 = arith.addf %3, %5 : vector<512x128xf32>
    %cst_6 = arith.constant dense<0.000000e+00> : vector<128xf32>
    %7 = vector.multi_reduction <add>, %6, %cst_6 [0] : vector<512x128xf32> to vector<128xf32>
    %8 = vector.shape_cast %7 : vector<128xf32> to vector<1x128xf32>
    %9 = arith.mulf %6, %6 : vector<512x128xf32>
    %cst_7 = arith.constant dense<0.000000e+00> : vector<128xf32>
    %10 = vector.multi_reduction <add>, %9, %cst_7 [0] : vector<512x128xf32> to vector<128xf32>
    %11 = vector.shape_cast %10 : vector<128xf32> to vector<1x128xf32>
    %12 = tpu.concatenate %8, %11 in 0 : vector<1x128xf32>, vector<1x128xf32> -> vector<2x128xf32>
    %c0_8 = arith.constant 0 : index
    %c0_9 = arith.constant 0 : index
    %13 = vector.load %arg6[%c0_8, %c0_9] : memref<128x128xf32, #tpu.memory_space<vmem>>, vector<128x128xf32>
    %cst_10 = arith.constant dense<0.000000e+00> : vector<2x128xf32>
    %14 = tpu.matmul %12, %13, %cst_10 {dimension_numbers = #tpu.dot_dimension_numbers<[1], [0], [0], [1], [0, 0, 1, 1], [], []>} : vector<2x128xf32>, vector<128x128xf32>, vector<2x128xf32> -> vector<2x128xf32>
    %15 = vector.extract_strided_slice %14 {offsets = [0, 0], sizes = [1, 128], strides = [1, 1]} : vector<2x128xf32> to vector<1x128xf32>
    %16 = vector.extract_strided_slice %14 {offsets = [1, 0], sizes = [1, 128], strides = [1, 1]} : vector<2x128xf32> to vector<1x128xf32>
    %17 = arith.mulf %15, %15 : vector<1x128xf32>
    %18 = arith.subf %16, %17 : vector<1x128xf32>
    %cst_11 = arith.constant 0.000000e+00 : f32
    %19 = vector.broadcast %cst_11 : f32 to vector<1x128xf32>
    %20 = arith.maximumf %18, %19 : vector<1x128xf32>
    %cst_12 = arith.constant 9.99999974E-6 : f32
    %21 = vector.broadcast %cst_12 : f32 to vector<1x128xf32>
    %22 = arith.addf %20, %21 : vector<1x128xf32>
    %23 = math.rsqrt %22 : vector<1x128xf32>
    %c0_13 = arith.constant 0 : index
    %c0_14 = arith.constant 0 : index
    %24 = vector.load %arg4[%c0_13, %c0_14] : memref<1x128xf32, #tpu.memory_space<vmem>>, vector<1x128xf32>
    %25 = arith.mulf %23, %24 : vector<1x128xf32>
    %c0_15 = arith.constant 0 : index
    %c0_16 = arith.constant 0 : index
    %26 = vector.load %arg5[%c0_15, %c0_16] : memref<1x128xf32, #tpu.memory_space<vmem>>, vector<1x128xf32>
    %27 = arith.mulf %15, %25 : vector<1x128xf32>
    %28 = arith.subf %26, %27 : vector<1x128xf32>
    %29 = vector.broadcast %25 : vector<1x128xf32> to vector<512x128xf32>
    %30 = arith.mulf %6, %29 : vector<512x128xf32>
    %31 = vector.broadcast %28 : vector<1x128xf32> to vector<512x128xf32>
    %32 = arith.addf %30, %31 : vector<512x128xf32>
    %cst_17 = arith.constant 0.000000e+00 : f32
    %33 = vector.broadcast %cst_17 : f32 to vector<512x128xf32>
    %34 = arith.maximumf %32, %33 : vector<512x128xf32>
    %35 = arith.truncf %34 : vector<512x128xf32> to vector<512x128xbf16>
    %c0_18 = arith.constant 0 : index
    %c0_19 = arith.constant 0 : index
    %c0_20 = arith.constant 0 : index
    %36 = vector.load %arg7[%c0_18, %c0_19, %c0_20] : memref<1x512x128xbf16, #tpu.memory_space<vmem>>, vector<1x512x128xbf16>
    %37 = vector.shape_cast %36 : vector<1x512x128xbf16> to vector<512x128xbf16>
    %38 = vector.shape_cast %35 : vector<512x128xbf16> to vector<1x512x128xbf16>
    tpu.vector_store %arg7[%c0_18, %c0_19, %c0_20], %38 {strides = array<i32>} : memref<1x512x128xbf16, #tpu.memory_space<vmem>>, vector<1x512x128xbf16>,
    return
  }
  func.func @transform_0(%arg0: i32) -> (i32, i32, i32) {
    %c0_i32 = arith.constant 0 : i32
    %c0_i32_0 = arith.constant 0 : i32
    %c0_i32_1 = arith.constant 0 : i32
    return %arg0, %c0_i32, %c0_i32_0 : i32, i32, i32
  }
  func.func @transform_1(%arg0: i32) -> (i32, i32) {
    %c0_i32 = arith.constant 0 : i32
    %c0_i32_0 = arith.constant 0 : i32
    %c0_i32_1 = arith.constant 0 : i32
    return %c0_i32, %c0_i32_0 : i32, i32
  }
  func.func @transform_2(%arg0: i32) -> (i32, i32) {
    %c0_i32 = arith.constant 0 : i32
    %c0_i32_0 = arith.constant 0 : i32
    %c0_i32_1 = arith.constant 0 : i32
    return %c0_i32, %c0_i32_0 : i32, i32
  }
  func.func @transform_3(%arg0: i32) -> (i32, i32) {
    %c0_i32 = arith.constant 0 : i32
    %c0_i32_0 = arith.constant 0 : i32
    %c0_i32_1 = arith.constant 0 : i32
    return %c0_i32, %c0_i32_0 : i32, i32
  }
  func.func @transform_4(%arg0: i32) -> (i32, i32) {
    %c0_i32 = arith.constant 0 : i32
    %c0_i32_0 = arith.constant 0 : i32
    %c0_i32_1 = arith.constant 0 : i32
    return %c0_i32, %c0_i32_0 : i32, i32
  }
  func.func @transform_5(%arg0: i32) -> (i32, i32) {
    %c0_i32 = arith.constant 0 : i32
    %c0_i32_0 = arith.constant 0 : i32
    %c0_i32_1 = arith.constant 0 : i32
    return %c0_i32, %c0_i32_0 : i32, i32
  }
  func.func @transform_6(%arg0: i32) -> (i32, i32, i32) {
    %c0_i32 = arith.constant 0 : i32
    %c0_i32_0 = arith.constant 0 : i32
    %c0_i32_1 = arith.constant 0 : i32
    return %arg0, %c0_i32, %c0_i32_0 : i32, i32, i32
  }
}

module attributes {stable_mosaic.version = 11 : i64} {
  func.func @_stage2_kernel(%arg0: i32, %arg1: memref<1x4x10x8x384xbf16, #tpu.memory_space<vmem>>, %arg2: memref<3072x256xbf16, #tpu.memory_space<vmem>>, %arg3: memref<1x256xf32, #tpu.memory_space<vmem>>, %arg4: memref<1x256xf32, #tpu.memory_space<vmem>>, %arg5: memref<1x256xf32, #tpu.memory_space<vmem>>, %arg6: memref<256x256xf32, #tpu.memory_space<vmem>>, %arg7: memref<1x2x8x256xf32, #tpu.memory_space<vmem>>) attributes {dimension_semantics = [#tpu.dimension_semantics<parallel>], iteration_bounds = array<i64: 2>, scalar_prefetch = 0 : i64, scratch_operands = 0 : i64, tpu.core_type = #tpu.core_type<tc>, window_params = [{transform_indices = @transform_0, window_bounds = array<i64: 1, 4, 10, 8, 384>}, {pipeline_mode = #tpu.pipeline_mode<synchronous>, transform_indices = @transform_1, window_bounds = array<i64: 3072, 256>}, {pipeline_mode = #tpu.pipeline_mode<synchronous>, transform_indices = @transform_2, window_bounds = array<i64: 1, 256>}, {pipeline_mode = #tpu.pipeline_mode<synchronous>, transform_indices = @transform_3, window_bounds = array<i64: 1, 256>}, {pipeline_mode = #tpu.pipeline_mode<synchronous>, transform_indices = @transform_4, window_bounds = array<i64: 1, 256>}, {pipeline_mode = #tpu.pipeline_mode<synchronous>, transform_indices = @transform_5, window_bounds = array<i64: 256, 256>}, {transform_indices = @transform_6, window_bounds = array<i64: 1, 2, 8, 256>}]} {
    %c0 = arith.constant 0 : index
    %c0_0 = arith.constant 0 : index
    %c0_1 = arith.constant 0 : index
    %c0_2 = arith.constant 0 : index
    %c0_3 = arith.constant 0 : index
    %0 = vector.load %arg1[%c0, %c0_0, %c0_1, %c0_2, %c0_3] : memref<1x4x10x8x384xbf16, #tpu.memory_space<vmem>>, vector<1x4x10x8x384xbf16>
    %1 = vector.shape_cast %0 : vector<1x4x10x8x384xbf16> to vector<4x10x8x384xbf16>
    %2 = vector.extract_strided_slice %1 {offsets = [0, 0, 0, 0], sizes = [1, 8, 8, 256], strides = [1, 1, 1, 1]} : vector<4x10x8x384xbf16> to vector<1x8x8x256xbf16>
    %3 = vector.shape_cast %2 : vector<1x8x8x256xbf16> to vector<8x8x256xbf16>
    %4 = vector.extract_strided_slice %1 {offsets = [0, 1, 0, 0], sizes = [1, 8, 8, 256], strides = [1, 1, 1, 1]} : vector<4x10x8x384xbf16> to vector<1x8x8x256xbf16>
    %5 = vector.shape_cast %4 : vector<1x8x8x256xbf16> to vector<8x8x256xbf16>
    %6 = vector.extract_strided_slice %1 {offsets = [0, 2, 0, 0], sizes = [1, 8, 8, 256], strides = [1, 1, 1, 1]} : vector<4x10x8x384xbf16> to vector<1x8x8x256xbf16>
    %7 = vector.shape_cast %6 : vector<1x8x8x256xbf16> to vector<8x8x256xbf16>
    %8 = vector.extract_strided_slice %1 {offsets = [1, 0, 0, 0], sizes = [1, 8, 8, 256], strides = [1, 1, 1, 1]} : vector<4x10x8x384xbf16> to vector<1x8x8x256xbf16>
    %9 = vector.shape_cast %8 : vector<1x8x8x256xbf16> to vector<8x8x256xbf16>
    %10 = vector.extract_strided_slice %1 {offsets = [1, 1, 0, 0], sizes = [1, 8, 8, 256], strides = [1, 1, 1, 1]} : vector<4x10x8x384xbf16> to vector<1x8x8x256xbf16>
    %11 = vector.shape_cast %10 : vector<1x8x8x256xbf16> to vector<8x8x256xbf16>
    %12 = vector.extract_strided_slice %1 {offsets = [1, 2, 0, 0], sizes = [1, 8, 8, 256], strides = [1, 1, 1, 1]} : vector<4x10x8x384xbf16> to vector<1x8x8x256xbf16>
    %13 = vector.shape_cast %12 : vector<1x8x8x256xbf16> to vector<8x8x256xbf16>
    %14 = vector.extract_strided_slice %1 {offsets = [2, 0, 0, 0], sizes = [1, 8, 8, 256], strides = [1, 1, 1, 1]} : vector<4x10x8x384xbf16> to vector<1x8x8x256xbf16>
    %15 = vector.shape_cast %14 : vector<1x8x8x256xbf16> to vector<8x8x256xbf16>
    %16 = vector.extract_strided_slice %1 {offsets = [2, 1, 0, 0], sizes = [1, 8, 8, 256], strides = [1, 1, 1, 1]} : vector<4x10x8x384xbf16> to vector<1x8x8x256xbf16>
    %17 = vector.shape_cast %16 : vector<1x8x8x256xbf16> to vector<8x8x256xbf16>
    %18 = vector.extract_strided_slice %1 {offsets = [2, 2, 0, 0], sizes = [1, 8, 8, 256], strides = [1, 1, 1, 1]} : vector<4x10x8x384xbf16> to vector<1x8x8x256xbf16>
    %19 = vector.shape_cast %18 : vector<1x8x8x256xbf16> to vector<8x8x256xbf16>
    %20 = vector.extract_strided_slice %1 {offsets = [3, 0, 0, 0], sizes = [1, 8, 8, 256], strides = [1, 1, 1, 1]} : vector<4x10x8x384xbf16> to vector<1x8x8x256xbf16>
    %21 = vector.shape_cast %20 : vector<1x8x8x256xbf16> to vector<8x8x256xbf16>
    %22 = vector.extract_strided_slice %1 {offsets = [3, 1, 0, 0], sizes = [1, 8, 8, 256], strides = [1, 1, 1, 1]} : vector<4x10x8x384xbf16> to vector<1x8x8x256xbf16>
    %23 = vector.shape_cast %22 : vector<1x8x8x256xbf16> to vector<8x8x256xbf16>
    %24 = vector.extract_strided_slice %1 {offsets = [3, 2, 0, 0], sizes = [1, 8, 8, 256], strides = [1, 1, 1, 1]} : vector<4x10x8x384xbf16> to vector<1x8x8x256xbf16>
    %25 = vector.shape_cast %24 : vector<1x8x8x256xbf16> to vector<8x8x256xbf16>
    %26 = tpu.concatenate %3, %5, %7, %9, %11, %13, %15, %17, %19, %21, %23, %25 in 2 : vector<8x8x256xbf16>, vector<8x8x256xbf16>, vector<8x8x256xbf16>, vector<8x8x256xbf16>, vector<8x8x256xbf16>, vector<8x8x256xbf16>, vector<8x8x256xbf16>, vector<8x8x256xbf16>, vector<8x8x256xbf16>, vector<8x8x256xbf16>, vector<8x8x256xbf16>, vector<8x8x256xbf16> -> vector<8x8x3072xbf16>
    %27 = vector.shape_cast %26 : vector<8x8x3072xbf16> to vector<64x3072xbf16>
    %28 = vector.extract_strided_slice %1 {offsets = [0, 0, 0, 128], sizes = [1, 8, 8, 256], strides = [1, 1, 1, 1]} : vector<4x10x8x384xbf16> to vector<1x8x8x256xbf16>
    %29 = vector.shape_cast %28 : vector<1x8x8x256xbf16> to vector<8x8x256xbf16>
    %30 = vector.extract_strided_slice %1 {offsets = [0, 1, 0, 128], sizes = [1, 8, 8, 256], strides = [1, 1, 1, 1]} : vector<4x10x8x384xbf16> to vector<1x8x8x256xbf16>
    %31 = vector.shape_cast %30 : vector<1x8x8x256xbf16> to vector<8x8x256xbf16>
    %32 = vector.extract_strided_slice %1 {offsets = [0, 2, 0, 128], sizes = [1, 8, 8, 256], strides = [1, 1, 1, 1]} : vector<4x10x8x384xbf16> to vector<1x8x8x256xbf16>
    %33 = vector.shape_cast %32 : vector<1x8x8x256xbf16> to vector<8x8x256xbf16>
    %34 = vector.extract_strided_slice %1 {offsets = [1, 0, 0, 128], sizes = [1, 8, 8, 256], strides = [1, 1, 1, 1]} : vector<4x10x8x384xbf16> to vector<1x8x8x256xbf16>
    %35 = vector.shape_cast %34 : vector<1x8x8x256xbf16> to vector<8x8x256xbf16>
    %36 = vector.extract_strided_slice %1 {offsets = [1, 1, 0, 128], sizes = [1, 8, 8, 256], strides = [1, 1, 1, 1]} : vector<4x10x8x384xbf16> to vector<1x8x8x256xbf16>
    %37 = vector.shape_cast %36 : vector<1x8x8x256xbf16> to vector<8x8x256xbf16>
    %38 = vector.extract_strided_slice %1 {offsets = [1, 2, 0, 128], sizes = [1, 8, 8, 256], strides = [1, 1, 1, 1]} : vector<4x10x8x384xbf16> to vector<1x8x8x256xbf16>
    %39 = vector.shape_cast %38 : vector<1x8x8x256xbf16> to vector<8x8x256xbf16>
    %40 = vector.extract_strided_slice %1 {offsets = [2, 0, 0, 128], sizes = [1, 8, 8, 256], strides = [1, 1, 1, 1]} : vector<4x10x8x384xbf16> to vector<1x8x8x256xbf16>
    %41 = vector.shape_cast %40 : vector<1x8x8x256xbf16> to vector<8x8x256xbf16>
    %42 = vector.extract_strided_slice %1 {offsets = [2, 1, 0, 128], sizes = [1, 8, 8, 256], strides = [1, 1, 1, 1]} : vector<4x10x8x384xbf16> to vector<1x8x8x256xbf16>
    %43 = vector.shape_cast %42 : vector<1x8x8x256xbf16> to vector<8x8x256xbf16>
    %44 = vector.extract_strided_slice %1 {offsets = [2, 2, 0, 128], sizes = [1, 8, 8, 256], strides = [1, 1, 1, 1]} : vector<4x10x8x384xbf16> to vector<1x8x8x256xbf16>
    %45 = vector.shape_cast %44 : vector<1x8x8x256xbf16> to vector<8x8x256xbf16>
    %46 = vector.extract_strided_slice %1 {offsets = [3, 0, 0, 128], sizes = [1, 8, 8, 256], strides = [1, 1, 1, 1]} : vector<4x10x8x384xbf16> to vector<1x8x8x256xbf16>
    %47 = vector.shape_cast %46 : vector<1x8x8x256xbf16> to vector<8x8x256xbf16>
    %48 = vector.extract_strided_slice %1 {offsets = [3, 1, 0, 128], sizes = [1, 8, 8, 256], strides = [1, 1, 1, 1]} : vector<4x10x8x384xbf16> to vector<1x8x8x256xbf16>
    %49 = vector.shape_cast %48 : vector<1x8x8x256xbf16> to vector<8x8x256xbf16>
    %50 = vector.extract_strided_slice %1 {offsets = [3, 2, 0, 128], sizes = [1, 8, 8, 256], strides = [1, 1, 1, 1]} : vector<4x10x8x384xbf16> to vector<1x8x8x256xbf16>
    %51 = vector.shape_cast %50 : vector<1x8x8x256xbf16> to vector<8x8x256xbf16>
    %52 = tpu.concatenate %29, %31, %33, %35, %37, %39, %41, %43, %45, %47, %49, %51 in 2 : vector<8x8x256xbf16>, vector<8x8x256xbf16>, vector<8x8x256xbf16>, vector<8x8x256xbf16>, vector<8x8x256xbf16>, vector<8x8x256xbf16>, vector<8x8x256xbf16>, vector<8x8x256xbf16>, vector<8x8x256xbf16>, vector<8x8x256xbf16>, vector<8x8x256xbf16>, vector<8x8x256xbf16> -> vector<8x8x3072xbf16>
    %53 = vector.shape_cast %52 : vector<8x8x3072xbf16> to vector<64x3072xbf16>
    %54 = tpu.concatenate %27, %53 in 0 : vector<64x3072xbf16>, vector<64x3072xbf16> -> vector<128x3072xbf16>
    %c0_4 = arith.constant 0 : index
    %c0_5 = arith.constant 0 : index
    %55 = vector.load %arg2[%c0_4, %c0_5] : memref<3072x256xbf16, #tpu.memory_space<vmem>>, vector<3072x256xbf16>
    %cst = arith.constant dense<0.000000e+00> : vector<128x256xf32>
    %56 = tpu.matmul %54, %55, %cst {dimension_numbers = #tpu.dot_dimension_numbers<[1], [0], [0], [1], [0, 0, 1, 1], [], []>} : vector<128x3072xbf16>, vector<3072x256xbf16>, vector<128x256xf32> -> vector<128x256xf32>
    %c0_6 = arith.constant 0 : index
    %c0_7 = arith.constant 0 : index
    %57 = vector.load %arg3[%c0_6, %c0_7] : memref<1x256xf32, #tpu.memory_space<vmem>>, vector<1x256xf32>
    %58 = vector.broadcast %57 : vector<1x256xf32> to vector<128x256xf32>
    %59 = arith.addf %56, %58 : vector<128x256xf32>
    %cst_8 = arith.constant dense<0.000000e+00> : vector<256xf32>
    %60 = vector.multi_reduction <add>, %59, %cst_8 [0] : vector<128x256xf32> to vector<256xf32>
    %61 = vector.shape_cast %60 : vector<256xf32> to vector<1x256xf32>
    %62 = arith.mulf %59, %59 : vector<128x256xf32>
    %cst_9 = arith.constant dense<0.000000e+00> : vector<256xf32>
    %63 = vector.multi_reduction <add>, %62, %cst_9 [0] : vector<128x256xf32> to vector<256xf32>
    %64 = vector.shape_cast %63 : vector<256xf32> to vector<1x256xf32>
    %65 = tpu.concatenate %61, %64 in 0 : vector<1x256xf32>, vector<1x256xf32> -> vector<2x256xf32>
    %c0_10 = arith.constant 0 : index
    %c0_11 = arith.constant 0 : index
    %66 = vector.load %arg6[%c0_10, %c0_11] : memref<256x256xf32, #tpu.memory_space<vmem>>, vector<256x256xf32>
    %cst_12 = arith.constant dense<0.000000e+00> : vector<2x256xf32>
    %67 = tpu.matmul %65, %66, %cst_12 {dimension_numbers = #tpu.dot_dimension_numbers<[1], [0], [0], [1], [0, 0, 1, 1], [], []>} : vector<2x256xf32>, vector<256x256xf32>, vector<2x256xf32> -> vector<2x256xf32>
    %68 = vector.extract_strided_slice %67 {offsets = [0, 0], sizes = [1, 256], strides = [1, 1]} : vector<2x256xf32> to vector<1x256xf32>
    %69 = vector.extract_strided_slice %67 {offsets = [1, 0], sizes = [1, 256], strides = [1, 1]} : vector<2x256xf32> to vector<1x256xf32>
    %70 = arith.mulf %68, %68 : vector<1x256xf32>
    %71 = arith.subf %69, %70 : vector<1x256xf32>
    %cst_13 = arith.constant 0.000000e+00 : f32
    %72 = vector.broadcast %cst_13 : f32 to vector<1x256xf32>
    %73 = arith.maximumf %71, %72 : vector<1x256xf32>
    %cst_14 = arith.constant 9.99999974E-6 : f32
    %74 = vector.broadcast %cst_14 : f32 to vector<1x256xf32>
    %75 = arith.addf %73, %74 : vector<1x256xf32>
    %76 = math.rsqrt %75 : vector<1x256xf32>
    %c0_15 = arith.constant 0 : index
    %c0_16 = arith.constant 0 : index
    %77 = vector.load %arg4[%c0_15, %c0_16] : memref<1x256xf32, #tpu.memory_space<vmem>>, vector<1x256xf32>
    %78 = arith.mulf %76, %77 : vector<1x256xf32>
    %c0_17 = arith.constant 0 : index
    %c0_18 = arith.constant 0 : index
    %79 = vector.load %arg5[%c0_17, %c0_18] : memref<1x256xf32, #tpu.memory_space<vmem>>, vector<1x256xf32>
    %80 = arith.mulf %68, %78 : vector<1x256xf32>
    %81 = arith.subf %79, %80 : vector<1x256xf32>
    %82 = vector.broadcast %78 : vector<1x256xf32> to vector<128x256xf32>
    %83 = arith.mulf %59, %82 : vector<128x256xf32>
    %84 = vector.broadcast %81 : vector<1x256xf32> to vector<128x256xf32>
    %85 = arith.addf %83, %84 : vector<128x256xf32>
    %cst_19 = arith.constant 0.000000e+00 : f32
    %86 = vector.broadcast %cst_19 : f32 to vector<128x256xf32>
    %87 = arith.maximumf %85, %86 : vector<128x256xf32>
    %88 = vector.shape_cast %87 : vector<128x256xf32> to vector<2x8x8x256xf32>
    %cst_20 = arith.constant dense<0xFF800000> : vector<2x8x256xf32>
    %89 = vector.multi_reduction <maximumf>, %88, %cst_20 [2] : vector<2x8x8x256xf32> to vector<2x8x256xf32>
    %c0_21 = arith.constant 0 : index
    %c0_22 = arith.constant 0 : index
    %c0_23 = arith.constant 0 : index
    %c0_24 = arith.constant 0 : index
    %90 = vector.load %arg7[%c0_21, %c0_22, %c0_23, %c0_24] : memref<1x2x8x256xf32, #tpu.memory_space<vmem>>, vector<1x2x8x256xf32>
    %91 = vector.shape_cast %90 : vector<1x2x8x256xf32> to vector<2x8x256xf32>
    %92 = vector.shape_cast %89 : vector<2x8x256xf32> to vector<1x2x8x256xf32>
    tpu.vector_store %arg7[%c0_21, %c0_22, %c0_23, %c0_24], %92 {strides = array<i32>} : memref<1x2x8x256xf32, #tpu.memory_space<vmem>>, vector<1x2x8x256xf32>,
    return
  }
  func.func @transform_0(%arg0: i32) -> (i32, i32, i32, i32, i32) {
    %c0_i32 = arith.constant 0 : i32
    %c0_i32_0 = arith.constant 0 : i32
    %c0_i32_1 = arith.constant 0 : i32
    %c0_i32_2 = arith.constant 0 : i32
    %c0_i32_3 = arith.constant 0 : i32
    return %arg0, %c0_i32, %c0_i32_0, %c0_i32_1, %c0_i32_2 : i32, i32, i32, i32, i32
  }
  func.func @transform_1(%arg0: i32) -> (i32, i32) {
    %c0_i32 = arith.constant 0 : i32
    %c0_i32_0 = arith.constant 0 : i32
    %c0_i32_1 = arith.constant 0 : i32
    return %c0_i32, %c0_i32_0 : i32, i32
  }
  func.func @transform_2(%arg0: i32) -> (i32, i32) {
    %c0_i32 = arith.constant 0 : i32
    %c0_i32_0 = arith.constant 0 : i32
    %c0_i32_1 = arith.constant 0 : i32
    return %c0_i32, %c0_i32_0 : i32, i32
  }
  func.func @transform_3(%arg0: i32) -> (i32, i32) {
    %c0_i32 = arith.constant 0 : i32
    %c0_i32_0 = arith.constant 0 : i32
    %c0_i32_1 = arith.constant 0 : i32
    return %c0_i32, %c0_i32_0 : i32, i32
  }
  func.func @transform_4(%arg0: i32) -> (i32, i32) {
    %c0_i32 = arith.constant 0 : i32
    %c0_i32_0 = arith.constant 0 : i32
    %c0_i32_1 = arith.constant 0 : i32
    return %c0_i32, %c0_i32_0 : i32, i32
  }
  func.func @transform_5(%arg0: i32) -> (i32, i32) {
    %c0_i32 = arith.constant 0 : i32
    %c0_i32_0 = arith.constant 0 : i32
    %c0_i32_1 = arith.constant 0 : i32
    return %c0_i32, %c0_i32_0 : i32, i32
  }
  func.func @transform_6(%arg0: i32) -> (i32, i32, i32, i32) {
    %c0_i32 = arith.constant 0 : i32
    %c0_i32_0 = arith.constant 0 : i32
    %c0_i32_1 = arith.constant 0 : i32
    %c0_i32_2 = arith.constant 0 : i32
    return %arg0, %c0_i32, %c0_i32_0, %c0_i32_1 : i32, i32, i32, i32
  }
}

</mosaic_0001>

<bundles_post_ra>
// kernel: mul.4
= control target key start
LH: loop header
LB: loop body
LE: loop exit
PB: predicated region body
PF: predicated region fallthrough
CT: control target
= control target key end

     0   :  { %vm183_vm0 = vcmask 261120   ;;  %s818_s0 = inlined_call_operand.vmem [shape: f32[5,3,3,2,32], index: 0, kind: input, shape index: {}]   ;;  %s819_s1 = inlined_call_operand.vmem [shape: f32[90,32], index: 1, kind: output, shape index: {}]  }
   0x1   :  { %v405_v0 = vld [vmem:[%s818_s0 + $0x58] sm:$0x3]  ;;  %v406_v1 = vld [vmem:[%s818_s0 + $0x56] sm:$0x3]  ;;  %v407_v2 = vld [vmem:[%s818_s0 + $0x54] sm:$0x3] }
   0x2   :  { %7 = vst [vmem:[#allocation0 + $0xb0] sm:$0x3] %v405_v0  ;;  %v408_v3 = vld [vmem:[%s818_s0 + $0x52] sm:$0x3]  ;;  %v409_v4 = vld [vmem:[%s818_s0 + $0x50] sm:$0x3] }
   0x3   :  { %11 = vst [vmem:[#allocation0 + $0x90] sm:$0x3] %v406_v1  ;;  %v410_v5 = vld [vmem:[%s818_s0 + $0x4e] sm:$0x3]  ;;  %v411_v6 = vld [vmem:[%s818_s0 + $0x4c] sm:$0x3] }
   0x4   :  { %15 = vst [vmem:[#allocation0 + $0x150] sm:$0x3] %v407_v2  ;;  %v412_v7 = vld [vmem:[%s818_s0 + $0x4a] sm:$0x3]  ;;  %v413_v8 = vld [vmem:[%s818_s0 + $0x48] sm:$0x3] }
   0x5   :  { %19 = vst [vmem:[#allocation0 + $0x118] sm:$0x3] %v408_v3  ;;  %v414_v9 = vld [vmem:[%s818_s0 + $0x46] sm:$0x3]  ;;  %v415_v10 = vld [vmem:[%s818_s0 + $0x44] sm:$0x3] }
   0x6   :  { %23 = vst [vmem:[#allocation0] sm:$0x3] %v409_v4  ;;  %v416_v11 = vld [vmem:[%s818_s0 + $0x42] sm:$0x3]  ;;  %v417_v12 = vld [vmem:[%s818_s0 + $0x40] sm:$0x3] }
   0x7   :  { %27 = vst [vmem:[#allocation0 + $0x38] sm:$0x3] %v410_v5  ;;  %v418_v13 = vld [vmem:[%s818_s0 + $0x3e] sm:$0x3]  ;;  %v419_v14 = vld [vmem:[%s818_s0 + $0x3c] sm:$0x3] }
   0x8   :  { %31 = vst [vmem:[#allocation0 + $0x120] sm:$0x3] %v411_v6  ;;  %v420_v15 = vld [vmem:[%s818_s0 + $0x3a] sm:$0x3]  ;;  %v421_v16 = vld [vmem:[%s818_s0 + $0x38] sm:$0x3] }
   0x9   :  { %35 = vst [vmem:[#allocation0 + $0x60] sm:$0x3] %v412_v7  ;;  %v422_v17 = vld [vmem:[%s818_s0 + $0x36] sm:$0x3]  ;;  %v423_v18 = vld [vmem:[%s818_s0 + $0x34] sm:$0x3] }
   0xa   :  { %39 = vst [vmem:[#allocation0 + $0x58] sm:$0x3] %v413_v8  ;;  %v424_v19 = vld [vmem:[%s818_s0 + $0x32] sm:$0x3]  ;;  %v425_v20 = vld [vmem:[%s818_s0 + $0x30] sm:$0x3] }
   0xb   :  { %43 = vst [vmem:[#allocation0 + $0xd8] sm:$0x3] %v414_v9  ;;  %v426_v21 = vld [vmem:[%s818_s0 + $0x2e] sm:$0x3]  ;;  %v427_v22 = vld [vmem:[%s818_s0 + $0x2c] sm:$0x3] }
   0xc   :  { %47 = vst [vmem:[#allocation0 + $0x50] sm:$0x3] %v415_v10  ;;  %v428_v23 = vld [vmem:[%s818_s0 + $0x2a] sm:$0x3]  ;;  %v429_v24 = vld [vmem:[%s818_s0 + $0x28] sm:$0x3] }
   0xd   :  { %51 = vst [vmem:[#allocation0 + $0x20] sm:$0x3] %v416_v11  ;;  %v430_v25 = vld [vmem:[%s818_s0 + $0x26] sm:$0x3]  ;;  %v431_v26 = vld [vmem:[%s818_s0 + $0x24] sm:$0x3] }
   0xe   :  { %55 = vst [vmem:[#allocation0 + $0x68] sm:$0x3] %v417_v12  ;;  %v432_v27 = vld [vmem:[%s818_s0 + $0x22] sm:$0x3]  ;;  %v433_v28 = vld [vmem:[%s818_s0 + $0x20] sm:$0x3] }
   0xf   :  { %59 = vst [vmem:[#allocation0 + $0x110] sm:$0x3] %v418_v13  ;;  %v434_v29 = vld [vmem:[%s818_s0 + $0x1e] sm:$0x3]  ;;  %v435_v30 = vld [vmem:[%s818_s0 + $0x1c] sm:$0x3] }
  0x10   :  { %63 = vst [vmem:[#allocation0 + $0x158] sm:$0x3] %v419_v14  ;;  %v436_v31 = vld [vmem:[%s818_s0 + $0x1a] sm:$0x3]  ;;  %v437_v32 = vld [vmem:[%s818_s0 + $0x18] sm:$0x3] }
  0x11   :  { %67 = vst [vmem:[#allocation0 + $0xe8] sm:$0x3] %v420_v15  ;;  %v438_v33 = vld [vmem:[%s818_s0 + $0x16] sm:$0x3]  ;;  %v439_v34 = vld [vmem:[%s818_s0 + $0x14] sm:$0x3] }
  0x12   :  { %71 = vst [vmem:[#allocation0 + $0x138] sm:$0x3] %v421_v16  ;;  %v440_v35 = vld [vmem:[%s818_s0 + $0x12] sm:$0x3]  ;;  %v441_v36 = vld [vmem:[%s818_s0 + $0x10] sm:$0x3] }
  0x13   :  { %75 = vst [vmem:[#allocation0 + $0x30] sm:$0x3] %v422_v17  ;;  %v442_v37 = vld [vmem:[%s818_s0 + $0xe] sm:$0x3]  ;;  %v443_v38 = vld [vmem:[%s818_s0 + $0xc] sm:$0x3] }
  0x14   :  { %79 = vst [vmem:[#allocation0 + $0x48] sm:$0x3] %v423_v18  ;;  %v444_v39 = vld [vmem:[%s818_s0 + $0xa] sm:$0x3]  ;;  %v445_v40 = vld [vmem:[%s818_s0 + $0x8] sm:$0x3] }
  0x15   :  { %83 = vst [vmem:[#allocation0 + $0x88] sm:$0x3] %v424_v19  ;;  %v446_v41 = vld [vmem:[%s818_s0 + $0x6] sm:$0x3]  ;;  %v447_v42 = vld [vmem:[%s818_s0 + $0x4] sm:$0x3] }
  0x16   :  { %87 = vst [vmem:[#allocation0 + $0xc0] sm:$0x3] %v425_v20  ;;  %v448_v43 = vld [vmem:[%s818_s0 + $0x2] sm:$0x3]  ;;  %v180_v44 = vld [vmem:[%s818_s0] sm:$0x3] }
  0x17   :  { %91 = vst [vmem:[#allocation0 + $0x160] sm:$0x3] %v426_v21  ;;  %v331_v11 = vld [vmem:[#allocation0 + $0x158] sm:$0x3]   ;;  %v336_v12 = vld [vmem:[#allocation0 + $0x110] sm:$0x3]  }
  0x18   :  { %95 = vst [vmem:[#allocation0 + $0x140] sm:$0x3] %v427_v22  ;;  %v326_v10 = vld [vmem:[#allocation0 + $0xe8] sm:$0x3]   ;;  %v346_v14 = vld [vmem:[#allocation0 + $0x20] sm:$0x3]  }
  0x19   :  { %99 = vst [vmem:[#allocation0 + $0x80] sm:$0x3] %v428_v23  ;;  %v321_v9 = vld [vmem:[#allocation0 + $0x138] sm:$0x3]   ;;  %v341_v13 = vld [vmem:[#allocation0 + $0x68] sm:$0x3]  }
  0x1a   :  { %103 = vst [vmem:[#allocation0 + $0x70] sm:$0x3] %v429_v24  ;;  %v316_v8 = vld [vmem:[#allocation0 + $0x30] sm:$0x3]   ;;  %v356_v16 = vld [vmem:[#allocation0 + $0xd8] sm:$0x3]  }
  0x1b   :  { %107 = vst [vmem:[#allocation0 + $0x8] sm:$0x3] %v430_v25  ;;  %v311_v7 = vld [vmem:[#allocation0 + $0x48] sm:$0x3]   ;;  %v351_v15 = vld [vmem:[#allocation0 + $0x50] sm:$0x3]  }
  0x1c   :  { %111 = vst [vmem:[#allocation0 + $0xe0] sm:$0x3] %v431_v26  ;;  %v306_v6 = vld [vmem:[#allocation0 + $0x88] sm:$0x3]   ;;  %v361_v17 = vld [vmem:[#allocation0 + $0x58] sm:$0x3]  }
  0x1d   :  { %115 = vst [vmem:[#allocation0 + $0xc8] sm:$0x3] %v432_v27  ;;  %v301_v5 = vld [vmem:[#allocation0 + $0xc0] sm:$0x3]   ;;  %v376_v20 = vld [vmem:[#allocation0 + $0x38] sm:$0x3]  }
  0x1e   :  { %119 = vst [vmem:[#allocation0 + $0xa8] sm:$0x3] %v433_v28  ;;  %v296_v4 = vld [vmem:[#allocation0 + $0x160] sm:$0x3]   ;;  %v386_v22 = vld [vmem:[#allocation0 + $0x118] sm:$0x3]  }
  0x1f   :  { %123 = vst [vmem:[#allocation0 + $0x40] sm:$0x3] %v434_v29  ;;  %v291_v3 = vld [vmem:[#allocation0 + $0x140] sm:$0x3]   ;;  %v391_v23 = vld [vmem:[#allocation0 + $0x150] sm:$0x3]  }
  0x20   :  { %127 = vst [vmem:[#allocation0 + $0x28] sm:$0x3] %v435_v30  ;;  %v286_v2 = vld [vmem:[#allocation0 + $0x80] sm:$0x3]   ;;  %v396_v24 = vld [vmem:[#allocation0 + $0x90] sm:$0x3]  }
  0x21   :  { %131 = vst [vmem:[#allocation0 + $0x108] sm:$0x3] %v436_v31  ;;  %v281_v1 = vld [vmem:[#allocation0 + $0x70] sm:$0x3]   ;;  %v366_v18 = vld [vmem:[#allocation0 + $0x60] sm:$0x3]  }
  0x22   :  { %135 = vst [vmem:[#allocation0 + $0xa0] sm:$0x3] %v437_v32  ;;  %v276_v0 = vld [vmem:[#allocation0 + $0x8] sm:$0x3]   ;;  %v371_v19 = vld [vmem:[#allocation0 + $0x120] sm:$0x3]  }
  0x23   :  { %139 = vst [vmem:[#allocation0 + $0x78] sm:$0x3] %v438_v33  ;;  %v271_v63 = vld [vmem:[#allocation0 + $0xe0] sm:$0x3]   ;;  %v401_v25 = vld [vmem:[#allocation0 + $0xb0] sm:$0x3]  }
  0x24   :  { %143 = vst [vmem:[#allocation0 + $0xb8] sm:$0x3] %v439_v34  ;;  %v266_v62 = vld [vmem:[#allocation0 + $0xc8] sm:$0x3]   ;;  %v381_v21 = vld [vmem:[#allocation0] sm:$0x3]  }
  0x25   :  { %147 = vst [vmem:[#allocation0 + $0xd0] sm:$0x3] %v440_v35  ;;  %v261_v61 = vld [vmem:[#allocation0 + $0xa8] sm:$0x3]  }
  0x26   :  { %151 = vst [vmem:[#allocation0 + $0xf8] sm:$0x3] %v441_v36  ;;  %v256_v60 = vld [vmem:[#allocation0 + $0x40] sm:$0x3]  }
  0x27   :  { %155 = vst [vmem:[#allocation0 + $0x100] sm:$0x3] %v442_v37  ;;  %v251_v59 = vld [vmem:[#allocation0 + $0x28] sm:$0x3]  }
  0x28   :  { %159 = vst [vmem:[#allocation0 + $0x10] sm:$0x3] %v443_v38  ;;  %v246_v58 = vld [vmem:[#allocation0 + $0x108] sm:$0x3]  }
  0x29   :  { %163 = vst [vmem:[#allocation0 + $0x130] sm:$0x3] %v444_v39  ;;  %v241_v57 = vld [vmem:[#allocation0 + $0xa0] sm:$0x3]  }
  0x2a   :  { %167 = vst [vmem:[#allocation0 + $0x148] sm:$0x3] %v445_v40  ;;  %v236_v56 = vld [vmem:[#allocation0 + $0x78] sm:$0x3]  }
  0x2b   :  { %171 = vst [vmem:[#allocation0 + $0xf0] sm:$0x3] %v446_v41  ;;  %v231_v55 = vld [vmem:[#allocation0 + $0xb8] sm:$0x3]  }
  0x2c   :  { %175 = vst [vmem:[#allocation0 + $0x18] sm:$0x3] %v447_v42  ;;  %v226_v54 = vld [vmem:[#allocation0 + $0xd0] sm:$0x3]  }
  0x2d   :  { %179 = vst [vmem:[#allocation0 + $0x98] sm:$0x3] %v448_v43  ;;  %v221_v52 = vld [vmem:[#allocation0 + $0xf8] sm:$0x3]  }
  0x2e   :  { %181 = vst [vmem:[#allocation0 + $0x128] sm:$0x3] %v180_v44  ;;  %v216_v45 = vld [vmem:[#allocation0 + $0x100] sm:$0x3]  }
  0x2f   :  { %v211_v46 = vld [vmem:[#allocation0 + $0x10] sm:$0x3]   ;;  %455 = vst.msk [vmem:[%s819_s1 + $0xe] sm:$0x3] %vm183_vm0, %v216_v45  }
  0x30   :  { %v206_v47 = vld [vmem:[#allocation0 + $0x130] sm:$0x3]   ;;  %454 = vst.msk [vmem:[%s819_s1 + $0xc] sm:$0x3] %vm183_vm0, %v211_v46  }
  0x31   :  { %v201_v48 = vld [vmem:[#allocation0 + $0x148] sm:$0x3]   ;;  %453 = vst.msk [vmem:[%s819_s1 + $0xa] sm:$0x3] %vm183_vm0, %v206_v47  }
  0x32   :  { %v196_v49 = vld [vmem:[#allocation0 + $0xf0] sm:$0x3]   ;;  %452 = vst.msk [vmem:[%s819_s1 + $0x8] sm:$0x3] %vm183_vm0, %v201_v48  }
  0x33   :  { %v191_v50 = vld [vmem:[#allocation0 + $0x18] sm:$0x3]   ;;  %451 = vst.msk [vmem:[%s819_s1 + $0x6] sm:$0x3] %vm183_vm0, %v196_v49  }
  0x34   :  { %v186_v51 = vld [vmem:[#allocation0 + $0x98] sm:$0x3]   ;;  %450 = vst.msk [vmem:[%s819_s1 + $0x4] sm:$0x3] %vm183_vm0, %v191_v50  }
  0x35   :  { %v182_v53 = vld [vmem:[#allocation0 + $0x128] sm:$0x3]   ;;  %449 = vst.msk [vmem:[%s819_s1 + $0x2] sm:$0x3] %vm183_vm0, %v186_v51  }
  0x36   :  { %184 = vst.msk [vmem:[%s819_s1] sm:$0x3] %vm183_vm0, %v182_v53  }
  0x37   :  { %456 = vst.msk [vmem:[%s819_s1 + $0x10] sm:$0x3] %vm183_vm0, %v221_v52  }
  0x38   :  { %457 = vst.msk [vmem:[%s819_s1 + $0x12] sm:$0x3] %vm183_vm0, %v226_v54  }
  0x39   :  { %458 = vst.msk [vmem:[%s819_s1 + $0x14] sm:$0x3] %vm183_vm0, %v231_v55  }
  0x3a   :  { %459 = vst.msk [vmem:[%s819_s1 + $0x16] sm:$0x3] %vm183_vm0, %v236_v56  }
  0x3b   :  { %460 = vst.msk [vmem:[%s819_s1 + $0x18] sm:$0x3] %vm183_vm0, %v241_v57  }
  0x3c   :  { %461 = vst.msk [vmem:[%s819_s1 + $0x1a] sm:$0x3] %vm183_vm0, %v246_v58  }
  0x3d   :  { %462 = vst.msk [vmem:[%s819_s1 + $0x1c] sm:$0x3] %vm183_vm0, %v251_v59  }
  0x3e   :  { %463 = vst.msk [vmem:[%s819_s1 + $0x1e] sm:$0x3] %vm183_vm0, %v256_v60  }
  0x3f   :  { %464 = vst.msk [vmem:[%s819_s1 + $0x20] sm:$0x3] %vm183_vm0, %v261_v61  }
  0x40   :  { %465 = vst.msk [vmem:[%s819_s1 + $0x22] sm:$0x3] %vm183_vm0, %v266_v62  }
  0x41   :  { %466 = vst.msk [vmem:[%s819_s1 + $0x24] sm:$0x3] %vm183_vm0, %v271_v63  }
  0x42   :  { %467 = vst.msk [vmem:[%s819_s1 + $0x26] sm:$0x3] %vm183_vm0, %v276_v0  }
  0x43   :  { %468 = vst.msk [vmem:[%s819_s1 + $0x28] sm:$0x3] %vm183_vm0, %v281_v1  }
  0x44   :  { %469 = vst.msk [vmem:[%s819_s1 + $0x2a] sm:$0x3] %vm183_vm0, %v286_v2  }
  0x45   :  { %470 = vst.msk [vmem:[%s819_s1 + $0x2c] sm:$0x3] %vm183_vm0, %v291_v3  }
  0x46   :  { %471 = vst.msk [vmem:[%s819_s1 + $0x2e] sm:$0x3] %vm183_vm0, %v296_v4  }
  0x47   :  { %472 = vst.msk [vmem:[%s819_s1 + $0x30] sm:$0x3] %vm183_vm0, %v301_v5  }
  0x48   :  { %473 = vst.msk [vmem:[%s819_s1 + $0x32] sm:$0x3] %vm183_vm0, %v306_v6  }
  0x49   :  { %474 = vst.msk [vmem:[%s819_s1 + $0x34] sm:$0x3] %vm183_vm0, %v311_v7  }
  0x4a   :  { %475 = vst.msk [vmem:[%s819_s1 + $0x36] sm:$0x3] %vm183_vm0, %v316_v8  }
  0x4b   :  { %476 = vst.msk [vmem:[%s819_s1 + $0x38] sm:$0x3] %vm183_vm0, %v321_v9  }
  0x4c   :  { %477 = vst.msk [vmem:[%s819_s1 + $0x3a] sm:$0x3] %vm183_vm0, %v326_v10  }
  0x4d   :  { %478 = vst.msk [vmem:[%s819_s1 + $0x3c] sm:$0x3] %vm183_vm0, %v331_v11  }
  0x4e   :  { %479 = vst.msk [vmem:[%s819_s1 + $0x3e] sm:$0x3] %vm183_vm0, %v336_v12  }
  0x4f   :  { %480 = vst.msk [vmem:[%s819_s1 + $0x40] sm:$0x3] %vm183_vm0, %v341_v13  }
  0x50   :  { %481 = vst.msk [vmem:[%s819_s1 + $0x42] sm:$0x3] %vm183_vm0, %v346_v14  }
  0x51   :  { %482 = vst.msk [vmem:[%s819_s1 + $0x44] sm:$0x3] %vm183_vm0, %v351_v15  }
  0x52   :  { %483 = vst.msk [vmem:[%s819_s1 + $0x46] sm:$0x3] %vm183_vm0, %v356_v16  }
  0x53   :  { %484 = vst.msk [vmem:[%s819_s1 + $0x48] sm:$0x3] %vm183_vm0, %v361_v17  }
  0x54   :  { %485 = vst.msk [vmem:[%s819_s1 + $0x4a] sm:$0x3] %vm183_vm0, %v366_v18  }
  0x55   :  { %486 = vst.msk [vmem:[%s819_s1 + $0x4c] sm:$0x3] %vm183_vm0, %v371_v19  }
  0x56   :  { %487 = vst.msk [vmem:[%s819_s1 + $0x4e] sm:$0x3] %vm183_vm0, %v376_v20  }
  0x57   :  { %488 = vst.msk [vmem:[%s819_s1 + $0x50] sm:$0x3] %vm183_vm0, %v381_v21  }
  0x58   :  { %489 = vst.msk [vmem:[%s819_s1 + $0x52] sm:$0x3] %vm183_vm0, %v386_v22  }
  0x59   :  { %490 = vst.msk [vmem:[%s819_s1 + $0x54] sm:$0x3] %vm183_vm0, %v391_v23  }
  0x5a   :  { %491 = vst.msk [vmem:[%s819_s1 + $0x56] sm:$0x3] %vm183_vm0, %v396_v24  }
  0x5b   :  { %492 = vst.msk [vmem:[%s819_s1 + $0x58] sm:$0x3] %vm183_vm0, %v401_v25  }

// kernel: tile.33
= control target key start
LH: loop header
LB: loop body
LE: loop exit
PB: predicated region body
PF: predicated region fallthrough
CT: control target
= control target key end

     0   :  { %s22_s0 = inlined_call_operand.vmem [shape: f32[32], index: 0, kind: input, shape index: {}]   ;;  %s23_s1 = inlined_call_operand.vmem [shape: f32[4,32], index: 1, kind: output, shape index: {}]  }
   0x1   :  { %v4_v0 = vld [vmem:[%s22_s0] ss:$0 sm:$0xff] }
   0x2   :  { %5 = vst [vmem:[%s23_s1] sm:$0xf] %v4_v0 }

// kernel: tile.34
= control target key start
LH: loop header
LB: loop body
LE: loop exit
PB: predicated region body
PF: predicated region fallthrough
CT: control target
= control target key end

     0   :  { %s37_s8 = smov 32   ;;  %s38_s9 = smov 64   ;;  %vm7_vm0 = vcmask 261120   ;;  %vm13_vm1 = vcmask 1048320   ;;  %vm19_vm2 = vcmask 785920   ;;  %vm25_vm3 = vcmask 523520   ;;  %s55_s0 = inlined_call_operand.vmem [shape: f32[4,32], index: 0, kind: input, shape index: {}]   ;;  %s56_s1 = inlined_call_operand.vmem [shape: f32[1,128], index: 1, kind: output, shape index: {}]  }
   0x1   :  { %v4_v0 = vld [vmem:[%s55_s0] sm:$0xf]  ;;  %s36_s0 = smov 96  }
   0x2   :  { %5 = vst [vmem:[#allocation1] sm:$0xf] %v4_v0 }
   0x9   :  { %v10_v1 = vld [vmem:[#allocation1 + $0x3] sm:$0x1]   ;;  %v22_v2 = vld [vmem:[#allocation1 + $0x1] sm:$0x1]   ;;  %v16_v3 = vld [vmem:[#allocation1 + $0x2] sm:$0x1]  }
   0xa   :  { %11 = vrot.lane.b32.xlu0 %v10_v1, %s36_s0  ;;  %23 = vrot.lane.b32.xlu1 %v22_v2, %s37_s8  ;;  %v6_v4 = vld [vmem:[#allocation1] sm:$0x1]  }
   0xb   :  { %8 = vst.msk [vmem:[#allocation0] sm:$0x1] %vm7_vm0, %v6_v4  }
  0x12   :  { %17 = vrot.lane.b32.xlu0 %v16_v3, %s38_s9 }
  0x7c   :  { %v12_v5 = vpop.permute.xlu0 %11   ;;  %v24_v6 = vpop.permute.xlu1 %23  }
  0x7d   :  { %14 = vst.msk [vmem:[#allocation0] sm:$0x1] %vm13_vm1, %v12_v5  }
  0x84   :  { %v18_v7 = vpop.permute.xlu0 %17  }
  0x85   :  { %20 = vst.msk [vmem:[#allocation0] sm:$0x1] %vm19_vm2, %v18_v7  }
  0x86   :  { %26 = vst.msk [vmem:[#allocation0] sm:$0x1] %vm25_vm3, %v24_v6  }
  0x8d   :  { %v29_v8 = vld [vmem:[#allocation0] sm:$0x1] }
  0x8e   :  { %32 = vst [vmem:[%s56_s1] sm:$0x1] %v29_v8 }

// kernel: doppler_encoder_group_forward.2
= control target key start
LH: loop header
LB: loop body
LE: loop exit
PB: predicated region body
PF: predicated region fallthrough
CT: control target
= control target key end

     0   :  { %s3125_s21 = smov 0   ;;  %s4636_s0 = inlined_call_operand.vmem [shape: bf16[2,512,384], index: 0, kind: input, shape index: {}]   ;;  %s4637_s1 = inlined_call_operand.vmem [shape: bf16[384,128], index: 1, kind: input, shape index: {}]   ;;  %s4638_s2 = inlined_call_operand.vmem [shape: f32[1,128], index: 2, kind: input, shape index: {}]   ;;  %s4639_s3 = inlined_call_operand.vmem [shape: f32[1,128], index: 3, kind: input, shape index: {}]   ;;  %s4640_s4 = inlined_call_operand.vmem [shape: f32[1,128], index: 4, kind: input, shape index: {}]   ;;  %s4641_s5 = inlined_call_operand.vmem [shape: f32[128,128], index: 5, kind: input, shape index: {}]   ;;  %s4642_s6 = inlined_call_operand.vmem [shape: bf16[2,512,128], index: 6, kind: output, shape index: {}]  }
   0x1 LB: > { %s2242_s22 = sadd.s32 4294967295, %s3088_s21   ;;  %p2246_p0 = scmp.ge.s32.totalorder %s3088_s21, 1  ;;  %s3088_s21 = sphi %s3125_s21, %s16_s21  }
   0x2   : > { %p212_p1 = scmp.lt.s32.totalorder %s3088_s21, 3 }
   0x4   : > { %p213_p2 = pnand %p2246_p0, %p212_p1 }
   0x6   : > { %216 = sbr.rel (%p213_p2) target bundleno = 847 (0x34f), region = 44 }
   0xb   : > { %v2836_v0 = vld [vmem:[%s4637_s1 + $0x38] sm:$0xff]  ;;  %v2835_v3 = vld [vmem:[%s4637_s1 + $0x30] sm:$0xff]  ;;  %v2834_v6 = vld [vmem:[%s4637_s1 + $0x28] sm:$0xff]  ;;  %p242_p3 = scmp.lt.s32.totalorder %s2242_s22, 1  ;;  %vm1797_vm0 = vcmask 1040384  }
   0xc   : > { %v3139_v1 = vld [vmem:[%s4637_s1 + $0x78] sm:$0xff]  ;;  %1088 = vmatpush.bf16.msra.mxu0 %v2836_v0  ;;  %3044 = vmatpush.bf16.msra.mxu3 %v2836_v0  ;;  %v3154_v4 = vld [vmem:[%s4637_s1 + $0x70] sm:$0xff]  ;;  %v2842_v7 = vld [vmem:[%s4637_s1 + $0x68] sm:$0xff] }
   0xd   : > { %v3144_v2 = vld [vmem:[%s4637_s1 + $0xb8] sm:$0xff]  ;;  %1257 = vmatpush.bf16.msra.mxu1 %v3139_v1  ;;  %v3159_v5 = vld [vmem:[%s4637_s1 + $0xb0] sm:$0xff]  ;;  %v3172_v8 = vld [vmem:[%s4637_s1 + $0xa8] sm:$0xff]  ;;  %s4776_s22 = smov (!%p242_p3, %s2242_s22), 1 }
   0xe   : > { %1426 = vmatpush.bf16.msra.mxu2 %v3144_v2  ;;  %v2833_v9 = vld [vmem:[%s4637_s1 + $0x20] sm:$0xff]  ;;  %v2832_v12 = vld [vmem:[%s4637_s1 + $0x18] sm:$0xff]  ;;  %v2831_v15 = vld [vmem:[%s4637_s1 + $0x10] sm:$0xff]  ;;  %s3068_s9 = smul.u32 768, %s4776_s22  ;;  %s2732_s27 = sshll.u32 %s4776_s22, 8 }
   0xf   : > { %v3180_v10 = vld [vmem:[%s4637_s1 + $0x60] sm:$0xff]  ;;  %v2840_v13 = vld [vmem:[%s4637_s1 + $0x58] sm:$0xff]  ;;  %v2839_v16 = vld [vmem:[%s4637_s1 + $0x50] sm:$0xff]  ;;  %s4484_s29 = scalar_lea.vmem %s4642_s6, %s2732_s27 }
  0x10   : > { %1089 = vmatpush.bf16.msra.mxu0 %v2835_v3  ;;  %3045 = vmatpush.bf16.msra.mxu3 %v2835_v3  ;;  %v3188_v11 = vld [vmem:[%s4637_s1 + $0xa0] sm:$0xff]  ;;  %v3205_v14 = vld [vmem:[%s4637_s1 + $0x98] sm:$0xff]  ;;  %v3218_v17 = vld [vmem:[%s4637_s1 + $0x90] sm:$0xff]  ;;  %s3226_s18 = scalar_lea.vmem %s4636_s0, %s3068_s9 }
  0x11   : > { %1258 = vmatpush.bf16.msra.mxu1 %v3154_v4  ;;  %v2830_v18 = vld [vmem:[%s4637_s1 + $0x8] sm:$0xff]  ;;  %v2829_v21 = vld [vmem:[%s4637_s1] sm:$0xff]  ;;  %v2552_v26 = vld [vmem:[%s3226_s18 + $0x258] sm:$0xf] }
  0x12   : > { %1427 = vmatpush.bf16.msra.mxu2 %v3159_v5  ;;  %v2838_v19 = vld [vmem:[%s4637_s1 + $0x48] sm:$0xff]  ;;  %v2837_v22 = vld [vmem:[%s4637_s1 + $0x40] sm:$0xff]  ;;  %v2254_v29 = vld [vmem:[%s3226_s18 + $0xc] sm:$0xf0] }
  0x13   : > { %v3235_v20 = vld [vmem:[%s4637_s1 + $0x88] sm:$0xff]  ;;  %v3246_v23 = vld [vmem:[%s4637_s1 + $0x80] sm:$0xff]  ;;  %v2735_v31 = vld [vmem:[%s3226_s18 + $0x10] sm:$0xf0] }
  0x14   : > { %1090 = vmatpush.bf16.msra.mxu0 %v2834_v6  ;;  %3046 = vmatpush.bf16.msra.mxu3 %v2834_v6  ;;  %v2252_v24 = vld [vmem:[%s3226_s18] sm:$0xf]  ;;  %v2734_v25 = vld [vmem:[%s3226_s18 + $0x8] sm:$0xf0]  ;;  %v2809_v27 = vld [vmem:[%s3226_s18 + $0x260] sm:$0xf0] }
  0x15   : > { %1259 = vmatpush.bf16.msra.mxu1 %v2842_v7  ;;  %v2733_v28 = vld [vmem:[%s3226_s18 + $0x4] sm:$0xf]  ;;  %v2260_v30 = vld [vmem:[%s3226_s18 + $0x8] sm:$0xf]  ;;  %v2253_v32 = vor.u32 %v2734_v25, %v2252_v24  ;;  %v2553_v33 = vor.u32 %v2809_v27, %v2552_v26  ;;  %v2264_v36 = vld [vmem:[%s3226_s18 + $0x18] sm:$0xf] }
  0x16   : > { %1428 = vmatpush.bf16.msra.mxu2 %v3172_v8  ;;  %v2257_v34 = vor.u32 %v2733_v28, %v2254_v29  ;;  %v2261_v35 = vor.u32 %v2735_v31, %v2260_v30  ;;  %v2737_v37 = vld [vmem:[%s3226_s18 + $0x20] sm:$0xf0]  ;;  %v2564_v38 = vld [vmem:[%s3226_s18 + $0x270] sm:$0xf]  ;;  %v2812_v39 = vld [vmem:[%s3226_s18 + $0x278] sm:$0xf0] }
  0x17   : > { %v2736_v40 = vld [vmem:[%s3226_s18 + $0x1c] sm:$0xf]  ;;  %v2266_v41 = vld [vmem:[%s3226_s18 + $0x24] sm:$0xf0]  ;;  %v2272_v42 = vld [vmem:[%s3226_s18 + $0x20] sm:$0xf]  ;;  %v2265_v44 = vor.u32 %v2737_v37, %v2264_v36  ;;  %v2565_v45 = vor.u32 %v2812_v39, %v2564_v38 }
  0x18   : > { %1091 = vmatpush.bf16.msra.mxu0 %v2833_v9  ;;  %3047 = vmatpush.bf16.msra.mxu3 %v2833_v9  ;;  %v2738_v43 = vld [vmem:[%s3226_s18 + $0x28] sm:$0xf0]  ;;  %v2269_v46 = vor.u32 %v2736_v40, %v2266_v41  ;;  %v2276_v48 = vld [vmem:[%s3226_s18 + $0x30] sm:$0xf]  ;;  %v2740_v49 = vld [vmem:[%s3226_s18 + $0x38] sm:$0xf0] }
  0x19   : > { %1260 = vmatpush.bf16.msra.mxu1 %v3180_v10  ;;  %v2273_v47 = vor.u32 %v2738_v43, %v2272_v42  ;;  %v2576_v50 = vld [vmem:[%s3226_s18 + $0x288] sm:$0xf]  ;;  %v2815_v51 = vld [vmem:[%s3226_s18 + $0x290] sm:$0xf0]  ;;  %v2278_v53 = vld [vmem:[%s3226_s18 + $0x3c] sm:$0xf0]  ;;  %v2277_v56 = vor.u32 %v2740_v49, %v2276_v48 }
  0x1a   : > { %1429 = vmatpush.bf16.msra.mxu2 %v3188_v11  ;;  %v2739_v52 = vld [vmem:[%s3226_s18 + $0x34] sm:$0xf]  ;;  %v2284_v54 = vld [vmem:[%s3226_s18 + $0x38] sm:$0xf]  ;;  %v2741_v55 = vld [vmem:[%s3226_s18 + $0x40] sm:$0xf0]  ;;  %v2577_v57 = vor.u32 %v2815_v51, %v2576_v50 }
  0x1b   : > { %v2281_v58 = vor.u32 %v2739_v52, %v2278_v53  ;;  %v2285_v59 = vor.u32 %v2741_v55, %v2284_v54  ;;  %v2288_v60 = vld [vmem:[%s3226_s18 + $0x48] sm:$0xf]  ;;  %v2743_v61 = vld [vmem:[%s3226_s18 + $0x50] sm:$0xf0]  ;;  %v2588_v62 = vld [vmem:[%s3226_s18 + $0x2a0] sm:$0xf] }
  0x1c   : > { %1092 = vmatpush.bf16.msra.mxu0 %v2832_v12  ;;  %3048 = vmatpush.bf16.msra.mxu3 %v2832_v12  ;;  %v2818_v63 = vld [vmem:[%s3226_s18 + $0x2a8] sm:$0xf0]  ;;  %v2744_v3 = vld [vmem:[%s3226_s18 + $0x58] sm:$0xf0]  ;;  %v2745_v12 = vld [vmem:[%s3226_s18 + $0x64] sm:$0xf] }
  0x1d   : > { %1261 = vmatpush.bf16.msra.mxu1 %v2840_v13  ;;  %v2742_v0 = vld [vmem:[%s3226_s18 + $0x4c] sm:$0xf]  ;;  %v2824_v24 = vld [vmem:[%s3226_s18 + $0x2d8] sm:$0xf0]  ;;  %v2320_v26 = vld [vmem:[%s3226_s18 + $0x80] sm:$0xf] }
  0x1e   : > { %1430 = vmatpush.bf16.msra.mxu2 %v3205_v14  ;;  %v2746_v9 = vld [vmem:[%s3226_s18 + $0x68] sm:$0xf0]  ;;  %v2748_v25 = vld [vmem:[%s3226_s18 + $0x7c] sm:$0xf]  ;;  %v2751_v36 = vld [vmem:[%s3226_s18 + $0x94] sm:$0xf] }
  0x1f   : > { %v2750_v27 = vld [vmem:[%s3226_s18 + $0x88] sm:$0xf0]  ;;  %v2326_v37 = vld [vmem:[%s3226_s18 + $0x9c] sm:$0xf0]  ;;  %v2332_v38 = vld [vmem:[%s3226_s18 + $0x98] sm:$0xf] }
  0x20   : > { %1093 = vmatpush.bf16.msra.mxu0 %v2831_v15  ;;  %3049 = vmatpush.bf16.msra.mxu3 %v2831_v15  ;;  %v2747_v15 = vld [vmem:[%s3226_s18 + $0x70] sm:$0xf0]  ;;  %v2321_v31 = vor.u32 %v2750_v27, %v2320_v26  ;;  %v2753_v39 = vld [vmem:[%s3226_s18 + $0xa0] sm:$0xf0]  ;;  %v2329_v42 = vor.u32 %v2751_v36, %v2326_v37  ;;  %v2554_v48 = vld [vmem:[%s3226_s18 + $0x264] sm:$0xf0] }
  0x21   : > { %1262 = vmatpush.bf16.msra.mxu1 %v2839_v16  ;;  %v2333_v43 = vor.u32 %v2753_v39, %v2332_v38  ;;  %v2338_v49 = vld [vmem:[%s3226_s18 + $0xb4] sm:$0xf0]  ;;  %v2344_v50 = vld [vmem:[%s3226_s18 + $0xb0] sm:$0xf]  ;;  %v2756_v51 = vld [vmem:[%s3226_s18 + $0xb8] sm:$0xf0] }
  0x22   : > { %1431 = vmatpush.bf16.msra.mxu2 %v3218_v17  ;;  %v2345_v55 = vor.u32 %v2756_v51, %v2344_v50 }
  0x24   : > { %1094 = vmatpush.bf16.msra.mxu0 %v2830_v18  ;;  %3050 = vmatpush.bf16.msra.mxu3 %v2830_v18 }
  0x25   : > { %1263 = vmatpush.bf16.msra.mxu1 %v2838_v19 }
  0x26   : > { %1432 = vmatpush.bf16.msra.mxu2 %v3235_v20 }
  0x28   : > { %1095 = vmatpush.bf16.msra.mxu0 %v2829_v21  ;;  %3051 = vmatpush.bf16.msra.mxu3 %v2829_v21  ;;  %v2749_v21 = vld [vmem:[%s3226_s18 + $0x80] sm:$0xf0] }
  0x29   : > { %1264 = vmatpush.bf16.msra.mxu1 %v2837_v22 }
  0x2a   : > { %1433 = vmatpush.bf16.msra.mxu2 %v3246_v23 }
  0x2b   : > { %1096 = vmatmul.bf16.vlgmr.msra.gmra.mxu0 %v2253_v32  ;;  %1221 = vmatmul.bf16.vlgmr.msra.gmra.mxu3 %v2553_v33  ;;  %v2324_v32 = vld [vmem:[%s3226_s18 + $0x90] sm:$0xf]  ;;  %v2752_v33 = vld [vmem:[%s3226_s18 + $0x98] sm:$0xf0] }
  0x2c   : > { %3052 = vmatpush.bf16.msrb.mxu3 %v3139_v1  ;;  %1265 = vmatmul.bf16.vlgmr.msra.gmra.mxu1 %v2257_v34  ;;  %v2290_v1 = vld [vmem:[%s3226_s18 + $0x54] sm:$0xf0]  ;;  %v2624_v34 = vld [vmem:[%s3226_s18 + $0x2e8] sm:$0xf]  ;;  %v2325_v40 = vor.u32 %v2752_v33, %v2324_v32 }
  0x2d   : > { %1434 = vmatmul.bf16.vlgmr.msra.gmra.mxu2 %v2261_v35  ;;  %v2293_v6 = vor.u32 %v2742_v0, %v2290_v1  ;;  %v2827_v35 = vld [vmem:[%s3226_s18 + $0x2f0] sm:$0xf0] }
  0x2e   : > { %v2625_v41 = vor.u32 %v2827_v35, %v2624_v34  ;;  %v2759_v0 = vld [vmem:[%s3226_s18 + $0xd0] sm:$0xf0] }
  0x30   : > { %3053 = vmatpush.bf16.msrb.mxu3 %v3154_v4  ;;  %v2289_v4 = vor.u32 %v2743_v61, %v2288_v60  ;;  %v2811_v60 = vld [vmem:[%s3226_s18 + $0x274] sm:$0xf]  ;;  %v2566_v61 = vld [vmem:[%s3226_s18 + $0x27c] sm:$0xf0] }
  0x34   : > { %3054 = vmatpush.bf16.msrb.mxu3 %v2842_v7 }
  0x38   : > { %3055 = vmatpush.bf16.msrb.mxu3 %v3180_v10  ;;  %v2600_v10 = vld [vmem:[%s3226_s18 + $0x2b8] sm:$0xf] }
  0x3b   : > { %1101 = vmatmul.bf16.gmra.mxu0 %v2265_v44  ;;  %1226 = vmatmul.bf16.gmra.mxu3 %v2565_v45  ;;  %v2336_v44 = vld [vmem:[%s3226_s18 + $0xa8] sm:$0xf]  ;;  %v2755_v45 = vld [vmem:[%s3226_s18 + $0xb0] sm:$0xf0] }
  0x3c   : > { %3056 = vmatpush.bf16.msrb.mxu3 %v2840_v13  ;;  %1270 = vmatmul.bf16.gmra.mxu1 %v2269_v46  ;;  %v2302_v13 = vld [vmem:[%s3226_s18 + $0x6c] sm:$0xf0]  ;;  %v2754_v46 = vld [vmem:[%s3226_s18 + $0xac] sm:$0xf]  ;;  %v2337_v52 = vor.u32 %v2755_v45, %v2336_v44  ;;  %v2763_v44 = vld [vmem:[%s3226_s18 + $0xf4] sm:$0xf] }
  0x3d   : > { %1439 = vmatmul.bf16.gmra.mxu2 %v2273_v47  ;;  %v2305_v18 = vor.u32 %v2745_v12, %v2302_v13  ;;  %v2808_v47 = vld [vmem:[%s3226_s18 + $0x25c] sm:$0xf]  ;;  %v2341_v54 = vor.u32 %v2754_v46, %v2338_v49  ;;  %v2817_v45 = vld [vmem:[%s3226_s18 + $0x2a4] sm:$0xf]  ;;  %v2590_v46 = vld [vmem:[%s3226_s18 + $0x2ac] sm:$0xf0] }
  0x3e   : > { %v2557_v53 = vor.u32 %v2808_v47, %v2554_v48  ;;  %v2374_v47 = vld [vmem:[%s3226_s18 + $0xfc] sm:$0xf0]  ;;  %v2380_v48 = vld [vmem:[%s3226_s18 + $0xf8] sm:$0xf]  ;;  %v2765_v49 = vld [vmem:[%s3226_s18 + $0x100] sm:$0xf0] }
  0x40   : > { %3057 = vmatpush.bf16.msrb.mxu3 %v2839_v16 }
  0x44   : > { %3058 = vmatpush.bf16.msrb.mxu3 %v2838_v19 }
  0x48   : > { %3059 = vmatpush.bf16.msrb.mxu3 %v2837_v22  ;;  %v2612_v22 = vld [vmem:[%s3226_s18 + $0x2d0] sm:$0xf] }
  0x49   : > { %v2613_v29 = vor.u32 %v2824_v24, %v2612_v22  ;;  %v2368_v22 = vld [vmem:[%s3226_s18 + $0xe0] sm:$0xf]  ;;  %v2762_v24 = vld [vmem:[%s3226_s18 + $0xe8] sm:$0xf0] }
  0x4b   : > { %1106 = vmatmul.bf16.gmra.mxu0 %v2277_v56  ;;  %1231 = vmatmul.bf16.gmra.mxu3 %v2577_v57  ;;  %v3328_v56 = vld [vmem:[%s4638_s2] ss:$0 sm:$0xff] }
  0x4c   : > { %3060 = vmatpush.bf16.msra.mxu3 %v3144_v2  ;;  %1275 = vmatmul.bf16.gmra.mxu1 %v2281_v58  ;;  %v2296_v2 = vld [vmem:[%s3226_s18 + $0x50] sm:$0xf]  ;;  %v2348_v57 = vld [vmem:[%s3226_s18 + $0xc0] sm:$0xf]  ;;  %v2758_v58 = vld [vmem:[%s3226_s18 + $0xc8] sm:$0xf0] }
  0x4d   : > { %1444 = vmatmul.bf16.gmra.mxu2 %v2285_v59  ;;  %v2297_v7 = vor.u32 %v2744_v3, %v2296_v2  ;;  %v2757_v59 = vld [vmem:[%s3226_s18 + $0xc4] sm:$0xf]  ;;  %v2349_v1 = vor.u32 %v2758_v58, %v2348_v57  ;;  %v2569_v2 = vor.u32 %v2811_v60, %v2566_v61  ;;  %v2377_v57 = vor.u32 %v2763_v44, %v2374_v47  ;;  %v2771_v44 = vld [vmem:[%s3226_s18 + $0x130] sm:$0xf0] }
  0x4e   : > { %v2381_v58 = vor.u32 %v2765_v49, %v2380_v48 }
  0x50   : > { %3061 = vmatpush.bf16.msra.mxu3 %v3159_v5  ;;  %v2589_v5 = vor.u32 %v2818_v63, %v2588_v62  ;;  %v2350_v62 = vld [vmem:[%s3226_s18 + $0xcc] sm:$0xf0]  ;;  %v2356_v63 = vld [vmem:[%s3226_s18 + $0xc8] sm:$0xf] }
  0x54   : > { %3062 = vmatpush.bf16.msra.mxu3 %v3172_v8  ;;  %v2300_v8 = vld [vmem:[%s3226_s18 + $0x60] sm:$0xf] }
  0x55   : > { %v2301_v16 = vor.u32 %v2746_v9, %v2300_v8 }
  0x58   : > { %3063 = vmatpush.bf16.msra.mxu3 %v3188_v11  ;;  %v2821_v11 = vld [vmem:[%s3226_s18 + $0x2c0] sm:$0xf0] }
  0x5b   : > { %1111 = vmatmul.bf16.gmra.mxu0 %v2289_v4  ;;  %1236 = vmatmul.bf16.gmra.mxu3 %v2589_v5  ;;  %v2353_v4 = vor.u32 %v2757_v59, %v2350_v62  ;;  %v2357_v5 = vor.u32 %v2759_v0, %v2356_v63 }
  0x5c   : > { %3064 = vmatpush.bf16.msra.mxu3 %v3205_v14  ;;  %1280 = vmatmul.bf16.gmra.mxu1 %v2293_v6  ;;  %v2308_v14 = vld [vmem:[%s3226_s18 + $0x68] sm:$0xf] }
  0x5d   : > { %1449 = vmatmul.bf16.gmra.mxu2 %v2297_v7  ;;  %v2309_v19 = vor.u32 %v2747_v15, %v2308_v14 }
  0x60   : > { %3065 = vmatpush.bf16.msra.mxu3 %v3218_v17  ;;  %v2601_v17 = vor.u32 %v2821_v11, %v2600_v10 }
  0x64   : > { %3066 = vmatpush.bf16.msra.mxu3 %v3235_v20  ;;  %v2312_v20 = vld [vmem:[%s3226_s18 + $0x78] sm:$0xf] }
  0x65   : > { %v2313_v28 = vor.u32 %v2749_v21, %v2312_v20  ;;  %v2578_v20 = vld [vmem:[%s3226_s18 + $0x294] sm:$0xf0]  ;;  %v2362_v21 = vld [vmem:[%s3226_s18 + $0xe4] sm:$0xf0] }
  0x68   : > { %3067 = vmatpush.bf16.msra.mxu3 %v3246_v23  ;;  %v2314_v23 = vld [vmem:[%s3226_s18 + $0x84] sm:$0xf0] }
  0x69   : > { %v2317_v30 = vor.u32 %v2748_v25, %v2314_v23 }
  0x6b   : > { %1116 = vmatmul.bf16.gmra.mxu0 %v2301_v16  ;;  %1241 = vmatmul.bf16.gmra.mxu3 %v2601_v17  ;;  %v2360_v16 = vld [vmem:[%s3226_s18 + $0xd8] sm:$0xf]  ;;  %v2761_v17 = vld [vmem:[%s3226_s18 + $0xe0] sm:$0xf0] }
  0x6c   : > { %1285 = vmatmul.bf16.gmra.mxu1 %v2305_v18  ;;  %v2760_v18 = vld [vmem:[%s3226_s18 + $0xdc] sm:$0xf]  ;;  %v2361_v26 = vor.u32 %v2761_v17, %v2360_v16 }
  0x6d   : > { %1454 = vmatmul.bf16.gmra.mxu2 %v2309_v19  ;;  %v2814_v19 = vld [vmem:[%s3226_s18 + $0x28c] sm:$0xf] }
  0x6e   : > { %v2581_v27 = vor.u32 %v2814_v19, %v2578_v20 }
  0x7b   : > { %1121 = vmatmul.bf16.gmra.mxu0 %v2313_v28  ;;  %1246 = vmatmul.bf16.gmra.mxu3 %v2613_v29 }
  0x7c   : > { %1290 = vmatmul.bf16.gmra.mxu1 %v2317_v30  ;;  %v2365_v30 = vor.u32 %v2760_v18, %v2362_v21 }
  0x7d   : > { %1459 = vmatmul.bf16.gmra.mxu2 %v2321_v31  ;;  %v2369_v31 = vor.u32 %v2762_v24, %v2368_v22 }
  0x8b   : > { %1126 = vmatmul.bf16.gmra.mxu0 %v2325_v40  ;;  %1251 = vmatmul.bf16.gmra.mxu3 %v2625_v41 }
  0x8c   : > { %1295 = vmatmul.bf16.gmra.mxu1 %v2329_v42  ;;  %v2372_v42 = vld [vmem:[%s3226_s18 + $0xf0] sm:$0xf] }
  0x8d   : > { %1464 = vmatmul.bf16.gmra.mxu2 %v2333_v43  ;;  %v2764_v43 = vld [vmem:[%s3226_s18 + $0xf8] sm:$0xf0] }
  0x9b   : > { %1131 = vmatmul.bf16.gmra.mxu0 %v2337_v52  ;;  %1390 = vmatmul.bf16.vlgmr.msrb.gmra.mxu3 %v2557_v53  ;;  %v2373_v52 = vor.u32 %v2764_v43, %v2372_v42  ;;  %v2593_v53 = vor.u32 %v2817_v45, %v2590_v46  ;;  %v2398_v42 = vld [vmem:[%s3226_s18 + $0x12c] sm:$0xf0]  ;;  %v2404_v43 = vld [vmem:[%s3226_s18 + $0x128] sm:$0xf] }
  0x9c   : > { %1300 = vmatmul.bf16.gmra.mxu1 %v2341_v54 }
  0x9d   : > { %1469 = vmatmul.bf16.gmra.mxu2 %v2345_v55 }
  0xa8   : > { %v1097_v3 = vpop.f32.mrf.mxu0 }
  0xa9   : > { %v1098_v6 = vadd.f32 %v3328_v56, %v1097_v3  ;;  %v1266_v7 = vpop.f32.mrf.mxu1 }
  0xab   : > { %v1267_v8 = vadd.f32 %v1266_v7, %v1098_v6  ;;  %1136 = vmatmul.bf16.gmra.mxu0 %v2349_v1  ;;  %1395 = vmatmul.bf16.gmra.mxu3 %v2569_v2  ;;  %v2767_v6 = vld [vmem:[%s3226_s18 + $0x110] sm:$0xf0]  ;;  %v2766_v7 = vld [vmem:[%s3226_s18 + $0x10c] sm:$0xf] }
  0xac   : > { %1305 = vmatmul.bf16.gmra.mxu1 %v2353_v4 }
  0xad   : > { %1474 = vmatmul.bf16.gmra.mxu2 %v2357_v5  ;;  %v2384_v5 = vld [vmem:[%s3226_s18 + $0x108] sm:$0xf] }
  0xae   : > { %v3339_v9 = vpop.f32.mrf.mxu3  ;;  %v2385_v17 = vor.u32 %v2767_v6, %v2384_v5  ;;  %v2773_v5 = vld [vmem:[%s3226_s18 + $0x140] sm:$0xf0]  ;;  %v2772_v6 = vld [vmem:[%s3226_s18 + $0x13c] sm:$0xf] }
  0xb0   : > { %v1435_v10 = vpop.f32.mrf.mxu2  ;;  %v1099_v12 = vpop.f32.mrf.mxu0 }
  0xb1   : > { %v3341_v11 = vadd.f32 %v1435_v10, %v1267_v8  ;;  %v1100_v13 = vadd.f32 %v3328_v56, %v1099_v12  ;;  %v1268_v14 = vpop.f32.mrf.mxu1  ;;  %v2820_v8 = vld [vmem:[%s3226_s18 + $0x2bc] sm:$0xf]  ;;  %v2602_v10 = vld [vmem:[%s3226_s18 + $0x2c4] sm:$0xf0]  ;;  %v2386_v12 = vld [vmem:[%s3226_s18 + $0x114] sm:$0xf0] }
  0xb2   : > { %v2605_v18 = vor.u32 %v2820_v8, %v2602_v10  ;;  %v2389_v21 = vor.u32 %v2766_v7, %v2386_v12  ;;  %v2826_v7 = vld [vmem:[%s3226_s18 + $0x2ec] sm:$0xf]  ;;  %v2626_v8 = vld [vmem:[%s3226_s18 + $0x2f4] sm:$0xf0]  ;;  %v2410_v10 = vld [vmem:[%s3226_s18 + $0x144] sm:$0xf0] }
  0xb3   : > { %v1269_v15 = vadd.f32 %v1268_v14, %v1100_v13  ;;  %v2392_v13 = vld [vmem:[%s3226_s18 + $0x110] sm:$0xf]  ;;  %v2768_v14 = vld [vmem:[%s3226_s18 + $0x118] sm:$0xf0]  ;;  %v2416_v12 = vld [vmem:[%s3226_s18 + $0x140] sm:$0xf] }
  0xb4   : > { %v2393_v22 = vor.u32 %v2768_v14, %v2392_v13  ;;  %v2774_v13 = vld [vmem:[%s3226_s18 + $0x148] sm:$0xf0] }
  0xb6   : > { %v3352_v25 = vpop.f32.mrf.mxu3 }
  0xb8   : > { %v1437_v23 = vpop.f32.mrf.mxu2  ;;  %v1102_v29 = vpop.f32.mrf.mxu0 }
  0xb9   : > { %v3354_v28 = vadd.f32 %v1437_v23, %v1269_v15  ;;  %v1103_v32 = vadd.f32 %v3328_v56, %v1102_v29  ;;  %v1271_v33 = vpop.f32.mrf.mxu1 }
  0xbb   : > { %4671 = vst [vmem:[#allocation2_spill] sm:$0xff] %v3354_v28  ;;  %v1272_v34 = vadd.f32 %v1271_v33, %v1103_v32  ;;  %1141 = vmatmul.bf16.gmra.mxu0 %v2361_v26  ;;  %1400 = vmatmul.bf16.gmra.mxu3 %v2581_v27 }
  0xbc   : > { %1310 = vmatmul.bf16.gmra.mxu1 %v2365_v30 }
  0xbd   : > { %1479 = vmatmul.bf16.gmra.mxu2 %v2369_v31 }
  0xbe   : > { %v3357_v35 = vpop.f32.mrf.mxu3 }
  0xc0   : > { %v1440_v36 = vpop.f32.mrf.mxu2  ;;  %v1104_v38 = vpop.f32.mrf.mxu0 }
  0xc1   : > { %v3359_v37 = vadd.f32 %v1440_v36, %v1272_v34  ;;  %v1105_v39 = vadd.f32 %v3328_v56, %v1104_v38  ;;  %v1273_v40 = vpop.f32.mrf.mxu1  ;;  %v2396_v36 = vld [vmem:[%s3226_s18 + $0x120] sm:$0xf]  ;;  %v2770_v38 = vld [vmem:[%s3226_s18 + $0x128] sm:$0xf0] }
  0xc2   : > { %v2397_v47 = vor.u32 %v2770_v38, %v2396_v36 }
  0xc3   : > { %v1274_v41 = vadd.f32 %v1273_v40, %v1105_v39  ;;  %v2769_v39 = vld [vmem:[%s3226_s18 + $0x124] sm:$0xf]  ;;  %v2823_v40 = vld [vmem:[%s3226_s18 + $0x2d4] sm:$0xf] }
  0xc6   : > { %v3370_v50 = vpop.f32.mrf.mxu3 }
  0xc8   : > { %v1442_v51 = vpop.f32.mrf.mxu2  ;;  %v1107_v55 = vpop.f32.mrf.mxu0 }
  0xc9   : > { %v3372_v54 = vadd.f32 %v1442_v51, %v1274_v41  ;;  %v1108_v59 = vadd.f32 %v3328_v56, %v1107_v55  ;;  %v1276_v60 = vpop.f32.mrf.mxu1  ;;  %v2614_v41 = vld [vmem:[%s3226_s18 + $0x2dc] sm:$0xf0] }
  0xca   : > { %v2617_v48 = vor.u32 %v2823_v40, %v2614_v41  ;;  %v2420_v40 = vld [vmem:[%s3226_s18 + $0x150] sm:$0xf]  ;;  %v2776_v41 = vld [vmem:[%s3226_s18 + $0x158] sm:$0xf0] }
  0xcb   : > { %4672 = vst [vmem:[#allocation3_spill] sm:$0xff] %v3372_v54  ;;  %v1277_v61 = vadd.f32 %v1276_v60, %v1108_v59  ;;  %1146 = vmatmul.bf16.gmra.mxu0 %v2373_v52  ;;  %1405 = vmatmul.bf16.gmra.mxu3 %v2593_v53  ;;  %v2401_v52 = vor.u32 %v2769_v39, %v2398_v42  ;;  %v2775_v42 = vld [vmem:[%s3226_s18 + $0x154] sm:$0xf] }
  0xcc   : > { %1315 = vmatmul.bf16.gmra.mxu1 %v2377_v57  ;;  %v2405_v53 = vor.u32 %v2771_v44, %v2404_v43  ;;  %v2560_v43 = vld [vmem:[%s3226_s18 + $0x260] sm:$0xf]  ;;  %v2810_v44 = vld [vmem:[%s3226_s18 + $0x268] sm:$0xf0] }
  0xcd   : > { %1484 = vmatmul.bf16.gmra.mxu2 %v2381_v58 }
  0xce   : > { %v3375_v62 = vpop.f32.mrf.mxu3 }
  0xd0   : > { %v1445_v63 = vpop.f32.mrf.mxu2  ;;  %v1109_v1 = vpop.f32.mrf.mxu0 }
  0xd1   : > { %v3377_v0 = vadd.f32 %v1445_v63, %v1277_v61  ;;  %v1110_v2 = vadd.f32 %v3328_v56, %v1109_v1  ;;  %v1278_v3 = vpop.f32.mrf.mxu1 }
  0xd3   : > { %v1279_v4 = vadd.f32 %v1278_v3, %v1110_v2 }
  0xd6   : > { %v3388_v15 = vpop.f32.mrf.mxu3 }
  0xd8   : > { %v1447_v16 = vpop.f32.mrf.mxu2  ;;  %v1112_v20 = vpop.f32.mrf.mxu0 }
  0xd9   : > { %v3390_v19 = vadd.f32 %v1447_v16, %v1279_v4  ;;  %v1113_v24 = vadd.f32 %v3328_v56, %v1112_v20  ;;  %v1281_v23 = vpop.f32.mrf.mxu1  ;;  %v2408_v4 = vld [vmem:[%s3226_s18 + $0x138] sm:$0xf] }
  0xdb   : > { %v1282_v26 = vadd.f32 %v1281_v23, %v1113_v24  ;;  %1151 = vmatmul.bf16.gmra.mxu0 %v2385_v17  ;;  %1410 = vmatmul.bf16.gmra.mxu3 %v2605_v18  ;;  %v2409_v17 = vor.u32 %v2773_v5, %v2408_v4  ;;  %v2629_v18 = vor.u32 %v2826_v7, %v2626_v8 }
  0xdc   : > { %1320 = vmatmul.bf16.gmra.mxu1 %v2389_v21  ;;  %v2417_v24 = vor.u32 %v2774_v13, %v2416_v12  ;;  %v2432_v13 = vld [vmem:[%s3226_s18 + $0x168] sm:$0xf] }
  0xdd   : > { %1489 = vmatmul.bf16.gmra.mxu2 %v2393_v22  ;;  %v2413_v22 = vor.u32 %v2772_v6, %v2410_v10 }
  0xde   : > { %v3393_v27 = vpop.f32.mrf.mxu3 }
  0xe0   : > { %v1450_v29 = vpop.f32.mrf.mxu2  ;;  %v1114_v31 = vpop.f32.mrf.mxu0 }
  0xe1   : > { %v3395_v30 = vadd.f32 %v1450_v29, %v1282_v26  ;;  %v1115_v32 = vadd.f32 %v3328_v56, %v1114_v31  ;;  %v1283_v33 = vpop.f32.mrf.mxu1 }
  0xe3   : > { %v1284_v34 = vadd.f32 %v1283_v33, %v1115_v32 }
  0xe6   : > { %v3406_v45 = vpop.f32.mrf.mxu3 }
  0xe8   : > { %v1452_v46 = vpop.f32.mrf.mxu2  ;;  %v1117_v51 = vpop.f32.mrf.mxu0 }
  0xe9   : > { %v3408_v49 = vadd.f32 %v1452_v46, %v1284_v34  ;;  %v1118_v55 = vadd.f32 %v3328_v56, %v1117_v51  ;;  %v1286_v57 = vpop.f32.mrf.mxu1  ;;  %v2422_v46 = vld [vmem:[%s3226_s18 + $0x15c] sm:$0xf0] }
  0xeb   : > { %4673 = vst [vmem:[#allocation4_spill] sm:$0xff] %v3408_v49  ;;  %v1287_v58 = vadd.f32 %v1286_v57, %v1118_v55  ;;  %1156 = vmatmul.bf16.gmra.mxu0 %v2397_v47  ;;  %1415 = vmatmul.bf16.gmra.mxu3 %v2617_v48  ;;  %v2428_v47 = vld [vmem:[%s3226_s18 + $0x158] sm:$0xf]  ;;  %v2777_v48 = vld [vmem:[%s3226_s18 + $0x160] sm:$0xf0]  ;;  %v2561_v55 = vor.u32 %v2810_v44, %v2560_v43 }
  0xec   : > { %1325 = vmatmul.bf16.gmra.mxu1 %v2401_v52  ;;  %v1223_v44 = vadd.f32 %v3328_v56, %v3339_v9  ;;  %v1225_v9 = vadd.f32 %v3328_v56, %v3352_v25 }
  0xed   : > { %1494 = vmatmul.bf16.gmra.mxu2 %v2405_v53  ;;  %v2421_v53 = vor.u32 %v2776_v41, %v2420_v40 }
  0xee   : > { %v3411_v59 = vpop.f32.mrf.mxu3 }
  0xf0   : > { %v1455_v60 = vpop.f32.mrf.mxu2  ;;  %v1119_v63 = vpop.f32.mrf.mxu0 }
  0xf1   : > { %v3413_v61 = vadd.f32 %v1455_v60, %v1287_v58  ;;  %v1120_v1 = vadd.f32 %v3328_v56, %v1119_v63  ;;  %v1288_v2 = vpop.f32.mrf.mxu1  ;;  %v2425_v60 = vor.u32 %v2775_v42, %v2422_v46  ;;  %v2429_v63 = vor.u32 %v2777_v48, %v2428_v47 }
  0xf3   : > { %4674 = vst [vmem:[#allocation5_spill] sm:$0xff] %v3413_v61  ;;  %v1289_v3 = vadd.f32 %v1288_v2, %v1120_v1 }
  0xf6   : > { %v3424_v14 = vpop.f32.mrf.mxu3 }
  0xf8   : > { %v1457_v16 = vpop.f32.mrf.mxu2  ;;  %v1122_v21 = vpop.f32.mrf.mxu0 }
  0xf9   : > { %v3426_v20 = vadd.f32 %v1457_v16, %v1289_v3  ;;  %v1123_v23 = vadd.f32 %v3328_v56, %v1122_v21  ;;  %v1291_v26 = vpop.f32.mrf.mxu1  ;;  %v2779_v16 = vld [vmem:[%s3226_s18 + $0x170] sm:$0xf0]  ;;  %v2813_v21 = vld [vmem:[%s3226_s18 + $0x280] sm:$0xf0] }
  0xfb   : > { %4675 = vst [vmem:[#allocation6_spill] sm:$0xff] %v3426_v20  ;;  %v1292_v29 = vadd.f32 %v1291_v26, %v1123_v23  ;;  %1161 = vmatmul.bf16.gmra.mxu0 %v2409_v17  ;;  %1420 = vmatmul.bf16.gmra.mxu3 %v2629_v18  ;;  %v2778_v17 = vld [vmem:[%s3226_s18 + $0x16c] sm:$0xf]  ;;  %v2572_v18 = vld [vmem:[%s3226_s18 + $0x278] sm:$0xf] }
  0xfc   : > { %1330 = vmatmul.bf16.gmra.mxu1 %v2413_v22  ;;  %v2434_v22 = vld [vmem:[%s3226_s18 + $0x174] sm:$0xf0]  ;;  %v2780_v23 = vld [vmem:[%s3226_s18 + $0x178] sm:$0xf0] }
  0xfd   : > { %1499 = vmatmul.bf16.gmra.mxu2 %v2417_v24  ;;  %v2440_v24 = vld [vmem:[%s3226_s18 + $0x170] sm:$0xf] }
  0xfe   : > { %v3429_v31 = vpop.f32.mrf.mxu3  ;;  %v2441_v40 = vor.u32 %v2780_v23, %v2440_v24 }
 0x100   : > { %v1460_v32 = vpop.f32.mrf.mxu2  ;;  %v1124_v34 = vpop.f32.mrf.mxu0 }
 0x101   : > { %v3431_v33 = vadd.f32 %v1460_v32, %v1292_v29  ;;  %v1125_v36 = vadd.f32 %v3328_v56, %v1124_v34  ;;  %v1293_v38 = vpop.f32.mrf.mxu1  ;;  %v2433_v32 = vor.u32 %v2779_v16, %v2432_v13  ;;  %v2573_v34 = vor.u32 %v2813_v21, %v2572_v18 }
 0x103   : > { %4676 = vst [vmem:[#allocation7_spill] sm:$0xff] %v3431_v33  ;;  %v1294_v39 = vadd.f32 %v1293_v38, %v1125_v36 }
 0x106   : > { %v3442_v51 = vpop.f32.mrf.mxu3 }
 0x108   : > { %v1462_v52 = vpop.f32.mrf.mxu2  ;;  %v1127_v58 = vpop.f32.mrf.mxu0 }
 0x109   : > { %v3444_v57 = vadd.f32 %v1462_v52, %v1294_v39  ;;  %v1128_v1 = vadd.f32 %v3328_v56, %v1127_v58  ;;  %v1296_v2 = vpop.f32.mrf.mxu1  ;;  %v2437_v39 = vor.u32 %v2778_v17, %v2434_v22 }
 0x10b   : > { %4677 = vst [vmem:[#allocation8_spill] sm:$0xff] %v3444_v57  ;;  %v1297_v3 = vadd.f32 %v1296_v2, %v1128_v1  ;;  %1166 = vmatmul.bf16.gmra.mxu0 %v2421_v53  ;;  %1559 = vmatmul.bf16.vlgmr.msra.gmra.mxu3 %v2561_v55  ;;  %v2782_v1 = vld [vmem:[%s3226_s18 + $0x188] sm:$0xf0]  ;;  %v2781_v2 = vld [vmem:[%s3226_s18 + $0x184] sm:$0xf] }
 0x10c   : > { %1335 = vmatmul.bf16.gmra.mxu1 %v2425_v60 }
 0x10d   : > { %1504 = vmatmul.bf16.gmra.mxu2 %v2429_v63  ;;  %v2444_v63 = vld [vmem:[%s3226_s18 + $0x180] sm:$0xf] }
 0x10e   : > { %v3447_v4 = vpop.f32.mrf.mxu3  ;;  %v2445_v17 = vor.u32 %v2782_v1, %v2444_v63  ;;  %v2458_v63 = vld [vmem:[%s3226_s18 + $0x1a4] sm:$0xf0]  ;;  %v2464_v1 = vld [vmem:[%s3226_s18 + $0x1a0] sm:$0xf] }
 0x110   : > { %v1465_v5 = vpop.f32.mrf.mxu2  ;;  %v1129_v7 = vpop.f32.mrf.mxu0 }
 0x111   : > { %v3449_v6 = vadd.f32 %v1465_v5, %v1297_v3  ;;  %v1130_v8 = vadd.f32 %v3328_v56, %v1129_v7  ;;  %v1298_v10 = vpop.f32.mrf.mxu1  ;;  %v2584_v3 = vld [vmem:[%s3226_s18 + $0x290] sm:$0xf]  ;;  %v2816_v5 = vld [vmem:[%s3226_s18 + $0x298] sm:$0xf0] }
 0x112   : > { %v2446_v7 = vld [vmem:[%s3226_s18 + $0x18c] sm:$0xf0]  ;;  %v2585_v18 = vor.u32 %v2816_v5, %v2584_v3 }
 0x113   : > { %4678 = vst [vmem:[#allocation9_spill] sm:$0xff] %v3449_v6  ;;  %v1299_v12 = vadd.f32 %v1298_v10, %v1130_v8  ;;  %v2452_v8 = vld [vmem:[%s3226_s18 + $0x188] sm:$0xf]  ;;  %v2783_v10 = vld [vmem:[%s3226_s18 + $0x190] sm:$0xf0]  ;;  %v2449_v24 = vor.u32 %v2781_v2, %v2446_v7 }
 0x114   : > { %v2453_v23 = vor.u32 %v2783_v10, %v2452_v8  ;;  %v2786_v2 = vld [vmem:[%s3226_s18 + $0x1a8] sm:$0xf0] }
 0x116   : > { %v3460_v26 = vpop.f32.mrf.mxu3 }
 0x118   : > { %v1467_v29 = vpop.f32.mrf.mxu2  ;;  %v1132_v38 = vpop.f32.mrf.mxu0 }
 0x119   : > { %v3462_v36 = vadd.f32 %v1467_v29, %v1299_v12  ;;  %v1133_v41 = vadd.f32 %v3328_v56, %v1132_v38  ;;  %v1301_v42 = vpop.f32.mrf.mxu1 }
 0x11b   : > { %4679 = vst [vmem:[#allocation10_spill] sm:$0xff] %v3462_v36  ;;  %v1302_v43 = vadd.f32 %v1301_v42, %v1133_v41  ;;  %1171 = vmatmul.bf16.gmra.mxu0 %v2433_v32  ;;  %1564 = vmatmul.bf16.gmra.mxu3 %v2573_v34  ;;  %v1228_v34 = vadd.f32 %v3328_v56, %v3357_v35 }
 0x11c   : > { %1340 = vmatmul.bf16.gmra.mxu1 %v2437_v39  ;;  %v1230_v35 = vadd.f32 %v3328_v56, %v3370_v50 }
 0x11d   : > { %1509 = vmatmul.bf16.gmra.mxu2 %v2441_v40 }
 0x11e   : > { %v1391_v46 = vpop.f32.mrf.mxu3 }
 0x11f   : > { %v3467_v47 = vadd.f32 %v1391_v46, %v1223_v44 }
 0x120   : > { %v1470_v48 = vpop.f32.mrf.mxu2  ;;  %v1134_v53 = vpop.f32.mrf.mxu0 }
 0x121   : > { %v3469_v52 = vadd.f32 %v1470_v48, %v1302_v43  ;;  %v1135_v55 = vadd.f32 %v3328_v56, %v1134_v53  ;;  %v1303_v58 = vpop.f32.mrf.mxu1  ;;  %v2456_v48 = vld [vmem:[%s3226_s18 + $0x198] sm:$0xf]  ;;  %v2785_v53 = vld [vmem:[%s3226_s18 + $0x1a0] sm:$0xf0] }
 0x122   : > { %v2457_v7 = vor.u32 %v2785_v53, %v2456_v48  ;;  %v1235_v48 = vadd.f32 %v3328_v56, %v3388_v15  ;;  %v2470_v53 = vld [vmem:[%s3226_s18 + $0x1bc] sm:$0xf0] }
 0x123   : > { %4680 = vst [vmem:[#allocation11_spill] sm:$0xff] %v3469_v52  ;;  %v1304_v60 = vadd.f32 %v1303_v58, %v1135_v55  ;;  %v2784_v55 = vld [vmem:[%s3226_s18 + $0x19c] sm:$0xf]  ;;  %v2596_v58 = vld [vmem:[%s3226_s18 + $0x2a8] sm:$0xf] }
 0x126   : > { %v1393_v12 = vpop.f32.mrf.mxu3 }
 0x127   : > { %v3482_v13 = vadd.f32 %v1393_v12, %v1225_v9 }
 0x128   : > { %v1472_v16 = vpop.f32.mrf.mxu2  ;;  %v1137_v22 = vpop.f32.mrf.mxu0 }
 0x129   : > { %v3484_v21 = vadd.f32 %v1472_v16, %v1304_v60  ;;  %v1138_v29 = vadd.f32 %v3328_v56, %v1137_v22  ;;  %v1306_v32 = vpop.f32.mrf.mxu1  ;;  %v2819_v60 = vld [vmem:[%s3226_s18 + $0x2b0] sm:$0xf0]  ;;  %v2461_v16 = vor.u32 %v2784_v55, %v2458_v63  ;;  %v2476_v55 = vld [vmem:[%s3226_s18 + $0x1b8] sm:$0xf] }
 0x12a   : > { %v2597_v8 = vor.u32 %v2819_v60, %v2596_v58  ;;  %v2789_v58 = vld [vmem:[%s3226_s18 + $0x1c0] sm:$0xf0] }
 0x12b   : > { %4681 = vst [vmem:[#allocation12_spill] sm:$0xff] %v3484_v21  ;;  %v1307_v25 = vadd.f32 %v1306_v32, %v1138_v29  ;;  %1176 = vmatmul.bf16.gmra.mxu0 %v2445_v17  ;;  %1569 = vmatmul.bf16.gmra.mxu3 %v2585_v18  ;;  %v2465_v17 = vor.u32 %v2786_v2, %v2464_v1 }
 0x12c   : > { %1345 = vmatmul.bf16.gmra.mxu1 %v2449_v24 }
 0x12d   : > { %1514 = vmatmul.bf16.gmra.mxu2 %v2453_v23 }
 0x12e   : > { %v1396_v38 = vpop.f32.mrf.mxu3 }
 0x12f   : > { %v3489_v39 = vadd.f32 %v1396_v38, %v1228_v34 }
 0x130   : > { %v1475_v40 = vpop.f32.mrf.mxu2  ;;  %v1139_v42 = vpop.f32.mrf.mxu0 }
 0x131   : > { %v3491_v41 = vadd.f32 %v1475_v40, %v1307_v25  ;;  %v1140_v43 = vadd.f32 %v3328_v56, %v1139_v42  ;;  %v1308_v44 = vpop.f32.mrf.mxu1  ;;  %v2468_v40 = vld [vmem:[%s3226_s18 + $0x1b0] sm:$0xf]  ;;  %v2788_v42 = vld [vmem:[%s3226_s18 + $0x1b8] sm:$0xf0] }
 0x132   : > { %v2469_v1 = vor.u32 %v2788_v42, %v2468_v40  ;;  %v2480_v40 = vld [vmem:[%s3226_s18 + $0x1c8] sm:$0xf]  ;;  %v2791_v42 = vld [vmem:[%s3226_s18 + $0x1d0] sm:$0xf0] }
 0x133   : > { %v1309_v46 = vadd.f32 %v1308_v44, %v1140_v43  ;;  %v2787_v43 = vld [vmem:[%s3226_s18 + $0x1b4] sm:$0xf]  ;;  %v2608_v44 = vld [vmem:[%s3226_s18 + $0x2c0] sm:$0xf] }
 0x136   : > { %v1398_v3 = vpop.f32.mrf.mxu3 }
 0x137   : > { %v3504_v5 = vadd.f32 %v1398_v3, %v1230_v35 }
 0x138   : > { %v1477_v9 = vpop.f32.mrf.mxu2  ;;  %v1142_v12 = vpop.f32.mrf.mxu0 }
 0x139   : > { %v3506_v10 = vadd.f32 %v1477_v9, %v1309_v46  ;;  %v1143_v18 = vadd.f32 %v3328_v56, %v1142_v12  ;;  %v1311_v50 = vpop.f32.mrf.mxu1  ;;  %v2822_v46 = vld [vmem:[%s3226_s18 + $0x2c8] sm:$0xf0] }
 0x13a   : > { %v2609_v2 = vor.u32 %v2822_v46, %v2608_v44  ;;  %v2620_v44 = vld [vmem:[%s3226_s18 + $0x2d8] sm:$0xf]  ;;  %v2825_v46 = vld [vmem:[%s3226_s18 + $0x2e0] sm:$0xf0] }
 0x13b   : > { %4682 = vst [vmem:[#allocation13_spill] sm:$0xff] %v3506_v10  ;;  %v1312_v22 = vadd.f32 %v1311_v50, %v1143_v18  ;;  %1181 = vmatmul.bf16.gmra.mxu0 %v2457_v7  ;;  %1574 = vmatmul.bf16.gmra.mxu3 %v2597_v8  ;;  %v2473_v7 = vor.u32 %v2787_v43, %v2470_v53  ;;  %v2790_v43 = vld [vmem:[%s3226_s18 + $0x1cc] sm:$0xf]  ;;  %v2488_v53 = vld [vmem:[%s3226_s18 + $0x1d0] sm:$0xf] }
 0x13c   : > { %1350 = vmatmul.bf16.gmra.mxu1 %v2461_v16  ;;  %v2477_v8 = vor.u32 %v2789_v58, %v2476_v55  ;;  %v2792_v55 = vld [vmem:[%s3226_s18 + $0x1d8] sm:$0xf0] }
 0x13d   : > { %1519 = vmatmul.bf16.gmra.mxu2 %v2465_v17  ;;  %v1238_v17 = vadd.f32 %v3328_v56, %v3393_v27  ;;  %v1240_v27 = vadd.f32 %v3328_v56, %v3406_v45 }
 0x13e   : > { %v3509_v24 = vpop.f32.mrf.mxu3 }
 0x140   : > { %v1480_v23 = vpop.f32.mrf.mxu2  ;;  %v1144_v32 = vpop.f32.mrf.mxu0 }
 0x141   : > { %v3511_v29 = vadd.f32 %v1480_v23, %v1312_v22  ;;  %v1145_v25 = vadd.f32 %v3328_v56, %v1144_v32  ;;  %v1313_v34 = vpop.f32.mrf.mxu1 }
 0x143   : > { %4683 = vst [vmem:[#allocation14_spill] sm:$0xff] %v3511_v29  ;;  %v1314_v38 = vadd.f32 %v1313_v34, %v1145_v25 }
 0x146   : > { %v1403_v60 = vpop.f32.mrf.mxu3 }
 0x147   : > { %v3524_v35 = vadd.f32 %v1403_v60, %v1235_v48  ;;  %v2482_v48 = vld [vmem:[%s3226_s18 + $0x1d4] sm:$0xf0] }
 0x148   : > { %v1482_v63 = vpop.f32.mrf.mxu2  ;;  %v1147_v9 = vpop.f32.mrf.mxu0 }
 0x149   : > { %v3526_v3 = vadd.f32 %v1482_v63, %v1314_v38  ;;  %v1148_v12 = vadd.f32 %v3328_v56, %v1147_v9  ;;  %v1316_v16 = vpop.f32.mrf.mxu1 }
 0x14b   : > { %4684 = vst [vmem:[#allocation15_spill] sm:$0xff] %v3526_v3  ;;  %v1317_v15 = vadd.f32 %v1316_v16, %v1148_v12  ;;  %1186 = vmatmul.bf16.gmra.mxu0 %v2469_v1  ;;  %1579 = vmatmul.bf16.gmra.mxu3 %v2609_v2  ;;  %v2481_v1 = vor.u32 %v2791_v42, %v2480_v40 }
 0x14c   : > { %1355 = vmatmul.bf16.gmra.mxu1 %v2473_v7  ;;  %v2621_v2 = vor.u32 %v2825_v46, %v2620_v44  ;;  %v2489_v12 = vor.u32 %v2792_v55, %v2488_v53  ;;  %v2794_v44 = vld [vmem:[%s3226_s18 + $0x1e8] sm:$0xf0]  ;;  %v2793_v46 = vld [vmem:[%s3226_s18 + $0x1e4] sm:$0xf]  ;;  %v2494_v53 = vld [vmem:[%s3226_s18 + $0x1ec] sm:$0xf0] }
 0x14d   : > { %1524 = vmatmul.bf16.gmra.mxu2 %v2477_v8  ;;  %v2485_v8 = vor.u32 %v2790_v43, %v2482_v48  ;;  %v2492_v43 = vld [vmem:[%s3226_s18 + $0x1e0] sm:$0xf]  ;;  %v2828_v48 = vld [vmem:[%s3226_s18 + $0x2f8] sm:$0xf0]  ;;  %v2500_v55 = vld [vmem:[%s3226_s18 + $0x1e8] sm:$0xf] }
 0x14e   : > { %v1406_v18 = vpop.f32.mrf.mxu3 }
 0x14f   : > { %v3531_v50 = vadd.f32 %v1406_v18, %v1238_v17  ;;  %v1243_v17 = vadd.f32 %v3328_v56, %v3411_v59  ;;  %v1245_v59 = vadd.f32 %v3328_v56, %v3424_v14 }
 0x150   : > { %v1485_v22 = vpop.f32.mrf.mxu2  ;;  %v1149_v32 = vpop.f32.mrf.mxu0 }
 0x151   : > { %v3533_v23 = vadd.f32 %v1485_v22, %v1317_v15  ;;  %v1150_v25 = vadd.f32 %v3328_v56, %v1149_v32  ;;  %v1318_v34 = vpop.f32.mrf.mxu1 }
 0x153   : > { %4685 = vst [vmem:[#allocation16_spill] sm:$0xff] %v3533_v23  ;;  %v1319_v38 = vadd.f32 %v1318_v34, %v1150_v25 }
 0x156   : > { %v1408_v58 = vpop.f32.mrf.mxu3 }
 0x157   : > { %v3546_v60 = vadd.f32 %v1408_v58, %v1240_v27  ;;  %v2632_v27 = vld [vmem:[%s3226_s18 + $0x2f0] sm:$0xf]  ;;  %v2795_v58 = vld [vmem:[%s3226_s18 + $0x1f0] sm:$0xf0] }
 0x158   : > { %v1487_v63 = vpop.f32.mrf.mxu2  ;;  %v1152_v7 = vpop.f32.mrf.mxu0 }
 0x159   : > { %v3548_v9 = vadd.f32 %v1487_v63, %v1319_v38  ;;  %v1153_v16 = vadd.f32 %v3328_v56, %v1152_v7  ;;  %v1321_v15 = vpop.f32.mrf.mxu1  ;;  %v2493_v7 = vor.u32 %v2794_v44, %v2492_v43 }
 0x15b   : > { %4686 = vst [vmem:[#allocation17_spill] sm:$0xff] %v3548_v9  ;;  %v1322_v45 = vadd.f32 %v1321_v15, %v1153_v16  ;;  %1191 = vmatmul.bf16.gmra.mxu0 %v2481_v1  ;;  %1584 = vmatmul.bf16.gmra.mxu3 %v2621_v2  ;;  %v2497_v15 = vor.u32 %v2793_v46, %v2494_v53  ;;  %v2796_v53 = vld [vmem:[%s3226_s18 + $0x1fc] sm:$0xf] }
 0x15c   : > { %1360 = vmatmul.bf16.gmra.mxu1 %v2485_v8  ;;  %v2633_v8 = vor.u32 %v2828_v48, %v2632_v27  ;;  %v2504_v48 = vld [vmem:[%s3226_s18 + $0x1f8] sm:$0xf] }
 0x15d   : > { %1529 = vmatmul.bf16.gmra.mxu2 %v2489_v12 }
 0x15e   : > { %v1411_v18 = vpop.f32.mrf.mxu3 }
 0x15f   : > { %v3553_v22 = vadd.f32 %v1411_v18, %v1243_v17 }
 0x160   : > { %v1490_v32 = vpop.f32.mrf.mxu2  ;;  %v1154_v34 = vpop.f32.mrf.mxu0 }
 0x161   : > { %v3555_v25 = vadd.f32 %v1490_v32, %v1322_v45  ;;  %v1155_v38 = vadd.f32 %v3328_v56, %v1154_v34  ;;  %v1323_v40 = vpop.f32.mrf.mxu1  ;;  %v2501_v45 = vor.u32 %v2795_v58, %v2500_v55  ;;  %v1248_v32 = vadd.f32 %v3328_v56, %v3429_v31  ;;  %v2506_v58 = vld [vmem:[%s3226_s18 + $0x204] sm:$0xf0]  ;;  %v2798_v31 = vld [vmem:[%s3226_s18 + $0x208] sm:$0xf0] }
 0x162   : > { %v1250_v55 = vadd.f32 %v3328_v56, %v3442_v51 }
 0x163   : > { %4687 = vst [vmem:[#allocation18_spill] sm:$0xff] %v3555_v25  ;;  %v1324_v42 = vadd.f32 %v1323_v40, %v1155_v38 }
 0x166   : > { %v1413_v63 = vpop.f32.mrf.mxu3 }
 0x167   : > { %v3568_v1 = vadd.f32 %v1413_v63, %v1245_v59  ;;  %v2797_v59 = vld [vmem:[%s3226_s18 + $0x200] sm:$0xf0]  ;;  %v2512_v63 = vld [vmem:[%s3226_s18 + $0x200] sm:$0xf] }
 0x168   : > { %v1492_v2 = vpop.f32.mrf.mxu2  ;;  %v1157_v16 = vpop.f32.mrf.mxu0 }
 0x169   : > { %4688 = vst [vmem:[#allocation19_spill] sm:$0xff] %v3568_v1  ;;  %v3570_v12 = vadd.f32 %v1492_v2, %v1324_v42  ;;  %v1158_v17 = vadd.f32 %v3328_v56, %v1157_v16  ;;  %v1326_v18 = vpop.f32.mrf.mxu1  ;;  %v2505_v16 = vor.u32 %v2797_v59, %v2504_v48 }
 0x16b   : > { %4689 = vst [vmem:[#allocation20_spill] sm:$0xff] %v3570_v12  ;;  %v1327_v14 = vadd.f32 %v1326_v18, %v1158_v17  ;;  %1196 = vmatmul.bf16.gmra.mxu0 %v2493_v7  ;;  %1589 = vmatmul.bf16.gmra.mxu3 %v2633_v8  ;;  %v2509_v17 = vor.u32 %v2796_v53, %v2506_v58  ;;  %v2800_v58 = vld [vmem:[%s3226_s18 + $0x218] sm:$0xf0] }
 0x16c   : > { %1365 = vmatmul.bf16.gmra.mxu1 %v2497_v15  ;;  %v2513_v18 = vor.u32 %v2798_v31, %v2512_v63  ;;  %v2799_v63 = vld [vmem:[%s3226_s18 + $0x214] sm:$0xf]  ;;  %v1255_v31 = vadd.f32 %v3328_v56, %v3460_v26 }
 0x16d   : > { %1534 = vmatmul.bf16.gmra.mxu2 %v2501_v45 }
 0x16e   : > { %v1416_v34 = vpop.f32.mrf.mxu3 }
 0x16f   : > { %v3575_v38 = vadd.f32 %v1416_v34, %v1248_v32  ;;  %v1253_v34 = vadd.f32 %v3328_v56, %v3447_v4  ;;  %v2801_v4 = vld [vmem:[%s3226_s18 + $0x220] sm:$0xf0] }
 0x170   : > { %v1495_v40 = vpop.f32.mrf.mxu2  ;;  %v1159_v43 = vpop.f32.mrf.mxu0 }
 0x171   : > { %4690 = vst [vmem:[#allocation21_spill] sm:$0xff] %v3575_v38  ;;  %v3577_v42 = vadd.f32 %v1495_v40, %v1327_v14  ;;  %v1160_v44 = vadd.f32 %v3328_v56, %v1159_v43  ;;  %v1328_v46 = vpop.f32.mrf.mxu1 }
 0x173   : > { %4691 = vst [vmem:[#allocation22_spill] sm:$0xff] %v3577_v42  ;;  %v1329_v27 = vadd.f32 %v1328_v46, %v1160_v44 }
 0x176   : > { %v1418_v2 = vpop.f32.mrf.mxu3 }
 0x177   : > { %v3588_v7 = vadd.f32 %v1418_v2, %v1250_v55  ;;  %v2516_v55 = vld [vmem:[%s3226_s18 + $0x210] sm:$0xf]  ;;  %v2518_v2 = vld [vmem:[%s3226_s18 + $0x21c] sm:$0xf0] }
 0x178   : > { %v1497_v8 = vpop.f32.mrf.mxu2  ;;  %v1162_v45 = vpop.f32.mrf.mxu0 }
 0x179   : > { %4692 = vst [vmem:[#allocation23_spill] sm:$0xff] %v3588_v7  ;;  %v3590_v15 = vadd.f32 %v1497_v8, %v1329_v27  ;;  %v1163_v14 = vadd.f32 %v3328_v56, %v1162_v45  ;;  %v1331_v32 = vpop.f32.mrf.mxu1  ;;  %v2524_v8 = vld [vmem:[%s3226_s18 + $0x218] sm:$0xf] }
 0x17b   : > { %4693 = vst [vmem:[#allocation24_spill] sm:$0xff] %v3590_v15  ;;  %v1332_v51 = vadd.f32 %v1331_v32, %v1163_v14  ;;  %1201 = vmatmul.bf16.gmra.mxu0 %v2505_v16 }
 0x17c   : > { %1370 = vmatmul.bf16.gmra.mxu1 %v2509_v17 }
 0x17d   : > { %1539 = vmatmul.bf16.gmra.mxu2 %v2513_v18  ;;  %v2517_v18 = vor.u32 %v2800_v58, %v2516_v55 }
 0x17e   : > { %v1421_v40 = vpop.f32.mrf.mxu3 }
 0x17f   : > { %v3595_v43 = vadd.f32 %v1421_v40, %v1253_v34  ;;  %v2525_v34 = vor.u32 %v2801_v4, %v2524_v8  ;;  %v2803_v8 = vld [vmem:[%s3226_s18 + $0x230] sm:$0xf0]  ;;  %v2802_v4 = vld [vmem:[%s3226_s18 + $0x22c] sm:$0xf] }
 0x180   : > { %v1500_v44 = vpop.f32.mrf.mxu2  ;;  %v1164_v27 = vpop.f32.mrf.mxu0 }
 0x181   : > { %4694 = vst [vmem:[#allocation25_spill] sm:$0xff] %v3595_v43  ;;  %v3597_v46 = vadd.f32 %v1500_v44, %v1332_v51  ;;  %v1165_v48 = vadd.f32 %v3328_v56, %v1164_v27  ;;  %v1333_v59 = vpop.f32.mrf.mxu1  ;;  %v2521_v51 = vor.u32 %v2799_v63, %v2518_v2  ;;  %v2528_v2 = vld [vmem:[%s3226_s18 + $0x228] sm:$0xf] }
 0x183   : > { %4695 = vst [vmem:[#allocation26_spill] sm:$0xff] %v3597_v46  ;;  %v1334_v53 = vadd.f32 %v1333_v59, %v1165_v48 }
 0x186   : > { %v1423_v16 = vpop.f32.mrf.mxu3 }
 0x187   : > { %v3608_v45 = vadd.f32 %v1423_v16, %v1255_v31  ;;  %v2530_v16 = vld [vmem:[%s3226_s18 + $0x234] sm:$0xf0] }
 0x188   : > { %v1502_v17 = vpop.f32.mrf.mxu2  ;;  %v1167_v32 = vpop.f32.mrf.mxu0 }
 0x189   : > { %4696 = vst [vmem:[#allocation27_spill] sm:$0xff] %v3608_v45  ;;  %v3610_v14 = vadd.f32 %v1502_v17, %v1334_v53  ;;  %v1168_v40 = vadd.f32 %v3328_v56, %v1167_v32  ;;  %v1336_v44 = vpop.f32.mrf.mxu1  ;;  %v2536_v17 = vld [vmem:[%s3226_s18 + $0x230] sm:$0xf] }
 0x18b   : > { %4697 = vst [vmem:[#allocation28_spill] sm:$0xff] %v3610_v14  ;;  %v1337_v26 = vadd.f32 %v1336_v44, %v1168_v40  ;;  %1206 = vmatmul.bf16.gmra.mxu0 %v2517_v18  ;;  %v2804_v18 = vld [vmem:[%s3226_s18 + $0x238] sm:$0xf0] }
 0x18c   : > { %1375 = vmatmul.bf16.gmra.mxu1 %v2521_v51 }
 0x18d   : > { %1544 = vmatmul.bf16.gmra.mxu2 %v2525_v34 }
 0x18e   : > { %v1560_v27 = vpop.f32.mrf.mxu3 }
 0x18f   : > { %v3614_v59 = vadd.f32 %v1560_v27, %v3467_v47  ;;  %v2529_v47 = vor.u32 %v2803_v8, %v2528_v2  ;;  %v2537_v27 = vor.u32 %v2804_v18, %v2536_v17  ;;  %v2540_v18 = vld [vmem:[%s3226_s18 + $0x240] sm:$0xf] }
 0x190   : > { %v1505_v48 = vpop.f32.mrf.mxu2  ;;  %v1169_v55 = vpop.f32.mrf.mxu0 }
 0x191   : > { %v3616_v53 = vadd.f32 %v1505_v48, %v1337_v26  ;;  %v1170_v58 = vadd.f32 %v3328_v56, %v1169_v55  ;;  %v1338_v63 = vpop.f32.mrf.mxu1  ;;  %v2533_v26 = vor.u32 %v2802_v4, %v2530_v16 }
 0x193   : > { %4698 = vst [vmem:[#allocation29_spill] sm:$0xff] %v3616_v53  ;;  %v1339_v31 = vadd.f32 %v1338_v63, %v1170_v58 }
 0x196   : > { %v1562_v32 = vpop.f32.mrf.mxu3 }
 0x197   : > { %v3626_v34 = vadd.f32 %v1562_v32, %v3482_v13  ;;  %v2806_v32 = vld [vmem:[%s3226_s18 + $0x248] sm:$0xf0] }
 0x198   : > { %v1507_v51 = vpop.f32.mrf.mxu2  ;;  %v1172_v44 = vpop.f32.mrf.mxu0 }
 0x199   : > { %v3628_v40 = vadd.f32 %v1507_v51, %v1339_v31  ;;  %v1173_v48 = vadd.f32 %v3328_v56, %v1172_v44  ;;  %v1341_v55 = vpop.f32.mrf.mxu1  ;;  %v2805_v51 = vld [vmem:[%s3226_s18 + $0x244] sm:$0xf]  ;;  %v2542_v44 = vld [vmem:[%s3226_s18 + $0x24c] sm:$0xf0] }
 0x19b   : > { %4699 = vst [vmem:[#allocation30_spill] sm:$0xff] %v3628_v40  ;;  %v1342_v58 = vadd.f32 %v1341_v55, %v1173_v48  ;;  %1211 = vmatmul.bf16.gmra.mxu0 %v2529_v47  ;;  %v2548_v47 = vld [vmem:[%s3226_s18 + $0x248] sm:$0xf]  ;;  %v2807_v48 = vld [vmem:[%s3226_s18 + $0x250] sm:$0xf0] }
 0x19c   : > { %1380 = vmatmul.bf16.gmra.mxu1 %v2533_v26 }
 0x19d   : > { %1549 = vmatmul.bf16.gmra.mxu2 %v2537_v27  ;;  %v2541_v27 = vor.u32 %v2806_v32, %v2540_v18  ;;  %v3651_v18 = vld [vmem:[%s4638_s2] ss:$0 sm:$0xff] }
 0x19e   : > { %v1565_v13 = vpop.f32.mrf.mxu3 }
 0x19f   : > { %v3632_v31 = vadd.f32 %v1565_v13, %v3489_v39  ;;  %v2545_v39 = vor.u32 %v2805_v51, %v2542_v44  ;;  %v2549_v13 = vor.u32 %v2807_v48, %v2548_v47 }
 0x1a0   : > { %v1510_v63 = vpop.f32.mrf.mxu2  ;;  %v1174_v8 = vpop.f32.mrf.mxu0 }
 0x1a1   : > { %v3634_v2 = vadd.f32 %v1510_v63, %v1342_v58  ;;  %v1175_v4 = vadd.f32 %v3328_v56, %v1174_v8  ;;  %v1343_v16 = vpop.f32.mrf.mxu1 }
 0x1a3   : > { %4700 = vst [vmem:[#allocation31_spill] sm:$0xff] %v3634_v2  ;;  %v1344_v17 = vadd.f32 %v1343_v16, %v1175_v4 }
 0x1a8   : > { %v1512_v26 = vpop.f32.mrf.mxu2  ;;  %v1177_v45 = vpop.f32.mrf.mxu0 }
 0x1a9   : > { %v3643_v55 = vadd.f32 %v1512_v26, %v1344_v17  ;;  %v1178_v58 = vadd.f32 %v3328_v56, %v1177_v45  ;;  %v1346_v63 = vpop.f32.mrf.mxu1 }
 0x1ab   : > { %4701 = vst [vmem:[#allocation32_spill] sm:$0xff] %v3643_v55  ;;  %v1347_v43 = vadd.f32 %v1346_v63, %v1178_v58  ;;  %1216 = vmatmul.bf16.gmra.mxu0 %v2541_v27 }
 0x1ac   : > { %1385 = vmatmul.bf16.gmra.mxu1 %v2545_v39 }
 0x1ad   : > { %1554 = vmatmul.bf16.gmra.mxu2 %v2549_v13 }
 0x1b0   : > { %v1515_v8 = vpop.f32.mrf.mxu2  ;;  %v1179_v16 = vpop.f32.mrf.mxu0 }
 0x1b1   : > { %v3646_v4 = vadd.f32 %v1515_v8, %v1347_v43  ;;  %v1180_v17 = vadd.f32 %v3651_v18, %v1179_v16  ;;  %v1348_v32 = vpop.f32.mrf.mxu1 }
 0x1b3   : > { %4702 = vst [vmem:[#allocation33_spill] sm:$0xff] %v3646_v4  ;;  %v1349_v51 = vadd.f32 %v1348_v32, %v1180_v17 }
 0x1b8   : > { %v1517_v44 = vpop.f32.mrf.mxu2  ;;  %v1182_v45 = vpop.f32.mrf.mxu0 }
 0x1b9   : > { %v3654_v56 = vadd.f32 %v1517_v44, %v1349_v51  ;;  %v1183_v47 = vadd.f32 %v3651_v18, %v1182_v45  ;;  %v1351_v48 = vpop.f32.mrf.mxu1 }
 0x1bb   : > { %4703 = vst [vmem:[#allocation34_spill] sm:$0xff] %v3654_v56  ;;  %v1352_v26 = vadd.f32 %v1351_v48, %v1183_v47 }
 0x1c0   : > { %v1520_v43 = vpop.f32.mrf.mxu2  ;;  %v1184_v39 = vpop.f32.mrf.mxu0 }
 0x1c1   : > { %v3657_v27 = vadd.f32 %v1520_v43, %v1352_v26  ;;  %v1185_v13 = vadd.f32 %v3651_v18, %v1184_v39  ;;  %v1353_v58 = vpop.f32.mrf.mxu1  ;;  %v1665_v39 = vmul.f32 %v3354_v28, %v3354_v28 }
 0x1c3   : > { %v1354_v63 = vadd.f32 %v1353_v58, %v1185_v13  ;;  %v1664_v58 = vmul.f32 %v3341_v11, %v3341_v11 }
 0x1c8   : > { %v1522_v8 = vpop.f32.mrf.mxu2  ;;  %v1187_v17 = vpop.f32.mrf.mxu0 }
 0x1c9   : > { %v3660_v16 = vadd.f32 %v1522_v8, %v1354_v63  ;;  %v1188_v32 = vadd.f32 %v3651_v18, %v1187_v17  ;;  %v1356_v51 = vpop.f32.mrf.mxu1  ;;  %v1595_v63 = vadd.f32 %v3354_v28, %v3341_v11  ;;  %v1666_v8 = vmul.f32 %v3359_v37, %v3359_v37 }
 0x1ca   : > { %v1668_v28 = vmul.f32 %v3377_v0, %v3377_v0 }
 0x1cb   : > { %v1357_v44 = vadd.f32 %v1356_v51, %v1188_v32 }
 0x1d0   : > { %v1525_v7 = vpop.f32.mrf.mxu2  ;;  %v1189_v47 = vpop.f32.mrf.mxu0 }
 0x1d1   : > { %v3663_v45 = vadd.f32 %v1525_v7, %v1357_v44  ;;  %v1190_v48 = vadd.f32 %v3651_v18, %v1189_v47  ;;  %v1358_v26 = vpop.f32.mrf.mxu1  ;;  %v1728_v44 = vadd.f32 %v1665_v39, %v1664_v58  ;;  %v1596_v47 = vadd.f32 %v1595_v63, %v3359_v37  ;;  %v1813_v39 = vld [vmem:[%s4641_s5 + $0x70] sm:$0xff] }
 0x1d2   : > { %v1669_v63 = vmul.f32 %v3390_v19, %v3390_v19 }
 0x1d3   : > { %v1359_v43 = vadd.f32 %v1358_v26, %v1190_v48  ;;  %v1667_v48 = vmul.f32 %v3372_v54, %v3372_v54  ;;  %v1729_v38 = vadd.f32 %v1728_v44, %v1666_v8  ;;  %v1597_v1 = vadd.f32 %v1596_v47, %v3372_v54 }
 0x1d5   : > { %v1598_v58 = vadd.f32 %v1597_v1, %v3377_v0 }
 0x1d8   : > { %v1527_v13 = vpop.f32.mrf.mxu2  ;;  %v1192_v17 = vpop.f32.mrf.mxu0 }
 0x1d9   : > { %v3674_v7 = vadd.f32 %v1527_v13, %v1359_v43  ;;  %v1193_v32 = vadd.f32 %v3651_v18, %v1192_v17  ;;  %v1361_v51 = vpop.f32.mrf.mxu1  ;;  %v1814_v43 = vld [vmem:[%s4641_s5 + $0x78] sm:$0xff]  ;;  %v1730_v13 = vadd.f32 %v1729_v38, %v1667_v48  ;;  %v1671_v48 = vmul.f32 %v3408_v49, %v3408_v49 }
 0x1da   : > { %1815 = vmatpush.msrb.mxu3 %v1814_v43 }
 0x1db   : > { %v1362_v26 = vadd.f32 %v1361_v51, %v1193_v32  ;;  %v1731_v17 = vadd.f32 %v1730_v13, %v1668_v28  ;;  %v1599_v32 = vadd.f32 %v1598_v58, %v3390_v19  ;;  %v1670_v51 = vmul.f32 %v3395_v30, %v3395_v30 }
 0x1dc   : > { %1816 = vmatpush.msrb.mxu3 %v1813_v39  ;;  %v1672_v39 = vmul.f32 %v3413_v61, %v3413_v61 }
 0x1dd   : > { %v1732_v38 = vadd.f32 %v1731_v17, %v1669_v63  ;;  %v1600_v1 = vadd.f32 %v1599_v32, %v3395_v30  ;;  %v1673_v63 = vmul.f32 %v3426_v20, %v3426_v20 }
 0x1df   : > { %v1733_v43 = vadd.f32 %v1732_v38, %v1670_v51  ;;  %v1601_v28 = vadd.f32 %v1600_v1, %v3408_v49  ;;  %v1674_v51 = vmul.f32 %v3431_v33, %v3431_v33 }
 0x1e0   : > { %v1530_v8 = vpop.f32.mrf.mxu2  ;;  %v3697_v47 = vpop.f32.mrf.mxu0 }
 0x1e1   : > { %v3695_v44 = vadd.f32 %v1530_v8, %v1362_v26  ;;  %v3699_v54 = vpop.f32.mrf.mxu1  ;;  %v1812_v26 = vld [vmem:[%s4641_s5 + $0x68] sm:$0xff]  ;;  %v1734_v13 = vadd.f32 %v1733_v43, %v1671_v48  ;;  %v1602_v58 = vadd.f32 %v1601_v28, %v3413_v61  ;;  %v1675_v43 = vmul.f32 %v3444_v57, %v3444_v57  ;;  %v3725_v28 = vpop.f32.mrf.mxu3 }
 0x1e2   : > { %1817 = vmatpush.msrb.mxu3 %v1812_v26 }
 0x1e3   : > { %v1735_v17 = vadd.f32 %v1734_v13, %v1672_v39  ;;  %v1603_v32 = vadd.f32 %v1602_v58, %v3426_v20  ;;  %v1676_v13 = vmul.f32 %v3449_v6, %v3449_v6  ;;  %v1811_v58 = vld [vmem:[%s4641_s5 + $0x60] sm:$0xff] }
 0x1e4   : > { %1818 = vmatpush.msrb.mxu3 %v1811_v58 }
 0x1e5   : > { %v1736_v49 = vadd.f32 %v1735_v17, %v1673_v63  ;;  %v1604_v48 = vadd.f32 %v1603_v32, %v3431_v33  ;;  %v1677_v17 = vmul.f32 %v3462_v36, %v3462_v36 }
 0x1e7   : > { %v1737_v26 = vadd.f32 %v1736_v49, %v1674_v51  ;;  %v1605_v39 = vadd.f32 %v1604_v48, %v3444_v57  ;;  %v1678_v51 = vmul.f32 %v3469_v52, %v3469_v52 }
 0x1e8   : > { %v3713_v8 = vpop.f32.mrf.mxu2  ;;  %v3718_v38 = vpop.f32.mrf.mxu0 }
 0x1e9   : > { %v3720_v1 = vpop.f32.mrf.mxu1  ;;  %v1738_v20 = vadd.f32 %v1737_v26, %v1675_v43  ;;  %v1606_v63 = vadd.f32 %v1605_v39, %v3449_v6  ;;  %v1679_v26 = vmul.f32 %v3484_v21, %v3484_v21 }
 0x1eb   : > { %v1739_v33 = vadd.f32 %v1738_v20, %v1676_v13  ;;  %v1607_v49 = vadd.f32 %v1606_v63, %v3462_v36  ;;  %v1680_v20 = vmul.f32 %v3491_v41, %v3491_v41  ;;  %v1810_v13 = vld [vmem:[%s4641_s5 + $0x58] sm:$0xff]  ;;  %v3754_v63 = vpop.f32.mrf.mxu3 }
 0x1ec   : > { %1819 = vmatpush.msrb.mxu3 %v1810_v13 }
 0x1ed   : > { %v1740_v61 = vadd.f32 %v1739_v33, %v1677_v17  ;;  %v1608_v43 = vadd.f32 %v1607_v49, %v3469_v52  ;;  %v1681_v17 = vmul.f32 %v3506_v10, %v3506_v10 }
 0x1ef   : > { %v1741_v39 = vadd.f32 %v1740_v61, %v1678_v51  ;;  %v1609_v58 = vadd.f32 %v1608_v43, %v3484_v21  ;;  %v1682_v43 = vmul.f32 %v3511_v29, %v3511_v29 }
 0x1f0   : > { %v3736_v32 = vpop.f32.mrf.mxu2  ;;  %v3741_v48 = vpop.f32.mrf.mxu0 }
 0x1f1   : > { %v3743_v57 = vpop.f32.mrf.mxu1  ;;  %v1742_v36 = vadd.f32 %v1741_v39, %v1679_v26  ;;  %v1610_v33 = vadd.f32 %v1609_v58, %v3491_v41  ;;  %v1683_v39 = vmul.f32 %v3526_v3, %v3526_v3 }
 0x1f3   : > { %v1743_v61 = vadd.f32 %v1742_v36, %v1680_v20  ;;  %v1611_v51 = vadd.f32 %v1610_v33, %v3506_v10  ;;  %v1684_v36 = vmul.f32 %v3533_v23, %v3533_v23  ;;  %v1809_v20 = vld [vmem:[%s4641_s5 + $0x50] sm:$0xff] }
 0x1f4   : > { %1820 = vmatpush.msrb.mxu3 %v1809_v20 }
 0x1f5   : > { %v1744_v6 = vadd.f32 %v1743_v61, %v1681_v17  ;;  %v1612_v26 = vadd.f32 %v1611_v51, %v3511_v29  ;;  %v1685_v17 = vmul.f32 %v3548_v9, %v3548_v9  ;;  %v3780_v61 = vpop.f32.mrf.mxu3 }
 0x1f7   : > { %v1745_v58 = vadd.f32 %v1744_v6, %v1682_v43  ;;  %v1613_v13 = vadd.f32 %v1612_v26, %v3526_v3  ;;  %v1686_v26 = vmul.f32 %v3555_v25, %v3555_v25 }
 0x1f8   : > { %v3759_v49 = vpop.f32.mrf.mxu2  ;;  %v3764_v21 = vpop.f32.mrf.mxu0 }
 0x1f9   : > { %v3766_v52 = vpop.f32.mrf.mxu1  ;;  %v1746_v33 = vadd.f32 %v1745_v58, %v1683_v39  ;;  %v1614_v10 = vadd.f32 %v1613_v13, %v3533_v23  ;;  %v1687_v13 = vmul.f32 %v3570_v12, %v3570_v12 }
 0x1fb   : > { %v1747_v6 = vadd.f32 %v1746_v33, %v1684_v36  ;;  %v1615_v43 = vadd.f32 %v1614_v10, %v3548_v9  ;;  %v1688_v36 = vmul.f32 %v3577_v42, %v3577_v42  ;;  %v1808_v10 = vld [vmem:[%s4641_s5 + $0x48] sm:$0xff] }
 0x1fc   : > { %1821 = vmatpush.msrb.mxu3 %v1808_v10 }
 0x1fd   : > { %v1748_v39 = vadd.f32 %v1747_v6, %v1685_v17  ;;  %v1616_v58 = vadd.f32 %v1615_v43, %v3555_v25  ;;  %v1689_v17 = vmul.f32 %v3590_v15, %v3590_v15 }
 0x1ff   : > { %v1749_v20 = vadd.f32 %v1748_v39, %v1686_v26  ;;  %v1617_v23 = vadd.f32 %v1616_v58, %v3570_v12  ;;  %v1690_v39 = vmul.f32 %v3597_v46, %v3597_v46  ;;  %v3810_v12 = vpop.f32.mrf.mxu3 }
 0x200   : > { %v3782_v51 = vpop.f32.mrf.mxu2  ;;  %v3787_v3 = vpop.f32.mrf.mxu0 }
 0x201   : > { %v3789_v29 = vpop.f32.mrf.mxu1  ;;  %v1750_v33 = vadd.f32 %v1749_v20, %v1687_v13  ;;  %v1618_v9 = vadd.f32 %v1617_v23, %v3577_v42  ;;  %v1691_v20 = vmul.f32 %v3610_v14, %v3610_v14 }
 0x203   : > { %v1751_v43 = vadd.f32 %v1750_v33, %v1688_v36  ;;  %v1619_v26 = vadd.f32 %v1618_v9, %v3590_v15  ;;  %v1692_v9 = vmul.f32 %v3616_v53, %v3616_v53  ;;  %v1807_v33 = vld [vmem:[%s4641_s5 + $0x40] sm:$0xff] }
 0x204   : > { %1822 = vmatpush.msrb.mxu3 %v1807_v33 }
 0x205   : > { %v1752_v13 = vadd.f32 %v1751_v43, %v1689_v17  ;;  %v1620_v23 = vadd.f32 %v1619_v26, %v3597_v46  ;;  %v1693_v17 = vmul.f32 %v3628_v40, %v3628_v40 }
 0x207   : > { %v1753_v10 = vadd.f32 %v1752_v13, %v1690_v39  ;;  %v1621_v36 = vadd.f32 %v1620_v23, %v3610_v14  ;;  %v1694_v13 = vmul.f32 %v3634_v2, %v3634_v2 }
 0x208   : > { %v3803_v6 = vpop.f32.mrf.mxu2  ;;  %v3808_v58 = vpop.f32.mrf.mxu0 }
 0x209   : > { %v3812_v25 = vpop.f32.mrf.mxu1  ;;  %v1754_v15 = vadd.f32 %v1753_v10, %v1691_v20  ;;  %v1622_v42 = vadd.f32 %v1621_v36, %v3616_v53  ;;  %v1695_v20 = vmul.f32 %v3643_v55, %v3643_v55  ;;  %v3836_v10 = vpop.f32.mrf.mxu3 }
 0x20b   : > { %v1755_v26 = vadd.f32 %v1754_v15, %v1692_v9  ;;  %v1623_v39 = vadd.f32 %v1622_v42, %v3628_v40  ;;  %v1696_v42 = vmul.f32 %v3646_v4, %v3646_v4  ;;  %v1806_v15 = vld [vmem:[%s4641_s5 + $0x38] sm:$0xff]  ;;  %v1805_v9 = vld [vmem:[%s4641_s5 + $0x30] sm:$0xff] }
 0x20c   : > { %1823 = vmatpush.msrb.mxu3 %v1806_v15 }
 0x20d   : > { %v1756_v46 = vadd.f32 %v1755_v26, %v1693_v17  ;;  %v1624_v33 = vadd.f32 %v1623_v39, %v3634_v2  ;;  %v1198_v2 = vadd.f32 %v3651_v18, %v3718_v38 }
 0x20e   : > { %1824 = vmatpush.msrb.mxu3 %v1805_v9  ;;  %v1699_v9 = vmul.f32 %v3660_v16, %v3660_v16 }
 0x20f   : > { %v1757_v36 = vadd.f32 %v1756_v46, %v1694_v13  ;;  %v1625_v53 = vadd.f32 %v1624_v33, %v3643_v55  ;;  %v1697_v46 = vmul.f32 %v3654_v56, %v3654_v56  ;;  %v1698_v55 = vmul.f32 %v3657_v27, %v3657_v27 }
 0x210   : > { %v3826_v43 = vpop.f32.mrf.mxu2  ;;  %v1209_v23 = vpop.f32.mrf.mxu0 }
 0x211   : > { %v3831_v14 = vpop.f32.mrf.mxu1  ;;  %v1758_v17 = vadd.f32 %v1757_v36, %v1695_v20  ;;  %v1626_v26 = vadd.f32 %v1625_v53, %v3646_v4  ;;  %v1195_v20 = vadd.f32 %v3651_v18, %v3697_v47  ;;  %v3866_v38 = vpop.f32.mrf.mxu3  ;;  %v1200_v47 = vadd.f32 %v3651_v18, %v3741_v48 }
 0x213   : > { %v1759_v13 = vadd.f32 %v1758_v17, %v1696_v42  ;;  %v1627_v33 = vadd.f32 %v1626_v26, %v3654_v56  ;;  %v1700_v26 = vmul.f32 %v3663_v45, %v3663_v45  ;;  %v1367_v56 = vadd.f32 %v3720_v1, %v1198_v2 }
 0x214   : > { %v1364_v4 = vadd.f32 %v3699_v54, %v1195_v20  ;;  %v1702_v54 = vmul.f32 %v3695_v44, %v3695_v44  ;;  %v1369_v20 = vadd.f32 %v3743_v57, %v1200_v47 }
 0x215   : > { %v1760_v36 = vadd.f32 %v1759_v13, %v1697_v46  ;;  %v1628_v15 = vadd.f32 %v1627_v33, %v3657_v27  ;;  %v1203_v46 = vadd.f32 %v3651_v18, %v3764_v21  ;;  %v1701_v33 = vmul.f32 %v3674_v7, %v3674_v7 }
 0x216   : > { %v3883_v48 = vadd.f32 %v3736_v32, %v1367_v56  ;;  %v3895_v56 = vadd.f32 %v3759_v49, %v1369_v20 }
 0x217   : > { %v1761_v42 = vadd.f32 %v1760_v36, %v1698_v55  ;;  %v1629_v17 = vadd.f32 %v1628_v15, %v3660_v16  ;;  %v3877_v36 = vadd.f32 %v3713_v8, %v1364_v4  ;;  %v1208_v4 = vadd.f32 %v3651_v18, %v3808_v58 }
 0x218   : > { %v3850_v39 = vpop.f32.mrf.mxu2  ;;  %v1212_v40 = vpop.f32.mrf.mxu0 }
 0x219   : > { %v1381_v53 = vpop.f32.mrf.mxu1  ;;  %v1762_v13 = vadd.f32 %v1761_v42, %v1699_v9  ;;  %v1630_v55 = vadd.f32 %v1629_v17, %v3663_v45  ;;  %v1372_v9 = vadd.f32 %v3766_v52, %v1203_v46  ;;  %v1205_v42 = vadd.f32 %v3651_v18, %v3787_v3 }
 0x21a   : > { %v1704_v52 = vmul.f32 %v3883_v48, %v3883_v48  ;;  %v1377_v47 = vadd.f32 %v3812_v25, %v1208_v4  ;;  %v1210_v46 = vadd.f32 %v3651_v18, %v1209_v23 }
 0x21b   : > { %v1763_v1 = vadd.f32 %v1762_v13, %v1700_v26  ;;  %v1631_v15 = vadd.f32 %v1630_v55, %v3674_v7  ;;  %v1703_v13 = vmul.f32 %v3877_v36, %v3877_v36  ;;  %v3901_v3 = vadd.f32 %v3782_v51, %v1372_v9 }
 0x21c   : > { %v1374_v58 = vadd.f32 %v3789_v29, %v1205_v42  ;;  %v1213_v55 = vadd.f32 %v3651_v18, %v1212_v40  ;;  %v3919_v40 = vadd.f32 %v3826_v43, %v1377_v47  ;;  %v1379_v9 = vadd.f32 %v3831_v14, %v1210_v46  ;;  %v1804_v47 = vld [vmem:[%s4641_s5 + $0x28] sm:$0xff]  ;;  %v1803_v46 = vld [vmem:[%s4641_s5 + $0x20] sm:$0xff] }
 0x21d   : > { %v1764_v17 = vadd.f32 %v1763_v1, %v1701_v33  ;;  %v1632_v26 = vadd.f32 %v1631_v15, %v3695_v44  ;;  %v3907_v33 = vpop.f32.mrf.mxu3  ;;  %v1705_v15 = vmul.f32 %v3895_v56, %v3895_v56  ;;  %v1706_v23 = vmul.f32 %v3901_v3, %v3901_v3  ;;  %1825 = vmatpush.msrb.mxu3 %v1804_v47 }
 0x21e   : > { %v1382_v42 = vadd.f32 %v1381_v53, %v1213_v55  ;;  %v1708_v43 = vmul.f32 %v3919_v40, %v3919_v40 }
 0x21f   : > { %v1765_v32 = vadd.f32 %v1764_v17, %v1702_v54  ;;  %v1633_v57 = vadd.f32 %v1632_v26, %v3877_v36  ;;  %v3913_v54 = vadd.f32 %v3803_v6, %v1374_v58  ;;  %1826 = vmatpush.msrb.mxu3 %v1803_v46 }
 0x220   : > { %v1550_v2 = vpop.f32.mrf.mxu2  ;;  %v1214_v21 = vpop.f32.mrf.mxu0 }
 0x221   : > { %v1383_v8 = vpop.f32.mrf.mxu1  ;;  %v1766_v49 = vadd.f32 %v1765_v32, %v1703_v13  ;;  %v1634_v1 = vadd.f32 %v1633_v57, %v3883_v48  ;;  %v1215_v4 = vadd.f32 %v3651_v18, %v1214_v21  ;;  %v1707_v26 = vmul.f32 %v3913_v54, %v3913_v54 }
 0x222   : > { %v3928_v57 = vadd.f32 %v3850_v39, %v1379_v9  ;;  %v3933_v53 = vadd.f32 %v1550_v2, %v1382_v42 }
 0x223   : > { %v1767_v29 = vadd.f32 %v1766_v49, %v1704_v52  ;;  %v1635_v25 = vadd.f32 %v1634_v1, %v3895_v56  ;;  %v1384_v21 = vadd.f32 %v1383_v8, %v1215_v4 }
 0x224   : > { %v1709_v1 = vmul.f32 %v3928_v57, %v3928_v57 }
 0x225   : > { %v1768_v6 = vadd.f32 %v1767_v29, %v1705_v15  ;;  %v1636_v32 = vadd.f32 %v1635_v25, %v3901_v3  ;;  %v1802_v15 = vld [vmem:[%s4641_s5 + $0x18] sm:$0xff] }
 0x226   : > { %1827 = vmatpush.msrb.mxu3 %v1802_v15 }
 0x227   : > { %v1769_v52 = vadd.f32 %v1768_v6, %v1706_v23  ;;  %v1637_v14 = vadd.f32 %v1636_v32, %v3913_v54  ;;  %v1710_v23 = vmul.f32 %v3933_v53, %v3933_v53 }
 0x228   : > { %v1552_v51 = vpop.f32.mrf.mxu2  ;;  %v1217_v20 = vpop.f32.mrf.mxu0 }
 0x229   : > { %v1218_v17 = vadd.f32 %v3651_v18, %v1217_v20  ;;  %v1386_v13 = vpop.f32.mrf.mxu1  ;;  %v1770_v39 = vadd.f32 %v1769_v52, %v1707_v26  ;;  %v1638_v49 = vadd.f32 %v1637_v14, %v3919_v40  ;;  %v3944_v2 = vadd.f32 %v1552_v51, %v1384_v21  ;;  %v3949_v20 = vpop.f32.mrf.mxu3  ;;  %v1801_v51 = vld [vmem:[%s4641_s5 + $0x10] sm:$0xff]  ;;  %v1800_v26 = vld [vmem:[%s4641_s5 + $0x8] sm:$0xff]  ;;  %v1799_v21 = vld [vmem:[%s4641_s5] sm:$0xff] }
 0x22a   : > { %1828 = vmatpush.msrb.mxu3 %v1801_v51  ;;  %v1715_v51 = vmul.f32 %v3626_v34, %v3626_v34 }
 0x22b   : > { %v1387_v58 = vadd.f32 %v1386_v13, %v1218_v17  ;;  %v1771_v29 = vadd.f32 %v1770_v39, %v1708_v43  ;;  %v1639_v25 = vadd.f32 %v1638_v49, %v3928_v57  ;;  %v1711_v6 = vmul.f32 %v3944_v2, %v3944_v2 }
 0x22c   : > { %1829 = vmatpush.msrb.mxu3 %v1800_v26 }
 0x22d   : > { %v1772_v4 = vadd.f32 %v1771_v29, %v1709_v1  ;;  %v1640_v17 = vadd.f32 %v1639_v25, %v3933_v53  ;;  %v1714_v29 = vmul.f32 %v3614_v59, %v3614_v59 }
 0x22e   : > { %1830 = vmatpush.msrb.mxu3 %v1799_v21 }
 0x22f   : > { %v1773_v32 = vadd.f32 %v1772_v4, %v1710_v23  ;;  %v1641_v52 = vadd.f32 %v1640_v17, %v3944_v2  ;;  %v3988_v4 = vadd.f32 %v3725_v28, %v3504_v5 }
 0x230   : > { %v1555_v55 = vpop.f32.mrf.mxu2  ;;  %v1219_v8 = vpop.f32.mrf.mxu0 }
 0x231   : > { %v3954_v9 = vadd.f32 %v1555_v55, %v1387_v58  ;;  %v1220_v42 = vadd.f32 %v3651_v18, %v1219_v8  ;;  %v1388_v13 = vpop.f32.mrf.mxu1  ;;  %v1774_v47 = vadd.f32 %v1773_v32, %v1711_v6  ;;  %v1233_v8 = vadd.f32 %v3651_v18, %v3375_v62  ;;  %v1587_v15 = vpop.f32.mrf.mxu3 }
 0x232   : > { %v1716_v62 = vmul.f32 %v3632_v31, %v3632_v31  ;;  %v4001_v32 = vadd.f32 %v3780_v61, %v3524_v35  ;;  %v4015_v35 = vadd.f32 %v3836_v10, %v3546_v60 }
 0x233   : > { %v1712_v43 = vmul.f32 %v3954_v9, %v3954_v9  ;;  %v1389_v14 = vadd.f32 %v1388_v13, %v1220_v42  ;;  %v1642_v46 = vadd.f32 %v1641_v52, %v3954_v9  ;;  %v1402_v42 = vadd.f32 %v3509_v24, %v1233_v8 }
 0x234   : > { %v1717_v24 = vmul.f32 %v3988_v4, %v3988_v4 }
 0x235   : > { %v1775_v55 = vadd.f32 %v1774_v47, %v1712_v43  ;;  %v3994_v18 = vadd.f32 %v3754_v63, %v1402_v42  ;;  %v4008_v63 = vadd.f32 %v3810_v12, %v3531_v50  ;;  %v4022_v50 = vadd.f32 %v3866_v38, %v3553_v22 }
 0x237   : > { %v1718_v52 = vmul.f32 %v3994_v18, %v3994_v18 }
 0x238   : > { %v1557_v58 = vpop.f32.mrf.mxu2 }
 0x239   : > { %v3973_v39 = vadd.f32 %v1557_v58, %v1389_v14  ;;  %v1590_v21 = vpop.f32.mrf.mxu3  ;;  %v1719_v58 = vmul.f32 %v4001_v32, %v4001_v32 }
 0x23b   : > { %v1643_v49 = vadd.f32 %v1642_v46, %v3973_v39  ;;  %v1713_v1 = vmul.f32 %v3973_v39, %v3973_v39  ;;  %v1720_v46 = vmul.f32 %v4008_v63, %v4008_v63 }
 0x23d   : > { %v1644_v25 = vadd.f32 %v1643_v49, %v3614_v59  ;;  %v1776_v23 = vadd.f32 %v1775_v55, %v1713_v1  ;;  %v1721_v49 = vmul.f32 %v4015_v35, %v4015_v35  ;;  %v4704_v1 = vld [vmem:[#allocation19_spill] sm:$0xff] }
 0x23e   : > { %v4029_v60 = vadd.f32 %v3907_v33, %v4704_v1 }
 0x23f   : > { %v1645_v17 = vadd.f32 %v1644_v25, %v3626_v34  ;;  %v1777_v6 = vadd.f32 %v1776_v23, %v1714_v29  ;;  %v1722_v29 = vmul.f32 %v4022_v50, %v4022_v50  ;;  %v4705_v25 = vld [vmem:[#allocation21_spill] sm:$0xff] }
 0x240   : > { %v4036_v22 = vadd.f32 %v3949_v20, %v4705_v25  ;;  %v1723_v42 = vmul.f32 %v4029_v60, %v4029_v60 }
 0x241   : > { %v1646_v26 = vadd.f32 %v1645_v17, %v3632_v31  ;;  %v1778_v13 = vadd.f32 %v1777_v6, %v1715_v51  ;;  %v4706_v51 = vld [vmem:[#allocation23_spill] sm:$0xff] }
 0x242   : > { %v4042_v17 = vadd.f32 %v1587_v15, %v4706_v51 }
 0x243   : > { %v1647_v5 = vadd.f32 %v1646_v26, %v3988_v4  ;;  %v1779_v28 = vadd.f32 %v1778_v13, %v1716_v62  ;;  %v1592_v62 = vpop.f32.mrf.mxu3  ;;  %v1724_v26 = vmul.f32 %v4036_v22, %v4036_v22  ;;  %v4707_v13 = vld [vmem:[#allocation25_spill] sm:$0xff] }
 0x245   : > { %v1648_v43 = vadd.f32 %v1647_v5, %v3994_v18  ;;  %v1780_v14 = vadd.f32 %v1779_v28, %v1717_v24  ;;  %v4048_v24 = vadd.f32 %v1590_v21, %v4707_v13  ;;  %v1725_v28 = vmul.f32 %v4042_v17, %v4042_v17 }
 0x247   : > { %v1649_v61 = vadd.f32 %v1648_v43, %v4001_v32  ;;  %v1781_v47 = vadd.f32 %v1780_v14, %v1718_v52  ;;  %v4708_v52 = vld [vmem:[#allocation27_spill] sm:$0xff] }
 0x248   : > { %v4054_v43 = vadd.f32 %v1592_v62, %v4708_v52 }
 0x249   : > { %v1650_v12 = vadd.f32 %v1649_v61, %v4008_v63  ;;  %v1782_v55 = vadd.f32 %v1781_v47, %v1719_v58  ;;  %v1726_v58 = vmul.f32 %v4048_v24, %v4048_v24 }
 0x24a   : > { %v1727_v21 = vmul.f32 %v4054_v43, %v4054_v43 }
 0x24b   : > { %v1651_v10 = vadd.f32 %v1650_v12, %v4015_v35  ;;  %v1783_v8 = vadd.f32 %v1782_v55, %v1720_v46 }
 0x24d   : > { %v1652_v38 = vadd.f32 %v1651_v10, %v4022_v50  ;;  %v1784_v23 = vadd.f32 %v1783_v8, %v1721_v49 }
 0x24f   : > { %v1785_v33 = vadd.f32 %v1784_v23, %v1722_v29  ;;  %v1653_v6 = vadd.f32 %v1652_v38, %v4029_v60 }
 0x251   : > { %v1654_v20 = vadd.f32 %v1653_v6, %v4036_v22  ;;  %v1786_v5 = vadd.f32 %v1785_v33, %v1723_v42 }
 0x253   : > { %v1655_v15 = vadd.f32 %v1654_v20, %v4042_v17  ;;  %v1787_v14 = vadd.f32 %v1786_v5, %v1724_v26 }
 0x255   : > { %v1656_v61 = vadd.f32 %v1655_v15, %v4048_v24  ;;  %v1788_v47 = vadd.f32 %v1787_v14, %v1725_v28 }
 0x257   : > { %v1657_v46 = vadd.f32 %v1656_v61, %v4054_v43  ;;  %v1789_v12 = vadd.f32 %v1788_v47, %v1726_v58 }
 0x259   : > { %v1658_v55 = vrot.slane %v1657_v46, 4  ;;  %v1790_v49 = vadd.f32 %v1789_v12, %v1727_v21 }
 0x25b   : > { %v1659_v1 = vadd.f32 %v1658_v55, %v1657_v46  ;;  %v1791_v10 = vrot.slane %v1790_v49, 4  ;;  %v3078_v46 = vld [vmem:[%s4639_s3] ss:$0 sm:$0xff] }
 0x25d   : > { %v1660_v8 = vrot.slane %v1659_v1, 2  ;;  %v1792_v29 = vadd.f32 %v1791_v10, %v1790_v49 }
 0x25f   : > { %v1661_v25 = vadd.f32 %v1660_v8, %v1659_v1  ;;  %v1793_v38 = vrot.slane %v1792_v29, 2  ;;  %v1857_v8 = vld [vmem:[%s4640_s4] sm:$0x1] }
 0x261   : > { %v1662_v23 = vrot.slane %v1661_v25, 1  ;;  %v1794_v42 = vadd.f32 %v1793_v38, %v1792_v29 }
 0x263   : > { %v1795_v51 = vrot.slane %v1794_v42, 1  ;;  %v1663_v33 = vadd.f32 %v1662_v23, %v1661_v25  ;;  %v4709_v25 = vld [vmem:[#allocation2_spill] sm:$0xff] }
 0x265   : > { %v1796_v6 = vadd.f32 %v1795_v51, %v1794_v42  ;;  %v4710_v42 = vld [vmem:[#allocation3_spill] sm:$0xff] }
 0x267   : > { %v1798_v62 = vsel %vm1797_vm0, %v1663_v33, %v1796_v6 }
 0x268   : > { %1831 = vmatmul.f32.vlgmr.msrb.gmra.mxu3 %v1798_v62 }
 0x2eb   : > { %v1832_v26 = vpop.f32.mrf.mxu3 }
 0x2ec   : > { %v1835_v13 = vmul.f32 %v1832_v26, %v1832_v26 }
 0x2ee   : > { %v1837_v20 = vrot.slane %v1835_v13, 7  ;;  %v4712_v13 = vld [vmem:[#allocation5_spill] sm:$0xff] }
 0x2f0   : > { %v1839_v5 = vsub.f32 %v1832_v26, %v1837_v20 }
 0x2f2   : > { %v1840_v28 = vmax.f32 %v1839_v5, 0.0  ;;  %v4713_v5 = vld [vmem:[#allocation6_spill] sm:$0xff] }
 0x2f4   : > { %v1841_v52 = vadd.f32 1e-05, %v1840_v28  ;;  %v4714_v28 = vld [vmem:[#allocation7_spill] sm:$0xff] }
 0x2f6   : > { %3079 = vrsqrt.f32 %v1841_v52  ;;  %vm1848_vm2 = vweird.f32 %v1841_v52 }
 0x2fc   : > { %v3080_v15 = vpop.eup %3079 }
 0x2fd   : > { %v1843_v14 = vmul.f32 %v3080_v15, %v1841_v52  ;;  %vm1849_vm1 = vweird.f32 %v3080_v15  ;;  %v4715_v52 = vld [vmem:[#allocation8_spill] sm:$0xff] }
 0x2fe   : > { %vm1850_vm3 = vmor %vm1848_vm2, %vm1849_vm1 }
 0x2ff   : > { %v1844_v58 = vmul.f32 %v3080_v15, %v1843_v14 }
 0x301   : > { %v1845_v61 = vmul.f32 0.5, %v1844_v58  ;;  %v4717_v58 = vld [vmem:[#allocation10_spill] sm:$0xff] }
 0x303   : > { %v1846_v47 = vsub.f32 1.5, %v1845_v61 }
 0x305   : > { %v1847_v21 = vmul.f32 %v3080_v15, %v1846_v47  ;;  %v4718_v47 = vld [vmem:[#allocation11_spill] sm:$0xff] }
 0x307   : > { %v1851_v12 = vsel %vm1850_vm3, %v3080_v15, %v1847_v21  ;;  %v4716_v15 = vld [vmem:[#allocation9_spill] sm:$0xff] }
 0x308   : > { %v1856_v55 = vmul.f32 %v3078_v46, %v1851_v12  ;;  %v4719_v46 = vld [vmem:[#allocation12_spill] sm:$0xff] }
 0x30a   : > { %v1859_v49 = vrot.slane %v1856_v55, 1  ;;  %v4066_v1 = vperm.slane %v1856_v55, 1 }
 0x30c   : > { %v1861_v10 = vmul.f32 %v1859_v49, %v1832_v26  ;;  %v4073_v29 = vmul.f32 %v4066_v1, %v3341_v11  ;;  %v4077_v38 = vmul.f32 %v4066_v1, %v4709_v25  ;;  %v4081_v23 = vmul.f32 %v4066_v1, %v3359_v37  ;;  %v4711_v26 = vld [vmem:[#allocation4_spill] sm:$0xff]  ;;  %v4720_v49 = vld [vmem:[#allocation13_spill] sm:$0xff] }
 0x30d   : > { %v4085_v51 = vmul.f32 %v4066_v1, %v4710_v42  ;;  %v4089_v33 = vmul.f32 %v4066_v1, %v3377_v0  ;;  %v4093_v11 = vmul.f32 %v4066_v1, %v3390_v19  ;;  %v4097_v62 = vmul.f32 %v4066_v1, %v3395_v30  ;;  %v4722_v42 = vld [vmem:[#allocation15_spill] sm:$0xff] }
 0x30e   : > { %v1862_v6 = vsub.f32 %v1857_v8, %v1861_v10  ;;  %v4101_v37 = vmul.f32 %v4066_v1, %v4711_v26  ;;  %v4105_v20 = vmul.f32 %v4066_v1, %v4712_v13  ;;  %v4109_v0 = vmul.f32 %v4066_v1, %v4713_v5  ;;  %v4721_v8 = vld [vmem:[#allocation14_spill] sm:$0xff]  ;;  %v4723_v13 = vld [vmem:[#allocation16_spill] sm:$0xff] }
 0x30f   : > { %v4113_v19 = vmul.f32 %v4066_v1, %v4714_v28  ;;  %v4117_v30 = vmul.f32 %v4066_v1, %v4715_v52  ;;  %v4121_v14 = vmul.f32 %v4066_v1, %v4716_v15  ;;  %v4125_v61 = vmul.f32 %v4066_v1, %v4717_v58  ;;  %v4724_v28 = vld [vmem:[#allocation17_spill] sm:$0xff]  ;;  %v4726_v52 = vld [vmem:[#allocation18_spill] sm:$0xff]  ;;  %v4728_v58 = vld [vmem:[#allocation20_spill] sm:$0xff] }
 0x310   : > { %v4129_v21 = vmul.f32 %v4066_v1, %v4718_v47  ;;  %v4133_v12 = vmul.f32 %v4066_v1, %v4719_v46  ;;  %v4137_v55 = vmul.f32 %v4066_v1, %v3491_v41  ;;  %v4141_v10 = vmul.f32 %v4066_v1, %v4720_v49  ;;  %v4730_v46 = vld [vmem:[#allocation22_spill] sm:$0xff] }
 0x311   : > { %v4145_v25 = vmul.f32 %v4066_v1, %v4721_v8  ;;  %v4149_v26 = vmul.f32 %v4066_v1, %v4722_v42  ;;  %v4153_v5 = vmul.f32 %v4066_v1, %v4723_v13  ;;  %v4157_v41 = vmul.f32 %v4066_v1, %v4724_v28  ;;  %v4732_v8 = vld [vmem:[#allocation24_spill] sm:$0xff]  ;;  %v4734_v13 = vld [vmem:[#allocation26_spill] sm:$0xff] }
 0x312   : > { %v4161_v15 = vmul.f32 %v4066_v1, %v4726_v52  ;;  %v4165_v47 = vmul.f32 %v4066_v1, %v4728_v58  ;;  %v4169_v49 = vmul.f32 %v4066_v1, %v4730_v46  ;;  %v4173_v42 = vmul.f32 %v4066_v1, %v4732_v8 }
 0x313   : > { %4725 = vst [vmem:[#allocation19_spill] sm:$0xff] %v4157_v41  ;;  %v4177_v28 = vmul.f32 %v4066_v1, %v4734_v13  ;;  %v4736_v41 = vld [vmem:[#allocation28_spill] sm:$0xff] }
 0x314   : > { %4727 = vst [vmem:[#allocation21_spill] sm:$0xff] %v4161_v15  ;;  %v4181_v52 = vmul.f32 %v4066_v1, %v4736_v41  ;;  %v4738_v15 = vld [vmem:[#allocation29_spill] sm:$0xff] }
 0x315   : > { %4729 = vst [vmem:[#allocation23_spill] sm:$0xff] %v4165_v47  ;;  %v4185_v58 = vmul.f32 %v4066_v1, %v4738_v15  ;;  %v4739_v47 = vld [vmem:[#allocation30_spill] sm:$0xff] }
 0x316   : > { %4731 = vst [vmem:[#allocation25_spill] sm:$0xff] %v4169_v49  ;;  %v4189_v46 = vmul.f32 %v4066_v1, %v4739_v47  ;;  %v4740_v49 = vld [vmem:[#allocation31_spill] sm:$0xff]  ;;  %v4209_v47 = vmul.f32 %v4066_v1, %v3657_v27  ;;  %v4229_v27 = vmul.f32 %v4066_v1, %v3877_v36  ;;  %v4249_v36 = vmul.f32 %v4066_v1, %v3919_v40 }
 0x317   : > { %4733 = vst [vmem:[#allocation27_spill] sm:$0xff] %v4173_v42  ;;  %v4193_v8 = vmul.f32 %v4066_v1, %v4740_v49  ;;  %v4741_v42 = vld [vmem:[#allocation32_spill] sm:$0xff]  ;;  %v4213_v49 = vmul.f32 %v4066_v1, %v3660_v16  ;;  %v4233_v16 = vmul.f32 %v4066_v1, %v3883_v48  ;;  %v4253_v48 = vmul.f32 %v4066_v1, %v3928_v57 }
 0x318   : > { %4735 = vst [vmem:[#allocation2_spill] sm:$0xff] %v4177_v28  ;;  %v4197_v13 = vmul.f32 %v4066_v1, %v4741_v42  ;;  %v4742_v28 = vld [vmem:[#allocation33_spill] sm:$0xff]  ;;  %v4217_v42 = vmul.f32 %v4066_v1, %v3663_v45  ;;  %v4237_v45 = vmul.f32 %v4066_v1, %v3895_v56  ;;  %v4257_v56 = vmul.f32 %v4066_v1, %v3933_v53 }
 0x319   : > { %4737 = vst [vmem:[#allocation3_spill] sm:$0xff] %v4181_v52  ;;  %v4201_v41 = vmul.f32 %v4066_v1, %v4742_v28  ;;  %v4743_v52 = vld [vmem:[#allocation34_spill] sm:$0xff]  ;;  %v4221_v28 = vmul.f32 %v4066_v1, %v3674_v7  ;;  %v4241_v7 = vmul.f32 %v4066_v1, %v3901_v3  ;;  %v4261_v3 = vmul.f32 %v4066_v1, %v3944_v2 }
 0x31a   : > { %v4205_v15 = vmul.f32 %v4066_v1, %v4743_v52  ;;  %v4225_v52 = vmul.f32 %v4066_v1, %v3695_v44  ;;  %v4245_v44 = vmul.f32 %v4066_v1, %v3913_v54  ;;  %4744 = vst [vmem:[#allocation4_spill] sm:$0xff] %v4257_v56  ;;  %v4265_v54 = vmul.f32 %v4066_v1, %v3954_v9 }
 0x31b   : > { %v4269_v40 = vmul.f32 %v4066_v1, %v3973_v39  ;;  %v4273_v57 = vmul.f32 %v4066_v1, %v3614_v59  ;;  %v4277_v53 = vmul.f32 %v4066_v1, %v3626_v34  ;;  %v4279_v56 = vperm.slane %v1862_v6, 0 }
 0x31c   : > { %v4283_v2 = vmul.f32 %v4066_v1, %v3632_v31  ;;  %v4287_v9 = vmul.f32 %v4066_v1, %v3988_v4  ;;  %v4291_v39 = vmul.f32 %v4066_v1, %v3994_v18  ;;  %v4295_v59 = vmul.f32 %v4066_v1, %v4001_v32 }
 0x31d   : > { %v4299_v34 = vmul.f32 %v4066_v1, %v4008_v63  ;;  %v4303_v31 = vmul.f32 %v4066_v1, %v4015_v35  ;;  %v4307_v4 = vmul.f32 %v4066_v1, %v4022_v50  ;;  %v4311_v18 = vmul.f32 %v4066_v1, %v4029_v60 }
 0x31e   : > { %4745 = vst [vmem:[#allocation5_spill] sm:$0xff] %v4291_v39  ;;  %v4315_v32 = vmul.f32 %v4066_v1, %v4036_v22  ;;  %v4319_v63 = vmul.f32 %v4066_v1, %v4042_v17  ;;  %v4323_v35 = vmul.f32 %v4066_v1, %v4048_v24  ;;  %v4327_v50 = vmul.f32 %v4066_v1, %v4054_v43 }
 0x31f   : > { %4746 = vst [vmem:[#allocation6_spill] sm:$0xff] %v4295_v59  ;;  %v1931_v60 = vadd.f32 %v4279_v56, %v4073_v29  ;;  %v1932_v6 = vadd.f32 %v4279_v56, %v4077_v38  ;;  %v1933_v22 = vadd.f32 %v4279_v56, %v4081_v23  ;;  %v1934_v17 = vadd.f32 %v4279_v56, %v4085_v51 }
 0x320   : > { %4747 = vst [vmem:[#allocation7_spill] sm:$0xff] %v4299_v34  ;;  %v1935_v24 = vadd.f32 %v4279_v56, %v4089_v33  ;;  %v1937_v43 = vadd.f32 %v4279_v56, %v4097_v62  ;;  %v1938_v1 = vadd.f32 %v4279_v56, %v4101_v37  ;;  %v4347_v29 = vadd.f32 %v4279_v56, %v4105_v20 }
 0x321   : > { %4748 = vst [vmem:[#allocation8_spill] sm:$0xff] %v4303_v31  ;;  %v1940_v38 = vadd.f32 %v4279_v56, %v4109_v0  ;;  %v4353_v23 = vadd.f32 %v4279_v56, %v4113_v19  ;;  %v4357_v51 = vadd.f32 %v4279_v56, %v4117_v30  ;;  %v4361_v33 = vadd.f32 %v4279_v56, %v4121_v14 }
 0x322   : > { %4749 = vst [vmem:[#allocation9_spill] sm:$0xff] %v4307_v4  ;;  %v4369_v62 = vadd.f32 %v4279_v56, %v4129_v21  ;;  %v4373_v37 = vadd.f32 %v4279_v56, %v4133_v12  ;;  %v4377_v20 = vadd.f32 %v4279_v56, %v4137_v55  ;;  %v4381_v0 = vadd.f32 %v4279_v56, %v4141_v10  ;;  %v4756_v12 = vld [vmem:[#allocation21_spill] sm:$0xff]  ;;  %v4757_v10 = vld [vmem:[#allocation23_spill] sm:$0xff] }
 0x323   : > { %4750 = vst [vmem:[#allocation10_spill] sm:$0xff] %v4311_v18  ;;  %v4385_v19 = vadd.f32 %v4279_v56, %v4145_v25  ;;  %v4389_v30 = vadd.f32 %v4279_v56, %v4149_v26  ;;  %v4393_v14 = vadd.f32 %v4279_v56, %v4153_v5  ;;  %v4401_v55 = vadd.f32 %v4279_v56, %v4756_v12  ;;  %v4761_v18 = vld [vmem:[#allocation3_spill] sm:$0xff] }
 0x324   : > { %4751 = vst [vmem:[#allocation11_spill] sm:$0xff] %v4315_v32  ;;  %v4405_v25 = vadd.f32 %v4279_v56, %v4757_v10  ;;  %v4760_v32 = vld [vmem:[#allocation2_spill] sm:$0xff]  ;;  %v4421_v12 = vadd.f32 %v4279_v56, %v4761_v18  ;;  %v4425_v10 = vadd.f32 %v4279_v56, %v4185_v58  ;;  %v4441_v18 = vadd.f32 %v4279_v56, %v4201_v41 }
 0x325   : > { %4752 = vst [vmem:[#allocation12_spill] sm:$0xff] %v4319_v63  ;;  %v4759_v63 = vld [vmem:[#allocation27_spill] sm:$0xff]  ;;  %v4445_v58 = vadd.f32 %v4279_v56, %v4205_v15  ;;  %v4461_v41 = vadd.f32 %v4279_v56, %v4221_v28  ;;  %v1995_v4 = vmax.f32 %v1931_v60, 0.0  ;;  %v1996_v31 = vmax.f32 %v1932_v6, 0.0 }
 0x326   : > { %4753 = vst [vmem:[#allocation13_spill] sm:$0xff] %v4323_v35  ;;  %v1936_v35 = vadd.f32 %v4279_v56, %v4093_v11  ;;  %v4365_v11 = vadd.f32 %v4279_v56, %v4125_v61  ;;  %v4755_v61 = vld [vmem:[#allocation19_spill] sm:$0xff]  ;;  %v4413_v5 = vadd.f32 %v4279_v56, %v4759_v63  ;;  %v4433_v63 = vadd.f32 %v4279_v56, %v4193_v8 }
 0x327   : > { %4754 = vst [vmem:[#allocation14_spill] sm:$0xff] %v4327_v50  ;;  %v4397_v21 = vadd.f32 %v4279_v56, %v4755_v61  ;;  %v4758_v50 = vld [vmem:[#allocation25_spill] sm:$0xff]  ;;  %v4417_v61 = vadd.f32 %v4279_v56, %v4760_v32  ;;  %v4437_v32 = vadd.f32 %v4279_v56, %v4197_v13  ;;  %v4453_v8 = vadd.f32 %v4279_v56, %v4213_v49 }
 0x328   : > { %v4409_v26 = vadd.f32 %v4279_v56, %v4758_v50  ;;  %v4429_v50 = vadd.f32 %v4279_v56, %v4189_v46  ;;  %v4449_v46 = vadd.f32 %v4279_v56, %v4209_v47  ;;  %v4457_v13 = vadd.f32 %v4279_v56, %v4217_v42 }
 0x329   : > { %v1997_v15 = vmax.f32 %v1933_v22, 0.0  ;;  %v1998_v34 = vmax.f32 %v1934_v17, 0.0  ;;  %v1999_v59 = vmax.f32 %v1935_v24, 0.0  ;;  %v2000_v47 = vmax.f32 %v1936_v35, 0.0 }
 0x32a   : > { %4762 = vst [vmem:[#allocation15_spill] sm:$0xff] %v4457_v13  ;;  %v4466_v39 = vadd.f32 %v4279_v56, %v4225_v52  ;;  %v4470_v49 = vadd.f32 %v4279_v56, %v4229_v27  ;;  %v2001_v42 = vmax.f32 %v1937_v43, 0.0  ;;  %v2002_v13 = vmax.f32 %v1938_v1, 0.0 }
 0x32b   : > { %v4474_v28 = vadd.f32 %v4279_v56, %v4233_v16  ;;  %v4478_v60 = vadd.f32 %v4279_v56, %v4237_v45  ;;  %v2003_v35 = vmax.f32 %v4347_v29, 0.0  ;;  %v2004_v6 = vmax.f32 %v1940_v38, 0.0 }
 0x32c   : > { %v4488_v52 = vadd.f32 %v4279_v56, %v4241_v7  ;;  %v2005_v27 = vmax.f32 %v4353_v23, 0.0  ;;  %v2006_v16 = vmax.f32 %v4357_v51, 0.0  ;;  %v2007_v45 = vmax.f32 %v4361_v33, 0.0 }
 0x32d   : > { %v2008_v22 = vmax.f32 %v4365_v11, 0.0  ;;  %v2856_v17 = vpack.c.bf16 %v1996_v31, %v1995_v4  ;;  %v2861_v24 = vpack.c.bf16 %v1998_v34, %v1997_v15  ;;  %v2866_v43 = vpack.c.bf16 %v2000_v47, %v1999_v59 }
 0x32e   : > { %v4496_v1 = vadd.f32 %v4279_v56, %v4245_v44  ;;  %v2009_v29 = vmax.f32 %v4369_v62, 0.0  ;;  %v2010_v7 = vmax.f32 %v4373_v37, 0.0  ;;  %v2871_v38 = vpack.c.bf16 %v2002_v13, %v2001_v42 }
 0x32f   : > { %v4502_v23 = vadd.f32 %v4279_v56, %v4249_v36  ;;  %v2011_v51 = vmax.f32 %v4377_v20, 0.0  ;;  %v2012_v31 = vmax.f32 %v4381_v0, 0.0  ;;  %2857 = vst [vmem:[%s4484_s29] sm:$0xff] %v2856_v17   ;;  %v2876_v59 = vpack.c.bf16 %v2004_v6, %v2003_v35  ;;  %v4763_v36 = vld [vmem:[#allocation4_spill] sm:$0xff] }
 0x330   : > { %v4509_v44 = vadd.f32 %v4279_v56, %v4253_v48  ;;  %v2013_v34 = vmax.f32 %v4385_v19, 0.0  ;;  %v2014_v4 = vmax.f32 %v4389_v30, 0.0  ;;  %3013 = vst [vmem:[%s4484_s29 + $0x8] sm:$0xff] %v2861_v24   ;;  %v2881_v33 = vpack.c.bf16 %v2006_v16, %v2005_v27 }
 0x331   : > { %v4516_v11 = vadd.f32 %v4279_v56, %v4763_v36  ;;  %v2015_v62 = vmax.f32 %v4393_v14, 0.0  ;;  %v2016_v37 = vmax.f32 %v4397_v21, 0.0  ;;  %3014 = vst [vmem:[%s4484_s29 + $0x10] sm:$0xff] %v2866_v43   ;;  %v2886_v20 = vpack.c.bf16 %v2008_v22, %v2007_v45  ;;  %v4767_v43 = vld [vmem:[#allocation7_spill] sm:$0xff]  ;;  %v4770_v36 = vld [vmem:[#allocation10_spill] sm:$0xff] }
 0x332   : > { %v4523_v48 = vadd.f32 %v4279_v56, %v4261_v3  ;;  %v2017_v0 = vmax.f32 %v4401_v55, 0.0  ;;  %v2018_v19 = vmax.f32 %v4405_v25, 0.0  ;;  %3015 = vst [vmem:[%s4484_s29 + $0x18] sm:$0xff] %v2871_v38   ;;  %v2891_v30 = vpack.c.bf16 %v2010_v7, %v2009_v29 }
 0x333   : > { %v4530_v13 = vadd.f32 %v4279_v56, %v4265_v54  ;;  %v2019_v14 = vmax.f32 %v4409_v26, 0.0  ;;  %v2020_v21 = vmax.f32 %v4413_v5, 0.0  ;;  %3016 = vst [vmem:[%s4484_s29 + $0x20] sm:$0xff] %v2876_v59   ;;  %v2896_v15 = vpack.c.bf16 %v2012_v31, %v2011_v51  ;;  %v4768_v51 = vld [vmem:[#allocation8_spill] sm:$0xff] }
 0x334   : > { %v4537_v3 = vadd.f32 %v4279_v56, %v4269_v40  ;;  %v2021_v55 = vmax.f32 %v4417_v61, 0.0  ;;  %v2022_v25 = vmax.f32 %v4421_v12, 0.0  ;;  %3017 = vst [vmem:[%s4484_s29 + $0x28] sm:$0xff] %v2881_v33   ;;  %v2901_v47 = vpack.c.bf16 %v2014_v4, %v2013_v34  ;;  %v4769_v34 = vld [vmem:[#allocation9_spill] sm:$0xff] }
 0x335   : > { %v4544_v54 = vadd.f32 %v4279_v56, %v4273_v57  ;;  %v2023_v26 = vmax.f32 %v4425_v10, 0.0  ;;  %v2024_v5 = vmax.f32 %v4429_v50, 0.0  ;;  %3018 = vst [vmem:[%s4484_s29 + $0x30] sm:$0xff] %v2886_v20   ;;  %v2906_v42 = vpack.c.bf16 %v2016_v37, %v2015_v62  ;;  %v4771_v20 = vld [vmem:[#allocation11_spill] sm:$0xff] }
 0x336   : > { %v4551_v40 = vadd.f32 %v4279_v56, %v4277_v53  ;;  %v2025_v61 = vmax.f32 %v4433_v63, 0.0  ;;  %v2026_v12 = vmax.f32 %v4437_v32, 0.0  ;;  %3019 = vst [vmem:[%s4484_s29 + $0x38] sm:$0xff] %v2891_v30   ;;  %v2911_v35 = vpack.c.bf16 %v2018_v19, %v2017_v0  ;;  %v4772_v30 = vld [vmem:[#allocation12_spill] sm:$0xff] }
 0x337   : > { %v4558_v57 = vadd.f32 %v4279_v56, %v4283_v2  ;;  %v2027_v10 = vmax.f32 %v4441_v18, 0.0  ;;  %v2028_v50 = vmax.f32 %v4445_v58, 0.0  ;;  %3020 = vst [vmem:[%s4484_s29 + $0x40] sm:$0xff] %v2896_v15   ;;  %v2916_v6 = vpack.c.bf16 %v2020_v21, %v2019_v14  ;;  %v4764_v2 = vld [vmem:[#allocation5_spill] sm:$0xff]  ;;  %v4765_v18 = vld [vmem:[#allocation15_spill] sm:$0xff] }
 0x338   : > { %v4565_v53 = vadd.f32 %v4279_v56, %v4287_v9  ;;  %v2029_v63 = vmax.f32 %v4449_v46, 0.0  ;;  %v2030_v32 = vmax.f32 %v4453_v8, 0.0  ;;  %3021 = vst [vmem:[%s4484_s29 + $0x48] sm:$0xff] %v2901_v47   ;;  %v2921_v27 = vpack.c.bf16 %v2022_v25, %v2021_v55  ;;  %v4766_v9 = vld [vmem:[#allocation6_spill] sm:$0xff]  ;;  %v4773_v15 = vld [vmem:[#allocation13_spill] sm:$0xff] }
 0x339   : > { %v4572_v16 = vadd.f32 %v4279_v56, %v4764_v2  ;;  %v2031_v58 = vmax.f32 %v4765_v18, 0.0  ;;  %v2032_v45 = vmax.f32 %v4461_v41, 0.0  ;;  %3022 = vst [vmem:[%s4484_s29 + $0x50] sm:$0xff] %v2906_v42   ;;  %v2926_v22 = vpack.c.bf16 %v2024_v5, %v2023_v26  ;;  %v4774_v47 = vld [vmem:[#allocation14_spill] sm:$0xff] }
 0x33a   : > { %v1986_v17 = vadd.f32 %v4279_v56, %v4766_v9  ;;  %v2033_v46 = vmax.f32 %v4466_v39, 0.0  ;;  %v2034_v8 = vmax.f32 %v4470_v49, 0.0  ;;  %3023 = vst [vmem:[%s4484_s29 + $0x58] sm:$0xff] %v2911_v35   ;;  %v2931_v24 = vpack.c.bf16 %v2026_v12, %v2025_v61 }
 0x33b   : > { %v1987_v29 = vadd.f32 %v4279_v56, %v4767_v43  ;;  %v2035_v7 = vmax.f32 %v4474_v28, 0.0  ;;  %v2036_v41 = vmax.f32 %v4478_v60, 0.0  ;;  %3024 = vst [vmem:[%s4484_s29 + $0x60] sm:$0xff] %v2916_v6   ;;  %v2936_v38 = vpack.c.bf16 %v2028_v50, %v2027_v10 }
 0x33c   : > { %v1988_v31 = vadd.f32 %v4279_v56, %v4768_v51  ;;  %v2037_v39 = vmax.f32 %v4488_v52, 0.0  ;;  %v2038_v49 = vmax.f32 %v4496_v1, 0.0  ;;  %3025 = vst [vmem:[%s4484_s29 + $0x68] sm:$0xff] %v2921_v27   ;;  %v2941_v59 = vpack.c.bf16 %v2030_v32, %v2029_v63 }
 0x33d   : > { %v1989_v4 = vadd.f32 %v4279_v56, %v4769_v34  ;;  %v2039_v28 = vmax.f32 %v4502_v23, 0.0  ;;  %v2040_v60 = vmax.f32 %v4509_v44, 0.0  ;;  %3026 = vst [vmem:[%s4484_s29 + $0x70] sm:$0xff] %v2926_v22   ;;  %v2946_v33 = vpack.c.bf16 %v2032_v45, %v2031_v58 }
 0x33e   : > { %v1990_v62 = vadd.f32 %v4279_v56, %v4770_v36  ;;  %v2041_v52 = vmax.f32 %v4516_v11, 0.0  ;;  %v2042_v1 = vmax.f32 %v4523_v48, 0.0  ;;  %3027 = vst [vmem:[%s4484_s29 + $0x78] sm:$0xff] %v2931_v24   ;;  %v2951_v37 = vpack.c.bf16 %v2034_v8, %v2033_v46 }
 0x33f   : > { %v1991_v0 = vadd.f32 %v4279_v56, %v4771_v20  ;;  %v2043_v23 = vmax.f32 %v4530_v13, 0.0  ;;  %v2044_v44 = vmax.f32 %v4537_v3, 0.0  ;;  %3028 = vst [vmem:[%s4484_s29 + $0x80] sm:$0xff] %v2936_v38   ;;  %v2956_v19 = vpack.c.bf16 %v2036_v41, %v2035_v7 }
 0x340   : > { %v1992_v14 = vadd.f32 %v4279_v56, %v4772_v30  ;;  %v2045_v11 = vmax.f32 %v4544_v54, 0.0  ;;  %v2046_v48 = vmax.f32 %v4551_v40, 0.0  ;;  %3029 = vst [vmem:[%s4484_s29 + $0x88] sm:$0xff] %v2941_v59   ;;  %v2961_v21 = vpack.c.bf16 %v2038_v49, %v2037_v39 }
 0x341   : > { %v1993_v55 = vadd.f32 %v4279_v56, %v4773_v15  ;;  %v2047_v13 = vmax.f32 %v4558_v57, 0.0  ;;  %v2048_v3 = vmax.f32 %v4565_v53, 0.0  ;;  %3030 = vst [vmem:[%s4484_s29 + $0x90] sm:$0xff] %v2946_v33   ;;  %v2966_v25 = vpack.c.bf16 %v2040_v60, %v2039_v28 }
 0x342   : > { %v1994_v26 = vadd.f32 %v4279_v56, %v4774_v47  ;;  %v2049_v54 = vmax.f32 %v4572_v16, 0.0  ;;  %v2050_v5 = vmax.f32 %v1986_v17, 0.0  ;;  %3031 = vst [vmem:[%s4484_s29 + $0x98] sm:$0xff] %v2951_v37   ;;  %v2971_v42 = vpack.c.bf16 %v2042_v1, %v2041_v52 }
 0x343   : > { %v2051_v40 = vmax.f32 %v1987_v29, 0.0  ;;  %v2052_v61 = vmax.f32 %v1988_v31, 0.0  ;;  %3032 = vst [vmem:[%s4484_s29 + $0xa0] sm:$0xff] %v2956_v19   ;;  %v2976_v12 = vpack.c.bf16 %v2044_v44, %v2043_v23  ;;  %v2053_v35 = vmax.f32 %v1989_v4, 0.0 }
 0x344   : > { %v2054_v57 = vmax.f32 %v1990_v62, 0.0  ;;  %3033 = vst [vmem:[%s4484_s29 + $0xa8] sm:$0xff] %v2961_v21   ;;  %v2981_v10 = vpack.c.bf16 %v2046_v48, %v2045_v11  ;;  %v2055_v50 = vmax.f32 %v1991_v0, 0.0  ;;  %v2056_v56 = vmax.f32 %v1992_v14, 0.0 }
 0x345   : > { %3034 = vst [vmem:[%s4484_s29 + $0xb0] sm:$0xff] %v2966_v25   ;;  %v2986_v6 = vpack.c.bf16 %v2048_v3, %v2047_v13  ;;  %v2057_v53 = vmax.f32 %v1993_v55, 0.0  ;;  %v2058_v63 = vmax.f32 %v1994_v26, 0.0  ;;  %v2991_v32 = vpack.c.bf16 %v2050_v5, %v2049_v54 }
 0x346   : > { %3035 = vst [vmem:[%s4484_s29 + $0xb8] sm:$0xff] %v2971_v42   ;;  %v2996_v27 = vpack.c.bf16 %v2052_v61, %v2051_v40  ;;  %v3001_v2 = vpack.c.bf16 %v2054_v57, %v2053_v35  ;;  %v3006_v16 = vpack.c.bf16 %v2056_v56, %v2055_v50 }
 0x347   : > { %3036 = vst [vmem:[%s4484_s29 + $0xc0] sm:$0xff] %v2976_v12   ;;  %v3011_v18 = vpack.c.bf16 %v2058_v63, %v2057_v53 }
 0x348   : > { %3037 = vst [vmem:[%s4484_s29 + $0xc8] sm:$0xff] %v2981_v10  }
 0x349   : > { %3038 = vst [vmem:[%s4484_s29 + $0xd0] sm:$0xff] %v2986_v6  }
 0x34a   : > { %3039 = vst [vmem:[%s4484_s29 + $0xd8] sm:$0xff] %v2991_v32  }
 0x34b   : > { %3040 = vst [vmem:[%s4484_s29 + $0xe0] sm:$0xff] %v2996_v27  }
 0x34c   : > { %3041 = vst [vmem:[%s4484_s29 + $0xe8] sm:$0xff] %v3001_v2  }
 0x34d   : > { %3042 = vst [vmem:[%s4484_s29 + $0xf0] sm:$0xff] %v3006_v16  }
 0x34e   : > { %3043 = vst [vmem:[%s4484_s29 + $0xf8] sm:$0xff] %v3011_v18  }
 0x34f PF: > { %s16_s21 = sadd.s32 1, %s3088_s21  }
 0x350   : > { %p13_p4 = scmp.ge.s32.totalorder %s16_s21, 4  }
 0x352   :  { %15 = sbr.rel (!%p13_p4) target bundleno = 1 (0x1), region = 74 }

// kernel: tile.48
= control target key start
LH: loop header
LB: loop body
LE: loop exit
PB: predicated region body
PF: predicated region fallthrough
CT: control target
= control target key end

     0   :  { %s22_s0 = inlined_call_operand.vmem [shape: f32[64], index: 0, kind: input, shape index: {}]   ;;  %s23_s1 = inlined_call_operand.vmem [shape: f32[4,64], index: 1, kind: output, shape index: {}]  }
   0x1   :  { %v4_v0 = vld [vmem:[%s22_s0] ss:$0 sm:$0xff] }
   0x2   :  { %5 = vst [vmem:[%s23_s1] sm:$0xf] %v4_v0 }

// kernel: tile.49
= control target key start
LH: loop header
LB: loop body
LE: loop exit
PB: predicated region body
PF: predicated region fallthrough
CT: control target
= control target key end

     0   :  { %s6_s8 = smov 3  ;;  %vm8_vm0 = vcmask 523264   ;;  %s31_s9 = smov 64   ;;  %vm15_vm1 = vcmask 1048064   ;;  %s51_s0 = inlined_call_operand.vmem [shape: f32[4,64], index: 0, kind: input, shape index: {}]   ;;  %s52_s1 = inlined_call_operand.vmem [shape: f32[1,256], index: 1, kind: output, shape index: {}]  }
   0x1   :  { %v4_v0 = vld [vmem:[%s51_s0] sm:$0xf]  ;;  %s11_s0 = smov 3 }
   0x2   :  { %5 = vst [vmem:[#allocation1] sm:$0xf] %v4_v0 }
   0x9   :  { %v12_v1 = vld [vmem:[#allocation1 + $0x1] ss:$2 sm:%s11_s0]   ;;  %v7_v2 = vld [vmem:[#allocation1] ss:$2 sm:%s6_s8]  }
   0xa   :  { %13 = vrot.lane.b32.xlu0 %v12_v1, %s31_s9  ;;  %9 = vst.msk [vmem:[#allocation0] ss:$8 sm:$0x3] %vm8_vm0, %v7_v2  }
  0x7c   :  { %v14_v3 = vpop.permute.xlu0 %13  }
  0x7d   :  { %16 = vst.msk [vmem:[#allocation0] ss:$8 sm:$0x3] %vm15_vm1, %v14_v3  }
  0x84   :  { %v19_v4 = vld [vmem:[#allocation0] sm:$0x1]  ;;  %v24_v5 = vld [vmem:[#allocation0 + $0x8] sm:$0x1] }
  0x85   :  { %22 = vst [vmem:[%s52_s1] sm:$0x1] %v19_v4 }
  0x86   :  { %29 = vst [vmem:[%s52_s1 + $0x1] sm:$0x1] %v24_v5 }

// kernel: doppler_encoder_group_forward.3
= control target key start
LH: loop header
LB: loop body
LE: loop exit
PB: predicated region body
PF: predicated region fallthrough
CT: control target
= control target key end

     0   :  { %s8376_s21 = smov 0   ;;  %s13250_s0 = inlined_call_operand.vmem [shape: bf16[2,4,10,8,384], index: 0, kind: input, shape index: {}]   ;;  %s13251_s1 = inlined_call_operand.vmem [shape: bf16[3072,256], index: 1, kind: input, shape index: {}]   ;;  %s13252_s2 = inlined_call_operand.vmem [shape: f32[1,256], index: 2, kind: input, shape index: {}]   ;;  %s13253_s3 = inlined_call_operand.vmem [shape: f32[1,256], index: 3, kind: input, shape index: {}]   ;;  %s13254_s4 = inlined_call_operand.vmem [shape: f32[1,256], index: 4, kind: input, shape index: {}]   ;;  %s13255_s5 = inlined_call_operand.vmem [shape: f32[256,256], index: 5, kind: input, shape index: {}]   ;;  %s13256_s6 = inlined_call_operand.vmem [shape: f32[2,2,8,256], index: 6, kind: output, shape index: {}]  }
   0x1 LB: > { %s6388_s22 = sadd.s32 4294967295, %s8339_s21   ;;  %p6392_p0 = scmp.ge.s32.totalorder %s8339_s21, 1  ;;  %s8339_s21 = sphi %s8376_s21, %s16_s21  }
   0x2   : > { %p212_p1 = scmp.lt.s32.totalorder %s8339_s21, 3 }
   0x4   : > { %p213_p2 = pnand %p6392_p0, %p212_p1 }
   0x6   : > { %216 = sbr.rel (%p213_p2) target bundleno = 1983 (0x7bf), region = 44 }
   0xb   : > { %v6454_v0 = vld [vmem:[%s13251_s1 + $0x70] sm:$0xf]  ;;  %v7950_v1 = vld [vmem:[%s13251_s1 + $0x74] sm:$0xf0]  ;;  %v6446_v11 = vld [vmem:[%s13251_s1 + $0x60] sm:$0xf] }
   0xc   : > { %v6518_v2 = vld [vmem:[%s13251_s1 + $0xf0] sm:$0xf]  ;;  %v6455_v3 = vor.u32 %v7950_v1, %v6454_v0  ;;  %v7966_v4 = vld [vmem:[%s13251_s1 + $0xf4] sm:$0xf0]  ;;  %v7948_v13 = vld [vmem:[%s13251_s1 + $0x64] sm:$0xf0] }
   0xd   : > { %v6582_v5 = vld [vmem:[%s13251_s1 + $0x170] sm:$0xf]  ;;  %v7982_v6 = vld [vmem:[%s13251_s1 + $0x174] sm:$0xf0]  ;;  %v6519_v7 = vor.u32 %v7966_v4, %v6518_v2  ;;  %v6510_v14 = vld [vmem:[%s13251_s1 + $0xe0] sm:$0xf]  ;;  %v6447_v16 = vor.u32 %v7948_v13, %v6446_v11 }
   0xe   : > { %v6583_v8 = vor.u32 %v7982_v6, %v6582_v5  ;;  %v6646_v9 = vld [vmem:[%s13251_s1 + $0x1f0] sm:$0xf]  ;;  %v7998_v10 = vld [vmem:[%s13251_s1 + $0x1f4] sm:$0xf0]  ;;  %3291 = vmatpush.bf16.msra.mxu0 %v6455_v3  ;;  %v7964_v15 = vld [vmem:[%s13251_s1 + $0xe4] sm:$0xf0] }
   0xf   : > { %v6647_v12 = vor.u32 %v7998_v10, %v6646_v9  ;;  %3340 = vmatpush.bf16.msra.mxu1 %v6519_v7  ;;  %v6511_v17 = vor.u32 %v7964_v15, %v6510_v14  ;;  %v6574_v18 = vld [vmem:[%s13251_s1 + $0x160] sm:$0xf]  ;;  %v7980_v19 = vld [vmem:[%s13251_s1 + $0x164] sm:$0xf0]  ;;  %v6438_v23 = vld [vmem:[%s13251_s1 + $0x50] sm:$0xf] }
  0x10   : > { %3389 = vmatpush.bf16.msra.mxu2 %v6583_v8  ;;  %v6638_v20 = vld [vmem:[%s13251_s1 + $0x1e0] sm:$0xf]  ;;  %v6575_v21 = vor.u32 %v7980_v19, %v6574_v18  ;;  %v7996_v22 = vld [vmem:[%s13251_s1 + $0x1e4] sm:$0xf0]  ;;  %v7946_v24 = vld [vmem:[%s13251_s1 + $0x54] sm:$0xf0] }
  0x11   : > { %3438 = vmatpush.bf16.msra.mxu3 %v6647_v12  ;;  %v6639_v25 = vor.u32 %v7996_v22, %v6638_v20  ;;  %v6502_v26 = vld [vmem:[%s13251_s1 + $0xd0] sm:$0xf]  ;;  %v7962_v27 = vld [vmem:[%s13251_s1 + $0xd4] sm:$0xf0]  ;;  %v6439_v29 = vor.u32 %v7946_v24, %v6438_v23  ;;  %v6430_v35 = vld [vmem:[%s13251_s1 + $0x40] sm:$0xf] }
  0x12   : > { %v6566_v28 = vld [vmem:[%s13251_s1 + $0x150] sm:$0xf]  ;;  %3292 = vmatpush.bf16.msra.mxu0 %v6447_v16  ;;  %v7978_v30 = vld [vmem:[%s13251_s1 + $0x154] sm:$0xf0]  ;;  %v6503_v33 = vor.u32 %v7962_v27, %v6502_v26  ;;  %v7944_v36 = vld [vmem:[%s13251_s1 + $0x44] sm:$0xf0] }
  0x13   : > { %v6630_v31 = vld [vmem:[%s13251_s1 + $0x1d0] sm:$0xf]  ;;  %v7994_v32 = vld [vmem:[%s13251_s1 + $0x1d4] sm:$0xf0]  ;;  %3341 = vmatpush.bf16.msra.mxu1 %v6511_v17  ;;  %v6567_v34 = vor.u32 %v7978_v30, %v6566_v28  ;;  %v6494_v37 = vld [vmem:[%s13251_s1 + $0xc0] sm:$0xf]  ;;  %v6431_v44 = vor.u32 %v7944_v36, %v6430_v35 }
  0x14   : > { %3390 = vmatpush.bf16.msra.mxu2 %v6575_v21  ;;  %v6631_v38 = vor.u32 %v7994_v32, %v6630_v31  ;;  %v7960_v39 = vld [vmem:[%s13251_s1 + $0xc4] sm:$0xf0]  ;;  %v6558_v40 = vld [vmem:[%s13251_s1 + $0x140] sm:$0xf]  ;;  %v6422_v47 = vld [vmem:[%s13251_s1 + $0x30] sm:$0xf] }
  0x15   : > { %3439 = vmatpush.bf16.msra.mxu3 %v6639_v25  ;;  %v7976_v41 = vld [vmem:[%s13251_s1 + $0x144] sm:$0xf0]  ;;  %v6622_v42 = vld [vmem:[%s13251_s1 + $0x1c0] sm:$0xf]  ;;  %v6495_v45 = vor.u32 %v7960_v39, %v6494_v37  ;;  %v7942_v48 = vld [vmem:[%s13251_s1 + $0x34] sm:$0xf0] }
  0x16   : > { %v7992_v43 = vld [vmem:[%s13251_s1 + $0x1c4] sm:$0xf0]  ;;  %3293 = vmatpush.bf16.msra.mxu0 %v6439_v29  ;;  %v6559_v46 = vor.u32 %v7976_v41, %v6558_v40  ;;  %v6486_v49 = vld [vmem:[%s13251_s1 + $0xb0] sm:$0xf]  ;;  %v7958_v51 = vld [vmem:[%s13251_s1 + $0xb4] sm:$0xf0]  ;;  %v6423_v56 = vor.u32 %v7942_v48, %v6422_v47 }
  0x17   : > { %3342 = vmatpush.bf16.msra.mxu1 %v6503_v33  ;;  %v6623_v50 = vor.u32 %v7992_v43, %v6622_v42  ;;  %v6550_v52 = vld [vmem:[%s13251_s1 + $0x130] sm:$0xf]  ;;  %v7974_v53 = vld [vmem:[%s13251_s1 + $0x134] sm:$0xf0]  ;;  %v6487_v57 = vor.u32 %v7958_v51, %v6486_v49  ;;  %v6414_v59 = vld [vmem:[%s13251_s1 + $0x20] sm:$0xf] }
  0x18   : > { %3391 = vmatpush.bf16.msra.mxu2 %v6567_v34  ;;  %v6614_v54 = vld [vmem:[%s13251_s1 + $0x1b0] sm:$0xf]  ;;  %v7990_v55 = vld [vmem:[%s13251_s1 + $0x1b4] sm:$0xf0]  ;;  %v6551_v58 = vor.u32 %v7974_v53, %v6550_v52  ;;  %v7940_v60 = vld [vmem:[%s13251_s1 + $0x24] sm:$0xf0] }
  0x19   : > { %3440 = vmatpush.bf16.msra.mxu3 %v6631_v38  ;;  %v6478_v61 = vld [vmem:[%s13251_s1 + $0xa0] sm:$0xf]  ;;  %v6615_v62 = vor.u32 %v7990_v55, %v6614_v54  ;;  %v7956_v63 = vld [vmem:[%s13251_s1 + $0xa4] sm:$0xf0]  ;;  %v6415_v4 = vor.u32 %v7940_v60, %v6414_v59  ;;  %v6406_v5 = vld [vmem:[%s13251_s1 + $0x10] sm:$0xf] }
  0x1a   : > { %3294 = vmatpush.bf16.msra.mxu0 %v6431_v44  ;;  %v6542_v0 = vld [vmem:[%s13251_s1 + $0x120] sm:$0xf]  ;;  %v7972_v1 = vld [vmem:[%s13251_s1 + $0x124] sm:$0xf0]  ;;  %v6479_v6 = vor.u32 %v7956_v63, %v6478_v61  ;;  %v7938_v8 = vld [vmem:[%s13251_s1 + $0x14] sm:$0xf0] }
  0x1b   : > { %3343 = vmatpush.bf16.msra.mxu1 %v6495_v45  ;;  %v6606_v2 = vld [vmem:[%s13251_s1 + $0x1a0] sm:$0xf]  ;;  %v7988_v3 = vld [vmem:[%s13251_s1 + $0x1a4] sm:$0xf0]  ;;  %v6543_v7 = vor.u32 %v7972_v1, %v6542_v0  ;;  %v6470_v9 = vld [vmem:[%s13251_s1 + $0x90] sm:$0xf]  ;;  %v6407_v16 = vor.u32 %v7938_v8, %v6406_v5 }
  0x1c   : > { %3392 = vmatpush.bf16.msra.mxu2 %v6559_v46  ;;  %v7954_v10 = vld [vmem:[%s13251_s1 + $0x94] sm:$0xf0]  ;;  %v6607_v11 = vor.u32 %v7988_v3, %v6606_v2  ;;  %v6534_v12 = vld [vmem:[%s13251_s1 + $0x110] sm:$0xf]  ;;  %p242_p3 = scmp.lt.s32.totalorder %s6388_s22, 1  ;;  %vm476_vm0 = vcmask 1043456  }
  0x1d   : > { %3441 = vmatpush.bf16.msra.mxu3 %v6623_v50  ;;  %v7970_v13 = vld [vmem:[%s13251_s1 + $0x114] sm:$0xf0]  ;;  %v6598_v14 = vld [vmem:[%s13251_s1 + $0x190] sm:$0xf]  ;;  %v6398_v17 = vld [vmem:[%s13251_s1] sm:$0xf]  ;;  %v6471_v19 = vor.u32 %v7954_v10, %v6470_v9 }
  0x1e   : > { %3295 = vmatpush.bf16.msra.mxu0 %v6423_v56  ;;  %v7986_v15 = vld [vmem:[%s13251_s1 + $0x194] sm:$0xf0]  ;;  %v7936_v18 = vld [vmem:[%s13251_s1 + $0x4] sm:$0xf0]  ;;  %s13879_s22 = smov (!%p242_p3, %s6388_s22), 1  ;;  %v6535_v20 = vor.u32 %v7970_v13, %v6534_v12  ;;  %vm5759_vm1 = vcmask 1040384  }
  0x1f   : > { %3344 = vmatpush.bf16.msra.mxu1 %v6487_v57  ;;  %v6462_v21 = vld [vmem:[%s13251_s1 + $0x80] sm:$0xf]  ;;  %v7952_v22 = vld [vmem:[%s13251_s1 + $0x84] sm:$0xf0]  ;;  %v6599_v24 = vor.u32 %v7986_v15, %v6598_v14  ;;  %s8319_s15 = smul.u32 480, %s13879_s22  ;;  %v6399_v30 = vor.u32 %v7936_v18, %v6398_v17  ;;  %vm6290_vm8 = vcmask 1041409  }
  0x20   : > { %3393 = vmatpush.bf16.msra.mxu2 %v6551_v58  ;;  %v6526_v23 = vld [vmem:[%s13251_s1 + $0x100] sm:$0xf]  ;;  %v7968_v25 = vld [vmem:[%s13251_s1 + $0x104] sm:$0xf0]  ;;  %v6838_v28 = vld [vmem:[%s13251_s1 + $0x370] sm:$0xf]  ;;  %v6463_v33 = vor.u32 %v7952_v22, %v6462_v21 }
  0x21   : > { %3442 = vmatpush.bf16.msra.mxu3 %v6615_v62  ;;  %v6590_v26 = vld [vmem:[%s13251_s1 + $0x180] sm:$0xf]  ;;  %v7984_v27 = vld [vmem:[%s13251_s1 + $0x184] sm:$0xf0]  ;;  %v8046_v29 = vld [vmem:[%s13251_s1 + $0x374] sm:$0xf0]  ;;  %s8592_s26 = scalar_lea.vmem %s13250_s0, %s8319_s15  ;;  %v6527_v34 = vor.u32 %v7968_v25, %v6526_v23 }
  0x22   : > { %3296 = vmatpush.bf16.msra.mxu0 %v6415_v4  ;;  %v6902_v31 = vld [vmem:[%s13251_s1 + $0x3f0] sm:$0xf]  ;;  %v8062_v32 = vld [vmem:[%s13251_s1 + $0x3f4] sm:$0xf0]  ;;  %v8601_v35 = vld [vmem:[%s8592_s26] sm:$0xff]  ;;  %v6591_v38 = vor.u32 %v7984_v27, %v6590_v26  ;;  %v6839_v41 = vor.u32 %v8046_v29, %v6838_v28  ;;  %vm6292_vm9 = vcmask 1042434  }
  0x23   : > { %3345 = vmatpush.bf16.msra.mxu1 %v6479_v6  ;;  %v8604_v36 = vld [vmem:[%s8592_s26 + $0xc] sm:$0xff]  ;;  %v8607_v37 = vld [vmem:[%s8592_s26 + $0x18] sm:$0xff]  ;;  %v340_v39 = vunpack.c.l.b16 %v8601_v35  ;;  %v341_v45 = vunpack.c.h.b16 %v8601_v35  ;;  %v6903_v48 = vor.u32 %v8062_v32, %v6902_v31  ;;  %v6830_v50 = vld [vmem:[%s13251_s1 + $0x360] sm:$0xf]  ;;  %vm6294_vm10 = vcmask 1043459   ;;  %s7934_s16 = sshll.u32 %s13879_s22, 5 }
  0x24   : > { %3394 = vmatpush.bf16.msra.mxu2 %v6543_v7  ;;  %v342_v40 = vunpack.c.l.b16 %v8604_v36  ;;  %v6710_v42 = vld [vmem:[%s13251_s1 + $0x270] sm:$0xf]  ;;  %v8014_v43 = vld [vmem:[%s13251_s1 + $0x274] sm:$0xf0]  ;;  %v343_v46 = vunpack.c.h.b16 %v8604_v36  ;;  %v344_v47 = vunpack.c.l.b16 %v8607_v37  ;;  %v8044_v51 = vld [vmem:[%s13251_s1 + $0x364] sm:$0xf0]  ;;  %v345_v53 = vunpack.c.h.b16 %v8607_v37  ;;  %s251_s18 = scalar_lea.vmem %s13256_s6, %s7934_s16 }
  0x25   : > { %3443 = vmatpush.bf16.msra.mxu3 %v6607_v11  ;;  %v6774_v44 = vld [vmem:[%s13251_s1 + $0x2f0] sm:$0xf]  ;;  %v8030_v49 = vld [vmem:[%s13251_s1 + $0x2f4] sm:$0xf0]  ;;  %v6894_v54 = vld [vmem:[%s13251_s1 + $0x3e0] sm:$0xf]  ;;  %v6711_v58 = vor.u32 %v8014_v43, %v6710_v42  ;;  %v6831_v61 = vor.u32 %v8044_v51, %v6830_v50 }
  0x26   : > { %3297 = vmatpush.bf16.msra.mxu0 %v6407_v16  ;;  %v8632_v52 = vpack.c.b16 %v342_v40, %v340_v39  ;;  %v8060_v55 = vld [vmem:[%s13251_s1 + $0x3e4] sm:$0xf0]  ;;  %v8641_v56 = vpack.c.b16 %v343_v46, %v341_v45  ;;  %v8643_v57 = vpack.c.b16 %v344_v47, %v342_v40  ;;  %v8645_v59 = vpack.c.b16 %v345_v53, %v343_v46  ;;  %v6702_v62 = vld [vmem:[%s13251_s1 + $0x260] sm:$0xf]  ;;  %v6822_v4 = vld [vmem:[%s13251_s1 + $0x350] sm:$0xf] }
  0x27   : > { %3346 = vmatpush.bf16.msra.mxu1 %v6471_v19  ;;  %v6775_v60 = vor.u32 %v8030_v49, %v6774_v44  ;;  %v8012_v63 = vld [vmem:[%s13251_s1 + $0x264] sm:$0xf0]  ;;  %v6895_v0 = vor.u32 %v8060_v55, %v6894_v54  ;;  %v6766_v1 = vld [vmem:[%s13251_s1 + $0x2e0] sm:$0xf]  ;;  %v8042_v5 = vld [vmem:[%s13251_s1 + $0x354] sm:$0xf0] }
  0x28   : > { %3395 = vmatpush.bf16.msra.mxu2 %v6535_v20  ;;  %13493 = vst [vmem:[#allocation2_spill] sm:$0xff] %v8643_v57  ;;  %v8028_v2 = vld [vmem:[%s13251_s1 + $0x2e4] sm:$0xf0]  ;;  %v6703_v3 = vor.u32 %v8012_v63, %v6702_v62  ;;  %v6823_v7 = vor.u32 %v8042_v5, %v6822_v4  ;;  %v6694_v8 = vld [vmem:[%s13251_s1 + $0x250] sm:$0xf]  ;;  %v8783_v5 = vld [vmem:[%s8592_s26 + $0x60] sm:$0xff] }
  0x29   : > { %3444 = vmatpush.bf16.msra.mxu3 %v6599_v24  ;;  %13494 = vst [vmem:[#allocation3_spill] sm:$0xff] %v8645_v59  ;;  %v6767_v6 = vor.u32 %v8028_v2, %v6766_v1  ;;  %v8010_v9 = vld [vmem:[%s13251_s1 + $0x254] sm:$0xf0]  ;;  %v6886_v10 = vld [vmem:[%s13251_s1 + $0x3d0] sm:$0xf]  ;;  %v8688_v14 = vld [vmem:[%s8592_s26 + $0x24] sm:$0xff] }
  0x2a   : > { %3298 = vmatpush.bf16.msra.mxu0 %v6399_v30  ;;  %v8058_v11 = vld [vmem:[%s13251_s1 + $0x3d4] sm:$0xf0]  ;;  %v6758_v12 = vld [vmem:[%s13251_s1 + $0x2d0] sm:$0xf]  ;;  %v6695_v17 = vor.u32 %v8010_v9, %v6694_v8  ;;  %v346_v19 = vunpack.c.l.b16 %v8688_v14  ;;  %v347_v20 = vunpack.c.h.b16 %v8688_v14  ;;  %v6814_v27 = vld [vmem:[%s13251_s1 + $0x340] sm:$0xf]  ;;  %v13262_v8 = vunpack.c.l.b16 %v8783_v5 }
  0x2b   : > { %3347 = vmatpush.bf16.msra.mxu1 %v6463_v33  ;;  %v8026_v13 = vld [vmem:[%s13251_s1 + $0x2d4] sm:$0xf0]  ;;  %v6887_v15 = vor.u32 %v8058_v11, %v6886_v10  ;;  %v8691_v16 = vld [vmem:[%s8592_s26 + $0x30] sm:$0xff]  ;;  %v8040_v28 = vld [vmem:[%s13251_s1 + $0x344] sm:$0xf0]  ;;  %v13261_v9 = vunpack.c.h.b16 %v8783_v5  ;;  %vm6296_vm11 = vcmask 1044484  }
  0x2c   : > { %3396 = vmatpush.bf16.msra.mxu2 %v6527_v34  ;;  %v6759_v18 = vor.u32 %v8026_v13, %v6758_v12  ;;  %v348_v21 = vunpack.c.l.b16 %v8691_v16  ;;  %v349_v22 = vunpack.c.h.b16 %v8691_v16  ;;  %v8697_v23 = vpack.c.b16 %v346_v19, %v344_v47  ;;  %v6686_v29 = vld [vmem:[%s13251_s1 + $0x240] sm:$0xf]  ;;  %v8008_v31 = vld [vmem:[%s13251_s1 + $0x244] sm:$0xf0]  ;;  %v8038_v54 = vld [vmem:[%s13251_s1 + $0x334] sm:$0xf0] }
  0x2d   : > { %3445 = vmatpush.bf16.msra.mxu3 %v6591_v38  ;;  %3299 = vmatmul.bf16.vlgmr.msra.gmra.mxu0 %v8632_v52  ;;  %v8699_v24 = vpack.c.b16 %v347_v20, %v345_v53  ;;  %v6815_v30 = vor.u32 %v8040_v28, %v6814_v27  ;;  %v6878_v32 = vld [vmem:[%s13251_s1 + $0x3c0] sm:$0xf]  ;;  %v8056_v33 = vld [vmem:[%s13251_s1 + $0x3c4] sm:$0xf0]  ;;  %v6687_v34 = vor.u32 %v8008_v31, %v6686_v29  ;;  %v6806_v53 = vld [vmem:[%s13251_s1 + $0x330] sm:$0xf] }
  0x2e   : > { %3348 = vmatmul.bf16.vlgmr.msra.gmra.mxu1 %v8641_v56  ;;  %3487 = vmatpush.bf16.msrb.mxu0 %v6711_v58  ;;  %13495 = vst [vmem:[#allocation4_spill] sm:$0xff] %v8697_v23  ;;  %v8701_v25 = vpack.c.b16 %v348_v21, %v346_v19  ;;  %v8703_v26 = vpack.c.b16 %v349_v22, %v347_v20  ;;  %v6750_v39 = vld [vmem:[%s13251_s1 + $0x2c0] sm:$0xf]  ;;  %v8024_v40 = vld [vmem:[%s13251_s1 + $0x2c4] sm:$0xf0]  ;;  %v8780_v2 = vld [vmem:[%s8592_s26 + $0x54] sm:$0xff] }
  0x2f   : > { %3397 = vmatmul.bf16.vlgmr.msra.gmra.mxu2 %v8643_v57  ;;  %3536 = vmatpush.bf16.msrb.mxu1 %v6775_v60  ;;  %13496 = vst [vmem:[#allocation5_spill] sm:$0xff] %v8699_v24  ;;  %v6879_v38 = vor.u32 %v8056_v33, %v6878_v32  ;;  %v6751_v42 = vor.u32 %v8024_v40, %v6750_v39  ;;  %v8737_v43 = vld [vmem:[%s8592_s26 + $0x48] sm:$0xff]  ;;  %v6678_v58 = vld [vmem:[%s13251_s1 + $0x230] sm:$0xf]  ;;  %v8006_v60 = vld [vmem:[%s13251_s1 + $0x234] sm:$0xf0] }
  0x30   : > { %3585 = vmatpush.bf16.msrb.mxu2 %v6839_v41  ;;  %3446 = vmatmul.bf16.vlgmr.msra.gmra.mxu3 %v8645_v59  ;;  %13497 = vst [vmem:[#allocation6_spill] sm:$0xff] %v8701_v25  ;;  %v8734_v41 = vld [vmem:[%s8592_s26 + $0x3c] sm:$0xff]  ;;  %v352_v46 = vunpack.c.l.b16 %v8737_v43  ;;  %v353_v47 = vunpack.c.h.b16 %v8737_v43  ;;  %v6807_v55 = vor.u32 %v8038_v54, %v6806_v53  ;;  %v6679_v62 = vor.u32 %v8006_v60, %v6678_v58  ;;  %v8054_v63 = vld [vmem:[%s13251_s1 + $0x3b4] sm:$0xf0]  ;;  %v8052_v33 = vld [vmem:[%s13251_s1 + $0x3a4] sm:$0xf0] }
  0x31   : > { %3634 = vmatpush.bf16.msrb.mxu3 %v6903_v48  ;;  %13498 = vst [vmem:[#allocation7_spill] sm:$0xff] %v8703_v26  ;;  %v350_v44 = vunpack.c.l.b16 %v8734_v41  ;;  %v351_v45 = vunpack.c.h.b16 %v8734_v41  ;;  %v8022_v1 = vld [vmem:[%s13251_s1 + $0x2b4] sm:$0xf0]  ;;  %v460_v19 = vrot.slane %v8601_v35, 4  ;;  %v462_v20 = vrot.slane %v8604_v36, 4 }
  0x32   : > { %3488 = vmatpush.bf16.msrb.mxu0 %v6703_v3  ;;  %v6798_v35 = vld [vmem:[%s13251_s1 + $0x320] sm:$0xf]  ;;  %v8036_v36 = vld [vmem:[%s13251_s1 + $0x324] sm:$0xf0]  ;;  %vm6298_vm12 = vcmask 1045509   ;;  %vm6300_vm13 = vcmask 1046534  }
  0x33   : > { %3537 = vmatpush.bf16.msrb.mxu1 %v6767_v6  ;;  %v8743_v48 = vpack.c.b16 %v350_v44, %v348_v21  ;;  %v8745_v49 = vpack.c.b16 %v351_v45, %v349_v22  ;;  %v8747_v50 = vpack.c.b16 %v352_v46, %v350_v44  ;;  %v8749_v51 = vpack.c.b16 %v353_v47, %v351_v45  ;;  %v6862_v31 = vld [vmem:[%s13251_s1 + $0x3a0] sm:$0xf] }
  0x34   : > { %3586 = vmatpush.bf16.msrb.mxu2 %v6831_v61  ;;  %v6870_v61 = vld [vmem:[%s13251_s1 + $0x3b0] sm:$0xf]  ;;  %v354_v6 = vunpack.c.l.b16 %v8780_v2  ;;  %v464_v21 = vrot.slane %v8607_v37, 4  ;;  %v6799_v29 = vor.u32 %v8036_v36, %v6798_v35  ;;  %v6670_v37 = vld [vmem:[%s13251_s1 + $0x220] sm:$0xf]  ;;  %vm6302_vm14 = vcmask 1047559  }
  0x35   : > { %3635 = vmatpush.bf16.msrb.mxu3 %v6895_v0  ;;  %13499 = vst [vmem:[#allocation8_spill] sm:$0xff] %v8743_v48  ;;  %v6742_v0 = vld [vmem:[%s13251_s1 + $0x2b0] sm:$0xf]  ;;  %v6871_v3 = vor.u32 %v8054_v63, %v6870_v61  ;;  %v259_v63 = vld [vmem:[%s8592_s26 + $0x2c] sm:$0xf] }
  0x36   : > { %3489 = vmatpush.bf16.msrb.mxu0 %v6695_v17  ;;  %13500 = vst [vmem:[#allocation9_spill] sm:$0xff] %v8745_v49  ;;  %v6743_v4 = vor.u32 %v8022_v1, %v6742_v0  ;;  %v8789_v10 = vpack.c.b16 %v354_v6, %v352_v46  ;;  %v8795_v12 = vpack.c.b16 %v13262_v8, %v354_v6  ;;  %v255_v17 = vld [vmem:[%s8592_s26 + $0x14] sm:$0xf]  ;;  %v261_v1 = vld [vmem:[%s8592_s26 + $0x38] sm:$0xf]  ;;  %v468_v6 = vrot.slane %v8691_v16, 4 }
  0x37   : > { %3538 = vmatpush.bf16.msrb.mxu1 %v6759_v18  ;;  %13501 = vst [vmem:[#allocation10_spill] sm:$0xff] %v8747_v50  ;;  %v257_v18 = vld [vmem:[%s8592_s26 + $0x20] sm:$0xf]  ;;  %v463_v27 = vrot.slane %v255_v17, 4  ;;  %v8034_v17 = vld [vmem:[%s13251_s1 + $0x314] sm:$0xf0] }
  0x38   : > { %3587 = vmatpush.bf16.msrb.mxu2 %v6823_v7  ;;  %13502 = vst [vmem:[#allocation11_spill] sm:$0xff] %v8749_v51  ;;  %v355_v7 = vunpack.c.h.b16 %v8780_v2  ;;  %v465_v28 = vrot.slane %v257_v18, 4  ;;  %v8002_v16 = vld [vmem:[%s13251_s1 + $0x214] sm:$0xf0] }
  0x39   : > { %3636 = vmatpush.bf16.msrb.mxu3 %v6887_v15  ;;  %13503 = vst [vmem:[#allocation12_spill] sm:$0xff] %v8789_v10  ;;  %v253_v15 = vld [vmem:[%s8592_s26 + $0x8] sm:$0xf]  ;;  %v478_v40 = vsel %vm476_vm0, %v462_v20, %v463_v27  ;;  %v8018_v27 = vld [vmem:[%s13251_s1 + $0x294] sm:$0xf0] }
  0x3a   : > { %3490 = vmatpush.bf16.msrb.mxu0 %v6687_v34  ;;  %v8791_v11 = vpack.c.b16 %v355_v7, %v353_v47  ;;  %13505 = vst [vmem:[#allocation14_spill] sm:$0xff] %v8795_v12  ;;  %v8799_v13 = vpack.c.b16 %v13261_v9, %v355_v7  ;;  %v461_v22 = vrot.slane %v253_v15, 4  ;;  %v6734_v34 = vld [vmem:[%s13251_s1 + $0x2a0] sm:$0xf]  ;;  %v479_v45 = vsel %vm476_vm0, %v464_v21, %v465_v28  ;;  %v6790_v15 = vld [vmem:[%s13251_s1 + $0x310] sm:$0xf] }
  0x3b   : > { %3539 = vmatpush.bf16.msrb.mxu1 %v6751_v42  ;;  %v6863_v42 = vor.u32 %v8052_v33, %v6862_v31  ;;  %v615_v47 = vunpack.c.l.b16 %v478_v40  ;;  %v616_v54 = vunpack.c.h.b16 %v478_v40  ;;  %v618_v58 = vunpack.c.h.b16 %v479_v45  ;;  %v8050_v21 = vld [vmem:[%s13251_s1 + $0x394] sm:$0xf0] }
  0x3c   : > { %3588 = vmatpush.bf16.msrb.mxu2 %v6815_v30  ;;  %13504 = vst [vmem:[#allocation13_spill] sm:$0xff] %v8791_v11  ;;  %v8004_v30 = vld [vmem:[%s13251_s1 + $0x224] sm:$0xf0]  ;;  %v477_v39 = vsel %vm476_vm0, %v460_v19, %v461_v22  ;;  %v469_v7 = vrot.slane %v261_v1, 4  ;;  %v6791_v18 = vor.u32 %v8034_v17, %v6790_v15  ;;  %v6854_v19 = vld [vmem:[%s13251_s1 + $0x390] sm:$0xf] }
  0x3d   : > { %3304 = vmatmul.bf16.gmra.mxu0 %v8697_v23  ;;  %3637 = vmatpush.bf16.msrb.mxu3 %v6879_v38  ;;  %13506 = vst [vmem:[#allocation15_spill] sm:$0xff] %v8799_v13  ;;  %v6671_v32 = vor.u32 %v8004_v30, %v6670_v37  ;;  %v8020_v38 = vld [vmem:[%s13251_s1 + $0x2a4] sm:$0xf0]  ;;  %v613_v46 = vunpack.c.l.b16 %v477_v39  ;;  %v614_v53 = vunpack.c.h.b16 %v477_v39  ;;  %v8845_v0 = vpack.c.b16 %v618_v58, %v616_v54  ;;  %v6726_v22 = vld [vmem:[%s13251_s1 + $0x290] sm:$0xf]  ;;  %v9119_v9 = vld [vmem:[%s8592_s26 + $0xb4] sm:$0xff] }
  0x3e   : > { %3353 = vmatmul.bf16.gmra.mxu1 %v8699_v24  ;;  %3491 = vmatpush.bf16.msrb.mxu0 %v6679_v62  ;;  %v6735_v44 = vor.u32 %v8020_v38, %v6734_v34  ;;  %v6855_v35 = vor.u32 %v8050_v21, %v6854_v19  ;;  %v6727_v36 = vor.u32 %v8018_v27, %v6726_v22  ;;  %v263_v39 = vld [vmem:[%s8592_s26 + $0x44] sm:$0xf]  ;;  %v267_v27 = vld [vmem:[%s8592_s26 + $0x5c] sm:$0xf] }
  0x3f   : > { %3402 = vmatmul.bf16.gmra.mxu2 %v8701_v25  ;;  %3540 = vmatpush.bf16.msrb.mxu1 %v6743_v4  ;;  %v8838_v60 = vpack.c.b16 %v615_v47, %v613_v46  ;;  %v8840_v61 = vpack.c.b16 %v616_v54, %v614_v53  ;;  %13510 = vst [vmem:[#allocation19_spill] sm:$0xff] %v8845_v0  ;;  %v467_v4 = vrot.slane %v259_v63, 4  ;;  %v471_v46 = vrot.slane %v263_v39, 4  ;;  %v6782_v53 = vld [vmem:[%s13251_s1 + $0x300] sm:$0xf] }
  0x40   : > { %3451 = vmatmul.bf16.gmra.mxu3 %v8703_v26  ;;  %3589 = vmatpush.bf16.msrb.mxu2 %v6807_v55  ;;  %v617_v55 = vunpack.c.l.b16 %v479_v45  ;;  %v472_v45 = vrot.slane %v8737_v43, 4  ;;  %v8032_v54 = vld [vmem:[%s13251_s1 + $0x304] sm:$0xf0] }
  0x41   : > { %3638 = vmatpush.bf16.msrb.mxu3 %v6871_v3  ;;  %13507 = vst [vmem:[#allocation16_spill] sm:$0xff] %v8838_v60  ;;  %v466_v3 = vrot.slane %v8688_v14, 4  ;;  %v6662_v14 = vld [vmem:[%s13251_s1 + $0x210] sm:$0xf]  ;;  %v6783_v43 = vor.u32 %v8032_v54, %v6782_v53  ;;  %v8048_v63 = vld [vmem:[%s13251_s1 + $0x384] sm:$0xf0] }
  0x42   : > { %3492 = vmatpush.bf16.msrb.mxu0 %v6671_v32  ;;  %13508 = vst [vmem:[#allocation17_spill] sm:$0xff] %v8840_v61  ;;  %v8842_v62 = vpack.c.b16 %v617_v55, %v615_v47  ;;  %v6663_v20 = vor.u32 %v8002_v16, %v6662_v14  ;;  %v6966_v53 = vld [vmem:[%s13251_s1 + $0x470] sm:$0xf]  ;;  %v8078_v54 = vld [vmem:[%s13251_s1 + $0x474] sm:$0xf0] }
  0x43   : > { %3541 = vmatpush.bf16.msrb.mxu1 %v6735_v44  ;;  %v480_v28 = vsel %vm476_vm0, %v466_v3, %v467_v4  ;;  %v470_v44 = vrot.slane %v8734_v41, 4  ;;  %v6654_v41 = vld [vmem:[%s13251_s1 + $0x200] sm:$0xf] }
  0x44   : > { %3590 = vmatpush.bf16.msrb.mxu2 %v6799_v29  ;;  %13509 = vst [vmem:[#allocation18_spill] sm:$0xff] %v8842_v62  ;;  %v481_v29 = vsel %vm476_vm0, %v468_v6, %v469_v7  ;;  %v619_v37 = vunpack.c.l.b16 %v480_v28  ;;  %v620_v30 = vunpack.c.h.b16 %v480_v28  ;;  %v6718_v4 = vld [vmem:[%s13251_s1 + $0x280] sm:$0xf]  ;;  %v8016_v6 = vld [vmem:[%s13251_s1 + $0x284] sm:$0xf0] }
  0x45   : > { %3639 = vmatpush.bf16.msrb.mxu3 %v6863_v42  ;;  %v621_v31 = vunpack.c.l.b16 %v481_v29  ;;  %v622_v32 = vunpack.c.h.b16 %v481_v29  ;;  %v265_v42 = vld [vmem:[%s8592_s26 + $0x50] sm:$0xf]  ;;  %v482_v7 = vsel %vm476_vm0, %v470_v44, %v471_v46  ;;  %v6719_v15 = vor.u32 %v8016_v6, %v6718_v4  ;;  %v8110_v46 = vld [vmem:[%s13251_s1 + $0x574] sm:$0xf0] }
  0x46   : > { %3493 = vmatpush.bf16.msrb.mxu0 %v6663_v20  ;;  %v8880_v33 = vpack.c.b16 %v619_v37, %v617_v55  ;;  %v8882_v34 = vpack.c.b16 %v620_v30, %v618_v58  ;;  %v473_v47 = vrot.slane %v265_v42, 4  ;;  %v8000_v55 = vld [vmem:[%s13251_s1 + $0x204] sm:$0xf0]  ;;  %v6846_v58 = vld [vmem:[%s13251_s1 + $0x380] sm:$0xf]  ;;  %v624_v14 = vunpack.c.h.b16 %v482_v7 }
  0x47   : > { %3542 = vmatpush.bf16.msrb.mxu1 %v6727_v36  ;;  %v8884_v38 = vpack.c.b16 %v621_v31, %v619_v37  ;;  %v8887_v40 = vpack.c.b16 %v622_v32, %v620_v30  ;;  %v6655_v1 = vor.u32 %v8000_v55, %v6654_v41  ;;  %v6847_v3 = vor.u32 %v8048_v63, %v6846_v58  ;;  %v8933_v36 = vld [vmem:[%s8592_s26 + $0x84] sm:$0xff]  ;;  %v7158_v41 = vld [vmem:[%s13251_s1 + $0x5f0] sm:$0xf]  ;;  %v8126_v63 = vld [vmem:[%s13251_s1 + $0x5f4] sm:$0xf0] }
  0x48   : > { %3591 = vmatpush.bf16.msrb.mxu2 %v6791_v18  ;;  %13511 = vst [vmem:[#allocation20_spill] sm:$0xff] %v8880_v33  ;;  %v483_v17 = vsel %vm476_vm0, %v472_v45, %v473_v47  ;;  %v623_v18 = vunpack.c.l.b16 %v482_v7  ;;  %v8924_v21 = vpack.c.b16 %v624_v14, %v622_v32  ;;  %v474_v29 = vrot.slane %v8780_v2, 4  ;;  %v8941_v32 = vld [vmem:[%s8592_s26 + $0x90] sm:$0xff]  ;;  %v8094_v7 = vld [vmem:[%s13251_s1 + $0x4f4] sm:$0xf0] }
  0x49   : > { %3640 = vmatpush.bf16.msrb.mxu3 %v6855_v35  ;;  %13512 = vst [vmem:[#allocation21_spill] sm:$0xff] %v8882_v34  ;;  %v625_v16 = vunpack.c.l.b16 %v483_v17  ;;  %v626_v19 = vunpack.c.h.b16 %v483_v17  ;;  %v269_v35 = vld [vmem:[%s8592_s26 + $0x68] sm:$0xf]  ;;  %v486_v37 = vrot.slane %v8783_v5, 4  ;;  %v475_v30 = vrot.slane %v267_v27, 4 }
  0x4a   : > { %13513 = vst [vmem:[#allocation22_spill] sm:$0xff] %v8884_v38  ;;  %3494 = vmatpush.bf16.msrb.mxu0 %v6655_v1  ;;  %v8922_v20 = vpack.c.b16 %v623_v18, %v621_v31  ;;  %v487_v31 = vrot.slane %v269_v35, 4  ;;  %v372_v39 = vunpack.c.l.b16 %v8933_v36  ;;  %v374_v42 = vunpack.c.l.b16 %v8941_v32  ;;  %v7094_v45 = vld [vmem:[%s13251_s1 + $0x570] sm:$0xf] }
  0x4b   : > { %13514 = vst [vmem:[#allocation23_spill] sm:$0xff] %v8887_v40  ;;  %3543 = vmatpush.bf16.msrb.mxu1 %v6719_v15  ;;  %v8926_v22 = vpack.c.b16 %v625_v16, %v623_v18  ;;  %v8929_v28 = vpack.c.b16 %v626_v19, %v624_v14  ;;  %v373_v44 = vunpack.c.h.b16 %v8933_v36  ;;  %v375_v2 = vunpack.c.h.b16 %v8941_v32  ;;  %v7030_v6 = vld [vmem:[%s13251_s1 + $0x4f0] sm:$0xf] }
  0x4c   : > { %3592 = vmatpush.bf16.msrb.mxu2 %v6783_v43  ;;  %13515 = vst [vmem:[#allocation24_spill] sm:$0xff] %v8922_v20  ;;  %v7095_v47 = vor.u32 %v8110_v46, %v7094_v45  ;;  %v8965_v43 = vpack.c.b16 %v374_v42, %v372_v39  ;;  %v6967_v58 = vor.u32 %v8078_v54, %v6966_v53  ;;  %v8076_v46 = vld [vmem:[%s13251_s1 + $0x464] sm:$0xf0] }
  0x4d   : > { %3309 = vmatmul.bf16.gmra.mxu0 %v8743_v48  ;;  %3641 = vmatpush.bf16.msrb.mxu3 %v6847_v3  ;;  %13516 = vst [vmem:[#allocation25_spill] sm:$0xff] %v8924_v21  ;;  %v8969_v55 = vpack.c.b16 %v375_v2, %v373_v44  ;;  %v484_v1 = vsel %vm476_vm0, %v474_v29, %v475_v30  ;;  %v8124_v53 = vld [vmem:[%s13251_s1 + $0x5e4] sm:$0xf0] }
  0x4e   : > { %3358 = vmatmul.bf16.gmra.mxu1 %v8745_v49  ;;  %13517 = vst [vmem:[#allocation26_spill] sm:$0xff] %v8926_v22  ;;  %v7159_v3 = vor.u32 %v8126_v63, %v7158_v41  ;;  %v8976_v4 = vsel %vm476_vm0, %v486_v37, %v487_v31  ;;  %3683 = vmatpush.bf16.msra.mxu0 %v6967_v58  ;;  %v627_v15 = vunpack.c.l.b16 %v484_v1  ;;  %v628_v18 = vunpack.c.h.b16 %v484_v1  ;;  %v6958_v31 = vld [vmem:[%s13251_s1 + $0x460] sm:$0xf]  ;;  %v9021_v58 = vld [vmem:[%s8592_s26 + $0x78] sm:$0xff] }
  0x4f   : > { %3407 = vmatmul.bf16.gmra.mxu2 %v8747_v50  ;;  %13518 = vst [vmem:[#allocation27_spill] sm:$0xff] %v8929_v28  ;;  %v7031_v17 = vor.u32 %v8094_v7, %v7030_v6  ;;  %v13260_v14 = vunpack.c.l.b16 %v8976_v4  ;;  %v13257_v27 = vunpack.c.h.b16 %v8976_v4  ;;  %v6959_v54 = vor.u32 %v8076_v46, %v6958_v31  ;;  %v1365_v63 = vld [vmem:[%s13252_s2] sm:$0x3] }
  0x50   : > { %3456 = vmatmul.bf16.gmra.mxu3 %v8749_v51  ;;  %13519 = vst [vmem:[#allocation28_spill] sm:$0xff] %v8965_v43  ;;  %3781 = vmatpush.bf16.msra.mxu2 %v7095_v47  ;;  %v8986_v35 = vpack.c.b16 %v627_v15, %v625_v16  ;;  %v8988_v29 = vpack.c.b16 %v628_v18, %v626_v19  ;;  %v7086_v16 = vld [vmem:[%s13251_s1 + $0x560] sm:$0xf]  ;;  %v8108_v19 = vld [vmem:[%s13251_s1 + $0x564] sm:$0xf0]  ;;  %v370_v7 = vunpack.c.l.b16 %v9021_v58 }
  0x51   : > { %13520 = vst [vmem:[#allocation29_spill] sm:$0xff] %v8969_v55  ;;  %3830 = vmatpush.bf16.msra.mxu3 %v7159_v3  ;;  %3732 = vmatpush.bf16.msra.mxu1 %v7031_v17  ;;  %v8992_v37 = vpack.c.b16 %v13260_v14, %v627_v15  ;;  %v8996_v30 = vpack.c.b16 %v13257_v27, %v628_v18  ;;  %v7150_v47 = vld [vmem:[%s13251_s1 + $0x5e0] sm:$0xf]  ;;  %v8092_v3 = vld [vmem:[%s13251_s1 + $0x4e4] sm:$0xf0]  ;;  %v9033_v15 = vperm.slane %v1365_v63, 0  ;;  %v371_v17 = vunpack.c.h.b16 %v9021_v58 }
  0x52   : > { %13521 = vst [vmem:[#allocation30_spill] sm:$0xff] %v8986_v35  ;;  %v7087_v45 = vor.u32 %v8108_v19, %v7086_v16  ;;  %v7151_v41 = vor.u32 %v8124_v53, %v7150_v47  ;;  %3684 = vmatpush.bf16.msra.mxu0 %v6959_v54  ;;  %v7022_v1 = vld [vmem:[%s13251_s1 + $0x4e0] sm:$0xf]  ;;  %v9036_v16 = vpack.c.b16 %v372_v39, %v370_v7  ;;  %v7078_v47 = vld [vmem:[%s13251_s1 + $0x550] sm:$0xf]  ;;  %v9116_v14 = vld [vmem:[%s8592_s26 + $0xa8] sm:$0xff] }
  0x53   : > { %13522 = vst [vmem:[#allocation31_spill] sm:$0xff] %v8988_v29  ;;  %v7023_v6 = vor.u32 %v8092_v3, %v7022_v1  ;;  %v8106_v39 = vld [vmem:[%s13251_s1 + $0x554] sm:$0xf0]  ;;  %v7014_v27 = vld [vmem:[%s13251_s1 + $0x4d0] sm:$0xf] }
  0x54   : > { %13523 = vst [vmem:[#allocation32_spill] sm:$0xff] %v8992_v37  ;;  %3782 = vmatpush.bf16.msra.mxu2 %v7087_v45  ;;  %v9039_v45 = vpack.c.b16 %v373_v44, %v371_v17  ;;  %v6950_v44 = vld [vmem:[%s13251_s1 + $0x450] sm:$0xf]  ;;  %v7079_v53 = vor.u32 %v8106_v39, %v7078_v47  ;;  %v8074_v54 = vld [vmem:[%s13251_s1 + $0x454] sm:$0xf0]  ;;  %v9065_v47 = vld [vmem:[%s8592_s26 + $0x9c] sm:$0xff] }
  0x55   : > { %13524 = vst [vmem:[#allocation33_spill] sm:$0xff] %v8996_v30  ;;  %3831 = vmatpush.bf16.msra.mxu3 %v7151_v41  ;;  %3733 = vmatpush.bf16.msra.mxu1 %v7023_v6  ;;  %v7142_v41 = vld [vmem:[%s13251_s1 + $0x5d0] sm:$0xf]  ;;  %v8122_v63 = vld [vmem:[%s13251_s1 + $0x5d4] sm:$0xf0]  ;;  %v6951_v3 = vor.u32 %v8074_v54, %v6950_v44 }
  0x56   : > { %13525 = vst [vmem:[#allocation34_spill] sm:$0xff] %v9036_v16  ;;  %v7143_v6 = vor.u32 %v8122_v63, %v7142_v41  ;;  %v13258_v41 = vunpack.c.h.b16 %v9065_v47 }
  0x57   : > { %13526 = vst [vmem:[#allocation35_spill] sm:$0xff] %v9039_v45  ;;  %3685 = vmatpush.bf16.msra.mxu0 %v6951_v3 }
  0x58   : > { %3783 = vmatpush.bf16.msra.mxu2 %v7079_v53  ;;  %v13259_v53 = vunpack.c.l.b16 %v9065_v47 }
  0x59   : > { %3832 = vmatpush.bf16.msra.mxu3 %v7143_v6 }
  0x5d   : > { %3314 = vmatmul.bf16.gmra.mxu0 %v8789_v10 }
  0x5e   : > { %3363 = vmatmul.bf16.gmra.mxu1 %v8791_v11 }
  0x5f   : > { %3412 = vmatmul.bf16.gmra.mxu2 %v8795_v12 }
  0x60   : > { %3461 = vmatmul.bf16.gmra.mxu3 %v8799_v13 }
  0x6d   : > { %3319 = vmatmul.bf16.gmra.mxu0 %v8838_v60 }
  0x6e   : > { %3368 = vmatmul.bf16.gmra.mxu1 %v8840_v61 }
  0x6f   : > { %3417 = vmatmul.bf16.gmra.mxu2 %v8842_v62 }
  0x70   : > { %3466 = vmatmul.bf16.gmra.mxu3 %v8845_v0 }
  0x7d   : > { %3324 = vmatmul.bf16.gmra.mxu0 %v8880_v33 }
  0x7e   : > { %3373 = vmatmul.bf16.gmra.mxu1 %v8882_v34 }
  0x7f   : > { %3422 = vmatmul.bf16.gmra.mxu2 %v8884_v38  ;;  %v13533_v38 = vunpack.c.h.b16 %v8783_v5 }
  0x80   : > { %3471 = vmatmul.bf16.gmra.mxu3 %v8887_v40 }
  0x8d   : > { %3329 = vmatmul.bf16.gmra.mxu0 %v8922_v20 }
  0x8e   : > { %3378 = vmatmul.bf16.gmra.mxu1 %v8924_v21 }
  0x8f   : > { %3427 = vmatmul.bf16.gmra.mxu2 %v8926_v22  ;;  %v9178_v22 = vld [vmem:[%s8592_s26 + $0xcc] sm:$0xff] }
  0x90   : > { %3476 = vmatmul.bf16.gmra.mxu3 %v8929_v28  ;;  %v9175_v28 = vld [vmem:[%s8592_s26 + $0xc0] sm:$0xff] }
  0x91   : > { %v13536_v62 = vunpack.c.h.b16 %v9175_v28 }
  0x9d   : > { %3334 = vmatmul.bf16.gmra.mxu0 %v8986_v35 }
  0x9e   : > { %3383 = vmatmul.bf16.gmra.mxu1 %v8988_v29 }
  0x9f   : > { %3432 = vmatmul.bf16.gmra.mxu2 %v8992_v37  ;;  %v9171_v37 = vld [vmem:[%s8592_s26 + $0x6c] sm:$0xff] }
  0xa0   : > { %3481 = vmatmul.bf16.gmra.mxu3 %v8996_v30 }
  0xaa   : > { %v3300_v18 = vpop.f32.mrf.mxu0 }
  0xab   : > { %v3301_v19 = vadd.f32 %v3300_v18, %v9033_v15  ;;  %v3349_v31 = vpop.f32.mrf.mxu1 }
  0xad   : > { %v3350_v46 = vadd.f32 %v3349_v31, %v3301_v19  ;;  %3495 = vmatmul.bf16.vlgmr.msrb.gmra.mxu0 %v8697_v23 }
  0xae   : > { %3544 = vmatmul.bf16.vlgmr.msrb.gmra.mxu1 %v8699_v24 }
  0xaf   : > { %3593 = vmatmul.bf16.vlgmr.msrb.gmra.mxu2 %v9036_v16 }
  0xb0   : > { %3642 = vmatmul.bf16.vlgmr.msrb.gmra.mxu3 %v9039_v45 }
  0xb2   : > { %v3398_v1 = vpop.f32.mrf.mxu2  ;;  %v3302_v18 = vpop.f32.mrf.mxu0 }
  0xb3   : > { %v3399_v7 = vadd.f32 %v3398_v1, %v3350_v46  ;;  %v3447_v17 = vpop.f32.mrf.mxu3  ;;  %v3303_v19 = vadd.f32 %v3302_v18, %v9033_v15  ;;  %v3351_v31 = vpop.f32.mrf.mxu1  ;;  %v8090_v46 = vld [vmem:[%s13251_s1 + $0x4d4] sm:$0xf0] }
  0xb4   : > { %v7015_v54 = vor.u32 %v8090_v46, %v7014_v27  ;;  %v9088_v27 = vpack.c.b16 %v13258_v41, %v375_v2  ;;  %v8104_v2 = vld [vmem:[%s13251_s1 + $0x544] sm:$0xf0]  ;;  %v6942_v46 = vld [vmem:[%s13251_s1 + $0x440] sm:$0xf] }
  0xb5   : > { %v9067_v39 = vadd.f32 %v3447_v17, %v3399_v7  ;;  %v3352_v44 = vadd.f32 %v3351_v31, %v3303_v19  ;;  %v9081_v7 = vpack.c.b16 %v13259_v53, %v374_v42  ;;  %v7070_v42 = vld [vmem:[%s13251_s1 + $0x540] sm:$0xf] }
  0xb6   : > { %3734 = vmatpush.bf16.msra.mxu1 %v7015_v54  ;;  %13528 = vst [vmem:[#allocation37_spill] sm:$0xff] %v9088_v27  ;;  %v8072_v54 = vld [vmem:[%s13251_s1 + $0x444] sm:$0xf0] }
  0xb7   : > { %13527 = vst [vmem:[#allocation36_spill] sm:$0xff] %v9081_v7 }
  0xba   : > { %v3400_v63 = vpop.f32.mrf.mxu2  ;;  %v3305_v6 = vpop.f32.mrf.mxu0 }
  0xbb   : > { %v3401_v1 = vadd.f32 %v3400_v63, %v3352_v44  ;;  %v3449_v3 = vpop.f32.mrf.mxu3  ;;  %v3306_v17 = vadd.f32 %v3305_v6, %v9033_v15  ;;  %v3354_v18 = vpop.f32.mrf.mxu1  ;;  %v7071_v44 = vor.u32 %v8104_v2, %v7070_v42  ;;  %v7134_v63 = vld [vmem:[%s13251_s1 + $0x5c0] sm:$0xf]  ;;  %v6943_v6 = vor.u32 %v8072_v54, %v6942_v46 }
  0xbc   : > { %v7006_v46 = vld [vmem:[%s13251_s1 + $0x4c0] sm:$0xf] }
  0xbd   : > { %v9090_v19 = vadd.f32 %v3449_v3, %v3401_v1  ;;  %v3355_v31 = vadd.f32 %v3354_v18, %v3306_v17  ;;  %3500 = vmatmul.bf16.gmra.mxu0 %v8743_v48  ;;  %v8120_v1 = vld [vmem:[%s13251_s1 + $0x5c4] sm:$0xf0]  ;;  %3784 = vmatpush.bf16.msra.mxu2 %v7071_v44 }
  0xbe   : > { %3549 = vmatmul.bf16.gmra.mxu1 %v8745_v49  ;;  %v7135_v17 = vor.u32 %v8120_v1, %v7134_v63  ;;  %3686 = vmatpush.bf16.msra.mxu0 %v6943_v6  ;;  %v13265_v63 = vunpack.c.l.b16 %v9119_v9  ;;  %v13266_v1 = vunpack.c.h.b16 %v9116_v14 }
  0xbf   : > { %3598 = vmatmul.bf16.gmra.mxu2 %v9081_v7 }
  0xc0   : > { %3647 = vmatmul.bf16.gmra.mxu3 %v9088_v27 }
  0xc1   : > { %3833 = vmatpush.bf16.msra.mxu3 %v7135_v17 }
  0xc2   : > { %v3403_v3 = vpop.f32.mrf.mxu2  ;;  %v3307_v53 = vpop.f32.mrf.mxu0 }
  0xc3   : > { %v3404_v18 = vadd.f32 %v3403_v3, %v3355_v31  ;;  %v3452_v41 = vpop.f32.mrf.mxu3  ;;  %v3308_v42 = vadd.f32 %v3307_v53, %v9033_v15  ;;  %v3356_v2 = vpop.f32.mrf.mxu1  ;;  %v8088_v31 = vld [vmem:[%s13251_s1 + $0x4c4] sm:$0xf0]  ;;  %v13267_v53 = vunpack.c.l.b16 %v9116_v14  ;;  %v13264_v3 = vunpack.c.h.b16 %v9119_v9 }
  0xc4   : > { %v7007_v54 = vor.u32 %v8088_v31, %v7006_v46 }
  0xc5   : > { %v9121_v8 = vadd.f32 %v3452_v41, %v3404_v18  ;;  %v3357_v44 = vadd.f32 %v3356_v2, %v3308_v42  ;;  %v9137_v45 = vpack.c.b16 %v13265_v63, %v13267_v53  ;;  %v9144_v46 = vpack.c.b16 %v13264_v3, %v13266_v1 }
  0xc6   : > { %3735 = vmatpush.bf16.msra.mxu1 %v7007_v54  ;;  %v7062_v54 = vld [vmem:[%s13251_s1 + $0x530] sm:$0xf] }
  0xc7   : > { %13529 = vst [vmem:[#allocation38_spill] sm:$0xff] %v9137_v45 }
  0xc8   : > { %13530 = vst [vmem:[#allocation39_spill] sm:$0xff] %v9144_v46 }
  0xca   : > { %v3405_v41 = vpop.f32.mrf.mxu2  ;;  %v3310_v18 = vpop.f32.mrf.mxu0 }
  0xcb   : > { %v3406_v6 = vadd.f32 %v3405_v41, %v3357_v44  ;;  %v3454_v17 = vpop.f32.mrf.mxu3  ;;  %v3311_v42 = vadd.f32 %v3310_v18, %v9033_v15  ;;  %v3359_v2 = vpop.f32.mrf.mxu1  ;;  %v8102_v41 = vld [vmem:[%s13251_s1 + $0x534] sm:$0xf0] }
  0xcc   : > { %v8070_v18 = vld [vmem:[%s13251_s1 + $0x434] sm:$0xf0] }
  0xcd   : > { %v9146_v31 = vadd.f32 %v3454_v17, %v3406_v6  ;;  %v3360_v44 = vadd.f32 %v3359_v2, %v3311_v42  ;;  %3505 = vmatmul.bf16.gmra.mxu0 %v8789_v10  ;;  %v6934_v6 = vld [vmem:[%s13251_s1 + $0x430] sm:$0xf]  ;;  %v7063_v17 = vor.u32 %v8102_v41, %v7062_v54  ;;  %v8118_v2 = vld [vmem:[%s13251_s1 + $0x5b4] sm:$0xf0] }
  0xce   : > { %3554 = vmatmul.bf16.gmra.mxu1 %v8791_v11  ;;  %v7126_v42 = vld [vmem:[%s13251_s1 + $0x5b0] sm:$0xf]  ;;  %v6935_v63 = vor.u32 %v8070_v18, %v6934_v6  ;;  %v361_v18 = vunpack.c.h.b16 %v9171_v37 }
  0xcf   : > { %3603 = vmatmul.bf16.gmra.mxu2 %v9137_v45  ;;  %v7127_v1 = vor.u32 %v8118_v2, %v7126_v42  ;;  %v13531_v2 = vunpack.c.l.b16 %v8783_v5 }
  0xd0   : > { %3652 = vmatmul.bf16.gmra.mxu3 %v9144_v46  ;;  %3785 = vmatpush.bf16.msra.mxu2 %v7063_v17  ;;  %v9200_v0 = vpack.c.b16 %v361_v18, %v13533_v38  ;;  %v501_v18 = vrot.slane %v9021_v58, 4 }
  0xd1   : > { %3687 = vmatpush.bf16.msra.mxu0 %v6935_v63  ;;  %3834 = vmatpush.bf16.msra.mxu3 %v7127_v1  ;;  %v13278_v63 = vunpack.c.l.b16 %v9175_v28 }
  0xd2   : > { %v3408_v3 = vpop.f32.mrf.mxu2  ;;  %v3312_v30 = vpop.f32.mrf.mxu0  ;;  %13534 = vst [vmem:[#allocation41_spill] sm:$0xff] %v9200_v0 }
  0xd3   : > { %v3409_v53 = vadd.f32 %v3408_v3, %v3360_v44  ;;  %v3457_v16 = vpop.f32.mrf.mxu3  ;;  %v3313_v54 = vadd.f32 %v3312_v30, %v9033_v15  ;;  %v3361_v41 = vpop.f32.mrf.mxu1  ;;  %v6998_v3 = vld [vmem:[%s13251_s1 + $0x4b0] sm:$0xf]  ;;  %v8086_v44 = vld [vmem:[%s13251_s1 + $0x4b4] sm:$0xf0]  ;;  %v360_v30 = vunpack.c.l.b16 %v9171_v37 }
  0xd4   : > { %v6999_v17 = vor.u32 %v8086_v44, %v6998_v3 }
  0xd5   : > { %v9180_v40 = vadd.f32 %v3457_v16, %v3409_v53  ;;  %v3362_v6 = vadd.f32 %v3361_v41, %v3313_v54  ;;  %v13277_v16 = vunpack.c.l.b16 %v9178_v22  ;;  %v9196_v54 = vpack.c.b16 %v360_v30, %v13531_v2  ;;  %v275_v2 = vld [vmem:[%s8592_s26 + $0x8c] sm:$0xf] }
  0xd6   : > { %3736 = vmatpush.bf16.msra.mxu1 %v6999_v17  ;;  %v13537_v30 = vunpack.c.h.b16 %v9178_v22 }
  0xd7   : > { %13532 = vst [vmem:[#allocation40_spill] sm:$0xff] %v9196_v54  ;;  %v9206_v53 = vpack.c.b16 %v13277_v16, %v13278_v63  ;;  %v503_v16 = vrot.slane %v8933_v36, 4  ;;  %v504_v63 = vrot.slane %v275_v2, 4  ;;  %v6926_v36 = vld [vmem:[%s13251_s1 + $0x420] sm:$0xf] }
  0xd9   : > { %13535 = vst [vmem:[#allocation42_spill] sm:$0xff] %v9206_v53  ;;  %v9246_v13 = vsel %vm476_vm0, %v503_v16, %v504_v63 }
  0xda   : > { %v3410_v42 = vpop.f32.mrf.mxu2  ;;  %v3315_v44 = vpop.f32.mrf.mxu0  ;;  %v13286_v63 = vunpack.c.l.b16 %v9246_v13 }
  0xdb   : > { %v3411_v41 = vadd.f32 %v3410_v42, %v3362_v6  ;;  %v3459_v3 = vpop.f32.mrf.mxu3  ;;  %v3316_v17 = vadd.f32 %v3315_v44, %v9033_v15  ;;  %v3364_v1 = vpop.f32.mrf.mxu1  ;;  %v9213_v6 = vpack.c.b16 %v13537_v30, %v13536_v62  ;;  %v273_v42 = vld [vmem:[%s8592_s26 + $0x80] sm:$0xf] }
  0xdc   : > { %v502_v44 = vrot.slane %v273_v42, 4  ;;  %v7054_v62 = vld [vmem:[%s13251_s1 + $0x520] sm:$0xf] }
  0xdd   : > { %13538 = vst [vmem:[#allocation43_spill] sm:$0xff] %v9213_v6  ;;  %v9217_v5 = vadd.f32 %v3459_v3, %v3411_v41  ;;  %v3365_v38 = vadd.f32 %v3364_v1, %v3316_v17  ;;  %3510 = vmatmul.bf16.gmra.mxu0 %v9196_v54  ;;  %v8100_v1 = vld [vmem:[%s13251_s1 + $0x524] sm:$0xf0]  ;;  %v7118_v3 = vld [vmem:[%s13251_s1 + $0x5a0] sm:$0xf] }
  0xde   : > { %3559 = vmatmul.bf16.gmra.mxu1 %v9200_v0  ;;  %v7055_v58 = vor.u32 %v8100_v1, %v7054_v62  ;;  %v8068_v41 = vld [vmem:[%s13251_s1 + $0x424] sm:$0xf0]  ;;  %v517_v60 = vsel %vm476_vm0, %v501_v18, %v502_v44  ;;  %v13285_v44 = vunpack.c.h.b16 %v9246_v13 }
  0xdf   : > { %3608 = vmatmul.bf16.gmra.mxu2 %v9206_v53  ;;  %v8116_v17 = vld [vmem:[%s13251_s1 + $0x5a4] sm:$0xf0]  ;;  %v6927_v42 = vor.u32 %v8068_v41, %v6926_v36  ;;  %v6990_v36 = vld [vmem:[%s13251_s1 + $0x4a0] sm:$0xf]  ;;  %v633_v18 = vunpack.c.l.b16 %v517_v60  ;;  %v634_v16 = vunpack.c.h.b16 %v517_v60  ;;  %v279_v60 = vld [vmem:[%s8592_s26 + $0xa4] sm:$0xf] }
  0xe0   : > { %3657 = vmatmul.bf16.gmra.mxu3 %v9213_v6  ;;  %v7119_v2 = vor.u32 %v8116_v17, %v7118_v3  ;;  %3786 = vmatpush.bf16.msra.mxu2 %v7055_v58 }
  0xe1   : > { %3688 = vmatpush.bf16.msra.mxu0 %v6927_v42  ;;  %v9260_v17 = vpack.c.b16 %v13286_v63, %v633_v18  ;;  %v508_v18 = vrot.slane %v279_v60, 4 }
  0xe2   : > { %v3413_v30 = vpop.f32.mrf.mxu2  ;;  %v3317_v61 = vpop.f32.mrf.mxu0  ;;  %3835 = vmatpush.bf16.msra.mxu3 %v7119_v2  ;;  %v9265_v2 = vpack.c.b16 %v13285_v44, %v634_v16  ;;  %v7046_v16 = vld [vmem:[%s13251_s1 + $0x510] sm:$0xf] }
  0xe3   : > { %v3414_v0 = vadd.f32 %v3413_v30, %v3365_v38  ;;  %v3462_v54 = vpop.f32.mrf.mxu3  ;;  %v3318_v62 = vadd.f32 %v3317_v61, %v9033_v15  ;;  %v3366_v1 = vpop.f32.mrf.mxu1  ;;  %v8084_v38 = vld [vmem:[%s13251_s1 + $0x4a4] sm:$0xf0]  ;;  %13539 = vst [vmem:[#allocation44_spill] sm:$0xff] %v9260_v17 }
  0xe4   : > { %v6991_v58 = vor.u32 %v8084_v38, %v6990_v36  ;;  %13540 = vst [vmem:[#allocation45_spill] sm:$0xff] %v9265_v2  ;;  %v505_v38 = vrot.slane %v8941_v32, 4  ;;  %v6918_v32 = vld [vmem:[%s13251_s1 + $0x410] sm:$0xf] }
  0xe5   : > { %v9248_v12 = vadd.f32 %v3462_v54, %v3414_v0  ;;  %v3367_v61 = vadd.f32 %v3366_v1, %v3318_v62  ;;  %v277_v62 = vld [vmem:[%s8592_s26 + $0x98] sm:$0xf] }
  0xe6   : > { %3737 = vmatpush.bf16.msra.mxu1 %v6991_v58  ;;  %v506_v58 = vrot.slane %v277_v62, 4 }
  0xea   : > { %v3415_v0 = vpop.f32.mrf.mxu2  ;;  %v3320_v3 = vpop.f32.mrf.mxu0 }
  0xeb   : > { %v3416_v54 = vadd.f32 %v3415_v0, %v3367_v61  ;;  %v3464_v41 = vpop.f32.mrf.mxu3  ;;  %v3321_v30 = vadd.f32 %v3320_v3, %v9033_v15  ;;  %v3369_v42 = vpop.f32.mrf.mxu1  ;;  %v507_v61 = vrot.slane %v9065_v47, 4  ;;  %v8098_v0 = vld [vmem:[%s13251_s1 + $0x514] sm:$0xf0]  ;;  %v7110_v3 = vld [vmem:[%s13251_s1 + $0x590] sm:$0xf] }
  0xed   : > { %v9269_v1 = vadd.f32 %v3464_v41, %v3416_v54  ;;  %v3370_v36 = vadd.f32 %v3369_v42, %v3321_v30  ;;  %3515 = vmatmul.bf16.gmra.mxu0 %v8880_v33  ;;  %v7047_v54 = vor.u32 %v8098_v0, %v7046_v16  ;;  %v8066_v41 = vld [vmem:[%s13251_s1 + $0x414] sm:$0xf0] }
  0xee   : > { %3564 = vmatmul.bf16.gmra.mxu1 %v8882_v34  ;;  %v8114_v30 = vld [vmem:[%s13251_s1 + $0x594] sm:$0xf0]  ;;  %v6919_v62 = vor.u32 %v8066_v41, %v6918_v32  ;;  %v9300_v34 = vsel %vm476_vm0, %v507_v61, %v508_v18 }
  0xef   : > { %3613 = vmatmul.bf16.gmra.mxu2 %v9260_v17  ;;  %v7111_v60 = vor.u32 %v8114_v30, %v7110_v3  ;;  %v9297_v17 = vsel %vm476_vm0, %v505_v38, %v506_v58  ;;  %v8082_v32 = vld [vmem:[%s13251_s1 + $0x494] sm:$0xf0]  ;;  %v13294_v61 = vunpack.c.l.b16 %v9300_v34 }
  0xf0   : > { %3662 = vmatmul.bf16.gmra.mxu3 %v9265_v2  ;;  %3787 = vmatpush.bf16.msra.mxu2 %v7047_v54  ;;  %v13296_v58 = vunpack.c.l.b16 %v9297_v17  ;;  %v13295_v18 = vunpack.c.h.b16 %v9297_v17 }
  0xf1   : > { %3689 = vmatpush.bf16.msra.mxu0 %v6919_v62  ;;  %3836 = vmatpush.bf16.msra.mxu3 %v7111_v60 }
  0xf2   : > { %v3418_v42 = vpop.f32.mrf.mxu2  ;;  %v3322_v2 = vpop.f32.mrf.mxu0  ;;  %v9318_v30 = vpack.c.b16 %v13294_v61, %v13296_v58 }
  0xf3   : > { %v3419_v44 = vadd.f32 %v3418_v42, %v3370_v36  ;;  %v3467_v63 = vpop.f32.mrf.mxu3  ;;  %v3323_v16 = vadd.f32 %v3322_v2, %v9033_v15  ;;  %v3371_v0 = vpop.f32.mrf.mxu1  ;;  %v6982_v36 = vld [vmem:[%s13251_s1 + $0x490] sm:$0xf] }
  0xf4   : > { %v6983_v38 = vor.u32 %v8082_v32, %v6982_v36  ;;  %13541 = vst [vmem:[#allocation46_spill] sm:$0xff] %v9318_v30 }
  0xf5   : > { %v9302_v33 = vadd.f32 %v3467_v63, %v3419_v44  ;;  %v3372_v2 = vadd.f32 %v3371_v0, %v3323_v16  ;;  %v13293_v63 = vunpack.c.h.b16 %v9300_v34  ;;  %v281_v16 = vld [vmem:[%s8592_s26 + $0xb0] sm:$0xf]  ;;  %v283_v0 = vld [vmem:[%s8592_s26 + $0xbc] sm:$0xf] }
  0xf6   : > { %3738 = vmatpush.bf16.msra.mxu1 %v6983_v38  ;;  %v511_v38 = vrot.slane %v9119_v9, 4 }
  0xf7   : > { %v9325_v60 = vpack.c.b16 %v13293_v63, %v13295_v18  ;;  %v8112_v63 = vld [vmem:[%s13251_s1 + $0x584] sm:$0xf0] }
  0xf9   : > { %13542 = vst [vmem:[#allocation47_spill] sm:$0xff] %v9325_v60 }
  0xfa   : > { %v3420_v44 = vpop.f32.mrf.mxu2  ;;  %v3325_v3 = vpop.f32.mrf.mxu0 }
  0xfb   : > { %v3421_v54 = vadd.f32 %v3420_v44, %v3372_v2  ;;  %v3469_v41 = vpop.f32.mrf.mxu3  ;;  %v3326_v42 = vadd.f32 %v3325_v3, %v9033_v15  ;;  %v3374_v62 = vpop.f32.mrf.mxu1  ;;  %v509_v2 = vrot.slane %v9116_v14, 4  ;;  %v510_v44 = vrot.slane %v281_v16, 4  ;;  %v8064_v16 = vld [vmem:[%s13251_s1 + $0x404] sm:$0xf0] }
  0xfc   : > { %v512_v3 = vrot.slane %v283_v0, 4  ;;  %v7102_v0 = vld [vmem:[%s13251_s1 + $0x580] sm:$0xf] }
  0xfd   : > { %v9329_v36 = vadd.f32 %v3469_v41, %v3421_v54  ;;  %v3375_v32 = vadd.f32 %v3374_v62, %v3326_v42  ;;  %3520 = vmatmul.bf16.gmra.mxu0 %v8922_v20  ;;  %v7038_v54 = vld [vmem:[%s13251_s1 + $0x500] sm:$0xf]  ;;  %v8096_v41 = vld [vmem:[%s13251_s1 + $0x504] sm:$0xf0]  ;;  %v7103_v58 = vor.u32 %v8112_v63, %v7102_v0  ;;  %v9357_v10 = vsel %vm476_vm0, %v509_v2, %v510_v44 }
  0xfe   : > { %3569 = vmatmul.bf16.gmra.mxu1 %v8924_v21  ;;  %v6910_v42 = vld [vmem:[%s13251_s1 + $0x400] sm:$0xf]  ;;  %v7039_v62 = vor.u32 %v8096_v41, %v7038_v54  ;;  %v9360_v51 = vsel %vm476_vm0, %v511_v38, %v512_v3  ;;  %v8080_v63 = vld [vmem:[%s13251_s1 + $0x484] sm:$0xf0]  ;;  %v13310_v2 = vunpack.c.l.b16 %v9357_v10 }
  0xff   : > { %3618 = vmatmul.bf16.gmra.mxu2 %v9318_v30  ;;  %v6911_v18 = vor.u32 %v8064_v16, %v6910_v42  ;;  %3837 = vmatpush.bf16.msra.mxu3 %v7103_v58 }
 0x100   : > { %3667 = vmatmul.bf16.gmra.mxu3 %v9325_v60  ;;  %3788 = vmatpush.bf16.msra.mxu2 %v7039_v62 }
 0x101   : > { %3690 = vmatpush.bf16.msra.mxu0 %v6911_v18  ;;  %v13308_v18 = vunpack.c.l.b16 %v9360_v51 }
 0x102   : > { %v3423_v61 = vpop.f32.mrf.mxu2  ;;  %v3327_v11 = vpop.f32.mrf.mxu0 }
 0x103   : > { %v3424_v21 = vadd.f32 %v3423_v61, %v3375_v32  ;;  %v3472_v20 = vpop.f32.mrf.mxu3  ;;  %v3328_v54 = vadd.f32 %v3327_v11, %v9033_v15  ;;  %v3376_v41 = vpop.f32.mrf.mxu1  ;;  %v6974_v61 = vld [vmem:[%s13251_s1 + $0x480] sm:$0xf]  ;;  %v9378_v42 = vpack.c.b16 %v13308_v18, %v13310_v2 }
 0x104   : > { %v6975_v32 = vor.u32 %v8080_v63, %v6974_v61  ;;  %v287_v61 = vld [vmem:[%s8592_s26 + $0xd4] sm:$0xf] }
 0x105   : > { %v9362_v50 = vadd.f32 %v3472_v20, %v3424_v21  ;;  %v3377_v11 = vadd.f32 %v3376_v41, %v3328_v54  ;;  %v13309_v20 = vunpack.c.h.b16 %v9357_v10  ;;  %v13307_v21 = vunpack.c.h.b16 %v9360_v51  ;;  %13543 = vst [vmem:[#allocation48_spill] sm:$0xff] %v9378_v42  ;;  %v271_v54 = vld [vmem:[%s8592_s26 + $0x74] sm:$0xf]  ;;  %v285_v41 = vld [vmem:[%s8592_s26 + $0xc8] sm:$0xf] }
 0x106   : > { %3739 = vmatpush.bf16.msra.mxu1 %v6975_v32  ;;  %v513_v32 = vrot.slane %v9175_v28, 4  ;;  %v514_v18 = vrot.slane %v285_v41, 4  ;;  %v8190_v41 = vld [vmem:[%s13251_s1 + $0x7f4] sm:$0xf0] }
 0x107   : > { %v9385_v0 = vpack.c.b16 %v13307_v21, %v13309_v20  ;;  %v491_v21 = vrot.slane %v271_v54, 4  ;;  %v516_v20 = vrot.slane %v287_v61, 4  ;;  %v7414_v54 = vld [vmem:[%s13251_s1 + $0x7f0] sm:$0xf] }
 0x108   : > { %v9420_v25 = vsel %vm476_vm0, %v513_v32, %v514_v18 }
 0x109   : > { %13544 = vst [vmem:[#allocation49_spill] sm:$0xff] %v9385_v0  ;;  %v13328_v32 = vunpack.c.l.b16 %v9420_v25 }
 0x10a   : > { %v3425_v58 = vpop.f32.mrf.mxu2  ;;  %v3330_v3 = vpop.f32.mrf.mxu0 }
 0x10b   : > { %v3426_v38 = vadd.f32 %v3425_v58, %v3377_v11  ;;  %v3474_v44 = vpop.f32.mrf.mxu3  ;;  %v3331_v62 = vadd.f32 %v3330_v3, %v9033_v15  ;;  %v3379_v16 = vpop.f32.mrf.mxu1  ;;  %v490_v11 = vrot.slane %v9171_v37, 4  ;;  %v515_v3 = vrot.slane %v9178_v22, 4  ;;  %v7350_v37 = vld [vmem:[%s13251_s1 + $0x770] sm:$0xf] }
 0x10d   : > { %v9390_v63 = vadd.f32 %v3474_v44, %v3426_v38  ;;  %v3380_v58 = vadd.f32 %v3379_v16, %v3331_v62  ;;  %3525 = vmatmul.bf16.gmra.mxu0 %v8986_v35  ;;  %v8174_v38 = vld [vmem:[%s13251_s1 + $0x774] sm:$0xf0]  ;;  %v7222_v44 = vld [vmem:[%s13251_s1 + $0x670] sm:$0xf]  ;;  %v9423_v24 = vsel %vm476_vm0, %v515_v3, %v516_v20 }
 0x10e   : > { %3574 = vmatmul.bf16.gmra.mxu1 %v8988_v29  ;;  %v7351_v62 = vor.u32 %v8174_v38, %v7350_v37  ;;  %v8142_v16 = vld [vmem:[%s13251_s1 + $0x674] sm:$0xf0]  ;;  %v7415_v29 = vor.u32 %v8190_v41, %v7414_v54  ;;  %v492_v37 = vsel %vm476_vm0, %v490_v11, %v491_v21  ;;  %v13326_v20 = vunpack.c.l.b16 %v9423_v24 }
 0x10f   : > { %3623 = vmatmul.bf16.gmra.mxu2 %v9378_v42  ;;  %v7223_v2 = vor.u32 %v8142_v16, %v7222_v44  ;;  %v8158_v21 = vld [vmem:[%s13251_s1 + $0x6f4] sm:$0xf0]  ;;  %v631_v11 = vunpack.c.l.b16 %v492_v37  ;;  %v632_v18 = vunpack.c.h.b16 %v492_v37  ;;  %v13547_v54 = vunpack.c.h.b16 %v8976_v4 }
 0x110   : > { %3672 = vmatmul.bf16.gmra.mxu3 %v9385_v0  ;;  %3977 = vmatpush.bf16.msrb.mxu2 %v7351_v62 }
 0x111   : > { %3879 = vmatpush.bf16.msrb.mxu0 %v7223_v2  ;;  %4026 = vmatpush.bf16.msrb.mxu3 %v7415_v29  ;;  %v13327_v29 = vunpack.c.h.b16 %v9420_v25  ;;  %v13545_v2 = vunpack.c.l.b16 %v8976_v4  ;;  %v9443_v41 = vpack.c.b16 %v632_v18, %v13547_v54 }
 0x112   : > { %v3428_v61 = vpop.f32.mrf.mxu2  ;;  %v3332_v48 = vpop.f32.mrf.mxu0 }
 0x113   : > { %v3429_v35 = vadd.f32 %v3428_v61, %v3380_v58  ;;  %v3477_v49 = vpop.f32.mrf.mxu3  ;;  %v3333_v38 = vadd.f32 %v3332_v48, %v9033_v15  ;;  %v3381_v26 = vpop.f32.mrf.mxu1  ;;  %v7286_v58 = vld [vmem:[%s13251_s1 + $0x6f0] sm:$0xf]  ;;  %v9439_v3 = vpack.c.b16 %v631_v11, %v13545_v2  ;;  %13548 = vst [vmem:[#allocation51_spill] sm:$0xff] %v9443_v41  ;;  %v9449_v61 = vpack.c.b16 %v13326_v20, %v13328_v32  ;;  %v8172_v11 = vld [vmem:[%s13251_s1 + $0x764] sm:$0xf0] }
 0x114   : > { %v7287_v44 = vor.u32 %v8158_v21, %v7286_v58  ;;  %v7406_v2 = vld [vmem:[%s13251_s1 + $0x7e0] sm:$0xf] }
 0x115   : > { %v9425_v23 = vadd.f32 %v3477_v49, %v3429_v35  ;;  %v3382_v48 = vadd.f32 %v3381_v26, %v3333_v38  ;;  %v13325_v49 = vunpack.c.h.b16 %v9423_v24  ;;  %13546 = vst [vmem:[#allocation50_spill] sm:$0xff] %v9439_v3 }
 0x116   : > { %3928 = vmatpush.bf16.msrb.mxu1 %v7287_v44  ;;  %13549 = vst [vmem:[#allocation52_spill] sm:$0xff] %v9449_v61  ;;  %v7214_v44 = vld [vmem:[%s13251_s1 + $0x660] sm:$0xf] }
 0x117   : > { %v9456_v58 = vpack.c.b16 %v13325_v49, %v13327_v29  ;;  %v7278_v29 = vld [vmem:[%s13251_s1 + $0x6e0] sm:$0xf] }
 0x119   : > { %13550 = vst [vmem:[#allocation53_spill] sm:$0xff] %v9456_v58 }
 0x11a   : > { %v3430_v35 = vpop.f32.mrf.mxu2  ;;  %v3335_v26 = vpop.f32.mrf.mxu0 }
 0x11b   : > { %v3431_v62 = vadd.f32 %v3430_v35, %v3382_v48  ;;  %v3479_v16 = vpop.f32.mrf.mxu3  ;;  %v3336_v37 = vadd.f32 %v3335_v26, %v9033_v15  ;;  %v3384_v38 = vpop.f32.mrf.mxu1  ;;  %v7342_v48 = vld [vmem:[%s13251_s1 + $0x760] sm:$0xf]  ;;  %v8140_v35 = vld [vmem:[%s13251_s1 + $0x664] sm:$0xf0] }
 0x11c   : > { %v7343_v18 = vor.u32 %v8172_v11, %v7342_v48  ;;  %v7215_v26 = vor.u32 %v8140_v35, %v7214_v44  ;;  %v8156_v44 = vld [vmem:[%s13251_s1 + $0x6e4] sm:$0xf0] }
 0x11d   : > { %v9458_v21 = vadd.f32 %v3479_v16, %v3431_v62  ;;  %v3385_v4 = vadd.f32 %v3384_v38, %v3336_v37  ;;  %3530 = vmatmul.bf16.gmra.mxu0 %v9439_v3  ;;  %v8188_v62 = vld [vmem:[%s13251_s1 + $0x7e4] sm:$0xf0] }
 0x11e   : > { %3579 = vmatmul.bf16.gmra.mxu1 %v9443_v41  ;;  %v7407_v54 = vor.u32 %v8188_v62, %v7406_v2  ;;  %3978 = vmatpush.bf16.msrb.mxu2 %v7343_v18 }
 0x11f   : > { %3628 = vmatmul.bf16.gmra.mxu2 %v9449_v61  ;;  %3880 = vmatpush.bf16.msrb.mxu0 %v7215_v26 }
 0x120   : > { %3677 = vmatmul.bf16.gmra.mxu3 %v9456_v58 }
 0x121   : > { %4027 = vmatpush.bf16.msrb.mxu3 %v7407_v54 }
 0x122   : > { %v3433_v16 = vpop.f32.mrf.mxu2  ;;  %v3337_v49 = vpop.f32.mrf.mxu0 }
 0x123   : > { %v3434_v37 = vadd.f32 %v3433_v16, %v3385_v4  ;;  %v3482_v38 = vpop.f32.mrf.mxu3  ;;  %v3338_v48 = vadd.f32 %v3337_v49, %v9033_v15  ;;  %v3386_v11 = vpop.f32.mrf.mxu1  ;;  %v7279_v4 = vor.u32 %v8156_v44, %v7278_v29  ;;  %v7334_v29 = vld [vmem:[%s13251_s1 + $0x750] sm:$0xf]  ;;  %v8186_v44 = vld [vmem:[%s13251_s1 + $0x7d4] sm:$0xf0] }
 0x125   : > { %v9483_v20 = vadd.f32 %v3482_v38, %v3434_v37  ;;  %v3387_v35 = vadd.f32 %v3386_v11, %v3338_v48  ;;  %3929 = vmatpush.bf16.msrb.mxu1 %v7279_v4  ;;  %v7206_v37 = vld [vmem:[%s13251_s1 + $0x650] sm:$0xf]  ;;  %v8138_v48 = vld [vmem:[%s13251_s1 + $0x654] sm:$0xf0] }
 0x126   : > { %v7398_v11 = vld [vmem:[%s13251_s1 + $0x7d0] sm:$0xf]  ;;  %v7207_v4 = vor.u32 %v8138_v48, %v7206_v37  ;;  %v8154_v37 = vld [vmem:[%s13251_s1 + $0x6d4] sm:$0xf0] }
 0x128   : > { %3881 = vmatpush.bf16.msrb.mxu0 %v7207_v4 }
 0x12a   : > { %v3435_v2 = vpop.f32.mrf.mxu2  ;;  %v3496_v15 = vpop.f32.mrf.mxu0 }
 0x12b   : > { %v3436_v18 = vadd.f32 %v3435_v2, %v3387_v35  ;;  %v3484_v62 = vpop.f32.mrf.mxu3  ;;  %v3497_v49 = vadd.f32 %v3496_v15, %v9067_v39  ;;  %v3545_v16 = vpop.f32.mrf.mxu1  ;;  %v8170_v39 = vld [vmem:[%s13251_s1 + $0x754] sm:$0xf0]  ;;  %v7399_v2 = vor.u32 %v8186_v44, %v7398_v11 }
 0x12c   : > { %v7335_v38 = vor.u32 %v8170_v39, %v7334_v29  ;;  %v7270_v39 = vld [vmem:[%s13251_s1 + $0x6d0] sm:$0xf] }
 0x12d   : > { %v9492_v26 = vadd.f32 %v3484_v62, %v3436_v18  ;;  %v3546_v54 = vadd.f32 %v3545_v16, %v3497_v49  ;;  %3691 = vmatmul.bf16.vlgmr.msra.gmra.mxu0 %v8965_v43  ;;  %4028 = vmatpush.bf16.msrb.mxu3 %v7399_v2 }
 0x12e   : > { %3740 = vmatmul.bf16.vlgmr.msra.gmra.mxu1 %v8969_v55  ;;  %3979 = vmatpush.bf16.msrb.mxu2 %v7335_v38  ;;  %v13551_v38 = vunpack.c.l.b16 %v9065_v47 }
 0x12f   : > { %3789 = vmatmul.bf16.vlgmr.msra.gmra.mxu2 %v9081_v7 }
 0x130   : > { %3838 = vmatmul.bf16.vlgmr.msra.gmra.mxu3 %v9088_v27 }
 0x132   : > { %v3594_v35 = vpop.f32.mrf.mxu2  ;;  %v3498_v15 = vpop.f32.mrf.mxu0 }
 0x133   : > { %v3595_v18 = vadd.f32 %v3594_v35, %v3546_v54  ;;  %v3643_v62 = vpop.f32.mrf.mxu3  ;;  %v3499_v49 = vadd.f32 %v3498_v15, %v9090_v19  ;;  %v3547_v16 = vpop.f32.mrf.mxu1  ;;  %v7271_v54 = vor.u32 %v8154_v37, %v7270_v39  ;;  %v13552_v19 = vunpack.c.l.b16 %v9116_v14 }
 0x135   : > { %v9517_v29 = vadd.f32 %v3643_v62, %v3595_v18  ;;  %v3548_v48 = vadd.f32 %v3547_v16, %v3499_v49  ;;  %3930 = vmatpush.bf16.msrb.mxu1 %v7271_v54  ;;  %v9529_v44 = vpack.c.b16 %v13552_v19, %v13551_v38  ;;  %v13554_v18 = vunpack.c.h.b16 %v9065_v47  ;;  %v7198_v47 = vld [vmem:[%s13251_s1 + $0x640] sm:$0xf]  ;;  %v8136_v54 = vld [vmem:[%s13251_s1 + $0x644] sm:$0xf0] }
 0x136   : > { %v13555_v62 = vunpack.c.h.b16 %v9116_v14  ;;  %v7326_v14 = vld [vmem:[%s13251_s1 + $0x740] sm:$0xf]  ;;  %v8184_v38 = vld [vmem:[%s13251_s1 + $0x7c4] sm:$0xf0] }
 0x137   : > { %13553 = vst [vmem:[#allocation54_spill] sm:$0xff] %v9529_v44 }
 0x138   : > { %v9535_v15 = vpack.c.b16 %v13555_v62, %v13554_v18 }
 0x13a   : > { %v3596_v11 = vpop.f32.mrf.mxu2  ;;  %v3501_v2 = vpop.f32.mrf.mxu0  ;;  %13556 = vst [vmem:[#allocation55_spill] sm:$0xff] %v9535_v15 }
 0x13b   : > { %v3597_v35 = vadd.f32 %v3596_v11, %v3548_v48  ;;  %v3645_v4 = vpop.f32.mrf.mxu3  ;;  %v3502_v49 = vadd.f32 %v3501_v2, %v9121_v8  ;;  %v3550_v16 = vpop.f32.mrf.mxu1  ;;  %v8168_v8 = vld [vmem:[%s13251_s1 + $0x744] sm:$0xf0]  ;;  %v7390_v11 = vld [vmem:[%s13251_s1 + $0x7c0] sm:$0xf] }
 0x13c   : > { %v7327_v48 = vor.u32 %v8168_v8, %v7326_v14  ;;  %v7262_v8 = vld [vmem:[%s13251_s1 + $0x6c0] sm:$0xf] }
 0x13d   : > { %v9538_v39 = vadd.f32 %v3645_v4, %v3597_v35  ;;  %v3551_v37 = vadd.f32 %v3550_v16, %v3502_v49  ;;  %3696 = vmatmul.bf16.gmra.mxu0 %v9529_v44  ;;  %v7199_v35 = vor.u32 %v8136_v54, %v7198_v47  ;;  %v7391_v4 = vor.u32 %v8184_v38, %v7390_v11  ;;  %v8152_v47 = vld [vmem:[%s13251_s1 + $0x6c4] sm:$0xf0] }
 0x13e   : > { %3745 = vmatmul.bf16.gmra.mxu1 %v9535_v15  ;;  %3980 = vmatpush.bf16.msrb.mxu2 %v7327_v48  ;;  %v13557_v48 = vunpack.c.l.b16 %v9119_v9 }
 0x13f   : > { %3794 = vmatmul.bf16.gmra.mxu2 %v9137_v45  ;;  %3882 = vmatpush.bf16.msrb.mxu0 %v7199_v35 }
 0x140   : > { %3843 = vmatmul.bf16.gmra.mxu3 %v9144_v46 }
 0x141   : > { %4029 = vmatpush.bf16.msrb.mxu3 %v7391_v4 }
 0x142   : > { %v3599_v19 = vpop.f32.mrf.mxu2  ;;  %v3503_v62 = vpop.f32.mrf.mxu0 }
 0x143   : > { %v3600_v2 = vadd.f32 %v3599_v19, %v3551_v37  ;;  %v3648_v18 = vpop.f32.mrf.mxu3  ;;  %v3504_v49 = vadd.f32 %v3503_v62, %v9146_v31  ;;  %v3552_v16 = vpop.f32.mrf.mxu1  ;;  %v7263_v37 = vor.u32 %v8152_v47, %v7262_v8  ;;  %v13558_v31 = vunpack.c.l.b16 %v9175_v28 }
 0x145   : > { %v9563_v14 = vadd.f32 %v3648_v18, %v3600_v2  ;;  %v3553_v54 = vadd.f32 %v3552_v16, %v3504_v49  ;;  %3931 = vmatpush.bf16.msrb.mxu1 %v7263_v37  ;;  %v9575_v38 = vpack.c.b16 %v13558_v31, %v13557_v48  ;;  %v13560_v2 = vunpack.c.h.b16 %v9119_v9  ;;  %v7318_v9 = vld [vmem:[%s13251_s1 + $0x730] sm:$0xf]  ;;  %v8134_v37 = vld [vmem:[%s13251_s1 + $0x634] sm:$0xf0] }
 0x146   : > { %v13561_v18 = vunpack.c.h.b16 %v9175_v28  ;;  %v7190_v28 = vld [vmem:[%s13251_s1 + $0x630] sm:$0xf]  ;;  %v8182_v48 = vld [vmem:[%s13251_s1 + $0x7b4] sm:$0xf0] }
 0x147   : > { %13559 = vst [vmem:[#allocation56_spill] sm:$0xff] %v9575_v38 }
 0x148   : > { %v9581_v62 = vpack.c.b16 %v13561_v18, %v13560_v2 }
 0x14a   : > { %v3601_v11 = vpop.f32.mrf.mxu2  ;;  %v3506_v4 = vpop.f32.mrf.mxu0  ;;  %13562 = vst [vmem:[#allocation57_spill] sm:$0xff] %v9581_v62 }
 0x14b   : > { %v3602_v19 = vadd.f32 %v3601_v11, %v3553_v54  ;;  %v3650_v35 = vpop.f32.mrf.mxu3  ;;  %v3507_v49 = vadd.f32 %v3506_v4, %v9180_v40  ;;  %v3555_v16 = vpop.f32.mrf.mxu1  ;;  %v8166_v40 = vld [vmem:[%s13251_s1 + $0x734] sm:$0xf0]  ;;  %v7382_v11 = vld [vmem:[%s13251_s1 + $0x7b0] sm:$0xf] }
 0x14c   : > { %v7319_v54 = vor.u32 %v8166_v40, %v7318_v9  ;;  %v9613_v40 = vld [vmem:[%s8592_s26 + $0xe4] sm:$0xff] }
 0x14d   : > { %v9584_v8 = vadd.f32 %v3650_v35, %v3602_v19  ;;  %v3556_v47 = vadd.f32 %v3555_v16, %v3507_v49  ;;  %3701 = vmatmul.bf16.gmra.mxu0 %v9575_v38  ;;  %v7191_v19 = vor.u32 %v8134_v37, %v7190_v28  ;;  %v7383_v35 = vor.u32 %v8182_v48, %v7382_v11  ;;  %v9609_v49 = vld [vmem:[%s8592_s26 + $0xd8] sm:$0xff]  ;;  %v7254_v28 = vld [vmem:[%s13251_s1 + $0x6b0] sm:$0xf] }
 0x14e   : > { %3750 = vmatmul.bf16.gmra.mxu1 %v9581_v62  ;;  %3981 = vmatpush.bf16.msrb.mxu2 %v7319_v54  ;;  %v387_v54 = vunpack.c.l.b16 %v9609_v49  ;;  %v390_v48 = vunpack.c.l.b16 %v9613_v40 }
 0x14f   : > { %3799 = vmatmul.bf16.gmra.mxu2 %v9206_v53  ;;  %3883 = vmatpush.bf16.msrb.mxu0 %v7191_v19 }
 0x150   : > { %3848 = vmatmul.bf16.gmra.mxu3 %v9213_v6 }
 0x151   : > { %4030 = vmatpush.bf16.msrb.mxu3 %v7383_v35  ;;  %v13563_v35 = vunpack.c.l.b16 %v9178_v22 }
 0x152   : > { %v3604_v31 = vpop.f32.mrf.mxu2  ;;  %v3508_v18 = vpop.f32.mrf.mxu0 }
 0x153   : > { %v3605_v4 = vadd.f32 %v3604_v31, %v3556_v47  ;;  %v3653_v2 = vpop.f32.mrf.mxu3  ;;  %v3509_v16 = vadd.f32 %v3508_v18, %v9217_v5  ;;  %v3557_v9 = vpop.f32.mrf.mxu1  ;;  %v8150_v47 = vld [vmem:[%s13251_s1 + $0x6b4] sm:$0xf0]  ;;  %v388_v5 = vunpack.c.h.b16 %v9609_v49  ;;  %v391_v31 = vunpack.c.h.b16 %v9613_v40 }
 0x154   : > { %v7255_v11 = vor.u32 %v8150_v47, %v7254_v28  ;;  %v9635_v28 = vpack.c.b16 %v390_v48, %v387_v54 }
 0x155   : > { %v9615_v32 = vadd.f32 %v3653_v2, %v3605_v4  ;;  %v3558_v37 = vadd.f32 %v3557_v9, %v3509_v16  ;;  %v9629_v4 = vpack.c.b16 %v387_v54, %v13563_v35  ;;  %v13565_v16 = vunpack.c.h.b16 %v9178_v22  ;;  %v7310_v22 = vld [vmem:[%s13251_s1 + $0x720] sm:$0xf] }
 0x156   : > { %3932 = vmatpush.bf16.msrb.mxu1 %v7255_v11  ;;  %13567 = vst [vmem:[#allocation60_spill] sm:$0xff] %v9635_v28  ;;  %v9638_v15 = vpack.c.b16 %v391_v31, %v388_v5  ;;  %v7374_v54 = vld [vmem:[%s13251_s1 + $0x7a0] sm:$0xf] }
 0x157   : > { %13564 = vst [vmem:[#allocation58_spill] sm:$0xff] %v9629_v4  ;;  %v9633_v9 = vpack.c.b16 %v388_v5, %v13565_v16  ;;  %v8180_v5 = vld [vmem:[%s13251_s1 + $0x7a4] sm:$0xf0] }
 0x158   : > { %13568 = vst [vmem:[#allocation61_spill] sm:$0xff] %v9638_v15 }
 0x159   : > { %13566 = vst [vmem:[#allocation59_spill] sm:$0xff] %v9633_v9 }
 0x15a   : > { %v3606_v19 = vpop.f32.mrf.mxu2  ;;  %v3511_v62 = vpop.f32.mrf.mxu0 }
 0x15b   : > { %v3607_v2 = vadd.f32 %v3606_v19, %v3558_v37  ;;  %v3655_v18 = vpop.f32.mrf.mxu3  ;;  %v3512_v47 = vadd.f32 %v3511_v62, %v9248_v12  ;;  %v3560_v38 = vpop.f32.mrf.mxu1  ;;  %v8164_v12 = vld [vmem:[%s13251_s1 + $0x724] sm:$0xf0]  ;;  %v7375_v19 = vor.u32 %v8180_v5, %v7374_v54 }
 0x15c   : > { %v7311_v62 = vor.u32 %v8164_v12, %v7310_v22  ;;  %v8132_v37 = vld [vmem:[%s13251_s1 + $0x624] sm:$0xf0]  ;;  %v7246_v12 = vld [vmem:[%s13251_s1 + $0x6a0] sm:$0xf] }
 0x15d   : > { %v9640_v11 = vadd.f32 %v3655_v18, %v3607_v2  ;;  %v3561_v44 = vadd.f32 %v3560_v38, %v3512_v47  ;;  %3706 = vmatmul.bf16.gmra.mxu0 %v9629_v4  ;;  %v7182_v38 = vld [vmem:[%s13251_s1 + $0x620] sm:$0xf]  ;;  %4031 = vmatpush.bf16.msrb.mxu3 %v7375_v19 }
 0x15e   : > { %3755 = vmatmul.bf16.gmra.mxu1 %v9633_v9  ;;  %v7183_v31 = vor.u32 %v8132_v37, %v7182_v38  ;;  %3982 = vmatpush.bf16.msrb.mxu2 %v7311_v62  ;;  %v8148_v38 = vld [vmem:[%s13251_s1 + $0x6a4] sm:$0xf0]  ;;  %v13569_v62 = vunpack.c.l.b16 %v9246_v13 }
 0x15f   : > { %3804 = vmatmul.bf16.gmra.mxu2 %v9635_v28 }
 0x160   : > { %3853 = vmatmul.bf16.gmra.mxu3 %v9638_v15  ;;  %3884 = vmatpush.bf16.msrb.mxu0 %v7183_v31 }
 0x162   : > { %v3609_v48 = vpop.f32.mrf.mxu2  ;;  %v3513_v18 = vpop.f32.mrf.mxu0 }
 0x163   : > { %v3610_v35 = vadd.f32 %v3609_v48, %v3561_v44  ;;  %v3658_v2 = vpop.f32.mrf.mxu3  ;;  %v3514_v16 = vadd.f32 %v3513_v18, %v9269_v1  ;;  %v3562_v47 = vpop.f32.mrf.mxu1  ;;  %v7247_v44 = vor.u32 %v8148_v38, %v7246_v12  ;;  %v13570_v1 = vunpack.c.l.b16 %v9297_v17 }
 0x165   : > { %v9665_v22 = vadd.f32 %v3658_v2, %v3610_v35  ;;  %v3563_v37 = vadd.f32 %v3562_v47, %v3514_v16  ;;  %3933 = vmatpush.bf16.msrb.mxu1 %v7247_v44  ;;  %v9677_v5 = vpack.c.b16 %v13570_v1, %v13569_v62  ;;  %v13572_v35 = vunpack.c.h.b16 %v9246_v13  ;;  %v7302_v13 = vld [vmem:[%s13251_s1 + $0x710] sm:$0xf]  ;;  %v8130_v44 = vld [vmem:[%s13251_s1 + $0x614] sm:$0xf0] }
 0x166   : > { %v13573_v2 = vunpack.c.h.b16 %v9297_v17  ;;  %v7174_v17 = vld [vmem:[%s13251_s1 + $0x610] sm:$0xf]  ;;  %v8178_v62 = vld [vmem:[%s13251_s1 + $0x794] sm:$0xf0] }
 0x167   : > { %13571 = vst [vmem:[#allocation62_spill] sm:$0xff] %v9677_v5 }
 0x168   : > { %v9683_v18 = vpack.c.b16 %v13573_v2, %v13572_v35 }
 0x16a   : > { %v3611_v54 = vpop.f32.mrf.mxu2  ;;  %v3516_v19 = vpop.f32.mrf.mxu0  ;;  %13574 = vst [vmem:[#allocation63_spill] sm:$0xff] %v9683_v18 }
 0x16b   : > { %v3612_v48 = vadd.f32 %v3611_v54, %v3563_v37  ;;  %v3660_v31 = vpop.f32.mrf.mxu3  ;;  %v3517_v16 = vadd.f32 %v3516_v19, %v9302_v33  ;;  %v3565_v47 = vpop.f32.mrf.mxu1  ;;  %v8162_v33 = vld [vmem:[%s13251_s1 + $0x714] sm:$0xf0]  ;;  %v7366_v54 = vld [vmem:[%s13251_s1 + $0x790] sm:$0xf] }
 0x16c   : > { %v7303_v37 = vor.u32 %v8162_v33, %v7302_v13  ;;  %v7238_v33 = vld [vmem:[%s13251_s1 + $0x690] sm:$0xf] }
 0x16d   : > { %v9686_v12 = vadd.f32 %v3660_v31, %v3612_v48  ;;  %v3566_v38 = vadd.f32 %v3565_v47, %v3517_v16  ;;  %3711 = vmatmul.bf16.gmra.mxu0 %v9677_v5  ;;  %v7175_v48 = vor.u32 %v8130_v44, %v7174_v17  ;;  %v7367_v31 = vor.u32 %v8178_v62, %v7366_v54  ;;  %v8146_v17 = vld [vmem:[%s13251_s1 + $0x694] sm:$0xf0] }
 0x16e   : > { %3760 = vmatmul.bf16.gmra.mxu1 %v9683_v18  ;;  %3983 = vmatpush.bf16.msrb.mxu2 %v7303_v37  ;;  %v13575_v37 = vunpack.c.l.b16 %v9300_v34 }
 0x16f   : > { %3809 = vmatmul.bf16.gmra.mxu2 %v9318_v30  ;;  %3885 = vmatpush.bf16.msrb.mxu0 %v7175_v48 }
 0x170   : > { %3858 = vmatmul.bf16.gmra.mxu3 %v9325_v60 }
 0x171   : > { %4032 = vmatpush.bf16.msrb.mxu3 %v7367_v31 }
 0x172   : > { %v3614_v1 = vpop.f32.mrf.mxu2  ;;  %v3518_v2 = vpop.f32.mrf.mxu0 }
 0x173   : > { %v3615_v19 = vadd.f32 %v3614_v1, %v3566_v38  ;;  %v3663_v35 = vpop.f32.mrf.mxu3  ;;  %v3519_v16 = vadd.f32 %v3518_v2, %v9329_v36  ;;  %v3567_v47 = vpop.f32.mrf.mxu1  ;;  %v7239_v38 = vor.u32 %v8146_v17, %v7238_v33  ;;  %v13576_v36 = vunpack.c.l.b16 %v9357_v10 }
 0x175   : > { %v9711_v13 = vadd.f32 %v3663_v35, %v3615_v19  ;;  %v3568_v44 = vadd.f32 %v3567_v47, %v3519_v16  ;;  %3934 = vmatpush.bf16.msrb.mxu1 %v7239_v38  ;;  %v9723_v62 = vpack.c.b16 %v13576_v36, %v13575_v37  ;;  %v13578_v19 = vunpack.c.h.b16 %v9300_v34  ;;  %v7166_v34 = vld [vmem:[%s13251_s1 + $0x600] sm:$0xf]  ;;  %v8128_v38 = vld [vmem:[%s13251_s1 + $0x604] sm:$0xf0] }
 0x176   : > { %v13579_v35 = vunpack.c.h.b16 %v9357_v10  ;;  %v7294_v10 = vld [vmem:[%s13251_s1 + $0x700] sm:$0xf]  ;;  %v8176_v37 = vld [vmem:[%s13251_s1 + $0x784] sm:$0xf0] }
 0x177   : > { %13577 = vst [vmem:[#allocation64_spill] sm:$0xff] %v9723_v62 }
 0x178   : > { %v9729_v2 = vpack.c.b16 %v13579_v35, %v13578_v19 }
 0x17a   : > { %v3616_v54 = vpop.f32.mrf.mxu2  ;;  %v3521_v31 = vpop.f32.mrf.mxu0  ;;  %13580 = vst [vmem:[#allocation65_spill] sm:$0xff] %v9729_v2 }
 0x17b   : > { %v3617_v1 = vadd.f32 %v3616_v54, %v3568_v44  ;;  %v3665_v48 = vpop.f32.mrf.mxu3  ;;  %v3522_v16 = vadd.f32 %v3521_v31, %v9362_v50  ;;  %v3570_v47 = vpop.f32.mrf.mxu1  ;;  %v8160_v50 = vld [vmem:[%s13251_s1 + $0x704] sm:$0xf0]  ;;  %v7358_v54 = vld [vmem:[%s13251_s1 + $0x780] sm:$0xf] }
 0x17c   : > { %v7295_v44 = vor.u32 %v8160_v50, %v7294_v10  ;;  %v7230_v50 = vld [vmem:[%s13251_s1 + $0x680] sm:$0xf] }
 0x17d   : > { %v9732_v33 = vadd.f32 %v3665_v48, %v3617_v1  ;;  %v3571_v17 = vadd.f32 %v3570_v47, %v3522_v16  ;;  %3716 = vmatmul.bf16.gmra.mxu0 %v9723_v62  ;;  %v7167_v1 = vor.u32 %v8128_v38, %v7166_v34  ;;  %v7359_v48 = vor.u32 %v8176_v37, %v7358_v54 }
 0x17e   : > { %3765 = vmatmul.bf16.gmra.mxu1 %v9729_v2  ;;  %3984 = vmatpush.bf16.msrb.mxu2 %v7295_v44  ;;  %v13582_v54 = vunpack.c.l.b16 %v9420_v25 }
 0x17f   : > { %3814 = vmatmul.bf16.gmra.mxu2 %v9378_v42  ;;  %3886 = vmatpush.bf16.msrb.mxu0 %v7167_v1  ;;  %v7790_v42 = vld [vmem:[%s13251_s1 + $0xae0] sm:$0xf] }
 0x180   : > { %3863 = vmatmul.bf16.gmra.mxu3 %v9385_v0 }
 0x181   : > { %4033 = vmatpush.bf16.msrb.mxu3 %v7359_v48 }
 0x182   : > { %v3619_v36 = vpop.f32.mrf.mxu2  ;;  %v3523_v35 = vpop.f32.mrf.mxu0 }
 0x183   : > { %v3620_v31 = vadd.f32 %v3619_v36, %v3571_v17  ;;  %v3668_v19 = vpop.f32.mrf.mxu3  ;;  %v3524_v16 = vadd.f32 %v3523_v35, %v9390_v63  ;;  %v3572_v47 = vpop.f32.mrf.mxu1  ;;  %v8144_v17 = vld [vmem:[%s13251_s1 + $0x684] sm:$0xf0]  ;;  %v13581_v63 = vunpack.c.l.b16 %v9360_v51 }
 0x184   : > { %v7231_v38 = vor.u32 %v8144_v17, %v7230_v50  ;;  %v289_v50 = vld [vmem:[%s8592_s26 + $0xe0] sm:$0xf]  ;;  %v291_v17 = vld [vmem:[%s8592_s26 + $0xec] sm:$0xf] }
 0x185   : > { %v9757_v10 = vadd.f32 %v3668_v19, %v3620_v31  ;;  %v3573_v34 = vadd.f32 %v3572_v47, %v3524_v16  ;;  %v9769_v37 = vpack.c.b16 %v13582_v54, %v13581_v63  ;;  %v13584_v31 = vunpack.c.h.b16 %v9360_v51  ;;  %v8238_v63 = vld [vmem:[%s13251_s1 + $0x974] sm:$0xf0] }
 0x186   : > { %3935 = vmatpush.bf16.msrb.mxu1 %v7231_v38  ;;  %v13585_v19 = vunpack.c.h.b16 %v9420_v25  ;;  %v527_v25 = vrot.slane %v289_v50, 4  ;;  %v531_v51 = vrot.slane %v291_v17, 4  ;;  %v8206_v54 = vld [vmem:[%s13251_s1 + $0x874] sm:$0xf0] }
 0x187   : > { %13583 = vst [vmem:[#allocation66_spill] sm:$0xff] %v9769_v37 }
 0x188   : > { %v9775_v35 = vpack.c.b16 %v13585_v19, %v13584_v31 }
 0x18a   : > { %v3621_v44 = vpop.f32.mrf.mxu2  ;;  %v3526_v48 = vpop.f32.mrf.mxu0  ;;  %13586 = vst [vmem:[#allocation67_spill] sm:$0xff] %v9775_v35 }
 0x18b   : > { %v3622_v36 = vadd.f32 %v3621_v44, %v3573_v34  ;;  %v3670_v1 = vpop.f32.mrf.mxu3  ;;  %v3527_v16 = vadd.f32 %v3526_v48, %v9425_v23  ;;  %v3575_v47 = vpop.f32.mrf.mxu1  ;;  %v526_v34 = vrot.slane %v9609_v49, 4  ;;  %v530_v44 = vrot.slane %v9613_v40, 4  ;;  %v7606_v23 = vld [vmem:[%s13251_s1 + $0x970] sm:$0xf] }
 0x18c   : > { %v7478_v49 = vld [vmem:[%s13251_s1 + $0x870] sm:$0xf]  ;;  %v7607_v40 = vor.u32 %v8238_v63, %v7606_v23 }
 0x18d   : > { %v9780_v38 = vadd.f32 %v3670_v1, %v3622_v36  ;;  %v3576_v2 = vadd.f32 %v3575_v47, %v3527_v16  ;;  %3721 = vmatmul.bf16.gmra.mxu0 %v9769_v37  ;;  %v7670_v36 = vld [vmem:[%s13251_s1 + $0x9f0] sm:$0xf]  ;;  %v8254_v1 = vld [vmem:[%s13251_s1 + $0x9f4] sm:$0xf0]  ;;  %v7479_v31 = vor.u32 %v8206_v54, %v7478_v49  ;;  %v528_v17 = vsel %vm476_vm0, %v526_v34, %v527_v25 }
 0x18e   : > { %3770 = vmatmul.bf16.gmra.mxu1 %v9775_v35  ;;  %v7671_v19 = vor.u32 %v8254_v1, %v7670_v36  ;;  %4173 = vmatpush.bf16.msra.mxu2 %v7607_v40  ;;  %v532_v35 = vsel %vm476_vm0, %v530_v44, %v531_v51  ;;  %v7542_v49 = vld [vmem:[%s13251_s1 + $0x8f0] sm:$0xf]  ;;  %v649_v34 = vunpack.c.l.b16 %v528_v17  ;;  %v650_v40 = vunpack.c.h.b16 %v528_v17 }
 0x18f   : > { %3819 = vmatmul.bf16.gmra.mxu2 %v9449_v61  ;;  %4075 = vmatpush.bf16.msra.mxu0 %v7479_v31  ;;  %v652_v36 = vunpack.c.h.b16 %v532_v35  ;;  %v13587_v51 = vunpack.c.l.b16 %v9423_v24 }
 0x190   : > { %3868 = vmatmul.bf16.gmra.mxu3 %v9456_v58 }
 0x191   : > { %4222 = vmatpush.bf16.msra.mxu3 %v7671_v19  ;;  %v9819_v1 = vpack.c.b16 %v649_v34, %v13587_v51 }
 0x192   : > { %v3624_v48 = vpop.f32.mrf.mxu2  ;;  %v3528_v50 = vpop.f32.mrf.mxu0 }
 0x193   : > { %v3625_v16 = vadd.f32 %v3624_v48, %v3576_v2  ;;  %v3673_v47 = vpop.f32.mrf.mxu3  ;;  %v3529_v23 = vadd.f32 %v3528_v50, %v9458_v21  ;;  %v3577_v63 = vpop.f32.mrf.mxu1  ;;  %v8222_v2 = vld [vmem:[%s13251_s1 + $0x8f4] sm:$0xf0]  ;;  %v651_v21 = vunpack.c.l.b16 %v532_v35  ;;  %13588 = vst [vmem:[#allocation68_spill] sm:$0xff] %v9819_v1 }
 0x194   : > { %v7543_v25 = vor.u32 %v8222_v2, %v7542_v49  ;;  %v7470_v2 = vld [vmem:[%s13251_s1 + $0x860] sm:$0xf] }
 0x195   : > { %v9809_v37 = vadd.f32 %v3673_v47, %v3625_v16  ;;  %v3578_v54 = vadd.f32 %v3577_v63, %v3529_v23  ;;  %v13589_v16 = vunpack.c.h.b16 %v9423_v24  ;;  %v9825_v50 = vpack.c.b16 %v651_v21, %v649_v34  ;;  %v7598_v24 = vld [vmem:[%s13251_s1 + $0x960] sm:$0xf]  ;;  %v8204_v34 = vld [vmem:[%s13251_s1 + $0x864] sm:$0xf0] }
 0x196   : > { %4124 = vmatpush.bf16.msra.mxu1 %v7543_v25  ;;  %v9828_v63 = vpack.c.b16 %v652_v36, %v650_v40  ;;  %v7662_v25 = vld [vmem:[%s13251_s1 + $0x9e0] sm:$0xf]  ;;  %v7471_v36 = vor.u32 %v8204_v34, %v7470_v2  ;;  %v8220_v2 = vld [vmem:[%s13251_s1 + $0x8e4] sm:$0xf0] }
 0x197   : > { %v9823_v47 = vpack.c.b16 %v650_v40, %v13589_v16  ;;  %13591 = vst [vmem:[#allocation70_spill] sm:$0xff] %v9825_v50  ;;  %v8252_v40 = vld [vmem:[%s13251_s1 + $0x9e4] sm:$0xf0]  ;;  %v9858_v16 = vld [vmem:[%s8592_s26 + $0xfc] sm:$0xff] }
 0x198   : > { %13592 = vst [vmem:[#allocation71_spill] sm:$0xff] %v9828_v63  ;;  %4076 = vmatpush.bf16.msra.mxu0 %v7471_v36 }
 0x199   : > { %13590 = vst [vmem:[#allocation69_spill] sm:$0xff] %v9823_v47 }
 0x19a   : > { %v3626_v44 = vpop.f32.mrf.mxu2  ;;  %v3531_v19 = vpop.f32.mrf.mxu0 }
 0x19b   : > { %v3627_v48 = vadd.f32 %v3626_v44, %v3578_v54  ;;  %v3675_v31 = vpop.f32.mrf.mxu3  ;;  %v3532_v23 = vadd.f32 %v3531_v19, %v9483_v20  ;;  %v3580_v17 = vpop.f32.mrf.mxu1  ;;  %v8236_v20 = vld [vmem:[%s13251_s1 + $0x964] sm:$0xf0]  ;;  %v7663_v44 = vor.u32 %v8252_v40, %v7662_v25  ;;  %v9855_v19 = vld [vmem:[%s8592_s26 + $0xf0] sm:$0xff] }
 0x19c   : > { %v7599_v54 = vor.u32 %v8236_v20, %v7598_v24  ;;  %v9862_v24 = vld [vmem:[%s8592_s26 + $0x108] sm:$0xff]  ;;  %v401_v40 = vunpack.c.h.b16 %v9855_v19 }
 0x19d   : > { %v9830_v35 = vadd.f32 %v3675_v31, %v3627_v48  ;;  %v3581_v49 = vadd.f32 %v3580_v17, %v3532_v23  ;;  %3726 = vmatmul.bf16.gmra.mxu0 %v9819_v1  ;;  %4223 = vmatpush.bf16.msra.mxu3 %v7663_v44  ;;  %v404_v36 = vunpack.c.l.b16 %v9862_v24  ;;  %v405_v44 = vunpack.c.h.b16 %v9862_v24 }
 0x19e   : > { %3775 = vmatmul.bf16.gmra.mxu1 %v9823_v47  ;;  %4174 = vmatpush.bf16.msra.mxu2 %v7599_v54  ;;  %v400_v54 = vunpack.c.l.b16 %v9855_v19 }
 0x19f   : > { %3824 = vmatmul.bf16.gmra.mxu2 %v9825_v50 }
 0x1a0   : > { %3873 = vmatmul.bf16.gmra.mxu3 %v9828_v63 }
 0x1a2   : > { %v3629_v21 = vpop.f32.mrf.mxu2  ;;  %v3533_v31 = vpop.f32.mrf.mxu0 }
 0x1a3   : > { %v3630_v51 = vadd.f32 %v3629_v21, %v3581_v49  ;;  %v3678_v48 = vpop.f32.mrf.mxu3  ;;  %v3534_v23 = vadd.f32 %v3533_v31, %v9492_v26  ;;  %v3582_v17 = vpop.f32.mrf.mxu1  ;;  %v7534_v49 = vld [vmem:[%s13251_s1 + $0x8e0] sm:$0xf]  ;;  %v402_v26 = vunpack.c.l.b16 %v9858_v16  ;;  %v403_v21 = vunpack.c.h.b16 %v9858_v16 }
 0x1a4   : > { %v7535_v25 = vor.u32 %v8220_v2, %v7534_v49 }
 0x1a5   : > { %v9864_v20 = vadd.f32 %v3678_v48, %v3630_v51  ;;  %v3583_v34 = vadd.f32 %v3582_v17, %v3534_v23  ;;  %v9878_v48 = vpack.c.b16 %v402_v26, %v400_v54  ;;  %v9880_v17 = vpack.c.b16 %v403_v21, %v401_v40  ;;  %v8250_v40 = vld [vmem:[%s13251_s1 + $0x9d4] sm:$0xf0] }
 0x1a6   : > { %4125 = vmatpush.bf16.msra.mxu1 %v7535_v25  ;;  %v9882_v50 = vpack.c.b16 %v404_v36, %v402_v26  ;;  %v9885_v47 = vpack.c.b16 %v405_v44, %v403_v21  ;;  %v8202_v26 = vld [vmem:[%s13251_s1 + $0x854] sm:$0xf0]  ;;  %v7654_v25 = vld [vmem:[%s13251_s1 + $0x9d0] sm:$0xf] }
 0x1a7   : > { %13593 = vst [vmem:[#allocation72_spill] sm:$0xff] %v9878_v48 }
 0x1a8   : > { %13594 = vst [vmem:[#allocation73_spill] sm:$0xff] %v9880_v17 }
 0x1a9   : > { %13595 = vst [vmem:[#allocation74_spill] sm:$0xff] %v9882_v50 }
 0x1aa   : > { %v3631_v51 = vpop.f32.mrf.mxu2  ;;  %v3692_v23 = vpop.f32.mrf.mxu0  ;;  %13596 = vst [vmem:[#allocation75_spill] sm:$0xff] %v9885_v47 }
 0x1ab   : > { %v3632_v31 = vadd.f32 %v3631_v51, %v3583_v34  ;;  %v3680_v63 = vpop.f32.mrf.mxu3  ;;  %v3693_v49 = vadd.f32 %v3692_v23, %v9517_v29  ;;  %v3741_v2 = vpop.f32.mrf.mxu1  ;;  %v7590_v34 = vld [vmem:[%s13251_s1 + $0x950] sm:$0xf]  ;;  %v8234_v29 = vld [vmem:[%s13251_s1 + $0x954] sm:$0xf0] }
 0x1ac   : > { %v7591_v54 = vor.u32 %v8234_v29, %v7590_v34 }
 0x1ad   : > { %v9887_v1 = vadd.f32 %v3680_v63, %v3632_v31  ;;  %v3742_v62 = vadd.f32 %v3741_v2, %v3693_v49  ;;  %3887 = vmatmul.bf16.vlgmr.msrb.gmra.mxu0 %v9878_v48  ;;  %v7462_v63 = vld [vmem:[%s13251_s1 + $0x850] sm:$0xf]  ;;  %v7655_v31 = vor.u32 %v8250_v40, %v7654_v25 }
 0x1ae   : > { %3936 = vmatmul.bf16.vlgmr.msrb.gmra.mxu1 %v9880_v17  ;;  %v7463_v51 = vor.u32 %v8202_v26, %v7462_v63  ;;  %4175 = vmatpush.bf16.msra.mxu2 %v7591_v54  ;;  %v7526_v63 = vld [vmem:[%s13251_s1 + $0x8d0] sm:$0xf] }
 0x1af   : > { %3985 = vmatmul.bf16.vlgmr.msrb.gmra.mxu2 %v9882_v50  ;;  %v9916_v50 = vld [vmem:[%s8592_s26 + $0x120] sm:$0xff]  ;;  %4224 = vmatpush.bf16.msra.mxu3 %v7655_v31 }
 0x1b0   : > { %4034 = vmatmul.bf16.vlgmr.msrb.gmra.mxu3 %v9885_v47  ;;  %v9912_v47 = vld [vmem:[%s8592_s26 + $0x114] sm:$0xff]  ;;  %4077 = vmatpush.bf16.msra.mxu0 %v7463_v51  ;;  %v408_v40 = vunpack.c.l.b16 %v9916_v50 }
 0x1b1   : > { %v406_v54 = vunpack.c.l.b16 %v9912_v47 }
 0x1b2   : > { %v3790_v21 = vpop.f32.mrf.mxu2  ;;  %v3694_v2 = vpop.f32.mrf.mxu0 }
 0x1b3   : > { %v3791_v23 = vadd.f32 %v3790_v21, %v3742_v62  ;;  %v3839_v49 = vpop.f32.mrf.mxu3  ;;  %v3695_v34 = vadd.f32 %v3694_v2, %v9538_v39  ;;  %v3743_v29 = vpop.f32.mrf.mxu1  ;;  %v8218_v62 = vld [vmem:[%s13251_s1 + $0x8d4] sm:$0xf0]  ;;  %v407_v39 = vunpack.c.h.b16 %v9912_v47  ;;  %v409_v21 = vunpack.c.h.b16 %v9916_v50 }
 0x1b4   : > { %v7527_v25 = vor.u32 %v8218_v62, %v7526_v63  ;;  %v9930_v31 = vpack.c.b16 %v406_v54, %v404_v36  ;;  %v9934_v18 = vpack.c.b16 %v408_v40, %v406_v54  ;;  %v7582_v36 = vld [vmem:[%s13251_s1 + $0x940] sm:$0xf]  ;;  %v8200_v54 = vld [vmem:[%s13251_s1 + $0x844] sm:$0xf0] }
 0x1b5   : > { %v9918_v17 = vadd.f32 %v3839_v49, %v3791_v23  ;;  %v3744_v26 = vadd.f32 %v3743_v29, %v3695_v34  ;;  %v9932_v48 = vpack.c.b16 %v407_v39, %v405_v44  ;;  %v9937_v63 = vpack.c.b16 %v409_v21, %v407_v39  ;;  %v7454_v44 = vld [vmem:[%s13251_s1 + $0x840] sm:$0xf]  ;;  %v8248_v39 = vld [vmem:[%s13251_s1 + $0x9c4] sm:$0xf0] }
 0x1b6   : > { %4126 = vmatpush.bf16.msra.mxu1 %v7527_v25  ;;  %13597 = vst [vmem:[#allocation76_spill] sm:$0xff] %v9930_v31  ;;  %v7646_v25 = vld [vmem:[%s13251_s1 + $0x9c0] sm:$0xf] }
 0x1b7   : > { %13598 = vst [vmem:[#allocation77_spill] sm:$0xff] %v9932_v48 }
 0x1b8   : > { %13599 = vst [vmem:[#allocation78_spill] sm:$0xff] %v9934_v18 }
 0x1b9   : > { %13600 = vst [vmem:[#allocation79_spill] sm:$0xff] %v9937_v63 }
 0x1ba   : > { %v3792_v51 = vpop.f32.mrf.mxu2  ;;  %v3697_v2 = vpop.f32.mrf.mxu0 }
 0x1bb   : > { %v3793_v23 = vadd.f32 %v3792_v51, %v3744_v26  ;;  %v3841_v49 = vpop.f32.mrf.mxu3  ;;  %v3698_v34 = vadd.f32 %v3697_v2, %v9563_v14  ;;  %v3746_v29 = vpop.f32.mrf.mxu1  ;;  %v8232_v14 = vld [vmem:[%s13251_s1 + $0x944] sm:$0xf0] }
 0x1bc   : > { %v7583_v26 = vor.u32 %v8232_v14, %v7582_v36 }
 0x1bd   : > { %v9939_v62 = vadd.f32 %v3841_v49, %v3793_v23  ;;  %v3747_v5 = vadd.f32 %v3746_v29, %v3698_v34  ;;  %3892 = vmatmul.bf16.gmra.mxu0 %v9930_v31  ;;  %v7455_v23 = vor.u32 %v8200_v54, %v7454_v44  ;;  %v7647_v49 = vor.u32 %v8248_v39, %v7646_v25  ;;  %v7518_v44 = vld [vmem:[%s13251_s1 + $0x8c0] sm:$0xf] }
 0x1be   : > { %3941 = vmatmul.bf16.gmra.mxu1 %v9932_v48  ;;  %4176 = vmatpush.bf16.msra.mxu2 %v7583_v26 }
 0x1bf   : > { %3990 = vmatmul.bf16.gmra.mxu2 %v9934_v18  ;;  %v9968_v18 = vld [vmem:[%s8592_s26 + $0x138] sm:$0xff]  ;;  %4078 = vmatpush.bf16.msra.mxu0 %v7455_v23 }
 0x1c0   : > { %4039 = vmatmul.bf16.gmra.mxu3 %v9937_v63  ;;  %v9964_v63 = vld [vmem:[%s8592_s26 + $0x12c] sm:$0xff]  ;;  %v412_v39 = vunpack.c.l.b16 %v9968_v18 }
 0x1c1   : > { %4225 = vmatpush.bf16.msra.mxu3 %v7647_v49  ;;  %v410_v26 = vunpack.c.l.b16 %v9964_v63 }
 0x1c2   : > { %v3795_v51 = vpop.f32.mrf.mxu2  ;;  %v3699_v29 = vpop.f32.mrf.mxu0 }
 0x1c3   : > { %v3796_v2 = vadd.f32 %v3795_v51, %v3747_v5  ;;  %v3844_v34 = vpop.f32.mrf.mxu3  ;;  %v3700_v36 = vadd.f32 %v3699_v29, %v9584_v8  ;;  %v3748_v14 = vpop.f32.mrf.mxu1  ;;  %v8216_v5 = vld [vmem:[%s13251_s1 + $0x8c4] sm:$0xf0]  ;;  %v411_v8 = vunpack.c.h.b16 %v9964_v63  ;;  %v413_v51 = vunpack.c.h.b16 %v9968_v18 }
 0x1c4   : > { %v7519_v25 = vor.u32 %v8216_v5, %v7518_v44  ;;  %v9982_v49 = vpack.c.b16 %v410_v26, %v408_v40  ;;  %v9986_v9 = vpack.c.b16 %v412_v39, %v410_v26  ;;  %v7574_v40 = vld [vmem:[%s13251_s1 + $0x930] sm:$0xf]  ;;  %v8198_v26 = vld [vmem:[%s13251_s1 + $0x834] sm:$0xf0] }
 0x1c5   : > { %v9970_v15 = vadd.f32 %v3844_v34, %v3796_v2  ;;  %v3749_v54 = vadd.f32 %v3748_v14, %v3700_v36  ;;  %v9984_v28 = vpack.c.b16 %v411_v8, %v409_v21  ;;  %v9989_v44 = vpack.c.b16 %v413_v51, %v411_v8  ;;  %v7446_v21 = vld [vmem:[%s13251_s1 + $0x830] sm:$0xf]  ;;  %v8246_v8 = vld [vmem:[%s13251_s1 + $0x9b4] sm:$0xf0] }
 0x1c6   : > { %4127 = vmatpush.bf16.msra.mxu1 %v7519_v25  ;;  %13601 = vst [vmem:[#allocation80_spill] sm:$0xff] %v9982_v49  ;;  %v7638_v25 = vld [vmem:[%s13251_s1 + $0x9b0] sm:$0xf] }
 0x1c7   : > { %13602 = vst [vmem:[#allocation81_spill] sm:$0xff] %v9984_v28 }
 0x1c8   : > { %13603 = vst [vmem:[#allocation82_spill] sm:$0xff] %v9986_v9 }
 0x1c9   : > { %13604 = vst [vmem:[#allocation83_spill] sm:$0xff] %v9989_v44 }
 0x1ca   : > { %v3797_v23 = vpop.f32.mrf.mxu2  ;;  %v3702_v29 = vpop.f32.mrf.mxu0 }
 0x1cb   : > { %v3798_v2 = vadd.f32 %v3797_v23, %v3749_v54  ;;  %v3846_v34 = vpop.f32.mrf.mxu3  ;;  %v3703_v36 = vadd.f32 %v3702_v29, %v9615_v32  ;;  %v3751_v14 = vpop.f32.mrf.mxu1  ;;  %v8230_v32 = vld [vmem:[%s13251_s1 + $0x934] sm:$0xf0] }
 0x1cc   : > { %v7575_v54 = vor.u32 %v8230_v32, %v7574_v40 }
 0x1cd   : > { %v9991_v5 = vadd.f32 %v3846_v34, %v3798_v2  ;;  %v3752_v4 = vadd.f32 %v3751_v14, %v3703_v36  ;;  %3897 = vmatmul.bf16.gmra.mxu0 %v9982_v49  ;;  %v7447_v2 = vor.u32 %v8198_v26, %v7446_v21  ;;  %v7639_v34 = vor.u32 %v8246_v8, %v7638_v25  ;;  %v7510_v21 = vld [vmem:[%s13251_s1 + $0x8b0] sm:$0xf] }
 0x1ce   : > { %3946 = vmatmul.bf16.gmra.mxu1 %v9984_v28  ;;  %4177 = vmatpush.bf16.msra.mxu2 %v7575_v54 }
 0x1cf   : > { %3995 = vmatmul.bf16.gmra.mxu2 %v9986_v9  ;;  %v10020_v9 = vld [vmem:[%s8592_s26 + $0x150] sm:$0xff]  ;;  %4079 = vmatpush.bf16.msra.mxu0 %v7447_v2 }
 0x1d0   : > { %4044 = vmatmul.bf16.gmra.mxu3 %v9989_v44  ;;  %v10016_v44 = vld [vmem:[%s8592_s26 + $0x144] sm:$0xff]  ;;  %v13362_v8 = vunpack.c.l.b16 %v10020_v9 }
 0x1d1   : > { %4226 = vmatpush.bf16.msra.mxu3 %v7639_v34  ;;  %v414_v54 = vunpack.c.l.b16 %v10016_v44  ;;  %v415_v25 = vunpack.c.h.b16 %v10016_v44 }
 0x1d2   : > { %v3800_v23 = vpop.f32.mrf.mxu2  ;;  %v3704_v14 = vpop.f32.mrf.mxu0 }
 0x1d3   : > { %v3801_v29 = vadd.f32 %v3800_v23, %v3752_v4  ;;  %v3849_v36 = vpop.f32.mrf.mxu3  ;;  %v3705_v40 = vadd.f32 %v3704_v14, %v9640_v11  ;;  %v3753_v32 = vpop.f32.mrf.mxu1  ;;  %v8214_v4 = vld [vmem:[%s13251_s1 + $0x8b4] sm:$0xf0]  ;;  %v13361_v23 = vunpack.c.h.b16 %v10020_v9  ;;  %v10034_v34 = vpack.c.b16 %v414_v54, %v412_v39  ;;  %v297_v39 = vld [vmem:[%s8592_s26 + $0x110] sm:$0xf] }
 0x1d4   : > { %v7511_v11 = vor.u32 %v8214_v4, %v7510_v21  ;;  %v10036_v43 = vpack.c.b16 %v415_v25, %v413_v51  ;;  %v541_v51 = vrot.slane %v9855_v19, 4  ;;  %v8228_v19 = vld [vmem:[%s13251_s1 + $0x924] sm:$0xf0] }
 0x1d5   : > { %v10022_v55 = vadd.f32 %v3849_v36, %v3801_v29  ;;  %v3754_v26 = vadd.f32 %v3753_v32, %v3705_v40  ;;  %13605 = vst [vmem:[#allocation84_spill] sm:$0xff] %v10034_v34  ;;  %v10040_v40 = vpack.c.b16 %v13362_v8, %v414_v54  ;;  %v293_v32 = vld [vmem:[%s8592_s26 + $0xf8] sm:$0xf]  ;;  %v10046_v58 = vpack.c.b16 %v13361_v23, %v415_v25 }
 0x1d6   : > { %4128 = vmatpush.bf16.msra.mxu1 %v7511_v11  ;;  %13606 = vst [vmem:[#allocation85_spill] sm:$0xff] %v10036_v43  ;;  %v295_v11 = vld [vmem:[%s8592_s26 + $0x104] sm:$0xf]  ;;  %v545_v25 = vrot.slane %v9862_v24, 4  ;;  %v7630_v24 = vld [vmem:[%s13251_s1 + $0x9a0] sm:$0xf] }
 0x1d7   : > { %13607 = vst [vmem:[#allocation86_spill] sm:$0xff] %v10040_v40  ;;  %v544_v54 = vrot.slane %v295_v11, 4 }
 0x1d8   : > { %13608 = vst [vmem:[#allocation87_spill] sm:$0xff] %v10046_v58 }
 0x1da   : > { %v3802_v2 = vpop.f32.mrf.mxu2  ;;  %v3707_v14 = vpop.f32.mrf.mxu0 }
 0x1db   : > { %v3803_v29 = vadd.f32 %v3802_v2, %v3754_v26  ;;  %v3851_v36 = vpop.f32.mrf.mxu3  ;;  %v3708_v21 = vadd.f32 %v3707_v14, %v9665_v22  ;;  %v3756_v4 = vpop.f32.mrf.mxu1  ;;  %v542_v2 = vrot.slane %v293_v32, 4  ;;  %v543_v22 = vrot.slane %v9858_v16, 4  ;;  %v8196_v16 = vld [vmem:[%s13251_s1 + $0x824] sm:$0xf0] }
 0x1dc   : > { %v546_v14 = vrot.slane %v297_v39, 4 }
 0x1dd   : > { %v10050_v61 = vadd.f32 %v3851_v36, %v3803_v29  ;;  %v3757_v26 = vadd.f32 %v3756_v4, %v3708_v21  ;;  %3902 = vmatmul.bf16.gmra.mxu0 %v10034_v34  ;;  %v7566_v29 = vld [vmem:[%s13251_s1 + $0x920] sm:$0xf]  ;;  %v8244_v21 = vld [vmem:[%s13251_s1 + $0x9a4] sm:$0xf0] }
 0x1de   : > { %3951 = vmatmul.bf16.gmra.mxu1 %v10036_v43  ;;  %v7438_v36 = vld [vmem:[%s13251_s1 + $0x820] sm:$0xf]  ;;  %v7567_v32 = vor.u32 %v8228_v19, %v7566_v29  ;;  %v7631_v39 = vor.u32 %v8244_v21, %v7630_v24  ;;  %v557_v29 = vsel %vm476_vm0, %v541_v51, %v542_v2  ;;  %v558_v19 = vsel %vm476_vm0, %v543_v22, %v544_v54  ;;  %v8212_v51 = vld [vmem:[%s13251_s1 + $0x8a4] sm:$0xf0] }
 0x1df   : > { %4000 = vmatmul.bf16.gmra.mxu2 %v10040_v40  ;;  %v7439_v11 = vor.u32 %v8196_v16, %v7438_v36  ;;  %v10081_v3 = vsel %vm476_vm0, %v545_v25, %v546_v14  ;;  %v653_v22 = vunpack.c.l.b16 %v557_v29  ;;  %v655_v54 = vunpack.c.l.b16 %v558_v19 }
 0x1e0   : > { %4049 = vmatmul.bf16.gmra.mxu3 %v10046_v58  ;;  %4178 = vmatpush.bf16.msra.mxu2 %v7567_v32  ;;  %v656_v25 = vunpack.c.h.b16 %v558_v19  ;;  %v657_v14 = vunpack.c.l.b16 %v10081_v3 }
 0x1e1   : > { %4080 = vmatpush.bf16.msra.mxu0 %v7439_v11  ;;  %4227 = vmatpush.bf16.msra.mxu3 %v7631_v39  ;;  %v10093_v36 = vpack.c.b16 %v655_v54, %v653_v22  ;;  %v299_v39 = vld [vmem:[%s8592_s26 + $0x11c] sm:$0xf]  ;;  %v7558_v22 = vld [vmem:[%s13251_s1 + $0x910] sm:$0xf] }
 0x1e2   : > { %v3805_v4 = vpop.f32.mrf.mxu2  ;;  %v3709_v58 = vpop.f32.mrf.mxu0 }
 0x1e3   : > { %v3806_v23 = vadd.f32 %v3805_v4, %v3757_v26  ;;  %v3854_v8 = vpop.f32.mrf.mxu3  ;;  %v3710_v40 = vadd.f32 %v3709_v58, %v9686_v12  ;;  %v3758_v41 = vpop.f32.mrf.mxu1  ;;  %v7502_v26 = vld [vmem:[%s13251_s1 + $0x8a0] sm:$0xf]  ;;  %v654_v12 = vunpack.c.h.b16 %v557_v29  ;;  %13609 = vst [vmem:[#allocation88_spill] sm:$0xff] %v10093_v36  ;;  %v301_v29 = vld [vmem:[%s8592_s26 + $0x128] sm:$0xf] }
 0x1e4   : > { %v7503_v58 = vor.u32 %v8212_v51, %v7502_v26  ;;  %v547_v26 = vrot.slane %v9912_v47, 4  ;;  %v549_v51 = vrot.slane %v9916_v50, 4  ;;  %v7430_v47 = vld [vmem:[%s13251_s1 + $0x810] sm:$0xf] }
 0x1e5   : > { %v10083_v0 = vadd.f32 %v3854_v8, %v3806_v23  ;;  %v3759_v2 = vadd.f32 %v3758_v41, %v3710_v40  ;;  %v658_v8 = vunpack.c.h.b16 %v10081_v3  ;;  %v10095_v21 = vpack.c.b16 %v656_v25, %v654_v12  ;;  %v7622_v12 = vld [vmem:[%s13251_s1 + $0x990] sm:$0xf] }
 0x1e6   : > { %4129 = vmatpush.bf16.msra.mxu1 %v7503_v58  ;;  %v10097_v41 = vpack.c.b16 %v657_v14, %v655_v54  ;;  %v8226_v54 = vld [vmem:[%s13251_s1 + $0x914] sm:$0xf0] }
 0x1e7   : > { %13610 = vst [vmem:[#allocation89_spill] sm:$0xff] %v10095_v21  ;;  %v10100_v11 = vpack.c.b16 %v658_v8, %v656_v25  ;;  %v7559_v50 = vor.u32 %v8226_v54, %v7558_v22  ;;  %v8194_v58 = vld [vmem:[%s13251_s1 + $0x814] sm:$0xf0] }
 0x1e8   : > { %13611 = vst [vmem:[#allocation90_spill] sm:$0xff] %v10097_v41  ;;  %v8242_v25 = vld [vmem:[%s13251_s1 + $0x994] sm:$0xf0] }
 0x1e9   : > { %13612 = vst [vmem:[#allocation91_spill] sm:$0xff] %v10100_v11  ;;  %4179 = vmatpush.bf16.msra.mxu2 %v7559_v50 }
 0x1ea   : > { %v3807_v23 = vpop.f32.mrf.mxu2  ;;  %v3712_v24 = vpop.f32.mrf.mxu0 }
 0x1eb   : > { %v3808_v32 = vadd.f32 %v3807_v23, %v3759_v2  ;;  %v3856_v16 = vpop.f32.mrf.mxu3  ;;  %v3713_v40 = vadd.f32 %v3712_v24, %v9711_v13  ;;  %v3761_v4 = vpop.f32.mrf.mxu1  ;;  %v548_v2 = vrot.slane %v299_v39, 4  ;;  %v550_v13 = vrot.slane %v301_v29, 4 }
 0x1ed   : > { %v10104_v19 = vadd.f32 %v3856_v16, %v3808_v32  ;;  %v3762_v3 = vadd.f32 %v3761_v4, %v3713_v40  ;;  %3907 = vmatmul.bf16.gmra.mxu0 %v10093_v36  ;;  %v7431_v32 = vor.u32 %v8194_v58, %v7430_v47  ;;  %v7623_v16 = vor.u32 %v8242_v25, %v7622_v12  ;;  %v7494_v47 = vld [vmem:[%s13251_s1 + $0x890] sm:$0xf] }
 0x1ee   : > { %3956 = vmatmul.bf16.gmra.mxu1 %v10095_v21  ;;  %v560_v39 = vsel %vm476_vm0, %v547_v26, %v548_v2  ;;  %v10133_v54 = vsel %vm476_vm0, %v549_v51, %v550_v13  ;;  %v10306_v21 = vld [vmem:[%s8592_s26 + $0x168] sm:$0xff] }
 0x1ef   : > { %4005 = vmatmul.bf16.gmra.mxu2 %v10097_v41  ;;  %4081 = vmatpush.bf16.msra.mxu0 %v7431_v32  ;;  %v659_v2 = vunpack.c.l.b16 %v560_v39  ;;  %v660_v50 = vunpack.c.h.b16 %v560_v39  ;;  %v661_v51 = vunpack.c.l.b16 %v10133_v54  ;;  %v662_v13 = vunpack.c.h.b16 %v10133_v54  ;;  %v303_v39 = vld [vmem:[%s8592_s26 + $0x134] sm:$0xf] }
 0x1f0   : > { %4054 = vmatmul.bf16.gmra.mxu3 %v10100_v11 }
 0x1f1   : > { %4228 = vmatpush.bf16.msra.mxu3 %v7623_v16  ;;  %v10145_v12 = vpack.c.b16 %v659_v2, %v657_v14  ;;  %v10147_v16 = vpack.c.b16 %v660_v50, %v658_v8  ;;  %v551_v14 = vrot.slane %v9964_v63, 4  ;;  %v552_v8 = vrot.slane %v303_v39, 4 }
 0x1f2   : > { %v3810_v23 = vpop.f32.mrf.mxu2  ;;  %v3714_v4 = vpop.f32.mrf.mxu0 }
 0x1f3   : > { %v3811_v24 = vadd.f32 %v3810_v23, %v3762_v3  ;;  %v3859_v40 = vpop.f32.mrf.mxu3  ;;  %v3715_v29 = vadd.f32 %v3714_v4, %v9732_v33  ;;  %v3763_v22 = vpop.f32.mrf.mxu1  ;;  %v8210_v3 = vld [vmem:[%s13251_s1 + $0x894] sm:$0xf0]  ;;  %13613 = vst [vmem:[#allocation92_spill] sm:$0xff] %v10145_v12 }
 0x1f4   : > { %v7495_v33 = vor.u32 %v8210_v3, %v7494_v47  ;;  %13614 = vst [vmem:[#allocation93_spill] sm:$0xff] %v10147_v16  ;;  %v553_v3 = vrot.slane %v9968_v18, 4  ;;  %v7422_v18 = vld [vmem:[%s13251_s1 + $0x800] sm:$0xf] }
 0x1f5   : > { %v10135_v11 = vadd.f32 %v3859_v40, %v3811_v24  ;;  %v3764_v26 = vadd.f32 %v3763_v22, %v3715_v29  ;;  %v10149_v24 = vpack.c.b16 %v661_v51, %v659_v2  ;;  %v10152_v29 = vpack.c.b16 %v662_v13, %v660_v50  ;;  %v305_v22 = vld [vmem:[%s8592_s26 + $0x140] sm:$0xf]  ;;  %v8224_v2 = vld [vmem:[%s13251_s1 + $0x904] sm:$0xf0] }
 0x1f6   : > { %4130 = vmatpush.bf16.msra.mxu1 %v7495_v33  ;;  %v8192_v33 = vld [vmem:[%s13251_s1 + $0x804] sm:$0xf0]  ;;  %v7614_v50 = vld [vmem:[%s13251_s1 + $0x980] sm:$0xf] }
 0x1f7   : > { %13615 = vst [vmem:[#allocation94_spill] sm:$0xff] %v10149_v24 }
 0x1f8   : > { %13616 = vst [vmem:[#allocation95_spill] sm:$0xff] %v10152_v29 }
 0x1fa   : > { %v3812_v58 = vpop.f32.mrf.mxu2  ;;  %v3717_v32 = vpop.f32.mrf.mxu0 }
 0x1fb   : > { %v3813_v25 = vadd.f32 %v3812_v58, %v3764_v26  ;;  %v3861_v23 = vpop.f32.mrf.mxu3  ;;  %v3718_v40 = vadd.f32 %v3717_v32, %v9757_v10  ;;  %v3766_v4 = vpop.f32.mrf.mxu1  ;;  %v554_v10 = vrot.slane %v305_v22, 4  ;;  %v7550_v26 = vld [vmem:[%s13251_s1 + $0x900] sm:$0xf]  ;;  %v8240_v58 = vld [vmem:[%s13251_s1 + $0x984] sm:$0xf0]  ;;  %v562_v22 = vsel %vm476_vm0, %v551_v14, %v552_v8 }
 0x1fc   : > { %v7551_v63 = vor.u32 %v8224_v2, %v7550_v26  ;;  %v7615_v32 = vor.u32 %v8240_v58, %v7614_v50  ;;  %v663_v8 = vunpack.c.l.b16 %v562_v22 }
 0x1fd   : > { %v10156_v47 = vadd.f32 %v3861_v23, %v3813_v25  ;;  %v3767_v54 = vadd.f32 %v3766_v4, %v3718_v40  ;;  %3912 = vmatmul.bf16.gmra.mxu0 %v10145_v12  ;;  %v7423_v23 = vor.u32 %v8192_v33, %v7422_v18  ;;  %v7486_v18 = vld [vmem:[%s13251_s1 + $0x880] sm:$0xf] }
 0x1fe   : > { %3961 = vmatmul.bf16.gmra.mxu1 %v10147_v16  ;;  %4180 = vmatpush.bf16.msra.mxu2 %v7551_v63  ;;  %v664_v63 = vunpack.c.h.b16 %v562_v22  ;;  %v10197_v50 = vpack.c.b16 %v663_v8, %v661_v51  ;;  %v307_v22 = vld [vmem:[%s8592_s26 + $0x14c] sm:$0xf]  ;;  %v555_v51 = vrot.slane %v10016_v44, 4  ;;  %v7734_v44 = vld [vmem:[%s13251_s1 + $0xa70] sm:$0xf] }
 0x1ff   : > { %4010 = vmatmul.bf16.gmra.mxu2 %v10149_v24  ;;  %4082 = vmatpush.bf16.msra.mxu0 %v7423_v23 }
 0x200   : > { %4059 = vmatmul.bf16.gmra.mxu3 %v10152_v29  ;;  %v10185_v29 = vsel %vm476_vm0, %v553_v3, %v554_v10  ;;  %13617 = vst [vmem:[#allocation96_spill] sm:$0xff] %v10197_v50 }
 0x201   : > { %4229 = vmatpush.bf16.msra.mxu3 %v7615_v32  ;;  %v665_v3 = vunpack.c.l.b16 %v10185_v29  ;;  %v666_v10 = vunpack.c.h.b16 %v10185_v29  ;;  %v10199_v32 = vpack.c.b16 %v664_v63, %v662_v13  ;;  %v556_v13 = vrot.slane %v307_v22, 4 }
 0x202   : > { %v3815_v25 = vpop.f32.mrf.mxu2  ;;  %v3719_v39 = vpop.f32.mrf.mxu0 }
 0x203   : > { %v3816_v40 = vadd.f32 %v3815_v25, %v3767_v54  ;;  %v3864_v4 = vpop.f32.mrf.mxu3  ;;  %v3720_v26 = vadd.f32 %v3719_v39, %v9780_v38  ;;  %v3768_v2 = vpop.f32.mrf.mxu1  ;;  %v8208_v54 = vld [vmem:[%s13251_s1 + $0x884] sm:$0xf0]  ;;  %13618 = vst [vmem:[#allocation97_spill] sm:$0xff] %v10199_v32 }
 0x204   : > { %v7487_v38 = vor.u32 %v8208_v54, %v7486_v18  ;;  %v566_v54 = vrot.slane %v10020_v9, 4 }
 0x205   : > { %v10187_v24 = vadd.f32 %v3864_v4, %v3816_v40  ;;  %v3769_v14 = vadd.f32 %v3768_v2, %v3720_v26  ;;  %v10201_v40 = vpack.c.b16 %v665_v3, %v663_v8  ;;  %v10204_v26 = vpack.c.b16 %v666_v10, %v664_v63  ;;  %v309_v2 = vld [vmem:[%s8592_s26 + $0x158] sm:$0xf] }
 0x206   : > { %4131 = vmatpush.bf16.msra.mxu1 %v7487_v38  ;;  %v8302_v8 = vld [vmem:[%s13251_s1 + $0xb74] sm:$0xf0] }
 0x207   : > { %13619 = vst [vmem:[#allocation98_spill] sm:$0xff] %v10201_v40  ;;  %v8270_v63 = vld [vmem:[%s13251_s1 + $0xa74] sm:$0xf0] }
 0x208   : > { %13620 = vst [vmem:[#allocation99_spill] sm:$0xff] %v10204_v26 }
 0x20a   : > { %v3817_v33 = vpop.f32.mrf.mxu2  ;;  %v3722_v23 = vpop.f32.mrf.mxu0 }
 0x20b   : > { %v3818_v58 = vadd.f32 %v3817_v33, %v3769_v14  ;;  %v3866_v25 = vpop.f32.mrf.mxu3  ;;  %v3723_v4 = vadd.f32 %v3722_v23, %v9809_v37  ;;  %v3771_v39 = vpop.f32.mrf.mxu1  ;;  %v567_v37 = vrot.slane %v309_v2, 4  ;;  %v7862_v14 = vld [vmem:[%s13251_s1 + $0xb70] sm:$0xf]  ;;  %v7735_v23 = vor.u32 %v8270_v63, %v7734_v44  ;;  %v10250_v63 = vld [vmem:[%s8592_s26 + $0x174] sm:$0xff] }
 0x20c   : > { %v7863_v38 = vor.u32 %v8302_v8, %v7862_v14  ;;  %v7926_v33 = vld [vmem:[%s13251_s1 + $0xbf0] sm:$0xf]  ;;  %v564_v14 = vsel %vm476_vm0, %v555_v51, %v556_v13  ;;  %v8286_v51 = vld [vmem:[%s13251_s1 + $0xaf4] sm:$0xf0] }
 0x20d   : > { %v10208_v18 = vadd.f32 %v3866_v25, %v3818_v58  ;;  %v3772_v29 = vadd.f32 %v3771_v39, %v3723_v4  ;;  %3917 = vmatmul.bf16.gmra.mxu0 %v10197_v50  ;;  %v8318_v58 = vld [vmem:[%s13251_s1 + $0xbf4] sm:$0xf0]  ;;  %v667_v44 = vunpack.c.l.b16 %v564_v14 }
 0x20e   : > { %3966 = vmatmul.bf16.gmra.mxu1 %v10199_v32  ;;  %v7927_v4 = vor.u32 %v8318_v58, %v7926_v33  ;;  %4369 = vmatpush.bf16.msrb.mxu2 %v7863_v38  ;;  %v668_v38 = vunpack.c.h.b16 %v564_v14 }
 0x20f   : > { %4015 = vmatmul.bf16.gmra.mxu2 %v10201_v40  ;;  %v10237_v40 = vsel %vm476_vm0, %v566_v54, %v567_v37  ;;  %4271 = vmatpush.bf16.msrb.mxu0 %v7735_v23  ;;  %v10252_v58 = vpack.c.b16 %v667_v44, %v665_v3  ;;  %v432_v3 = vunpack.c.l.b16 %v10250_v63 }
 0x210   : > { %4064 = vmatmul.bf16.gmra.mxu3 %v10204_v26  ;;  %v13376_v54 = vunpack.c.l.b16 %v10237_v40  ;;  %v13375_v37 = vunpack.c.h.b16 %v10237_v40 }
 0x211   : > { %4418 = vmatpush.bf16.msrb.mxu3 %v7927_v4  ;;  %13621 = vst [vmem:[#allocation100_spill] sm:$0xff] %v10252_v58 }
 0x212   : > { %v3820_v25 = vpop.f32.mrf.mxu2  ;;  %v3724_v2 = vpop.f32.mrf.mxu0 }
 0x213   : > { %v3821_v39 = vadd.f32 %v3820_v25, %v3772_v29  ;;  %v3869_v22 = vpop.f32.mrf.mxu3  ;;  %v3725_v8 = vadd.f32 %v3724_v2, %v9830_v35  ;;  %v3773_v26 = vpop.f32.mrf.mxu1  ;;  %v7798_v29 = vld [vmem:[%s13251_s1 + $0xaf0] sm:$0xf] }
 0x214   : > { %v7799_v35 = vor.u32 %v8286_v51, %v7798_v29 }
 0x215   : > { %v10239_v41 = vadd.f32 %v3869_v22, %v3821_v39  ;;  %v3774_v13 = vadd.f32 %v3773_v26, %v3725_v8  ;;  %v10254_v39 = vpack.c.b16 %v668_v38, %v666_v10  ;;  %v10258_v26 = vpack.c.b16 %v13376_v54, %v667_v44  ;;  %v10261_v22 = vld [vmem:[%s8592_s26 + $0x180] sm:$0xff] }
 0x216   : > { %4320 = vmatpush.bf16.msrb.mxu1 %v7799_v35  ;;  %v10266_v8 = vpack.c.b16 %v13375_v37, %v668_v38  ;;  %v433_v10 = vunpack.c.h.b16 %v10250_v63  ;;  %v13378_v51 = vunpack.c.l.b16 %v10261_v22  ;;  %v7854_v38 = vld [vmem:[%s13251_s1 + $0xb60] sm:$0xf] }
 0x217   : > { %13622 = vst [vmem:[#allocation101_spill] sm:$0xff] %v10254_v39 }
 0x218   : > { %13623 = vst [vmem:[#allocation102_spill] sm:$0xff] %v10258_v26 }
 0x219   : > { %13624 = vst [vmem:[#allocation103_spill] sm:$0xff] %v10266_v8 }
 0x21a   : > { %v3822_v33 = vpop.f32.mrf.mxu2  ;;  %v3727_v4 = vpop.f32.mrf.mxu0 }
 0x21b   : > { %v3823_v25 = vadd.f32 %v3822_v33, %v3774_v13  ;;  %v3871_v23 = vpop.f32.mrf.mxu3  ;;  %v3728_v2 = vadd.f32 %v3727_v4, %v9864_v20  ;;  %v3776_v14 = vpop.f32.mrf.mxu1  ;;  %v13377_v13 = vunpack.c.h.b16 %v10261_v22  ;;  %v10279_v20 = vpack.c.b16 %v13378_v51, %v432_v3  ;;  %v8300_v33 = vld [vmem:[%s13251_s1 + $0xb64] sm:$0xf0] }
 0x21c   : > { %v8268_v4 = vld [vmem:[%s13251_s1 + $0xa64] sm:$0xf0] }
 0x21d   : > { %v10269_v29 = vadd.f32 %v3871_v23, %v3823_v25  ;;  %v3777_v44 = vadd.f32 %v3776_v14, %v3728_v2  ;;  %3922 = vmatmul.bf16.gmra.mxu0 %v10252_v58  ;;  %v10283_v35 = vpack.c.b16 %v13377_v13, %v433_v10  ;;  %v7726_v25 = vld [vmem:[%s13251_s1 + $0xa60] sm:$0xf]  ;;  %v7855_v23 = vor.u32 %v8300_v33, %v7854_v38  ;;  %v8316_v14 = vld [vmem:[%s13251_s1 + $0xbe4] sm:$0xf0] }
 0x21e   : > { %3971 = vmatmul.bf16.gmra.mxu1 %v10254_v39  ;;  %v7918_v2 = vld [vmem:[%s13251_s1 + $0xbe0] sm:$0xf]  ;;  %v7727_v54 = vor.u32 %v8268_v4, %v7726_v25 }
 0x21f   : > { %4020 = vmatmul.bf16.gmra.mxu2 %v10258_v26  ;;  %v7919_v13 = vor.u32 %v8316_v14, %v7918_v2 }
 0x220   : > { %4069 = vmatmul.bf16.gmra.mxu3 %v10266_v8  ;;  %4370 = vmatpush.bf16.msrb.mxu2 %v7855_v23  ;;  %v430_v23 = vunpack.c.l.b16 %v10306_v21 }
 0x221   : > { %4272 = vmatpush.bf16.msrb.mxu0 %v7727_v54  ;;  %4419 = vmatpush.bf16.msrb.mxu3 %v7919_v13 }
 0x222   : > { %v3825_v37 = vpop.f32.mrf.mxu2  ;;  %v3729_v26 = vpop.f32.mrf.mxu0 }
 0x223   : > { %v3826_v51 = vadd.f32 %v3825_v37, %v3777_v44  ;;  %v3874_v8 = vpop.f32.mrf.mxu3  ;;  %v3730_v38 = vadd.f32 %v3729_v26, %v9887_v1  ;;  %v3778_v33 = vpop.f32.mrf.mxu1  ;;  %v8284_v37 = vld [vmem:[%s13251_s1 + $0xae4] sm:$0xf0]  ;;  %v431_v1 = vunpack.c.h.b16 %v10306_v21 }
 0x224   : > { %v7791_v25 = vor.u32 %v8284_v37, %v7790_v42  ;;  %v7846_v42 = vld [vmem:[%s13251_s1 + $0xb50] sm:$0xf] }
 0x225   : > { %v10308_v36 = vadd.f32 %v3874_v8, %v3826_v51  ;;  %v3779_v44 = vadd.f32 %v3778_v33, %v3730_v38  ;;  %v10318_v51 = vpack.c.b16 %v432_v3, %v430_v23  ;;  %v10321_v14 = vpack.c.b16 %v433_v10, %v431_v1  ;;  %v7718_v3 = vld [vmem:[%s13251_s1 + $0xa50] sm:$0xf]  ;;  %v8266_v33 = vld [vmem:[%s13251_s1 + $0xa54] sm:$0xf0] }
 0x226   : > { %4321 = vmatpush.bf16.msrb.mxu1 %v7791_v25  ;;  %v7910_v37 = vld [vmem:[%s13251_s1 + $0xbd0] sm:$0xf]  ;;  %v7719_v23 = vor.u32 %v8266_v33, %v7718_v3 }
 0x227   : > { %13625 = vst [vmem:[#allocation104_spill] sm:$0xff] %v10318_v51 }
 0x228   : > { %13626 = vst [vmem:[#allocation105_spill] sm:$0xff] %v10321_v14  ;;  %4273 = vmatpush.bf16.msrb.mxu0 %v7719_v23 }
 0x22a   : > { %v3827_v26 = vpop.f32.mrf.mxu2  ;;  %v3888_v8 = vpop.f32.mrf.mxu0 }
 0x22b   : > { %v3828_v54 = vadd.f32 %v3827_v26, %v3779_v44  ;;  %v3876_v13 = vpop.f32.mrf.mxu3  ;;  %v3889_v4 = vadd.f32 %v3888_v8, %v9918_v17  ;;  %v3937_v2 = vpop.f32.mrf.mxu1  ;;  %v8298_v17 = vld [vmem:[%s13251_s1 + $0xb54] sm:$0xf0] }
 0x22c   : > { %v7847_v10 = vor.u32 %v8298_v17, %v7846_v42  ;;  %v8314_v44 = vld [vmem:[%s13251_s1 + $0xbd4] sm:$0xf0]  ;;  %v7782_v17 = vld [vmem:[%s13251_s1 + $0xad0] sm:$0xf] }
 0x22d   : > { %v10323_v60 = vadd.f32 %v3876_v13, %v3828_v54  ;;  %v3938_v38 = vadd.f32 %v3937_v2, %v3889_v4  ;;  %4083 = vmatmul.bf16.vlgmr.msra.gmra.mxu0 %v9930_v31  ;;  %v7911_v1 = vor.u32 %v8314_v44, %v7910_v37  ;;  %v10349_v2 = vld [vmem:[%s8592_s26 + $0x18c] sm:$0xff] }
 0x22e   : > { %4132 = vmatmul.bf16.vlgmr.msra.gmra.mxu1 %v9932_v48  ;;  %4371 = vmatpush.bf16.msrb.mxu2 %v7847_v10  ;;  %v13388_v10 = vunpack.c.l.b16 %v10349_v2  ;;  %v10462_v48 = vld [vmem:[%s8592_s26 + $0x1bc] sm:$0xff] }
 0x22f   : > { %4181 = vmatmul.bf16.vlgmr.msra.gmra.mxu2 %v10318_v51  ;;  %4420 = vmatpush.bf16.msrb.mxu3 %v7911_v1  ;;  %v13627_v1 = vunpack.c.l.b16 %v10261_v22  ;;  %v10403_v51 = vld [vmem:[%s8592_s26 + $0x1a4] sm:$0xff] }
 0x230   : > { %4230 = vmatmul.bf16.vlgmr.msra.gmra.mxu3 %v10321_v14  ;;  %v10400_v14 = vld [vmem:[%s8592_s26 + $0x198] sm:$0xff] }
 0x232   : > { %v3986_v25 = vpop.f32.mrf.mxu2  ;;  %v3890_v13 = vpop.f32.mrf.mxu0 }
 0x233   : > { %v3987_v26 = vadd.f32 %v3986_v25, %v3938_v38  ;;  %v4035_v54 = vpop.f32.mrf.mxu3  ;;  %v3891_v8 = vadd.f32 %v3890_v13, %v9939_v62  ;;  %v3939_v4 = vpop.f32.mrf.mxu1  ;;  %v8282_v38 = vld [vmem:[%s13251_s1 + $0xad4] sm:$0xf0]  ;;  %v13387_v62 = vunpack.c.h.b16 %v10349_v2 }
 0x234   : > { %v7783_v33 = vor.u32 %v8282_v38, %v7782_v17 }
 0x235   : > { %v10351_v42 = vadd.f32 %v4035_v54, %v3987_v26  ;;  %v3940_v3 = vadd.f32 %v3939_v4, %v3891_v8  ;;  %v10365_v26 = vpack.c.b16 %v13388_v10, %v13627_v1  ;;  %v13628_v8 = vunpack.c.h.b16 %v10261_v22 }
 0x236   : > { %4322 = vmatpush.bf16.msrb.mxu1 %v7783_v33  ;;  %v7710_v33 = vld [vmem:[%s13251_s1 + $0xa40] sm:$0xf] }
 0x237   : > { %v10372_v4 = vpack.c.b16 %v13387_v62, %v13628_v8 }
 0x23a   : > { %v3988_v37 = vpop.f32.mrf.mxu2  ;;  %v3893_v23 = vpop.f32.mrf.mxu0 }
 0x23b   : > { %v3989_v44 = vadd.f32 %v3988_v37, %v3940_v3  ;;  %v4037_v25 = vpop.f32.mrf.mxu3  ;;  %v3894_v54 = vadd.f32 %v3893_v23, %v9970_v15  ;;  %v3942_v13 = vpop.f32.mrf.mxu1  ;;  %v7838_v15 = vld [vmem:[%s13251_s1 + $0xb40] sm:$0xf]  ;;  %v8296_v3 = vld [vmem:[%s13251_s1 + $0xb44] sm:$0xf0] }
 0x23c   : > { %v7839_v37 = vor.u32 %v8296_v3, %v7838_v15  ;;  %v8312_v23 = vld [vmem:[%s13251_s1 + $0xbc4] sm:$0xf0] }
 0x23d   : > { %v10374_v17 = vadd.f32 %v4037_v25, %v3989_v44  ;;  %v3943_v38 = vadd.f32 %v3942_v13, %v3894_v54  ;;  %4088 = vmatmul.bf16.gmra.mxu0 %v9982_v49  ;;  %v8264_v44 = vld [vmem:[%s13251_s1 + $0xa44] sm:$0xf0]  ;;  %v7902_v25 = vld [vmem:[%s13251_s1 + $0xbc0] sm:$0xf]  ;;  %v10459_v49 = vld [vmem:[%s8592_s26 + $0x1b0] sm:$0xff] }
 0x23e   : > { %4137 = vmatmul.bf16.gmra.mxu1 %v9984_v28  ;;  %v7711_v54 = vor.u32 %v8264_v44, %v7710_v33  ;;  %v7903_v13 = vor.u32 %v8312_v23, %v7902_v25  ;;  %4372 = vmatpush.bf16.msrb.mxu2 %v7839_v37  ;;  %v7774_v33 = vld [vmem:[%s13251_s1 + $0xac0] sm:$0xf]  ;;  %v13395_v25 = vunpack.c.h.b16 %v10400_v14  ;;  %v13393_v23 = vunpack.c.h.b16 %v10403_v51 }
 0x23f   : > { %4186 = vmatmul.bf16.gmra.mxu2 %v10365_v26  ;;  %v13633_v6 = vunpack.c.h.b16 %v10459_v49 }
 0x240   : > { %4235 = vmatmul.bf16.gmra.mxu3 %v10372_v4  ;;  %4274 = vmatpush.bf16.msrb.mxu0 %v7711_v54 }
 0x241   : > { %4421 = vmatpush.bf16.msrb.mxu3 %v7903_v13 }
 0x242   : > { %v3991_v1 = vpop.f32.mrf.mxu2  ;;  %v3895_v10 = vpop.f32.mrf.mxu0 }
 0x243   : > { %v3992_v8 = vadd.f32 %v3991_v1, %v3943_v38  ;;  %v4040_v62 = vpop.f32.mrf.mxu3  ;;  %v3896_v15 = vadd.f32 %v3895_v10, %v9991_v5  ;;  %v3944_v3 = vpop.f32.mrf.mxu1  ;;  %v8280_v38 = vld [vmem:[%s13251_s1 + $0xac4] sm:$0xf0]  ;;  %v13396_v5 = vunpack.c.l.b16 %v10400_v14  ;;  %v13394_v10 = vunpack.c.l.b16 %v10403_v51 }
 0x244   : > { %v7775_v44 = vor.u32 %v8280_v38, %v7774_v33  ;;  %v10428_v33 = vpack.c.b16 %v13393_v23, %v13395_v25 }
 0x245   : > { %v10405_v28 = vadd.f32 %v4040_v62, %v3992_v8  ;;  %v3945_v37 = vadd.f32 %v3944_v3, %v3896_v15  ;;  %v10421_v8 = vpack.c.b16 %v13394_v10, %v13396_v5 }
 0x246   : > { %4323 = vmatpush.bf16.msrb.mxu1 %v7775_v44  ;;  %v8294_v44 = vld [vmem:[%s13251_s1 + $0xb34] sm:$0xf0] }
 0x24a   : > { %v3993_v62 = vpop.f32.mrf.mxu2  ;;  %v3898_v13 = vpop.f32.mrf.mxu0 }
 0x24b   : > { %v3994_v1 = vadd.f32 %v3993_v62, %v3945_v37  ;;  %v4042_v54 = vpop.f32.mrf.mxu3  ;;  %v3899_v15 = vadd.f32 %v3898_v13, %v10022_v55  ;;  %v3947_v3 = vpop.f32.mrf.mxu1  ;;  %v7830_v55 = vld [vmem:[%s13251_s1 + $0xb30] sm:$0xf] }
 0x24c   : > { %v7702_v62 = vld [vmem:[%s13251_s1 + $0xa30] sm:$0xf] }
 0x24d   : > { %v10430_v38 = vadd.f32 %v4042_v54, %v3994_v1  ;;  %v3948_v37 = vadd.f32 %v3947_v3, %v3899_v15  ;;  %4093 = vmatmul.bf16.gmra.mxu0 %v10034_v34  ;;  %v7831_v1 = vor.u32 %v8294_v44, %v7830_v55  ;;  %v8262_v54 = vld [vmem:[%s13251_s1 + $0xa34] sm:$0xf0]  ;;  %v7894_v13 = vld [vmem:[%s13251_s1 + $0xbb0] sm:$0xf]  ;;  %v10455_v34 = vld [vmem:[%s8592_s26 + $0x15c] sm:$0xff] }
 0x24e   : > { %4142 = vmatmul.bf16.gmra.mxu1 %v10036_v43  ;;  %v8310_v15 = vld [vmem:[%s13251_s1 + $0xbb4] sm:$0xf0]  ;;  %v7703_v23 = vor.u32 %v8262_v54, %v7702_v62  ;;  %v421_v54 = vunpack.c.h.b16 %v10455_v34 }
 0x24f   : > { %4191 = vmatmul.bf16.gmra.mxu2 %v10421_v8  ;;  %v7895_v10 = vor.u32 %v8310_v15, %v7894_v13  ;;  %v8278_v62 = vld [vmem:[%s13251_s1 + $0xab4] sm:$0xf0]  ;;  %v13629_v15 = vunpack.c.l.b16 %v10020_v9 }
 0x250   : > { %4240 = vmatmul.bf16.gmra.mxu3 %v10428_v33  ;;  %4373 = vmatpush.bf16.msrb.mxu2 %v7831_v1 }
 0x251   : > { %4275 = vmatpush.bf16.msrb.mxu0 %v7703_v23  ;;  %4422 = vmatpush.bf16.msrb.mxu3 %v7895_v10  ;;  %v13412_v23 = vunpack.c.l.b16 %v10459_v49 }
 0x252   : > { %v3996_v3 = vpop.f32.mrf.mxu2  ;;  %v3900_v43 = vpop.f32.mrf.mxu0 }
 0x253   : > { %v3997_v25 = vadd.f32 %v3996_v3, %v3948_v37  ;;  %v4045_v5 = vpop.f32.mrf.mxu3  ;;  %v3901_v55 = vadd.f32 %v3900_v43, %v10050_v61  ;;  %v3949_v44 = vpop.f32.mrf.mxu1  ;;  %v7766_v37 = vld [vmem:[%s13251_s1 + $0xab0] sm:$0xf]  ;;  %v420_v43 = vunpack.c.l.b16 %v10455_v34 }
 0x254   : > { %v7767_v61 = vor.u32 %v8278_v62, %v7766_v37  ;;  %v13631_v62 = vunpack.c.h.b16 %v10020_v9 }
 0x255   : > { %v10464_v31 = vadd.f32 %v4045_v5, %v3997_v25  ;;  %v3950_v1 = vadd.f32 %v3949_v44, %v3901_v55  ;;  %v13411_v5 = vunpack.c.l.b16 %v10462_v48  ;;  %v10480_v3 = vpack.c.b16 %v420_v43, %v13629_v15  ;;  %v315_v15 = vld [vmem:[%s8592_s26 + $0x17c] sm:$0xf] }
 0x256   : > { %4324 = vmatpush.bf16.msrb.mxu1 %v7767_v61  ;;  %v10484_v30 = vpack.c.b16 %v421_v54, %v13631_v62  ;;  %v13634_v43 = vunpack.c.h.b16 %v10462_v48  ;;  %v583_v62 = vrot.slane %v10250_v63, 4  ;;  %v7886_v63 = vld [vmem:[%s13251_s1 + $0xba0] sm:$0xf] }
 0x257   : > { %13630 = vst [vmem:[#allocation106_spill] sm:$0xff] %v10480_v3  ;;  %v10490_v10 = vpack.c.b16 %v13411_v5, %v13412_v23  ;;  %v584_v5 = vrot.slane %v315_v15, 4 }
 0x258   : > { %13632 = vst [vmem:[#allocation107_spill] sm:$0xff] %v10484_v30 }
 0x259   : > { %v10530_v46 = vsel %vm476_vm0, %v583_v62, %v584_v5 }
 0x25a   : > { %v3998_v13 = vpop.f32.mrf.mxu2  ;;  %v3903_v37 = vpop.f32.mrf.mxu0  ;;  %v13422_v5 = vunpack.c.l.b16 %v10530_v46  ;;  %v13421_v62 = vunpack.c.h.b16 %v10530_v46 }
 0x25b   : > { %v3999_v55 = vadd.f32 %v3998_v13, %v3950_v1  ;;  %v4047_v44 = vpop.f32.mrf.mxu3  ;;  %v3904_v61 = vadd.f32 %v3903_v37, %v10083_v0  ;;  %v3952_v25 = vpop.f32.mrf.mxu1  ;;  %v10497_v1 = vpack.c.b16 %v13634_v43, %v13633_v6  ;;  %v313_v13 = vld [vmem:[%s8592_s26 + $0x170] sm:$0xf]  ;;  %v581_v0 = vrot.slane %v10306_v21, 4  ;;  %v7822_v6 = vld [vmem:[%s13251_s1 + $0xb20] sm:$0xf] }
 0x25c   : > { %v582_v37 = vrot.slane %v313_v13, 4  ;;  %v8260_v21 = vld [vmem:[%s13251_s1 + $0xa24] sm:$0xf0] }
 0x25d   : > { %v10501_v9 = vadd.f32 %v4047_v44, %v3999_v55  ;;  %v3953_v54 = vadd.f32 %v3952_v25, %v3904_v61  ;;  %4098 = vmatmul.bf16.gmra.mxu0 %v10480_v3  ;;  %v8292_v25 = vld [vmem:[%s13251_s1 + $0xb24] sm:$0xf0]  ;;  %v7694_v55 = vld [vmem:[%s13251_s1 + $0xa20] sm:$0xf] }
 0x25e   : > { %4147 = vmatmul.bf16.gmra.mxu1 %v10484_v30  ;;  %v7823_v44 = vor.u32 %v8292_v25, %v7822_v6  ;;  %v8308_v61 = vld [vmem:[%s13251_s1 + $0xba4] sm:$0xf0]  ;;  %v7695_v13 = vor.u32 %v8260_v21, %v7694_v55  ;;  %v597_v53 = vsel %vm476_vm0, %v581_v0, %v582_v37  ;;  %v7758_v55 = vld [vmem:[%s13251_s1 + $0xaa0] sm:$0xf] }
 0x25f   : > { %4196 = vmatmul.bf16.gmra.mxu2 %v10490_v10  ;;  %v7887_v15 = vor.u32 %v8308_v61, %v7886_v63  ;;  %v673_v0 = vunpack.c.l.b16 %v597_v53  ;;  %v674_v37 = vunpack.c.h.b16 %v597_v53  ;;  %v319_v53 = vld [vmem:[%s8592_s26 + $0x194] sm:$0xf] }
 0x260   : > { %4245 = vmatmul.bf16.gmra.mxu3 %v10497_v1  ;;  %4374 = vmatpush.bf16.msrb.mxu2 %v7823_v44 }
 0x261   : > { %4276 = vmatpush.bf16.msrb.mxu0 %v7695_v13  ;;  %4423 = vmatpush.bf16.msrb.mxu3 %v7887_v15  ;;  %v10544_v63 = vpack.c.b16 %v13422_v5, %v673_v0  ;;  %v10549_v13 = vpack.c.b16 %v13421_v62, %v674_v37  ;;  %v317_v15 = vld [vmem:[%s8592_s26 + $0x188] sm:$0xf]  ;;  %v8290_v0 = vld [vmem:[%s13251_s1 + $0xb14] sm:$0xf0] }
 0x262   : > { %v4001_v43 = vpop.f32.mrf.mxu2  ;;  %v3905_v3 = vpop.f32.mrf.mxu0 }
 0x263   : > { %v4002_v23 = vadd.f32 %v4001_v43, %v3953_v54  ;;  %v4050_v30 = vpop.f32.mrf.mxu3  ;;  %v3906_v6 = vadd.f32 %v3905_v3, %v10104_v19  ;;  %v3954_v25 = vpop.f32.mrf.mxu1  ;;  %v8276_v54 = vld [vmem:[%s13251_s1 + $0xaa4] sm:$0xf0]  ;;  %13635 = vst [vmem:[#allocation108_spill] sm:$0xff] %v10544_v63 }
 0x264   : > { %v7759_v3 = vor.u32 %v8276_v54, %v7758_v55  ;;  %13636 = vst [vmem:[#allocation109_spill] sm:$0xff] %v10549_v13  ;;  %v585_v55 = vrot.slane %v10261_v22, 4  ;;  %v587_v54 = vrot.slane %v10349_v2, 4  ;;  %v7686_v22 = vld [vmem:[%s13251_s1 + $0xa10] sm:$0xf] }
 0x265   : > { %v10532_v45 = vadd.f32 %v4050_v30, %v4002_v23  ;;  %v3955_v19 = vadd.f32 %v3954_v25, %v3906_v6 }
 0x266   : > { %4325 = vmatpush.bf16.msrb.mxu1 %v7759_v3  ;;  %v7814_v3 = vld [vmem:[%s13251_s1 + $0xb10] sm:$0xf] }
 0x267   : > { %v7815_v37 = vor.u32 %v8290_v0, %v7814_v3 }
 0x269   : > { %4375 = vmatpush.bf16.msrb.mxu2 %v7815_v37 }
 0x26a   : > { %v4003_v30 = vpop.f32.mrf.mxu2  ;;  %v3908_v21 = vpop.f32.mrf.mxu0 }
 0x26b   : > { %v4004_v23 = vadd.f32 %v4003_v30, %v3955_v19  ;;  %v4052_v44 = vpop.f32.mrf.mxu3  ;;  %v3909_v61 = vadd.f32 %v3908_v21, %v10135_v11  ;;  %v3957_v43 = vpop.f32.mrf.mxu1  ;;  %v586_v11 = vrot.slane %v317_v15, 4  ;;  %v588_v19 = vrot.slane %v319_v53, 4  ;;  %v8258_v30 = vld [vmem:[%s13251_s1 + $0xa14] sm:$0xf0] }
 0x26d   : > { %v10553_v6 = vadd.f32 %v4052_v44, %v4004_v23  ;;  %v3958_v25 = vadd.f32 %v3957_v43, %v3909_v61  ;;  %4103 = vmatmul.bf16.gmra.mxu0 %v10145_v12  ;;  %v7878_v23 = vld [vmem:[%s13251_s1 + $0xb90] sm:$0xf]  ;;  %v8306_v44 = vld [vmem:[%s13251_s1 + $0xb94] sm:$0xf0]  ;;  %v7687_v61 = vor.u32 %v8258_v30, %v7686_v22  ;;  %v10581_v5 = vsel %vm476_vm0, %v585_v55, %v586_v11 }
 0x26e   : > { %4152 = vmatmul.bf16.gmra.mxu1 %v10147_v16  ;;  %v7879_v43 = vor.u32 %v8306_v44, %v7878_v23  ;;  %v8274_v22 = vld [vmem:[%s13251_s1 + $0xa94] sm:$0xf0]  ;;  %v13428_v55 = vunpack.c.l.b16 %v10581_v5  ;;  %v13427_v11 = vunpack.c.h.b16 %v10581_v5 }
 0x26f   : > { %4201 = vmatmul.bf16.gmra.mxu2 %v10544_v63  ;;  %4277 = vmatpush.bf16.msrb.mxu0 %v7687_v61 }
 0x270   : > { %4250 = vmatmul.bf16.gmra.mxu3 %v10549_v13  ;;  %v10584_v13 = vsel %vm476_vm0, %v587_v54, %v588_v19 }
 0x271   : > { %4424 = vmatpush.bf16.msrb.mxu3 %v7879_v43  ;;  %v13426_v54 = vunpack.c.l.b16 %v10584_v13  ;;  %v13425_v19 = vunpack.c.h.b16 %v10584_v13 }
 0x272   : > { %v4006_v21 = vpop.f32.mrf.mxu2  ;;  %v3910_v62 = vpop.f32.mrf.mxu0 }
 0x273   : > { %v4007_v15 = vadd.f32 %v4006_v21, %v3958_v25  ;;  %v4055_v53 = vpop.f32.mrf.mxu3  ;;  %v3911_v3 = vadd.f32 %v3910_v62, %v10156_v47  ;;  %v3959_v0 = vpop.f32.mrf.mxu1  ;;  %v7750_v25 = vld [vmem:[%s13251_s1 + $0xa90] sm:$0xf]  ;;  %v10602_v21 = vpack.c.b16 %v13426_v54, %v13428_v55 }
 0x274   : > { %v7751_v62 = vor.u32 %v8274_v22, %v7750_v25  ;;  %v589_v22 = vrot.slane %v10400_v14, 4 }
 0x275   : > { %v10586_v63 = vadd.f32 %v4055_v53, %v4007_v15  ;;  %v3960_v47 = vadd.f32 %v3959_v0, %v3911_v3  ;;  %v10609_v15 = vpack.c.b16 %v13425_v19, %v13427_v11  ;;  %v321_v53 = vld [vmem:[%s8592_s26 + $0x1a0] sm:$0xf]  ;;  %v323_v3 = vld [vmem:[%s8592_s26 + $0x1ac] sm:$0xf] }
 0x276   : > { %4326 = vmatpush.bf16.msrb.mxu1 %v7751_v62  ;;  %v592_v62 = vrot.slane %v323_v3, 4 }
 0x27a   : > { %v4008_v37 = vpop.f32.mrf.mxu2  ;;  %v3913_v44 = vpop.f32.mrf.mxu0 }
 0x27b   : > { %v4009_v30 = vadd.f32 %v4008_v37, %v3960_v47  ;;  %v4057_v23 = vpop.f32.mrf.mxu3  ;;  %v3914_v61 = vadd.f32 %v3913_v44, %v10187_v24  ;;  %v3962_v43 = vpop.f32.mrf.mxu1  ;;  %v591_v47 = vrot.slane %v10403_v51, 4  ;;  %v590_v24 = vrot.slane %v321_v53, 4  ;;  %v7806_v37 = vld [vmem:[%s13251_s1 + $0xb00] sm:$0xf]  ;;  %v8304_v53 = vld [vmem:[%s13251_s1 + $0xb84] sm:$0xf0] }
 0x27d   : > { %v10613_v0 = vadd.f32 %v4057_v23, %v4009_v30  ;;  %v3963_v25 = vadd.f32 %v3962_v43, %v3914_v61  ;;  %4108 = vmatmul.bf16.gmra.mxu0 %v10197_v50  ;;  %v8288_v30 = vld [vmem:[%s13251_s1 + $0xb04] sm:$0xf0]  ;;  %v7678_v23 = vld [vmem:[%s13251_s1 + $0xa00] sm:$0xf]  ;;  %v10641_v50 = vsel %vm476_vm0, %v589_v22, %v590_v24  ;;  %v10644_v16 = vsel %vm476_vm0, %v591_v47, %v592_v62 }
 0x27e   : > { %4157 = vmatmul.bf16.gmra.mxu1 %v10199_v32  ;;  %v7807_v44 = vor.u32 %v8288_v30, %v7806_v37  ;;  %v8256_v61 = vld [vmem:[%s13251_s1 + $0xa04] sm:$0xf0]  ;;  %v7870_v43 = vld [vmem:[%s13251_s1 + $0xb80] sm:$0xf]  ;;  %v13440_v22 = vunpack.c.l.b16 %v10641_v50 }
 0x27f   : > { %4206 = vmatmul.bf16.gmra.mxu2 %v10602_v21  ;;  %v7679_v19 = vor.u32 %v8256_v61, %v7678_v23  ;;  %v7871_v54 = vor.u32 %v8304_v53, %v7870_v43  ;;  %v8272_v23 = vld [vmem:[%s13251_s1 + $0xa84] sm:$0xf0] }
 0x280   : > { %4255 = vmatmul.bf16.gmra.mxu3 %v10609_v15  ;;  %4376 = vmatpush.bf16.msrb.mxu2 %v7807_v44 }
 0x281   : > { %4278 = vmatpush.bf16.msrb.mxu0 %v7679_v19  ;;  %4425 = vmatpush.bf16.msrb.mxu3 %v7871_v54  ;;  %v13438_v19 = vunpack.c.l.b16 %v10644_v16  ;;  %v13437_v54 = vunpack.c.h.b16 %v10644_v16 }
 0x282   : > { %v4011_v3 = vpop.f32.mrf.mxu2  ;;  %v3915_v32 = vpop.f32.mrf.mxu0 }
 0x283   : > { %v4012_v11 = vadd.f32 %v4011_v3, %v3963_v25  ;;  %v4060_v55 = vpop.f32.mrf.mxu3  ;;  %v3916_v37 = vadd.f32 %v3915_v32, %v10208_v18  ;;  %v3964_v30 = vpop.f32.mrf.mxu1  ;;  %v7742_v25 = vld [vmem:[%s13251_s1 + $0xa80] sm:$0xf]  ;;  %v10662_v44 = vpack.c.b16 %v13438_v19, %v13440_v22  ;;  %v311_v3 = vld [vmem:[%s8592_s26 + $0x164] sm:$0xf] }
 0x284   : > { %v7743_v18 = vor.u32 %v8272_v23, %v7742_v25  ;;  %v570_v23 = vrot.slane %v10455_v34, 4  ;;  %v7981_v34 = vld [vmem:[%s13251_s1 + $0x174] sm:$0xf] }
 0x285   : > { %v10646_v12 = vadd.f32 %v4060_v55, %v4012_v11  ;;  %v3965_v32 = vadd.f32 %v3964_v30, %v3916_v37  ;;  %v13439_v55 = vunpack.c.h.b16 %v10641_v50  ;;  %v325_v37 = vld [vmem:[%s8592_s26 + $0x1b8] sm:$0xf]  ;;  %v327_v30 = vld [vmem:[%s8592_s26 + $0x1c4] sm:$0xf] }
 0x286   : > { %4327 = vmatpush.bf16.msrb.mxu1 %v7743_v18 }
 0x287   : > { %v10669_v53 = vpack.c.b16 %v13437_v54, %v13439_v55  ;;  %v596_v54 = vrot.slane %v327_v30, 4 }
 0x28a   : > { %v4013_v11 = vpop.f32.mrf.mxu2  ;;  %v3918_v62 = vpop.f32.mrf.mxu0 }
 0x28b   : > { %v4014_v47 = vadd.f32 %v4013_v11, %v3965_v32  ;;  %v4062_v24 = vpop.f32.mrf.mxu3  ;;  %v3919_v61 = vadd.f32 %v3918_v62, %v10239_v41  ;;  %v3967_v43 = vpop.f32.mrf.mxu1  ;;  %v593_v32 = vrot.slane %v10459_v49, 4  ;;  %v595_v41 = vrot.slane %v10462_v48, 4 }
 0x28c   : > { %v571_v11 = vrot.slane %v311_v3, 4  ;;  %v594_v62 = vrot.slane %v325_v37, 4  ;;  %v7997_v3 = vld [vmem:[%s13251_s1 + $0x1f4] sm:$0xf]  ;;  %v6648_v37 = vld [vmem:[%s13251_s1 + $0x1f8] sm:$0xf0] }
 0x28d   : > { %v10674_v25 = vadd.f32 %v4062_v24, %v4014_v47  ;;  %v3968_v18 = vadd.f32 %v3967_v43, %v3919_v61  ;;  %4113 = vmatmul.bf16.gmra.mxu0 %v10252_v58  ;;  %v6584_v47 = vld [vmem:[%s13251_s1 + $0x178] sm:$0xf0]  ;;  %v7949_v24 = vld [vmem:[%s13251_s1 + $0x74] sm:$0xf]  ;;  %v6651_v55 = vor.u32 %v7997_v3, %v6648_v37  ;;  %v10707_v59 = vsel %vm476_vm0, %v595_v41, %v596_v54 }
 0x28e   : > { %4162 = vmatmul.bf16.gmra.mxu1 %v10254_v39  ;;  %v6587_v61 = vor.u32 %v7981_v34, %v6584_v47  ;;  %v6456_v43 = vld [vmem:[%s13251_s1 + $0x78] sm:$0xf0]  ;;  %v572_v34 = vsel %vm476_vm0, %v570_v23, %v571_v11  ;;  %v10704_v7 = vsel %vm476_vm0, %v593_v32, %v594_v62  ;;  %v13452_v54 = vunpack.c.l.b16 %v10707_v59 }
 0x28f   : > { %4211 = vmatmul.bf16.gmra.mxu2 %v10662_v44  ;;  %v6459_v19 = vor.u32 %v7949_v24, %v6456_v43  ;;  %4614 = vmatpush.bf16.msra.mxu3 %v6651_v55  ;;  %v6520_v23 = vld [vmem:[%s13251_s1 + $0xf8] sm:$0xf0]  ;;  %v672_v32 = vunpack.c.h.b16 %v572_v34  ;;  %v13454_v62 = vunpack.c.l.b16 %v10704_v7  ;;  %v13637_v55 = vunpack.c.l.b16 %v10237_v40 }
 0x290   : > { %4260 = vmatmul.bf16.gmra.mxu3 %v10669_v53  ;;  %4565 = vmatpush.bf16.msra.mxu2 %v6587_v61  ;;  %v13638_v43 = vunpack.c.h.b16 %v10237_v40 }
 0x291   : > { %4467 = vmatpush.bf16.msra.mxu0 %v6459_v19  ;;  %v13453_v19 = vunpack.c.h.b16 %v10704_v7  ;;  %v10733_v37 = vpack.c.b16 %v13452_v54, %v13454_v62 }
 0x292   : > { %v4016_v30 = vpop.f32.mrf.mxu2  ;;  %v3920_v58 = vpop.f32.mrf.mxu0  ;;  %v10727_v3 = vpack.c.b16 %v672_v32, %v13638_v43  ;;  %v7995_v32 = vld [vmem:[%s13251_s1 + $0x1e4] sm:$0xf] }
 0x293   : > { %v4017_v22 = vadd.f32 %v4016_v30, %v3968_v18  ;;  %v4065_v39 = vpop.f32.mrf.mxu3  ;;  %v3921_v47 = vadd.f32 %v3920_v58, %v10269_v29  ;;  %v3969_v27 = vpop.f32.mrf.mxu1  ;;  %v7965_v18 = vld [vmem:[%s13251_s1 + $0xf4] sm:$0xf]  ;;  %v671_v29 = vunpack.c.l.b16 %v572_v34 }
 0x294   : > { %v6523_v11 = vor.u32 %v7965_v18, %v6520_v23  ;;  %v6576_v23 = vld [vmem:[%s13251_s1 + $0x168] sm:$0xf0] }
 0x295   : > { %v10709_v57 = vadd.f32 %v4065_v39, %v4017_v22  ;;  %v3970_v58 = vadd.f32 %v3969_v27, %v3921_v47  ;;  %v13451_v39 = vunpack.c.h.b16 %v10707_v59  ;;  %v10723_v41 = vpack.c.b16 %v671_v29, %v13637_v55 }
 0x296   : > { %4516 = vmatpush.bf16.msra.mxu1 %v6523_v11  ;;  %v6448_v11 = vld [vmem:[%s13251_s1 + $0x68] sm:$0xf0] }
 0x297   : > { %v10740_v47 = vpack.c.b16 %v13451_v39, %v13453_v19  ;;  %v7963_v39 = vld [vmem:[%s13251_s1 + $0xe4] sm:$0xf] }
 0x29a   : > { %v4018_v22 = vpop.f32.mrf.mxu2  ;;  %v3923_v27 = vpop.f32.mrf.mxu0 }
 0x29b   : > { %v4019_v24 = vadd.f32 %v4018_v22, %v3970_v58  ;;  %v4067_v61 = vpop.f32.mrf.mxu3  ;;  %v3924_v30 = vadd.f32 %v3923_v27, %v10308_v36  ;;  %v3972_v34 = vpop.f32.mrf.mxu1  ;;  %v7979_v36 = vld [vmem:[%s13251_s1 + $0x164] sm:$0xf]  ;;  %v6640_v22 = vld [vmem:[%s13251_s1 + $0x1e8] sm:$0xf0] }
 0x29c   : > { %v7947_v58 = vld [vmem:[%s13251_s1 + $0x64] sm:$0xf]  ;;  %v6579_v29 = vor.u32 %v7979_v36, %v6576_v23 }
 0x29d   : > { %v10742_v18 = vadd.f32 %v4067_v61, %v4019_v24  ;;  %v3973_v40 = vadd.f32 %v3972_v34, %v3924_v30  ;;  %4118 = vmatmul.bf16.gmra.mxu0 %v10723_v41  ;;  %v6451_v24 = vor.u32 %v7947_v58, %v6448_v11  ;;  %v6643_v61 = vor.u32 %v7995_v32, %v6640_v22  ;;  %v6512_v58 = vld [vmem:[%s13251_s1 + $0xe8] sm:$0xf0] }
 0x29e   : > { %4167 = vmatmul.bf16.gmra.mxu1 %v10727_v3  ;;  %4566 = vmatpush.bf16.msra.mxu2 %v6579_v29 }
 0x29f   : > { %4216 = vmatmul.bf16.gmra.mxu2 %v10733_v37  ;;  %4468 = vmatpush.bf16.msra.mxu0 %v6451_v24 }
 0x2a0   : > { %4265 = vmatmul.bf16.gmra.mxu3 %v10740_v47 }
 0x2a1   : > { %4615 = vmatpush.bf16.msra.mxu3 %v6643_v61 }
 0x2a2   : > { %v4021_v55 = vpop.f32.mrf.mxu2  ;;  %v3925_v30 = vpop.f32.mrf.mxu0 }
 0x2a3   : > { %v4022_v27 = vadd.f32 %v4021_v55, %v3973_v40  ;;  %v4070_v43 = vpop.f32.mrf.mxu3  ;;  %v3926_v34 = vadd.f32 %v3925_v30, %v10323_v60  ;;  %v3974_v36 = vpop.f32.mrf.mxu1  ;;  %v6515_v40 = vor.u32 %v7963_v39, %v6512_v58  ;;  %v7977_v39 = vld [vmem:[%s13251_s1 + $0x154] sm:$0xf]  ;;  %v6632_v58 = vld [vmem:[%s13251_s1 + $0x1d8] sm:$0xf0] }
 0x2a5   : > { %v10767_v23 = vadd.f32 %v4070_v43, %v4022_v27  ;;  %v3975_v11 = vadd.f32 %v3974_v36, %v3926_v34  ;;  %4517 = vmatpush.bf16.msra.mxu1 %v6515_v40  ;;  %v7945_v43 = vld [vmem:[%s13251_s1 + $0x54] sm:$0xf]  ;;  %v6440_v34 = vld [vmem:[%s13251_s1 + $0x58] sm:$0xf0] }
 0x2a6   : > { %v7993_v36 = vld [vmem:[%s13251_s1 + $0x1d4] sm:$0xf]  ;;  %v6443_v40 = vor.u32 %v7945_v43, %v6440_v34  ;;  %v6504_v43 = vld [vmem:[%s13251_s1 + $0xd8] sm:$0xf0] }
 0x2a8   : > { %4469 = vmatpush.bf16.msra.mxu0 %v6443_v40 }
 0x2aa   : > { %v4023_v32 = vpop.f32.mrf.mxu2  ;;  %v4084_v60 = vpop.f32.mrf.mxu0 }
 0x2ab   : > { %v4024_v29 = vadd.f32 %v4023_v32, %v3975_v11  ;;  %v4072_v22 = vpop.f32.mrf.mxu3  ;;  %v4085_v55 = vadd.f32 %v4084_v60, %v10351_v42  ;;  %v4133_v24 = vpop.f32.mrf.mxu1  ;;  %v6568_v42 = vld [vmem:[%s13251_s1 + $0x158] sm:$0xf0]  ;;  %v6635_v32 = vor.u32 %v7993_v36, %v6632_v58 }
 0x2ac   : > { %v6571_v30 = vor.u32 %v7977_v39, %v6568_v42  ;;  %v7961_v42 = vld [vmem:[%s13251_s1 + $0xd4] sm:$0xf] }
 0x2ad   : > { %v10776_v61 = vadd.f32 %v4072_v22, %v4024_v29  ;;  %v4134_v27 = vadd.f32 %v4133_v24, %v4085_v55  ;;  %4279 = vmatmul.bf16.vlgmr.msrb.gmra.mxu0 %v10279_v20  ;;  %4616 = vmatpush.bf16.msra.mxu3 %v6635_v32 }
 0x2ae   : > { %4328 = vmatmul.bf16.vlgmr.msrb.gmra.mxu1 %v10283_v35  ;;  %4567 = vmatpush.bf16.msra.mxu2 %v6571_v30  ;;  %v13639_v30 = vunpack.c.l.b16 %v10349_v2 }
 0x2af   : > { %4377 = vmatmul.bf16.vlgmr.msrb.gmra.mxu2 %v10365_v26 }
 0x2b0   : > { %4426 = vmatmul.bf16.vlgmr.msrb.gmra.mxu3 %v10372_v4 }
 0x2b2   : > { %v4182_v11 = vpop.f32.mrf.mxu2  ;;  %v4086_v60 = vpop.f32.mrf.mxu0 }
 0x2b3   : > { %v4183_v29 = vadd.f32 %v4182_v11, %v4134_v27  ;;  %v4231_v22 = vpop.f32.mrf.mxu3  ;;  %v4087_v55 = vadd.f32 %v4086_v60, %v10374_v17  ;;  %v4135_v24 = vpop.f32.mrf.mxu1  ;;  %v6507_v27 = vor.u32 %v7961_v42, %v6504_v43  ;;  %v13640_v17 = vunpack.c.l.b16 %v10400_v14 }
 0x2b5   : > { %v10801_v39 = vadd.f32 %v4231_v22, %v4183_v29  ;;  %v4136_v34 = vadd.f32 %v4135_v24, %v4087_v55  ;;  %4518 = vmatpush.bf16.msra.mxu1 %v6507_v27  ;;  %v10813_v58 = vpack.c.b16 %v13640_v17, %v13639_v30  ;;  %v13641_v29 = vunpack.c.h.b16 %v10349_v2  ;;  %v7943_v2 = vld [vmem:[%s13251_s1 + $0x44] sm:$0xf]  ;;  %v6432_v27 = vld [vmem:[%s13251_s1 + $0x48] sm:$0xf0] }
 0x2b6   : > { %v13642_v22 = vunpack.c.h.b16 %v10400_v14  ;;  %v7975_v14 = vld [vmem:[%s13251_s1 + $0x144] sm:$0xf]  ;;  %v6624_v30 = vld [vmem:[%s13251_s1 + $0x1c8] sm:$0xf0] }
 0x2b8   : > { %v10819_v60 = vpack.c.b16 %v13642_v22, %v13641_v29 }
 0x2ba   : > { %v4184_v36 = vpop.f32.mrf.mxu2  ;;  %v4089_v32 = vpop.f32.mrf.mxu0 }
 0x2bb   : > { %v4185_v11 = vadd.f32 %v4184_v36, %v4136_v34  ;;  %v4233_v40 = vpop.f32.mrf.mxu3  ;;  %v4090_v55 = vadd.f32 %v4089_v32, %v10405_v28  ;;  %v4138_v24 = vpop.f32.mrf.mxu1  ;;  %v6560_v28 = vld [vmem:[%s13251_s1 + $0x148] sm:$0xf0]  ;;  %v7991_v36 = vld [vmem:[%s13251_s1 + $0x1c4] sm:$0xf] }
 0x2bc   : > { %v6563_v34 = vor.u32 %v7975_v14, %v6560_v28  ;;  %v7959_v28 = vld [vmem:[%s13251_s1 + $0xc4] sm:$0xf] }
 0x2bd   : > { %v10822_v42 = vadd.f32 %v4233_v40, %v4185_v11  ;;  %v4139_v43 = vadd.f32 %v4138_v24, %v4090_v55  ;;  %4284 = vmatmul.bf16.gmra.mxu0 %v10813_v58  ;;  %v6435_v11 = vor.u32 %v7943_v2, %v6432_v27  ;;  %v6627_v40 = vor.u32 %v7991_v36, %v6624_v30  ;;  %v6496_v2 = vld [vmem:[%s13251_s1 + $0xc8] sm:$0xf0] }
 0x2be   : > { %4333 = vmatmul.bf16.gmra.mxu1 %v10819_v60  ;;  %4568 = vmatpush.bf16.msra.mxu2 %v6563_v34  ;;  %v13643_v34 = vunpack.c.l.b16 %v10403_v51 }
 0x2bf   : > { %4382 = vmatmul.bf16.gmra.mxu2 %v10421_v8  ;;  %4470 = vmatpush.bf16.msra.mxu0 %v6435_v11 }
 0x2c0   : > { %4431 = vmatmul.bf16.gmra.mxu3 %v10428_v33 }
 0x2c1   : > { %4617 = vmatpush.bf16.msra.mxu3 %v6627_v40 }
 0x2c2   : > { %v4187_v17 = vpop.f32.mrf.mxu2  ;;  %v4091_v22 = vpop.f32.mrf.mxu0 }
 0x2c3   : > { %v4188_v32 = vadd.f32 %v4187_v17, %v4139_v43  ;;  %v4236_v29 = vpop.f32.mrf.mxu3  ;;  %v4092_v55 = vadd.f32 %v4091_v22, %v10430_v38  ;;  %v4140_v24 = vpop.f32.mrf.mxu1  ;;  %v6499_v43 = vor.u32 %v7959_v28, %v6496_v2  ;;  %v13644_v38 = vunpack.c.l.b16 %v10459_v49 }
 0x2c5   : > { %v10847_v14 = vadd.f32 %v4236_v29, %v4188_v32  ;;  %v4141_v27 = vadd.f32 %v4140_v24, %v4092_v55  ;;  %4519 = vmatpush.bf16.msra.mxu1 %v6499_v43  ;;  %v10859_v30 = vpack.c.b16 %v13644_v38, %v13643_v34  ;;  %v13646_v32 = vunpack.c.h.b16 %v10403_v51  ;;  %v7941_v51 = vld [vmem:[%s13251_s1 + $0x34] sm:$0xf]  ;;  %v6424_v43 = vld [vmem:[%s13251_s1 + $0x38] sm:$0xf0] }
 0x2c6   : > { %v13647_v29 = vunpack.c.h.b16 %v10459_v49  ;;  %v7973_v49 = vld [vmem:[%s13251_s1 + $0x134] sm:$0xf]  ;;  %v6616_v34 = vld [vmem:[%s13251_s1 + $0x1b8] sm:$0xf0] }
 0x2c7   : > { %13645 = vst [vmem:[#allocation110_spill] sm:$0xff] %v10859_v30 }
 0x2c8   : > { %v10865_v22 = vpack.c.b16 %v13647_v29, %v13646_v32 }
 0x2ca   : > { %v4189_v36 = vpop.f32.mrf.mxu2  ;;  %v4094_v40 = vpop.f32.mrf.mxu0  ;;  %13648 = vst [vmem:[#allocation111_spill] sm:$0xff] %v10865_v22 }
 0x2cb   : > { %v4190_v17 = vadd.f32 %v4189_v36, %v4141_v27  ;;  %v4238_v11 = vpop.f32.mrf.mxu3  ;;  %v4095_v55 = vadd.f32 %v4094_v40, %v10464_v31  ;;  %v4143_v24 = vpop.f32.mrf.mxu1  ;;  %v6552_v31 = vld [vmem:[%s13251_s1 + $0x138] sm:$0xf0]  ;;  %v7989_v36 = vld [vmem:[%s13251_s1 + $0x1b4] sm:$0xf] }
 0x2cc   : > { %v6555_v27 = vor.u32 %v7973_v49, %v6552_v31  ;;  %v10897_v31 = vld [vmem:[%s8592_s26 + $0x1d4] sm:$0xff] }
 0x2cd   : > { %v10868_v28 = vadd.f32 %v4238_v11, %v4190_v17  ;;  %v4144_v2 = vadd.f32 %v4143_v24, %v4095_v55  ;;  %4289 = vmatmul.bf16.gmra.mxu0 %v10859_v30  ;;  %v6427_v17 = vor.u32 %v7941_v51, %v6424_v43  ;;  %v6619_v11 = vor.u32 %v7989_v36, %v6616_v34  ;;  %v10893_v55 = vld [vmem:[%s8592_s26 + $0x1c8] sm:$0xff]  ;;  %v7957_v51 = vld [vmem:[%s13251_s1 + $0xb4] sm:$0xf] }
 0x2ce   : > { %4338 = vmatmul.bf16.gmra.mxu1 %v10865_v22  ;;  %4569 = vmatpush.bf16.msra.mxu2 %v6555_v27  ;;  %v447_v27 = vunpack.c.l.b16 %v10893_v55  ;;  %v450_v34 = vunpack.c.l.b16 %v10897_v31 }
 0x2cf   : > { %4387 = vmatmul.bf16.gmra.mxu2 %v10490_v10  ;;  %4471 = vmatpush.bf16.msra.mxu0 %v6427_v17 }
 0x2d0   : > { %4436 = vmatmul.bf16.gmra.mxu3 %v10497_v1 }
 0x2d1   : > { %4618 = vmatpush.bf16.msra.mxu3 %v6619_v11  ;;  %v13649_v11 = vunpack.c.l.b16 %v10462_v48 }
 0x2d2   : > { %v4192_v38 = vpop.f32.mrf.mxu2  ;;  %v4096_v29 = vpop.f32.mrf.mxu0 }
 0x2d3   : > { %v4193_v40 = vadd.f32 %v4192_v38, %v4144_v2  ;;  %v4241_v32 = vpop.f32.mrf.mxu3  ;;  %v4097_v24 = vadd.f32 %v4096_v29, %v10501_v9  ;;  %v4145_v49 = vpop.f32.mrf.mxu1  ;;  %v6488_v2 = vld [vmem:[%s13251_s1 + $0xb8] sm:$0xf0]  ;;  %v448_v9 = vunpack.c.h.b16 %v10893_v55  ;;  %v451_v38 = vunpack.c.h.b16 %v10897_v31 }
 0x2d4   : > { %v6491_v36 = vor.u32 %v7957_v51, %v6488_v2  ;;  %v10919_v51 = vpack.c.b16 %v450_v34, %v447_v27 }
 0x2d5   : > { %v10899_v54 = vadd.f32 %v4241_v32, %v4193_v40  ;;  %v4146_v43 = vadd.f32 %v4145_v49, %v4097_v24  ;;  %v10913_v40 = vpack.c.b16 %v447_v27, %v13649_v11  ;;  %v13650_v24 = vunpack.c.h.b16 %v10462_v48  ;;  %v7971_v48 = vld [vmem:[%s13251_s1 + $0x124] sm:$0xf] }
 0x2d6   : > { %4520 = vmatpush.bf16.msra.mxu1 %v6491_v36  ;;  %v10922_v22 = vpack.c.b16 %v451_v38, %v448_v9  ;;  %v7987_v27 = vld [vmem:[%s13251_s1 + $0x1a4] sm:$0xf] }
 0x2d7   : > { %v10917_v49 = vpack.c.b16 %v448_v9, %v13650_v24  ;;  %v6608_v9 = vld [vmem:[%s13251_s1 + $0x1a8] sm:$0xf0] }
 0x2d8   : > { %13651 = vst [vmem:[#allocation112_spill] sm:$0xff] %v10922_v22 }
 0x2da   : > { %v4194_v17 = vpop.f32.mrf.mxu2  ;;  %v4099_v19 = vpop.f32.mrf.mxu0 }
 0x2db   : > { %v4195_v32 = vadd.f32 %v4194_v17, %v4146_v43  ;;  %v4243_v29 = vpop.f32.mrf.mxu3  ;;  %v4100_v2 = vadd.f32 %v4099_v19, %v10532_v45  ;;  %v4148_v62 = vpop.f32.mrf.mxu1  ;;  %v6544_v45 = vld [vmem:[%s13251_s1 + $0x128] sm:$0xf0]  ;;  %v6611_v17 = vor.u32 %v7987_v27, %v6608_v9 }
 0x2dc   : > { %v6547_v19 = vor.u32 %v7971_v48, %v6544_v45  ;;  %v6416_v43 = vld [vmem:[%s13251_s1 + $0x28] sm:$0xf0]  ;;  %v7955_v45 = vld [vmem:[%s13251_s1 + $0xa4] sm:$0xf] }
 0x2dd   : > { %v10924_v36 = vadd.f32 %v4243_v29, %v4195_v32  ;;  %v4149_v30 = vadd.f32 %v4148_v62, %v4100_v2  ;;  %4294 = vmatmul.bf16.gmra.mxu0 %v10913_v40  ;;  %v7939_v62 = vld [vmem:[%s13251_s1 + $0x24] sm:$0xf]  ;;  %4619 = vmatpush.bf16.msra.mxu3 %v6611_v17 }
 0x2de   : > { %4343 = vmatmul.bf16.gmra.mxu1 %v10917_v49  ;;  %v6419_v38 = vor.u32 %v7939_v62, %v6416_v43  ;;  %4570 = vmatpush.bf16.msra.mxu2 %v6547_v19  ;;  %v6480_v62 = vld [vmem:[%s13251_s1 + $0xa8] sm:$0xf0]  ;;  %v13652_v19 = vunpack.c.l.b16 %v10530_v46 }
 0x2df   : > { %4392 = vmatmul.bf16.gmra.mxu2 %v10919_v51 }
 0x2e0   : > { %4441 = vmatmul.bf16.gmra.mxu3 %v10922_v22  ;;  %4472 = vmatpush.bf16.msra.mxu0 %v6419_v38  ;;  %v8155_v22 = vld [vmem:[%s13251_s1 + $0x6e4] sm:$0xf] }
 0x2e2   : > { %v4197_v34 = vpop.f32.mrf.mxu2  ;;  %v4101_v29 = vpop.f32.mrf.mxu0 }
 0x2e3   : > { %v4198_v11 = vadd.f32 %v4197_v34, %v4149_v30  ;;  %v4246_v32 = vpop.f32.mrf.mxu3  ;;  %v4102_v24 = vadd.f32 %v4101_v29, %v10553_v6  ;;  %v4150_v2 = vpop.f32.mrf.mxu1  ;;  %v6483_v30 = vor.u32 %v7955_v45, %v6480_v62  ;;  %v13653_v6 = vunpack.c.l.b16 %v10581_v5 }
 0x2e5   : > { %v10949_v48 = vadd.f32 %v4246_v32, %v4198_v11  ;;  %v4151_v43 = vadd.f32 %v4150_v2, %v4102_v24  ;;  %4521 = vmatpush.bf16.msra.mxu1 %v6483_v30  ;;  %v10961_v9 = vpack.c.b16 %v13653_v6, %v13652_v19  ;;  %v13655_v11 = vunpack.c.h.b16 %v10530_v46  ;;  %v7969_v46 = vld [vmem:[%s13251_s1 + $0x114] sm:$0xf]  ;;  %v6408_v30 = vld [vmem:[%s13251_s1 + $0x18] sm:$0xf0] }
 0x2e6   : > { %v13656_v32 = vunpack.c.h.b16 %v10581_v5  ;;  %v6536_v5 = vld [vmem:[%s13251_s1 + $0x118] sm:$0xf0] }
 0x2e7   : > { %13654 = vst [vmem:[#allocation113_spill] sm:$0xff] %v10961_v9  ;;  %v6600_v19 = vld [vmem:[%s13251_s1 + $0x198] sm:$0xf0] }
 0x2e8   : > { %v10967_v29 = vpack.c.b16 %v13656_v32, %v13655_v11 }
 0x2ea   : > { %v4199_v27 = vpop.f32.mrf.mxu2  ;;  %v4104_v17 = vpop.f32.mrf.mxu0  ;;  %13657 = vst [vmem:[#allocation114_spill] sm:$0xff] %v10967_v29 }
 0x2eb   : > { %v4200_v34 = vadd.f32 %v4199_v27, %v4151_v43  ;;  %v4248_v38 = vpop.f32.mrf.mxu3  ;;  %v4105_v24 = vadd.f32 %v4104_v17, %v10586_v63  ;;  %v4153_v2 = vpop.f32.mrf.mxu1  ;;  %v7937_v63 = vld [vmem:[%s13251_s1 + $0x14] sm:$0xf]  ;;  %v6539_v43 = vor.u32 %v7969_v46, %v6536_v5 }
 0x2ec   : > { %v7985_v27 = vld [vmem:[%s13251_s1 + $0x194] sm:$0xf] }
 0x2ed   : > { %v10970_v45 = vadd.f32 %v4248_v38, %v4200_v34  ;;  %v4154_v62 = vadd.f32 %v4153_v2, %v4105_v24  ;;  %4299 = vmatmul.bf16.gmra.mxu0 %v10961_v9  ;;  %v6411_v34 = vor.u32 %v7937_v63, %v6408_v30  ;;  %v6603_v38 = vor.u32 %v7985_v27, %v6600_v19  ;;  %v7953_v5 = vld [vmem:[%s13251_s1 + $0x94] sm:$0xf]  ;;  %v6472_v63 = vld [vmem:[%s13251_s1 + $0x98] sm:$0xf0] }
 0x2ee   : > { %4348 = vmatmul.bf16.gmra.mxu1 %v10967_v29  ;;  %4571 = vmatpush.bf16.msra.mxu2 %v6539_v43  ;;  %v13658_v43 = vunpack.c.l.b16 %v10584_v13 }
 0x2ef   : > { %4397 = vmatmul.bf16.gmra.mxu2 %v10602_v21  ;;  %4473 = vmatpush.bf16.msra.mxu0 %v6411_v34 }
 0x2f0   : > { %4446 = vmatmul.bf16.gmra.mxu3 %v10609_v15 }
 0x2f1   : > { %4620 = vmatpush.bf16.msra.mxu3 %v6603_v38 }
 0x2f2   : > { %v4202_v6 = vpop.f32.mrf.mxu2  ;;  %v4106_v32 = vpop.f32.mrf.mxu0 }
 0x2f3   : > { %v4203_v17 = vadd.f32 %v4202_v6, %v4154_v62  ;;  %v4251_v11 = vpop.f32.mrf.mxu3  ;;  %v4107_v24 = vadd.f32 %v4106_v32, %v10613_v0  ;;  %v4155_v2 = vpop.f32.mrf.mxu1  ;;  %v6475_v62 = vor.u32 %v7953_v5, %v6472_v63  ;;  %v13659_v0 = vunpack.c.l.b16 %v10641_v50 }
 0x2f5   : > { %v10995_v46 = vadd.f32 %v4251_v11, %v4203_v17  ;;  %v4156_v30 = vadd.f32 %v4155_v2, %v4107_v24  ;;  %4522 = vmatpush.bf16.msra.mxu1 %v6475_v62  ;;  %v11007_v19 = vpack.c.b16 %v13659_v0, %v13658_v43  ;;  %v13661_v17 = vunpack.c.h.b16 %v10584_v13  ;;  %v7935_v13 = vld [vmem:[%s13251_s1 + $0x4] sm:$0xf]  ;;  %v6400_v62 = vld [vmem:[%s13251_s1 + $0x8] sm:$0xf0] }
 0x2f6   : > { %v13662_v11 = vunpack.c.h.b16 %v10641_v50  ;;  %v7967_v50 = vld [vmem:[%s13251_s1 + $0x104] sm:$0xf]  ;;  %v6592_v43 = vld [vmem:[%s13251_s1 + $0x188] sm:$0xf0] }
 0x2f7   : > { %13660 = vst [vmem:[#allocation115_spill] sm:$0xff] %v11007_v19 }
 0x2f8   : > { %v11013_v32 = vpack.c.b16 %v13662_v11, %v13661_v17 }
 0x2fa   : > { %v4204_v27 = vpop.f32.mrf.mxu2  ;;  %v4109_v38 = vpop.f32.mrf.mxu0  ;;  %13663 = vst [vmem:[#allocation116_spill] sm:$0xff] %v11013_v32 }
 0x2fb   : > { %v4205_v6 = vadd.f32 %v4204_v27, %v4156_v30  ;;  %v4253_v34 = vpop.f32.mrf.mxu3  ;;  %v4110_v24 = vadd.f32 %v4109_v38, %v10646_v12  ;;  %v4158_v2 = vpop.f32.mrf.mxu1  ;;  %v6528_v12 = vld [vmem:[%s13251_s1 + $0x108] sm:$0xf0]  ;;  %v7983_v27 = vld [vmem:[%s13251_s1 + $0x184] sm:$0xf] }
 0x2fc   : > { %v6531_v30 = vor.u32 %v7967_v50, %v6528_v12  ;;  %v7951_v12 = vld [vmem:[%s13251_s1 + $0x84] sm:$0xf] }
 0x2fd   : > { %v11016_v5 = vadd.f32 %v4253_v34, %v4205_v6  ;;  %v4159_v63 = vadd.f32 %v4158_v2, %v4110_v24  ;;  %4304 = vmatmul.bf16.gmra.mxu0 %v11007_v19  ;;  %v6403_v6 = vor.u32 %v7935_v13, %v6400_v62  ;;  %v6595_v34 = vor.u32 %v7983_v27, %v6592_v43 }
 0x2fe   : > { %4353 = vmatmul.bf16.gmra.mxu1 %v11013_v32  ;;  %4572 = vmatpush.bf16.msra.mxu2 %v6531_v30  ;;  %v13665_v27 = vunpack.c.l.b16 %v10704_v7 }
 0x2ff   : > { %4402 = vmatmul.bf16.gmra.mxu2 %v10662_v44  ;;  %4474 = vmatpush.bf16.msra.mxu0 %v6403_v6 }
 0x300   : > { %4451 = vmatmul.bf16.gmra.mxu3 %v10669_v53 }
 0x301   : > { %4621 = vmatpush.bf16.msra.mxu3 %v6595_v34 }
 0x302   : > { %v4207_v0 = vpop.f32.mrf.mxu2  ;;  %v4111_v11 = vpop.f32.mrf.mxu0 }
 0x303   : > { %v4208_v38 = vadd.f32 %v4207_v0, %v4159_v63  ;;  %v4256_v17 = vpop.f32.mrf.mxu3  ;;  %v4112_v24 = vadd.f32 %v4111_v11, %v10674_v25  ;;  %v4160_v2 = vpop.f32.mrf.mxu1  ;;  %v6464_v63 = vld [vmem:[%s13251_s1 + $0x88] sm:$0xf0]  ;;  %v13664_v25 = vunpack.c.l.b16 %v10644_v16 }
 0x304   : > { %v6467_v62 = vor.u32 %v7951_v12, %v6464_v63  ;;  %v329_v12 = vld [vmem:[%s8592_s26 + $0x1d0] sm:$0xf]  ;;  %v331_v63 = vld [vmem:[%s8592_s26 + $0x1dc] sm:$0xf] }
 0x305   : > { %v11041_v50 = vadd.f32 %v4256_v17, %v4208_v38  ;;  %v4161_v13 = vadd.f32 %v4160_v2, %v4112_v24  ;;  %v11053_v43 = vpack.c.b16 %v13665_v27, %v13664_v25  ;;  %v13667_v38 = vunpack.c.h.b16 %v10644_v16  ;;  %v6840_v25 = vld [vmem:[%s13251_s1 + $0x378] sm:$0xf0] }
 0x306   : > { %4523 = vmatpush.bf16.msra.mxu1 %v6467_v62  ;;  %v13668_v17 = vunpack.c.h.b16 %v10704_v7  ;;  %v607_v7 = vrot.slane %v329_v12, 4  ;;  %v611_v16 = vrot.slane %v331_v63, 4  ;;  %v6712_v27 = vld [vmem:[%s13251_s1 + $0x278] sm:$0xf0] }
 0x307   : > { %13666 = vst [vmem:[#allocation117_spill] sm:$0xff] %v11053_v43 }
 0x308   : > { %v11059_v11 = vpack.c.b16 %v13668_v17, %v13667_v38 }
 0x30a   : > { %v4209_v30 = vpop.f32.mrf.mxu2  ;;  %v4114_v34 = vpop.f32.mrf.mxu0  ;;  %13669 = vst [vmem:[#allocation118_spill] sm:$0xff] %v11059_v11 }
 0x30b   : > { %v4210_v0 = vadd.f32 %v4209_v30, %v4161_v13  ;;  %v4258_v6 = vpop.f32.mrf.mxu3  ;;  %v4115_v24 = vadd.f32 %v4114_v34, %v10709_v57  ;;  %v4163_v2 = vpop.f32.mrf.mxu1  ;;  %v606_v13 = vrot.slane %v10893_v55, 4  ;;  %v610_v30 = vrot.slane %v10897_v31, 4  ;;  %v8045_v57 = vld [vmem:[%s13251_s1 + $0x374] sm:$0xf] }
 0x30c   : > { %v8013_v55 = vld [vmem:[%s13251_s1 + $0x274] sm:$0xf]  ;;  %v6843_v31 = vor.u32 %v8045_v57, %v6840_v25 }
 0x30d   : > { %v11064_v62 = vadd.f32 %v4258_v6, %v4210_v0  ;;  %v4164_v32 = vadd.f32 %v4163_v2, %v4115_v24  ;;  %4309 = vmatmul.bf16.gmra.mxu0 %v11053_v43  ;;  %v8061_v0 = vld [vmem:[%s13251_s1 + $0x3f4] sm:$0xf]  ;;  %v6904_v6 = vld [vmem:[%s13251_s1 + $0x3f8] sm:$0xf0]  ;;  %v6715_v38 = vor.u32 %v8013_v55, %v6712_v27  ;;  %v608_v63 = vsel %vm476_vm0, %v606_v13, %v607_v7 }
 0x30e   : > { %4358 = vmatmul.bf16.gmra.mxu1 %v11059_v11  ;;  %v6907_v17 = vor.u32 %v8061_v0, %v6904_v6  ;;  %4761 = vmatpush.bf16.msrb.mxu2 %v6843_v31  ;;  %v612_v11 = vsel %vm476_vm0, %v610_v30, %v611_v16  ;;  %v689_v29 = vunpack.c.l.b16 %v608_v63  ;;  %v690_v9 = vunpack.c.h.b16 %v608_v63  ;;  %v6776_v13 = vld [vmem:[%s13251_s1 + $0x2f8] sm:$0xf0] }
 0x30f   : > { %4407 = vmatmul.bf16.gmra.mxu2 %v10733_v37  ;;  %4663 = vmatpush.bf16.msrb.mxu0 %v6715_v38  ;;  %v691_v55 = vunpack.c.l.b16 %v612_v11  ;;  %v13670_v30 = vunpack.c.l.b16 %v10707_v59 }
 0x310   : > { %4456 = vmatmul.bf16.gmra.mxu3 %v10740_v47 }
 0x311   : > { %4810 = vmatpush.bf16.msrb.mxu3 %v6907_v17  ;;  %v11103_v16 = vpack.c.b16 %v689_v29, %v13670_v30  ;;  %v11109_v17 = vpack.c.b16 %v691_v55, %v689_v29  ;;  %v6896_v55 = vld [vmem:[%s13251_s1 + $0x3e8] sm:$0xf0] }
 0x312   : > { %v4212_v34 = vpop.f32.mrf.mxu2  ;;  %v4116_v12 = vpop.f32.mrf.mxu0 }
 0x313   : > { %v4213_v24 = vadd.f32 %v4212_v34, %v4164_v32  ;;  %v4261_v2 = vpop.f32.mrf.mxu3  ;;  %v4117_v57 = vadd.f32 %v4116_v12, %v10742_v18  ;;  %v4165_v25 = vpop.f32.mrf.mxu1  ;;  %v8029_v32 = vld [vmem:[%s13251_s1 + $0x2f4] sm:$0xf]  ;;  %v692_v18 = vunpack.c.h.b16 %v612_v11  ;;  %13671 = vst [vmem:[#allocation119_spill] sm:$0xff] %v11103_v16  ;;  %v13672_v34 = vunpack.c.h.b16 %v10707_v59  ;;  %v8043_v59 = vld [vmem:[%s13251_s1 + $0x364] sm:$0xf] }
 0x314   : > { %v6779_v7 = vor.u32 %v8029_v32, %v6776_v13  ;;  %13674 = vst [vmem:[#allocation121_spill] sm:$0xff] %v11109_v17 }
 0x315   : > { %v11093_v43 = vadd.f32 %v4261_v2, %v4213_v24  ;;  %v4166_v19 = vadd.f32 %v4165_v25, %v4117_v57  ;;  %v11107_v38 = vpack.c.b16 %v690_v9, %v13672_v34  ;;  %v11112_v11 = vpack.c.b16 %v692_v18, %v690_v9  ;;  %v8011_v9 = vld [vmem:[%s13251_s1 + $0x264] sm:$0xf]  ;;  %v6704_v57 = vld [vmem:[%s13251_s1 + $0x268] sm:$0xf0] }
 0x316   : > { %4712 = vmatpush.bf16.msrb.mxu1 %v6779_v7  ;;  %v8059_v25 = vld [vmem:[%s13251_s1 + $0x3e4] sm:$0xf]  ;;  %v6707_v7 = vor.u32 %v8011_v9, %v6704_v57 }
 0x317   : > { %13673 = vst [vmem:[#allocation120_spill] sm:$0xff] %v11107_v38  ;;  %v8027_v34 = vld [vmem:[%s13251_s1 + $0x2e4] sm:$0xf] }
 0x318   : > { %13675 = vst [vmem:[#allocation122_spill] sm:$0xff] %v11112_v11  ;;  %4664 = vmatpush.bf16.msrb.mxu0 %v6707_v7  ;;  %v8057_v7 = vld [vmem:[%s13251_s1 + $0x3d4] sm:$0xf] }
 0x31a   : > { %v4214_v31 = vpop.f32.mrf.mxu2  ;;  %v4119_v6 = vpop.f32.mrf.mxu0 }
 0x31b   : > { %v4215_v27 = vadd.f32 %v4214_v31, %v4166_v19  ;;  %v4263_v0 = vpop.f32.mrf.mxu3  ;;  %v4120_v24 = vadd.f32 %v4119_v6, %v10767_v23  ;;  %v4168_v2 = vpop.f32.mrf.mxu1  ;;  %v6832_v23 = vld [vmem:[%s13251_s1 + $0x368] sm:$0xf0]  ;;  %v6899_v31 = vor.u32 %v8059_v25, %v6896_v55  ;;  %v13676_v25 = vld [vmem:[#allocation2_spill] sm:$0xff] }
 0x31c   : > { %v6835_v19 = vor.u32 %v8043_v59, %v6832_v23  ;;  %v13677_v55 = vld [vmem:[#allocation3_spill] sm:$0xff] }
 0x31d   : > { %v11114_v12 = vadd.f32 %v4263_v0, %v4215_v27  ;;  %v4169_v63 = vadd.f32 %v4168_v2, %v4120_v24  ;;  %4314 = vmatmul.bf16.gmra.mxu0 %v11103_v16  ;;  %4811 = vmatpush.bf16.msrb.mxu3 %v6899_v31  ;;  %v6768_v24 = vld [vmem:[%s13251_s1 + $0x2e8] sm:$0xf0]  ;;  %v6888_v31 = vld [vmem:[%s13251_s1 + $0x3d8] sm:$0xf0] }
 0x31e   : > { %4363 = vmatmul.bf16.gmra.mxu1 %v11107_v38  ;;  %4762 = vmatpush.bf16.msrb.mxu2 %v6835_v19  ;;  %v13717_v16 = vld [vmem:[#allocation31_spill] sm:$0xff] }
 0x31f   : > { %4412 = vmatmul.bf16.gmra.mxu2 %v11109_v17  ;;  %v8015_v17 = vld [vmem:[%s13251_s1 + $0x284] sm:$0xf] }
 0x320   : > { %4461 = vmatmul.bf16.gmra.mxu3 %v11112_v11 }
 0x322   : > { %v4217_v29 = vpop.f32.mrf.mxu2  ;;  %v4121_v18 = vpop.f32.mrf.mxu0 }
 0x323   : > { %v4218_v32 = vadd.f32 %v4217_v29, %v4169_v63  ;;  %v4266_v13 = vpop.f32.mrf.mxu3  ;;  %v4122_v30 = vadd.f32 %v4121_v18, %v10776_v61  ;;  %v4170_v27 = vpop.f32.mrf.mxu1  ;;  %v6771_v63 = vor.u32 %v8027_v34, %v6768_v24  ;;  %v6891_v24 = vor.u32 %v8057_v7, %v6888_v31  ;;  %v13682_v7 = vld [vmem:[#allocation6_spill] sm:$0xff]  ;;  %v13683_v31 = vld [vmem:[#allocation7_spill] sm:$0xff] }
 0x325   : > { %v11139_v0 = vadd.f32 %v4266_v13, %v4218_v32  ;;  %v4171_v6 = vadd.f32 %v4170_v27, %v4122_v30  ;;  %4713 = vmatpush.bf16.msrb.mxu1 %v6771_v63  ;;  %v8041_v32 = vld [vmem:[%s13251_s1 + $0x354] sm:$0xf]  ;;  %4812 = vmatpush.bf16.msrb.mxu3 %v6891_v24  ;;  %v6688_v24 = vld [vmem:[%s13251_s1 + $0x248] sm:$0xf0] }
 0x326   : > { %v8009_v13 = vld [vmem:[%s13251_s1 + $0x254] sm:$0xf] }
 0x32a   : > { %v4219_v2 = vpop.f32.mrf.mxu2  ;;  %v4280_v61 = vpop.f32.mrf.mxu0 }
 0x32b   : > { %v4220_v59 = vadd.f32 %v4219_v2, %v4171_v6  ;;  %v4268_v23 = vpop.f32.mrf.mxu3  ;;  %v4281_v9 = vadd.f32 %v4280_v61, %v10801_v39  ;;  %v4329_v29 = vpop.f32.mrf.mxu1  ;;  %v6824_v39 = vld [vmem:[%s13251_s1 + $0x358] sm:$0xf0]  ;;  %v8025_v61 = vld [vmem:[%s13251_s1 + $0x2d4] sm:$0xf] }
 0x32d   : > { %v11148_v19 = vadd.f32 %v4268_v23, %v4220_v59  ;;  %v4330_v57 = vadd.f32 %v4329_v29, %v4281_v9  ;;  %4475 = vmatmul.bf16.vlgmr.msra.gmra.mxu0 %v8632_v52  ;;  %v6827_v52 = vor.u32 %v8041_v32, %v6824_v39  ;;  %v6760_v9 = vld [vmem:[%s13251_s1 + $0x2d8] sm:$0xf0] }
 0x32e   : > { %4524 = vmatmul.bf16.vlgmr.msra.gmra.mxu1 %v8641_v56  ;;  %v6696_v56 = vld [vmem:[%s13251_s1 + $0x258] sm:$0xf0] }
 0x32f   : > { %4573 = vmatmul.bf16.vlgmr.msra.gmra.mxu2 %v13676_v25  ;;  %v6699_v34 = vor.u32 %v8009_v13, %v6696_v56  ;;  %v13681_v56 = vld [vmem:[#allocation5_spill] sm:$0xff] }
 0x330   : > { %4622 = vmatmul.bf16.vlgmr.msra.gmra.mxu3 %v13677_v55  ;;  %4763 = vmatpush.bf16.msrb.mxu2 %v6827_v52  ;;  %v13680_v52 = vld [vmem:[#allocation4_spill] sm:$0xff] }
 0x331   : > { %4665 = vmatpush.bf16.msrb.mxu0 %v6699_v34 }
 0x332   : > { %v4378_v18 = vpop.f32.mrf.mxu2  ;;  %v4282_v6 = vpop.f32.mrf.mxu0 }
 0x333   : > { %v4379_v30 = vadd.f32 %v4378_v18, %v4330_v57  ;;  %v4427_v27 = vpop.f32.mrf.mxu3  ;;  %v4283_v2 = vadd.f32 %v4282_v6, %v10822_v42  ;;  %v4331_v63 = vpop.f32.mrf.mxu1  ;;  %v6763_v57 = vor.u32 %v8025_v61, %v6760_v9 }
 0x335   : > { %v11173_v59 = vadd.f32 %v4427_v27, %v4379_v30  ;;  %v4332_v23 = vadd.f32 %v4331_v63, %v4283_v2  ;;  %4714 = vmatpush.bf16.msrb.mxu1 %v6763_v57  ;;  %v8039_v30 = vld [vmem:[%s13251_s1 + $0x344] sm:$0xf]  ;;  %v6880_v63 = vld [vmem:[%s13251_s1 + $0x3c8] sm:$0xf0] }
 0x336   : > { %v8007_v27 = vld [vmem:[%s13251_s1 + $0x244] sm:$0xf] }
 0x337   : > { %13678 = vst [vmem:[#allocation2_spill] sm:$0xff] %v11173_v59  ;;  %v8055_v2 = vld [vmem:[%s13251_s1 + $0x3c4] sm:$0xf]  ;;  %v13740_v59 = vld [vmem:[#allocation52_spill] sm:$0xff] }
 0x338   : > { %v6883_v57 = vor.u32 %v8055_v2, %v6880_v63  ;;  %v13686_v2 = vld [vmem:[#allocation8_spill] sm:$0xff]  ;;  %v13687_v63 = vld [vmem:[#allocation9_spill] sm:$0xff] }
 0x33a   : > { %v4380_v29 = vpop.f32.mrf.mxu2  ;;  %v4285_v42 = vpop.f32.mrf.mxu0  ;;  %4813 = vmatpush.bf16.msrb.mxu3 %v6883_v57 }
 0x33b   : > { %v4381_v25 = vadd.f32 %v4380_v29, %v4332_v23  ;;  %v4429_v55 = vpop.f32.mrf.mxu3  ;;  %v4286_v32 = vadd.f32 %v4285_v42, %v10847_v14  ;;  %v4334_v39 = vpop.f32.mrf.mxu1  ;;  %v6816_v14 = vld [vmem:[%s13251_s1 + $0x348] sm:$0xf0]  ;;  %v6691_v29 = vor.u32 %v8007_v27, %v6688_v24 }
 0x33c   : > { %v6819_v34 = vor.u32 %v8039_v30, %v6816_v14 }
 0x33d   : > { %v11182_v13 = vadd.f32 %v4429_v55, %v4381_v25  ;;  %v4335_v18 = vadd.f32 %v4334_v39, %v4286_v32  ;;  %4480 = vmatmul.bf16.gmra.mxu0 %v13680_v52  ;;  %v8023_v39 = vld [vmem:[%s13251_s1 + $0x2c4] sm:$0xf] }
 0x33e   : > { %4529 = vmatmul.bf16.gmra.mxu1 %v13681_v56  ;;  %4764 = vmatpush.bf16.msrb.mxu2 %v6819_v34 }
 0x33f   : > { %13679 = vst [vmem:[#allocation3_spill] sm:$0xff] %v11182_v13  ;;  %4578 = vmatmul.bf16.gmra.mxu2 %v13682_v7  ;;  %4666 = vmatpush.bf16.msrb.mxu0 %v6691_v29  ;;  %v8005_v29 = vld [vmem:[%s13251_s1 + $0x234] sm:$0xf]  ;;  %v13741_v13 = vld [vmem:[#allocation53_spill] sm:$0xff] }
 0x340   : > { %4627 = vmatmul.bf16.gmra.mxu3 %v13683_v31 }
 0x342   : > { %v4383_v6 = vpop.f32.mrf.mxu2  ;;  %v4287_v9 = vpop.f32.mrf.mxu0 }
 0x343   : > { %v4384_v23 = vadd.f32 %v4383_v6, %v4335_v18  ;;  %v4432_v61 = vpop.f32.mrf.mxu3  ;;  %v4288_v25 = vadd.f32 %v4287_v9, %v10868_v28  ;;  %v4336_v55 = vpop.f32.mrf.mxu1  ;;  %v6752_v18 = vld [vmem:[%s13251_s1 + $0x2c8] sm:$0xf0]  ;;  %v8037_v9 = vld [vmem:[%s13251_s1 + $0x334] sm:$0xf] }
 0x344   : > { %v6755_v31 = vor.u32 %v8023_v39, %v6752_v18  ;;  %v6872_v39 = vld [vmem:[%s13251_s1 + $0x3b8] sm:$0xf0] }
 0x345   : > { %v11207_v42 = vadd.f32 %v4432_v61, %v4384_v23  ;;  %v4337_v32 = vadd.f32 %v4336_v55, %v4288_v25  ;;  %v13688_v23 = vld [vmem:[#allocation10_spill] sm:$0xff]  ;;  %v13689_v61 = vld [vmem:[#allocation11_spill] sm:$0xff]  ;;  %v6680_v55 = vld [vmem:[%s13251_s1 + $0x238] sm:$0xf0] }
 0x346   : > { %4715 = vmatpush.bf16.msrb.mxu1 %v6755_v31 }
 0x347   : > { %13684 = vst [vmem:[#allocation4_spill] sm:$0xff] %v11207_v42  ;;  %v13739_v42 = vld [vmem:[#allocation51_spill] sm:$0xff] }
 0x34a   : > { %v4385_v7 = vpop.f32.mrf.mxu2  ;;  %v4290_v28 = vpop.f32.mrf.mxu0 }
 0x34b   : > { %v4386_v30 = vadd.f32 %v4385_v7, %v4337_v32  ;;  %v4434_v14 = vpop.f32.mrf.mxu3  ;;  %v4291_v27 = vadd.f32 %v4290_v28, %v10899_v54  ;;  %v4339_v6 = vpop.f32.mrf.mxu1  ;;  %v6808_v54 = vld [vmem:[%s13251_s1 + $0x338] sm:$0xf0]  ;;  %v8053_v32 = vld [vmem:[%s13251_s1 + $0x3b4] sm:$0xf] }
 0x34c   : > { %v6811_v25 = vor.u32 %v8037_v9, %v6808_v54 }
 0x34d   : > { %v11216_v34 = vadd.f32 %v4434_v14, %v4386_v30  ;;  %v4340_v24 = vadd.f32 %v4339_v6, %v4291_v27  ;;  %4485 = vmatmul.bf16.gmra.mxu0 %v13686_v2  ;;  %v6683_v30 = vor.u32 %v8005_v29, %v6680_v55  ;;  %v6875_v14 = vor.u32 %v8053_v32, %v6872_v39 }
 0x34e   : > { %4534 = vmatmul.bf16.gmra.mxu1 %v13687_v63  ;;  %4765 = vmatpush.bf16.msrb.mxu2 %v6811_v25 }
 0x34f   : > { %13685 = vst [vmem:[#allocation5_spill] sm:$0xff] %v11216_v34  ;;  %4583 = vmatmul.bf16.gmra.mxu2 %v13688_v23  ;;  %4667 = vmatpush.bf16.msrb.mxu0 %v6683_v30  ;;  %v13695_v30 = vld [vmem:[#allocation15_spill] sm:$0xff]  ;;  %v8157_v34 = vld [vmem:[%s13251_s1 + $0x6f4] sm:$0xf] }
 0x350   : > { %4632 = vmatmul.bf16.gmra.mxu3 %v13689_v61  ;;  %v8021_v61 = vld [vmem:[%s13251_s1 + $0x2b4] sm:$0xf] }
 0x351   : > { %4814 = vmatpush.bf16.msrb.mxu3 %v6875_v14  ;;  %v8035_v14 = vld [vmem:[%s13251_s1 + $0x324] sm:$0xf] }
 0x352   : > { %v4388_v57 = vpop.f32.mrf.mxu2  ;;  %v4292_v31 = vpop.f32.mrf.mxu0 }
 0x353   : > { %v4389_v18 = vadd.f32 %v4388_v57, %v4340_v24  ;;  %v4437_v7 = vpop.f32.mrf.mxu3  ;;  %v4293_v28 = vadd.f32 %v4292_v31, %v10924_v36  ;;  %v4341_v27 = vpop.f32.mrf.mxu1  ;;  %v6744_v24 = vld [vmem:[%s13251_s1 + $0x2b8] sm:$0xf0]  ;;  %v13694_v31 = vld [vmem:[#allocation14_spill] sm:$0xff] }
 0x354   : > { %v6747_v54 = vor.u32 %v8021_v61, %v6744_v24  ;;  %v6672_v61 = vld [vmem:[%s13251_s1 + $0x228] sm:$0xf0]  ;;  %v8051_v24 = vld [vmem:[%s13251_s1 + $0x3a4] sm:$0xf] }
 0x355   : > { %v11241_v6 = vadd.f32 %v4437_v7, %v4389_v18  ;;  %v4342_v23 = vadd.f32 %v4341_v27, %v4293_v28  ;;  %v13692_v18 = vld [vmem:[#allocation12_spill] sm:$0xff]  ;;  %v13693_v7 = vld [vmem:[#allocation13_spill] sm:$0xff]  ;;  %v8003_v28 = vld [vmem:[%s13251_s1 + $0x224] sm:$0xf] }
 0x356   : > { %4716 = vmatpush.bf16.msrb.mxu1 %v6747_v54 }
 0x357   : > { %13690 = vst [vmem:[#allocation6_spill] sm:$0xff] %v11241_v6  ;;  %v13737_v6 = vld [vmem:[#allocation49_spill] sm:$0xff] }
 0x35a   : > { %v4390_v9 = vpop.f32.mrf.mxu2  ;;  %v4295_v36 = vpop.f32.mrf.mxu0 }
 0x35b   : > { %v4391_v29 = vadd.f32 %v4390_v9, %v4342_v23  ;;  %v4439_v57 = vpop.f32.mrf.mxu3  ;;  %v4296_v25 = vadd.f32 %v4295_v36, %v10949_v48  ;;  %v4344_v55 = vpop.f32.mrf.mxu1  ;;  %v6800_v48 = vld [vmem:[%s13251_s1 + $0x328] sm:$0xf0]  ;;  %v6675_v36 = vor.u32 %v8003_v28, %v6672_v61 }
 0x35c   : > { %v6803_v23 = vor.u32 %v8035_v14, %v6800_v48  ;;  %v6864_v9 = vld [vmem:[%s13251_s1 + $0x3a8] sm:$0xf0]  ;;  %v8019_v48 = vld [vmem:[%s13251_s1 + $0x2a4] sm:$0xf] }
 0x35d   : > { %v11250_v32 = vadd.f32 %v4439_v57, %v4391_v29  ;;  %v4345_v39 = vadd.f32 %v4344_v55, %v4296_v25  ;;  %4490 = vmatmul.bf16.gmra.mxu0 %v13692_v18  ;;  %v6867_v25 = vor.u32 %v8051_v24, %v6864_v9 }
 0x35e   : > { %4539 = vmatmul.bf16.gmra.mxu1 %v13693_v7  ;;  %4766 = vmatpush.bf16.msrb.mxu2 %v6803_v23 }
 0x35f   : > { %13691 = vst [vmem:[#allocation7_spill] sm:$0xff] %v11250_v32  ;;  %4588 = vmatmul.bf16.gmra.mxu2 %v13694_v31  ;;  %4668 = vmatpush.bf16.msrb.mxu0 %v6675_v36  ;;  %v13699_v36 = vld [vmem:[#allocation17_spill] sm:$0xff]  ;;  %v8079_v32 = vld [vmem:[%s13251_s1 + $0x484] sm:$0xf] }
 0x360   : > { %4637 = vmatmul.bf16.gmra.mxu3 %v13695_v30 }
 0x361   : > { %4815 = vmatpush.bf16.msrb.mxu3 %v6867_v25  ;;  %v13700_v25 = vld [vmem:[#allocation18_spill] sm:$0xff] }
 0x362   : > { %v4393_v27 = vpop.f32.mrf.mxu2  ;;  %v4297_v57 = vpop.f32.mrf.mxu0 }
 0x363   : > { %v4394_v54 = vadd.f32 %v4393_v27, %v4345_v39  ;;  %v4442_v29 = vpop.f32.mrf.mxu3  ;;  %v4298_v55 = vadd.f32 %v4297_v57, %v10970_v45  ;;  %v4346_v31 = vpop.f32.mrf.mxu1  ;;  %v6736_v39 = vld [vmem:[%s13251_s1 + $0x2a8] sm:$0xf0]  ;;  %v13698_v57 = vld [vmem:[#allocation16_spill] sm:$0xff] }
 0x364   : > { %v6739_v28 = vor.u32 %v8019_v48, %v6736_v39 }
 0x365   : > { %v11275_v30 = vadd.f32 %v4442_v29, %v4394_v54  ;;  %v4347_v14 = vadd.f32 %v4346_v31, %v4298_v55  ;;  %v13701_v55 = vld [vmem:[#allocation19_spill] sm:$0xff]  ;;  %v8033_v31 = vld [vmem:[%s13251_s1 + $0x314] sm:$0xf] }
 0x366   : > { %4717 = vmatpush.bf16.msrb.mxu1 %v6739_v28  ;;  %v8049_v28 = vld [vmem:[%s13251_s1 + $0x394] sm:$0xf] }
 0x367   : > { %13696 = vst [vmem:[#allocation8_spill] sm:$0xff] %v11275_v30  ;;  %v13733_v30 = vld [vmem:[#allocation45_spill] sm:$0xff] }
 0x36a   : > { %v4395_v27 = vpop.f32.mrf.mxu2  ;;  %v4300_v45 = vpop.f32.mrf.mxu0 }
 0x36b   : > { %v4396_v61 = vadd.f32 %v4395_v27, %v4347_v14  ;;  %v4444_v24 = vpop.f32.mrf.mxu3  ;;  %v4301_v23 = vadd.f32 %v4300_v45, %v10995_v46  ;;  %v4349_v9 = vpop.f32.mrf.mxu1  ;;  %v6792_v46 = vld [vmem:[%s13251_s1 + $0x318] sm:$0xf0]  ;;  %v8001_v14 = vld [vmem:[%s13251_s1 + $0x214] sm:$0xf] }
 0x36c   : > { %v6795_v39 = vor.u32 %v8033_v31, %v6792_v46  ;;  %v6664_v27 = vld [vmem:[%s13251_s1 + $0x218] sm:$0xf0]  ;;  %v8017_v46 = vld [vmem:[%s13251_s1 + $0x294] sm:$0xf] }
 0x36d   : > { %v11284_v54 = vadd.f32 %v4444_v24, %v4396_v61  ;;  %v4350_v29 = vadd.f32 %v4349_v9, %v4301_v23  ;;  %4495 = vmatmul.bf16.gmra.mxu0 %v13698_v57  ;;  %v6856_v61 = vld [vmem:[%s13251_s1 + $0x398] sm:$0xf0]  ;;  %v6667_v9 = vor.u32 %v8001_v14, %v6664_v27 }
 0x36e   : > { %4544 = vmatmul.bf16.gmra.mxu1 %v13699_v36  ;;  %v6859_v57 = vor.u32 %v8049_v28, %v6856_v61  ;;  %4767 = vmatpush.bf16.msrb.mxu2 %v6795_v39 }
 0x36f   : > { %13697 = vst [vmem:[#allocation9_spill] sm:$0xff] %v11284_v54  ;;  %4593 = vmatmul.bf16.gmra.mxu2 %v13700_v25  ;;  %4669 = vmatpush.bf16.msrb.mxu0 %v6667_v9  ;;  %v13705_v9 = vld [vmem:[#allocation21_spill] sm:$0xff]  ;;  %v8083_v54 = vld [vmem:[%s13251_s1 + $0x4a4] sm:$0xf] }
 0x370   : > { %4642 = vmatmul.bf16.gmra.mxu3 %v13701_v55 }
 0x371   : > { %4816 = vmatpush.bf16.msrb.mxu3 %v6859_v57  ;;  %v13706_v57 = vld [vmem:[#allocation22_spill] sm:$0xff] }
 0x372   : > { %v4398_v48 = vpop.f32.mrf.mxu2  ;;  %v4302_v23 = vpop.f32.mrf.mxu0 }
 0x373   : > { %v4399_v24 = vadd.f32 %v4398_v48, %v4350_v29  ;;  %v4447_v45 = vpop.f32.mrf.mxu3  ;;  %v4303_v36 = vadd.f32 %v4302_v23, %v11016_v5  ;;  %v4351_v25 = vpop.f32.mrf.mxu1  ;;  %v6728_v29 = vld [vmem:[%s13251_s1 + $0x298] sm:$0xf0]  ;;  %v13704_v23 = vld [vmem:[#allocation20_spill] sm:$0xff] }
 0x374   : > { %v6731_v14 = vor.u32 %v8017_v46, %v6728_v29 }
 0x375   : > { %v11309_v55 = vadd.f32 %v4447_v45, %v4399_v24  ;;  %v4352_v31 = vadd.f32 %v4351_v25, %v4303_v36  ;;  %v13707_v36 = vld [vmem:[#allocation23_spill] sm:$0xff]  ;;  %v8031_v25 = vld [vmem:[%s13251_s1 + $0x304] sm:$0xf] }
 0x376   : > { %4718 = vmatpush.bf16.msrb.mxu1 %v6731_v14  ;;  %v8047_v14 = vld [vmem:[%s13251_s1 + $0x384] sm:$0xf] }
 0x377   : > { %13702 = vst [vmem:[#allocation10_spill] sm:$0xff] %v11309_v55  ;;  %v13731_v55 = vld [vmem:[#allocation43_spill] sm:$0xff] }
 0x37a   : > { %v4400_v48 = vpop.f32.mrf.mxu2  ;;  %v4305_v5 = vpop.f32.mrf.mxu0 }
 0x37b   : > { %v4401_v27 = vadd.f32 %v4400_v48, %v4352_v31  ;;  %v4449_v28 = vpop.f32.mrf.mxu3  ;;  %v4306_v39 = vadd.f32 %v4305_v5, %v11041_v50  ;;  %v4354_v61 = vpop.f32.mrf.mxu1  ;;  %v6784_v50 = vld [vmem:[%s13251_s1 + $0x308] sm:$0xf0]  ;;  %v7999_v31 = vld [vmem:[%s13251_s1 + $0x204] sm:$0xf] }
 0x37c   : > { %v6787_v29 = vor.u32 %v8031_v25, %v6784_v50  ;;  %v6656_v48 = vld [vmem:[%s13251_s1 + $0x208] sm:$0xf0] }
 0x37d   : > { %v11318_v24 = vadd.f32 %v4449_v28, %v4401_v27  ;;  %v4355_v45 = vadd.f32 %v4354_v61, %v4306_v39  ;;  %4500 = vmatmul.bf16.gmra.mxu0 %v13704_v23  ;;  %v6848_v27 = vld [vmem:[%s13251_s1 + $0x388] sm:$0xf0]  ;;  %v6659_v61 = vor.u32 %v7999_v31, %v6656_v48 }
 0x37e   : > { %4549 = vmatmul.bf16.gmra.mxu1 %v13705_v9  ;;  %4768 = vmatpush.bf16.msrb.mxu2 %v6787_v29 }
 0x37f   : > { %13703 = vst [vmem:[#allocation11_spill] sm:$0xff] %v11318_v24  ;;  %4598 = vmatmul.bf16.gmra.mxu2 %v13706_v57  ;;  %v6851_v57 = vor.u32 %v8047_v14, %v6848_v27  ;;  %4670 = vmatpush.bf16.msrb.mxu0 %v6659_v61  ;;  %v13711_v61 = vld [vmem:[#allocation25_spill] sm:$0xff]  ;;  %v13730_v24 = vld [vmem:[#allocation42_spill] sm:$0xff] }
 0x380   : > { %4647 = vmatmul.bf16.gmra.mxu3 %v13707_v36 }
 0x381   : > { %4817 = vmatpush.bf16.msrb.mxu3 %v6851_v57  ;;  %v13712_v57 = vld [vmem:[#allocation26_spill] sm:$0xff] }
 0x382   : > { %v4403_v46 = vpop.f32.mrf.mxu2  ;;  %v4307_v39 = vpop.f32.mrf.mxu0 }
 0x383   : > { %v4404_v28 = vadd.f32 %v4403_v46, %v4355_v45  ;;  %v4452_v5 = vpop.f32.mrf.mxu3  ;;  %v4308_v36 = vadd.f32 %v4307_v39, %v11064_v62  ;;  %v4356_v25 = vpop.f32.mrf.mxu1  ;;  %v6720_v45 = vld [vmem:[%s13251_s1 + $0x288] sm:$0xf0]  ;;  %v13710_v39 = vld [vmem:[#allocation24_spill] sm:$0xff] }
 0x384   : > { %v6723_v31 = vor.u32 %v8015_v17, %v6720_v45 }
 0x385   : > { %v11343_v50 = vadd.f32 %v4452_v5, %v4404_v28  ;;  %v4357_v11 = vadd.f32 %v4356_v25, %v4308_v36  ;;  %v13713_v36 = vld [vmem:[#allocation27_spill] sm:$0xff] }
 0x386   : > { %4719 = vmatpush.bf16.msrb.mxu1 %v6723_v31 }
 0x387   : > { %13708 = vst [vmem:[#allocation12_spill] sm:$0xff] %v11343_v50  ;;  %v13729_v50 = vld [vmem:[#allocation41_spill] sm:$0xff] }
 0x38a   : > { %v4405_v46 = vpop.f32.mrf.mxu2  ;;  %v4310_v62 = vpop.f32.mrf.mxu0 }
 0x38b   : > { %v4406_v48 = vadd.f32 %v4405_v46, %v4357_v11  ;;  %v4454_v14 = vpop.f32.mrf.mxu3  ;;  %v4311_v29 = vadd.f32 %v4310_v62, %v11093_v43  ;;  %v4359_v27 = vpop.f32.mrf.mxu1 }
 0x38d   : > { %v11352_v28 = vadd.f32 %v4454_v14, %v4406_v48  ;;  %v4360_v5 = vadd.f32 %v4359_v27, %v4311_v29  ;;  %4505 = vmatmul.bf16.gmra.mxu0 %v13710_v39  ;;  %v8109_v48 = vld [vmem:[%s13251_s1 + $0x574] sm:$0xf]  ;;  %v7096_v14 = vld [vmem:[%s13251_s1 + $0x578] sm:$0xf0] }
 0x38e   : > { %4554 = vmatmul.bf16.gmra.mxu1 %v13711_v61  ;;  %v8077_v29 = vld [vmem:[%s13251_s1 + $0x474] sm:$0xf]  ;;  %v7099_v27 = vor.u32 %v8109_v48, %v7096_v14 }
 0x38f   : > { %13709 = vst [vmem:[#allocation13_spill] sm:$0xff] %v11352_v28  ;;  %4603 = vmatmul.bf16.gmra.mxu2 %v13712_v57  ;;  %v7160_v57 = vld [vmem:[%s13251_s1 + $0x5f8] sm:$0xf0]  ;;  %v8085_v28 = vld [vmem:[%s13251_s1 + $0x4b4] sm:$0xf] }
 0x390   : > { %4652 = vmatmul.bf16.gmra.mxu3 %v13713_v36  ;;  %4957 = vmatpush.bf16.msra.mxu2 %v7099_v27  ;;  %v13719_v27 = vld [vmem:[#allocation33_spill] sm:$0xff] }
 0x392   : > { %v4408_v25 = vpop.f32.mrf.mxu2  ;;  %v4312_v45 = vpop.f32.mrf.mxu0 }
 0x393   : > { %v4409_v17 = vadd.f32 %v4408_v25, %v4360_v5  ;;  %v4457_v11 = vpop.f32.mrf.mxu3  ;;  %v4313_v46 = vadd.f32 %v4312_v45, %v11114_v12  ;;  %v4361_v43 = vpop.f32.mrf.mxu1  ;;  %v6968_v12 = vld [vmem:[%s13251_s1 + $0x478] sm:$0xf0]  ;;  %v8125_v5 = vld [vmem:[%s13251_s1 + $0x5f4] sm:$0xf] }
 0x394   : > { %v6971_v36 = vor.u32 %v8077_v29, %v6968_v12  ;;  %v7163_v25 = vor.u32 %v8125_v5, %v7160_v57  ;;  %v13716_v57 = vld [vmem:[#allocation30_spill] sm:$0xff] }
 0x395   : > { %v11359_v62 = vadd.f32 %v4457_v11, %v4409_v17  ;;  %v4362_v31 = vadd.f32 %v4361_v43, %v4313_v46  ;;  %v8093_v17 = vld [vmem:[%s13251_s1 + $0x4f4] sm:$0xf]  ;;  %v7032_v11 = vld [vmem:[%s13251_s1 + $0x4f8] sm:$0xf0] }
 0x396   : > { %v7035_v46 = vor.u32 %v8093_v17, %v7032_v11  ;;  %4859 = vmatpush.bf16.msra.mxu0 %v6971_v36  ;;  %5006 = vmatpush.bf16.msra.mxu3 %v7163_v25  ;;  %v6960_v25 = vld [vmem:[%s13251_s1 + $0x468] sm:$0xf0] }
 0x397   : > { %13714 = vst [vmem:[#allocation14_spill] sm:$0xff] %v11359_v62  ;;  %v13718_v62 = vld [vmem:[#allocation32_spill] sm:$0xff]  ;;  %v7152_v17 = vld [vmem:[%s13251_s1 + $0x5e8] sm:$0xf0] }
 0x398   : > { %4908 = vmatpush.bf16.msra.mxu1 %v7035_v46 }
 0x39a   : > { %v4410_v45 = vpop.f32.mrf.mxu2  ;;  %v4315_v14 = vpop.f32.mrf.mxu0 }
 0x39b   : > { %v4411_v43 = vadd.f32 %v4410_v45, %v4362_v31  ;;  %v4459_v48 = vpop.f32.mrf.mxu3  ;;  %v4316_v38 = vadd.f32 %v4315_v14, %v11139_v0  ;;  %v4364_v29 = vpop.f32.mrf.mxu1  ;;  %v8107_v31 = vld [vmem:[%s13251_s1 + $0x564] sm:$0xf]  ;;  %v7088_v0 = vld [vmem:[%s13251_s1 + $0x568] sm:$0xf0] }
 0x39c   : > { %v7091_v36 = vor.u32 %v8107_v31, %v7088_v0  ;;  %v8091_v0 = vld [vmem:[%s13251_s1 + $0x4e4] sm:$0xf] }
 0x39d   : > { %v11386_v12 = vadd.f32 %v4459_v48, %v4411_v43  ;;  %v4365_v5 = vadd.f32 %v4364_v29, %v4316_v38  ;;  %4510 = vmatmul.bf16.gmra.mxu0 %v13716_v57  ;;  %v8075_v38 = vld [vmem:[%s13251_s1 + $0x464] sm:$0xf] }
 0x39e   : > { %4559 = vmatmul.bf16.gmra.mxu1 %v13717_v16  ;;  %v6963_v45 = vor.u32 %v8075_v38, %v6960_v25  ;;  %4958 = vmatpush.bf16.msra.mxu2 %v7091_v36  ;;  %v7024_v38 = vld [vmem:[%s13251_s1 + $0x4e8] sm:$0xf0]  ;;  %v8332_v36 = vld [vmem:[%s13252_s2] sm:$0x3] }
 0x39f   : > { %13715 = vst [vmem:[#allocation15_spill] sm:$0xff] %v11386_v12  ;;  %4608 = vmatmul.bf16.gmra.mxu2 %v13718_v62  ;;  %v8123_v62 = vld [vmem:[%s13251_s1 + $0x5e4] sm:$0xf]  ;;  %v13727_v12 = vld [vmem:[#allocation39_spill] sm:$0xff] }
 0x3a0   : > { %4657 = vmatmul.bf16.gmra.mxu3 %v13719_v27  ;;  %v7155_v46 = vor.u32 %v8123_v62, %v7152_v17  ;;  %4860 = vmatpush.bf16.msra.mxu0 %v6963_v45 }
 0x3a2   : > { %v4413_v11 = vpop.f32.mrf.mxu2  ;;  %v4317_v14 = vpop.f32.mrf.mxu0  ;;  %5007 = vmatpush.bf16.msra.mxu3 %v7155_v46 }
 0x3a3   : > { %v4414_v43 = vadd.f32 %v4413_v11, %v4365_v5  ;;  %v4462_v48 = vpop.f32.mrf.mxu3  ;;  %v4318_v29 = vadd.f32 %v4317_v14, %v11148_v19  ;;  %v4366_v27 = vpop.f32.mrf.mxu1  ;;  %v7027_v5 = vor.u32 %v8091_v0, %v7024_v38  ;;  %v11422_v19 = vperm.slane %v8332_v36, 1  ;;  %v8105_v0 = vld [vmem:[%s13251_s1 + $0x554] sm:$0xf]  ;;  %v7080_v38 = vld [vmem:[%s13251_s1 + $0x558] sm:$0xf0] }
 0x3a5   : > { %v11411_v31 = vadd.f32 %v4462_v48, %v4414_v43  ;;  %v4367_v25 = vadd.f32 %v4366_v27, %v4318_v29  ;;  %4909 = vmatpush.bf16.msra.mxu1 %v7027_v5  ;;  %v13722_v29 = vld [vmem:[#allocation34_spill] sm:$0xff]  ;;  %v13723_v27 = vld [vmem:[#allocation35_spill] sm:$0xff]  ;;  %v7083_v5 = vor.u32 %v8105_v0, %v7080_v38  ;;  %v8089_v38 = vld [vmem:[%s13251_s1 + $0x4d4] sm:$0xf] }
 0x3a7   : > { %13720 = vst [vmem:[#allocation16_spill] sm:$0xff] %v11411_v31  ;;  %4959 = vmatpush.bf16.msra.mxu2 %v7083_v5  ;;  %v8087_v31 = vld [vmem:[%s13251_s1 + $0x4c4] sm:$0xf] }
 0x3aa   : > { %v4415_v62 = vpop.f32.mrf.mxu2  ;;  %v4476_v45 = vpop.f32.mrf.mxu0 }
 0x3ab   : > { %v4416_v17 = vadd.f32 %v4415_v62, %v4367_v25  ;;  %v4464_v11 = vpop.f32.mrf.mxu3  ;;  %v4477_v46 = vadd.f32 %v4476_v45, %v11422_v19  ;;  %v4525_v43 = vpop.f32.mrf.mxu1  ;;  %v8073_v25 = vld [vmem:[%s13251_s1 + $0x454] sm:$0xf] }
 0x3ad   : > { %v11425_v48 = vadd.f32 %v4464_v11, %v4416_v17  ;;  %v4526_v14 = vadd.f32 %v4525_v43, %v4477_v46  ;;  %4671 = vmatmul.bf16.vlgmr.msrb.gmra.mxu0 %v13680_v52  ;;  %v6952_v52 = vld [vmem:[%s13251_s1 + $0x458] sm:$0xf0] }
 0x3ae   : > { %4720 = vmatmul.bf16.vlgmr.msrb.gmra.mxu1 %v13681_v56  ;;  %v8121_v56 = vld [vmem:[%s13251_s1 + $0x5d4] sm:$0xf]  ;;  %v6955_v62 = vor.u32 %v8073_v25, %v6952_v52  ;;  %v7144_v17 = vld [vmem:[%s13251_s1 + $0x5d8] sm:$0xf0] }
 0x3af   : > { %13721 = vst [vmem:[#allocation17_spill] sm:$0xff] %v11425_v48  ;;  %4769 = vmatmul.bf16.vlgmr.msrb.gmra.mxu2 %v13722_v29  ;;  %v7147_v43 = vor.u32 %v8121_v56, %v7144_v17  ;;  %v7016_v25 = vld [vmem:[%s13251_s1 + $0x4d8] sm:$0xf0] }
 0x3b0   : > { %4818 = vmatmul.bf16.vlgmr.msrb.gmra.mxu3 %v13723_v27  ;;  %4861 = vmatpush.bf16.msra.mxu0 %v6955_v62  ;;  %v7019_v52 = vor.u32 %v8089_v38, %v7016_v25  ;;  %v13725_v48 = vld [vmem:[#allocation37_spill] sm:$0xff]  ;;  %v8071_v38 = vld [vmem:[%s13251_s1 + $0x444] sm:$0xf] }
 0x3b1   : > { %5008 = vmatpush.bf16.msra.mxu3 %v7147_v43  ;;  %v13724_v43 = vld [vmem:[#allocation36_spill] sm:$0xff] }
 0x3b2   : > { %v4574_v36 = vpop.f32.mrf.mxu2  ;;  %v4478_v46 = vpop.f32.mrf.mxu0  ;;  %4910 = vmatpush.bf16.msra.mxu1 %v7019_v52 }
 0x3b3   : > { %v4575_v11 = vadd.f32 %v4574_v36, %v4526_v14  ;;  %v4623_v45 = vpop.f32.mrf.mxu3  ;;  %v4479_v29 = vadd.f32 %v4478_v46, %v11422_v19  ;;  %v4527_v27 = vpop.f32.mrf.mxu1 }
 0x3b5   : > { %v11450_v0 = vadd.f32 %v4623_v45, %v4575_v11  ;;  %v4528_v14 = vadd.f32 %v4527_v27, %v4479_v29  ;;  %v8103_v29 = vld [vmem:[%s13251_s1 + $0x544] sm:$0xf]  ;;  %v7072_v27 = vld [vmem:[%s13251_s1 + $0x548] sm:$0xf0] }
 0x3b6   : > { %v7075_v25 = vor.u32 %v8103_v29, %v7072_v27 }
 0x3b8   : > { %4960 = vmatpush.bf16.msra.mxu2 %v7075_v25 }
 0x3ba   : > { %v4576_v5 = vpop.f32.mrf.mxu2  ;;  %v4481_v17 = vpop.f32.mrf.mxu0 }
 0x3bb   : > { %v4577_v56 = vadd.f32 %v4576_v5, %v4528_v14  ;;  %v4625_v36 = vpop.f32.mrf.mxu3  ;;  %v4482_v62 = vadd.f32 %v4481_v17, %v11422_v19  ;;  %v4530_v11 = vpop.f32.mrf.mxu1  ;;  %v7136_v14 = vld [vmem:[%s13251_s1 + $0x5c8] sm:$0xf0] }
 0x3bd   : > { %v11459_v45 = vadd.f32 %v4625_v36, %v4577_v56  ;;  %v4531_v46 = vadd.f32 %v4530_v11, %v4482_v62  ;;  %4676 = vmatmul.bf16.gmra.mxu0 %v13686_v2  ;;  %v6944_v2 = vld [vmem:[%s13251_s1 + $0x448] sm:$0xf0] }
 0x3be   : > { %4725 = vmatmul.bf16.gmra.mxu1 %v13687_v63  ;;  %v8119_v63 = vld [vmem:[%s13251_s1 + $0x5c4] sm:$0xf]  ;;  %v6947_v5 = vor.u32 %v8071_v38, %v6944_v2  ;;  %v7008_v38 = vld [vmem:[%s13251_s1 + $0x4c8] sm:$0xf0] }
 0x3bf   : > { %4774 = vmatmul.bf16.gmra.mxu2 %v13724_v43  ;;  %v7139_v56 = vor.u32 %v8119_v63, %v7136_v14 }
 0x3c0   : > { %4823 = vmatmul.bf16.gmra.mxu3 %v13725_v48  ;;  %4862 = vmatpush.bf16.msra.mxu0 %v6947_v5 }
 0x3c1   : > { %5009 = vmatpush.bf16.msra.mxu3 %v7139_v56 }
 0x3c2   : > { %v4579_v52 = vpop.f32.mrf.mxu2  ;;  %v4483_v62 = vpop.f32.mrf.mxu0 }
 0x3c3   : > { %v4580_v36 = vadd.f32 %v4579_v52, %v4531_v46  ;;  %v4628_v17 = vpop.f32.mrf.mxu3  ;;  %v4484_v11 = vadd.f32 %v4483_v62, %v11422_v19  ;;  %v4532_v29 = vpop.f32.mrf.mxu1  ;;  %v7011_v46 = vor.u32 %v8087_v31, %v7008_v38  ;;  %v13726_v62 = vld [vmem:[#allocation38_spill] sm:$0xff]  ;;  %v8101_v31 = vld [vmem:[%s13251_s1 + $0x534] sm:$0xf] }
 0x3c5   : > { %v11484_v27 = vadd.f32 %v4628_v17, %v4580_v36  ;;  %v4533_v2 = vadd.f32 %v4532_v29, %v4484_v11  ;;  %4911 = vmatpush.bf16.msra.mxu1 %v7011_v46  ;;  %v7064_v11 = vld [vmem:[%s13251_s1 + $0x538] sm:$0xf0]  ;;  %v8069_v29 = vld [vmem:[%s13251_s1 + $0x434] sm:$0xf] }
 0x3c6   : > { %v7067_v38 = vor.u32 %v8101_v31, %v7064_v11 }
 0x3c8   : > { %4961 = vmatpush.bf16.msra.mxu2 %v7067_v38 }
 0x3ca   : > { %v4581_v63 = vpop.f32.mrf.mxu2  ;;  %v4486_v52 = vpop.f32.mrf.mxu0 }
 0x3cb   : > { %v4582_v25 = vadd.f32 %v4581_v63, %v4533_v2  ;;  %v4630_v14 = vpop.f32.mrf.mxu3  ;;  %v4487_v5 = vadd.f32 %v4486_v52, %v11422_v19  ;;  %v4535_v56 = vpop.f32.mrf.mxu1  ;;  %v7128_v2 = vld [vmem:[%s13251_s1 + $0x5b8] sm:$0xf0] }
 0x3cd   : > { %v11493_v36 = vadd.f32 %v4630_v14, %v4582_v25  ;;  %v4536_v17 = vadd.f32 %v4535_v56, %v4487_v5  ;;  %4681 = vmatmul.bf16.gmra.mxu0 %v13692_v18  ;;  %v6936_v18 = vld [vmem:[%s13251_s1 + $0x438] sm:$0xf0] }
 0x3ce   : > { %4730 = vmatmul.bf16.gmra.mxu1 %v13693_v7  ;;  %v8117_v7 = vld [vmem:[%s13251_s1 + $0x5b4] sm:$0xf]  ;;  %v6939_v63 = vor.u32 %v8069_v29, %v6936_v18  ;;  %v7000_v29 = vld [vmem:[%s13251_s1 + $0x4b8] sm:$0xf0] }
 0x3cf   : > { %4779 = vmatmul.bf16.gmra.mxu2 %v13726_v62  ;;  %v7131_v25 = vor.u32 %v8117_v7, %v7128_v2 }
 0x3d0   : > { %4828 = vmatmul.bf16.gmra.mxu3 %v13727_v12  ;;  %4863 = vmatpush.bf16.msra.mxu0 %v6939_v63 }
 0x3d1   : > { %5010 = vmatpush.bf16.msra.mxu3 %v7131_v25 }
 0x3d2   : > { %v4584_v46 = vpop.f32.mrf.mxu2  ;;  %v4488_v5 = vpop.f32.mrf.mxu0 }
 0x3d3   : > { %v4585_v14 = vadd.f32 %v4584_v46, %v4536_v17  ;;  %v4633_v52 = vpop.f32.mrf.mxu3  ;;  %v4489_v56 = vadd.f32 %v4488_v5, %v11422_v19  ;;  %v4537_v31 = vpop.f32.mrf.mxu1  ;;  %v7003_v17 = vor.u32 %v8085_v28, %v7000_v29  ;;  %v13728_v5 = vld [vmem:[#allocation40_spill] sm:$0xff]  ;;  %v8099_v28 = vld [vmem:[%s13251_s1 + $0x524] sm:$0xf] }
 0x3d5   : > { %v11518_v11 = vadd.f32 %v4633_v52, %v4585_v14  ;;  %v4538_v18 = vadd.f32 %v4537_v31, %v4489_v56  ;;  %4912 = vmatpush.bf16.msra.mxu1 %v7003_v17  ;;  %v7056_v56 = vld [vmem:[%s13251_s1 + $0x528] sm:$0xf0]  ;;  %v8067_v31 = vld [vmem:[%s13251_s1 + $0x424] sm:$0xf] }
 0x3d6   : > { %v7059_v29 = vor.u32 %v8099_v28, %v7056_v56  ;;  %v7120_v17 = vld [vmem:[%s13251_s1 + $0x5a8] sm:$0xf0] }
 0x3d8   : > { %4962 = vmatpush.bf16.msra.mxu2 %v7059_v29 }
 0x3da   : > { %v4586_v7 = vpop.f32.mrf.mxu2  ;;  %v4491_v46 = vpop.f32.mrf.mxu0 }
 0x3db   : > { %v4587_v38 = vadd.f32 %v4586_v7, %v4538_v18  ;;  %v4635_v2 = vpop.f32.mrf.mxu3  ;;  %v4492_v63 = vadd.f32 %v4491_v46, %v11422_v19  ;;  %v4540_v25 = vpop.f32.mrf.mxu1  ;;  %v8115_v18 = vld [vmem:[%s13251_s1 + $0x5a4] sm:$0xf] }
 0x3dd   : > { %v11527_v14 = vadd.f32 %v4635_v2, %v4587_v38  ;;  %v4541_v52 = vadd.f32 %v4540_v25, %v4492_v63  ;;  %4686 = vmatmul.bf16.gmra.mxu0 %v13728_v5  ;;  %v7123_v2 = vor.u32 %v8115_v18, %v7120_v17 }
 0x3de   : > { %4735 = vmatmul.bf16.gmra.mxu1 %v13729_v50  ;;  %v6928_v50 = vld [vmem:[%s13251_s1 + $0x428] sm:$0xf0] }
 0x3df   : > { %4784 = vmatmul.bf16.gmra.mxu2 %v13730_v24  ;;  %v6931_v38 = vor.u32 %v8067_v31, %v6928_v50  ;;  %5011 = vmatpush.bf16.msra.mxu3 %v7123_v2  ;;  %v6992_v31 = vld [vmem:[%s13251_s1 + $0x4a8] sm:$0xf0] }
 0x3e0   : > { %4833 = vmatmul.bf16.gmra.mxu3 %v13731_v55 }
 0x3e1   : > { %4864 = vmatpush.bf16.msra.mxu0 %v6931_v38 }
 0x3e2   : > { %v4589_v7 = vpop.f32.mrf.mxu2  ;;  %v4493_v25 = vpop.f32.mrf.mxu0 }
 0x3e3   : > { %v4590_v46 = vadd.f32 %v4589_v7, %v4541_v52  ;;  %v4638_v63 = vpop.f32.mrf.mxu3  ;;  %v4494_v5 = vadd.f32 %v4493_v25, %v11422_v19  ;;  %v4542_v28 = vpop.f32.mrf.mxu1  ;;  %v6995_v52 = vor.u32 %v8083_v54, %v6992_v31  ;;  %v13732_v25 = vld [vmem:[#allocation44_spill] sm:$0xff] }
 0x3e4   : > { %v8097_v54 = vld [vmem:[%s13251_s1 + $0x514] sm:$0xf] }
 0x3e5   : > { %v11552_v56 = vadd.f32 %v4638_v63, %v4590_v46  ;;  %v4543_v50 = vadd.f32 %v4542_v28, %v4494_v5  ;;  %4913 = vmatpush.bf16.msra.mxu1 %v6995_v52  ;;  %v7048_v5 = vld [vmem:[%s13251_s1 + $0x518] sm:$0xf0]  ;;  %v8065_v28 = vld [vmem:[%s13251_s1 + $0x414] sm:$0xf] }
 0x3e6   : > { %v7051_v31 = vor.u32 %v8097_v54, %v7048_v5  ;;  %v8081_v54 = vld [vmem:[%s13251_s1 + $0x494] sm:$0xf]  ;;  %v6984_v5 = vld [vmem:[%s13251_s1 + $0x498] sm:$0xf0] }
 0x3e8   : > { %4963 = vmatpush.bf16.msra.mxu2 %v7051_v31 }
 0x3ea   : > { %v4591_v18 = vpop.f32.mrf.mxu2  ;;  %v4496_v7 = vpop.f32.mrf.mxu0 }
 0x3eb   : > { %v4592_v29 = vadd.f32 %v4591_v18, %v4543_v50  ;;  %v4640_v17 = vpop.f32.mrf.mxu3  ;;  %v4497_v38 = vadd.f32 %v4496_v7, %v11422_v19  ;;  %v4545_v2 = vpop.f32.mrf.mxu1 }
 0x3ed   : > { %v11561_v46 = vadd.f32 %v4640_v17, %v4592_v29  ;;  %v4546_v63 = vadd.f32 %v4545_v2, %v4497_v38  ;;  %4691 = vmatmul.bf16.gmra.mxu0 %v13704_v23  ;;  %v6920_v23 = vld [vmem:[%s13251_s1 + $0x418] sm:$0xf0] }
 0x3ee   : > { %4740 = vmatmul.bf16.gmra.mxu1 %v13705_v9  ;;  %v7112_v9 = vld [vmem:[%s13251_s1 + $0x598] sm:$0xf0]  ;;  %v6923_v52 = vor.u32 %v8065_v28, %v6920_v23 }
 0x3ef   : > { %4789 = vmatmul.bf16.gmra.mxu2 %v13732_v25 }
 0x3f0   : > { %4838 = vmatmul.bf16.gmra.mxu3 %v13733_v30  ;;  %v8113_v30 = vld [vmem:[%s13251_s1 + $0x594] sm:$0xf]  ;;  %4865 = vmatpush.bf16.msra.mxu0 %v6923_v52 }
 0x3f1   : > { %v7115_v18 = vor.u32 %v8113_v30, %v7112_v9 }
 0x3f2   : > { %v4594_v50 = vpop.f32.mrf.mxu2  ;;  %v4498_v7 = vpop.f32.mrf.mxu0 }
 0x3f3   : > { %v4595_v29 = vadd.f32 %v4594_v50, %v4546_v63  ;;  %v4643_v17 = vpop.f32.mrf.mxu3  ;;  %v4499_v38 = vadd.f32 %v4498_v7, %v11422_v19  ;;  %v4547_v2 = vpop.f32.mrf.mxu1  ;;  %5012 = vmatpush.bf16.msra.mxu3 %v7115_v18  ;;  %v6987_v63 = vor.u32 %v8081_v54, %v6984_v5  ;;  %v13735_v7 = vld [vmem:[#allocation47_spill] sm:$0xff]  ;;  %v8063_v54 = vld [vmem:[%s13251_s1 + $0x404] sm:$0xf] }
 0x3f5   : > { %v11586_v25 = vadd.f32 %v4643_v17, %v4595_v29  ;;  %v4548_v28 = vadd.f32 %v4547_v2, %v4499_v38  ;;  %4914 = vmatpush.bf16.msra.mxu1 %v6987_v63  ;;  %v13734_v17 = vld [vmem:[#allocation46_spill] sm:$0xff]  ;;  %v7040_v2 = vld [vmem:[%s13251_s1 + $0x508] sm:$0xf0] }
 0x3f6   : > { %v8095_v38 = vld [vmem:[%s13251_s1 + $0x504] sm:$0xf] }
 0x3f7   : > { %v7043_v5 = vor.u32 %v8095_v38, %v7040_v2 }
 0x3f9   : > { %4964 = vmatpush.bf16.msra.mxu2 %v7043_v5 }
 0x3fa   : > { %v4596_v23 = vpop.f32.mrf.mxu2  ;;  %v4501_v9 = vpop.f32.mrf.mxu0 }
 0x3fb   : > { %v4597_v31 = vadd.f32 %v4596_v23, %v4548_v28  ;;  %v4645_v30 = vpop.f32.mrf.mxu3  ;;  %v4502_v50 = vadd.f32 %v4501_v9, %v11422_v19  ;;  %v4550_v52 = vpop.f32.mrf.mxu1  ;;  %v7104_v28 = vld [vmem:[%s13251_s1 + $0x588] sm:$0xf0] }
 0x3fd   : > { %v11595_v18 = vadd.f32 %v4645_v30, %v4597_v31  ;;  %v4551_v29 = vadd.f32 %v4550_v52, %v4502_v50  ;;  %4696 = vmatmul.bf16.gmra.mxu0 %v13710_v39  ;;  %v6912_v39 = vld [vmem:[%s13251_s1 + $0x408] sm:$0xf0] }
 0x3fe   : > { %4745 = vmatmul.bf16.gmra.mxu1 %v13711_v61  ;;  %v8111_v61 = vld [vmem:[%s13251_s1 + $0x584] sm:$0xf]  ;;  %v6915_v23 = vor.u32 %v8063_v54, %v6912_v39  ;;  %v6976_v54 = vld [vmem:[%s13251_s1 + $0x488] sm:$0xf0] }
 0x3ff   : > { %4794 = vmatmul.bf16.gmra.mxu2 %v13734_v17  ;;  %v7107_v31 = vor.u32 %v8111_v61, %v7104_v28 }
 0x400   : > { %4843 = vmatmul.bf16.gmra.mxu3 %v13735_v7  ;;  %4866 = vmatpush.bf16.msra.mxu0 %v6915_v23 }
 0x401   : > { %5013 = vmatpush.bf16.msra.mxu3 %v7107_v31 }
 0x402   : > { %v4599_v63 = vpop.f32.mrf.mxu2  ;;  %v4503_v50 = vpop.f32.mrf.mxu0 }
 0x403   : > { %v4600_v30 = vadd.f32 %v4599_v63, %v4551_v29  ;;  %v4648_v9 = vpop.f32.mrf.mxu3  ;;  %v4504_v52 = vadd.f32 %v4503_v50, %v11422_v19  ;;  %v4552_v38 = vpop.f32.mrf.mxu1  ;;  %v6979_v29 = vor.u32 %v8079_v32, %v6976_v54  ;;  %v13736_v50 = vld [vmem:[#allocation48_spill] sm:$0xff] }
 0x404   : > { %v8173_v32 = vld [vmem:[%s13251_s1 + $0x774] sm:$0xf] }
 0x405   : > { %v11620_v2 = vadd.f32 %v4648_v9, %v4600_v30  ;;  %v4553_v39 = vadd.f32 %v4552_v38, %v4504_v52  ;;  %4915 = vmatpush.bf16.msra.mxu1 %v6979_v29  ;;  %v7352_v52 = vld [vmem:[%s13251_s1 + $0x778] sm:$0xf0]  ;;  %v8141_v38 = vld [vmem:[%s13251_s1 + $0x674] sm:$0xf] }
 0x406   : > { %v7355_v54 = vor.u32 %v8173_v32, %v7352_v52 }
 0x408   : > { %5153 = vmatpush.bf16.msrb.mxu2 %v7355_v54 }
 0x40a   : > { %v4601_v61 = vpop.f32.mrf.mxu2  ;;  %v4506_v63 = vpop.f32.mrf.mxu0 }
 0x40b   : > { %v4602_v5 = vadd.f32 %v4601_v61, %v4553_v39  ;;  %v4650_v28 = vpop.f32.mrf.mxu3  ;;  %v4507_v23 = vadd.f32 %v4506_v63, %v11422_v19  ;;  %v4555_v31 = vpop.f32.mrf.mxu1  ;;  %v7416_v39 = vld [vmem:[%s13251_s1 + $0x7f8] sm:$0xf0] }
 0x40d   : > { %v11629_v30 = vadd.f32 %v4650_v28, %v4602_v5  ;;  %v4556_v9 = vadd.f32 %v4555_v31, %v4507_v23  ;;  %4701 = vmatmul.bf16.gmra.mxu0 %v13716_v57  ;;  %v8189_v57 = vld [vmem:[%s13251_s1 + $0x7f4] sm:$0xf] }
 0x40e   : > { %4750 = vmatmul.bf16.gmra.mxu1 %v13717_v16  ;;  %v7224_v16 = vld [vmem:[%s13251_s1 + $0x678] sm:$0xf0]  ;;  %v7419_v5 = vor.u32 %v8189_v57, %v7416_v39 }
 0x40f   : > { %4799 = vmatmul.bf16.gmra.mxu2 %v13736_v50  ;;  %v7227_v61 = vor.u32 %v8141_v38, %v7224_v16  ;;  %v7288_v38 = vld [vmem:[%s13251_s1 + $0x6f8] sm:$0xf0] }
 0x410   : > { %4848 = vmatmul.bf16.gmra.mxu3 %v13737_v6 }
 0x411   : > { %5055 = vmatpush.bf16.msrb.mxu0 %v7227_v61  ;;  %5202 = vmatpush.bf16.msrb.mxu3 %v7419_v5 }
 0x412   : > { %v4604_v29 = vpop.f32.mrf.mxu2  ;;  %v4508_v23 = vpop.f32.mrf.mxu0 }
 0x413   : > { %v4605_v28 = vadd.f32 %v4604_v29, %v4556_v9  ;;  %v4653_v63 = vpop.f32.mrf.mxu3  ;;  %v4509_v31 = vadd.f32 %v4508_v23, %v11422_v19  ;;  %v4557_v32 = vpop.f32.mrf.mxu1  ;;  %v7291_v9 = vor.u32 %v8157_v34, %v7288_v38  ;;  %v13738_v23 = vld [vmem:[#allocation50_spill] sm:$0xff] }
 0x414   : > { %v8171_v34 = vld [vmem:[%s13251_s1 + $0x764] sm:$0xf] }
 0x415   : > { %v11654_v52 = vadd.f32 %v4653_v63, %v4605_v28  ;;  %v4558_v16 = vadd.f32 %v4557_v32, %v4509_v31  ;;  %5104 = vmatpush.bf16.msrb.mxu1 %v7291_v9  ;;  %v7344_v31 = vld [vmem:[%s13251_s1 + $0x768] sm:$0xf0]  ;;  %v8139_v32 = vld [vmem:[%s13251_s1 + $0x664] sm:$0xf] }
 0x416   : > { %v7347_v38 = vor.u32 %v8171_v34, %v7344_v31  ;;  %v7408_v9 = vld [vmem:[%s13251_s1 + $0x7e8] sm:$0xf0] }
 0x418   : > { %5154 = vmatpush.bf16.msrb.mxu2 %v7347_v38 }
 0x41a   : > { %v4606_v57 = vpop.f32.mrf.mxu2  ;;  %v4511_v29 = vpop.f32.mrf.mxu0 }
 0x41b   : > { %v4607_v54 = vadd.f32 %v4606_v57, %v4558_v16  ;;  %v4655_v39 = vpop.f32.mrf.mxu3  ;;  %v4512_v61 = vadd.f32 %v4511_v29, %v11422_v19  ;;  %v4560_v5 = vpop.f32.mrf.mxu1  ;;  %v8187_v16 = vld [vmem:[%s13251_s1 + $0x7e4] sm:$0xf] }
 0x41d   : > { %v11663_v28 = vadd.f32 %v4655_v39, %v4607_v54  ;;  %v4561_v63 = vadd.f32 %v4560_v5, %v4512_v61  ;;  %4706 = vmatmul.bf16.gmra.mxu0 %v13738_v23  ;;  %v7411_v39 = vor.u32 %v8187_v16, %v7408_v9 }
 0x41e   : > { %4755 = vmatmul.bf16.gmra.mxu1 %v13739_v42  ;;  %v7216_v42 = vld [vmem:[%s13251_s1 + $0x668] sm:$0xf0] }
 0x41f   : > { %4804 = vmatmul.bf16.gmra.mxu2 %v13740_v59  ;;  %v7219_v54 = vor.u32 %v8139_v32, %v7216_v42  ;;  %5203 = vmatpush.bf16.msrb.mxu3 %v7411_v39  ;;  %v7280_v32 = vld [vmem:[%s13251_s1 + $0x6e8] sm:$0xf0] }
 0x420   : > { %4853 = vmatmul.bf16.gmra.mxu3 %v13741_v13 }
 0x421   : > { %5056 = vmatpush.bf16.msrb.mxu0 %v7219_v54 }
 0x422   : > { %v4609_v57 = vpop.f32.mrf.mxu2  ;;  %v4513_v5 = vpop.f32.mrf.mxu0 }
 0x423   : > { %v4610_v29 = vadd.f32 %v4609_v57, %v4561_v63  ;;  %v4658_v61 = vpop.f32.mrf.mxu3  ;;  %v4514_v23 = vadd.f32 %v4513_v5, %v11422_v19  ;;  %v4562_v34 = vpop.f32.mrf.mxu1  ;;  %v7283_v63 = vor.u32 %v8155_v22, %v7280_v32  ;;  %v13743_v5 = vld [vmem:[#allocation29_spill] sm:$0xff]  ;;  %v8169_v22 = vld [vmem:[%s13251_s1 + $0x754] sm:$0xf] }
 0x424   : > { %v7208_v32 = vld [vmem:[%s13251_s1 + $0x658] sm:$0xf0] }
 0x425   : > { %v11688_v31 = vadd.f32 %v4658_v61, %v4610_v29  ;;  %v4563_v42 = vadd.f32 %v4562_v34, %v4514_v23  ;;  %5105 = vmatpush.bf16.msrb.mxu1 %v7283_v63  ;;  %v13742_v61 = vld [vmem:[#allocation28_spill] sm:$0xff] }
 0x426   : > { %v8137_v23 = vld [vmem:[%s13251_s1 + $0x654] sm:$0xf] }
 0x427   : > { %v7211_v63 = vor.u32 %v8137_v23, %v7208_v32 }
 0x429   : > { %5057 = vmatpush.bf16.msrb.mxu0 %v7211_v63 }
 0x42a   : > { %v4611_v16 = vpop.f32.mrf.mxu2  ;;  %v4672_v19 = vpop.f32.mrf.mxu0 }
 0x42b   : > { %v4612_v38 = vadd.f32 %v4611_v16, %v4563_v42  ;;  %v4660_v9 = vpop.f32.mrf.mxu3  ;;  %v4673_v57 = vadd.f32 %v4672_v19, %v11450_v0  ;;  %v4721_v54 = vpop.f32.mrf.mxu1  ;;  %v7336_v0 = vld [vmem:[%s13251_s1 + $0x758] sm:$0xf0] }
 0x42c   : > { %v7339_v34 = vor.u32 %v8169_v22, %v7336_v0  ;;  %v7272_v22 = vld [vmem:[%s13251_s1 + $0x6d8] sm:$0xf0] }
 0x42d   : > { %v11697_v39 = vadd.f32 %v4660_v9, %v4612_v38  ;;  %v4722_v29 = vadd.f32 %v4721_v54, %v4673_v57  ;;  %4867 = vmatmul.bf16.vlgmr.msra.gmra.mxu0 %v13742_v61 }
 0x42e   : > { %4916 = vmatmul.bf16.vlgmr.msra.gmra.mxu1 %v13743_v5  ;;  %5155 = vmatpush.bf16.msrb.mxu2 %v7339_v34  ;;  %v8153_v5 = vld [vmem:[%s13251_s1 + $0x6d4] sm:$0xf] }
 0x42f   : > { %4965 = vmatmul.bf16.vlgmr.msra.gmra.mxu2 %v13724_v43  ;;  %v7400_v43 = vld [vmem:[%s13251_s1 + $0x7d8] sm:$0xf0] }
 0x430   : > { %5014 = vmatmul.bf16.vlgmr.msra.gmra.mxu3 %v13725_v48  ;;  %v8185_v48 = vld [vmem:[%s13251_s1 + $0x7d4] sm:$0xf] }
 0x431   : > { %v7403_v16 = vor.u32 %v8185_v48, %v7400_v43 }
 0x432   : > { %v4770_v42 = vpop.f32.mrf.mxu2  ;;  %v4674_v19 = vpop.f32.mrf.mxu0 }
 0x433   : > { %v4771_v38 = vadd.f32 %v4770_v42, %v4722_v29  ;;  %v4819_v9 = vpop.f32.mrf.mxu3  ;;  %v4675_v57 = vadd.f32 %v4674_v19, %v11459_v45  ;;  %v4723_v54 = vpop.f32.mrf.mxu1  ;;  %5204 = vmatpush.bf16.msrb.mxu3 %v7403_v16  ;;  %v7275_v29 = vor.u32 %v8153_v5, %v7272_v22  ;;  %v13744_v16 = vld [vmem:[#allocation54_spill] sm:$0xff] }
 0x434   : > { %v8135_v19 = vld [vmem:[%s13251_s1 + $0x644] sm:$0xf] }
 0x435   : > { %v11722_v61 = vadd.f32 %v4819_v9, %v4771_v38  ;;  %v4724_v0 = vadd.f32 %v4723_v54, %v4675_v57  ;;  %5106 = vmatpush.bf16.msrb.mxu1 %v7275_v29  ;;  %v13745_v38 = vld [vmem:[#allocation55_spill] sm:$0xff]  ;;  %v8167_v9 = vld [vmem:[%s13251_s1 + $0x744] sm:$0xf] }
 0x436   : > { %v7200_v54 = vld [vmem:[%s13251_s1 + $0x648] sm:$0xf0] }
 0x437   : > { %v7203_v22 = vor.u32 %v8135_v19, %v7200_v54 }
 0x439   : > { %5058 = vmatpush.bf16.msrb.mxu0 %v7203_v22  ;;  %v13747_v22 = vld [vmem:[#allocation57_spill] sm:$0xff] }
 0x43a   : > { %v4772_v23 = vpop.f32.mrf.mxu2  ;;  %v4677_v45 = vpop.f32.mrf.mxu0 }
 0x43b   : > { %v4773_v34 = vadd.f32 %v4772_v23, %v4724_v0  ;;  %v4821_v32 = vpop.f32.mrf.mxu3  ;;  %v4678_v48 = vadd.f32 %v4677_v45, %v11484_v27  ;;  %v4726_v43 = vpop.f32.mrf.mxu1  ;;  %v7328_v27 = vld [vmem:[%s13251_s1 + $0x748] sm:$0xf0] }
 0x43c   : > { %v7331_v57 = vor.u32 %v8167_v9, %v7328_v27 }
 0x43d   : > { %v11731_v42 = vadd.f32 %v4821_v32, %v4773_v34  ;;  %v4727_v63 = vadd.f32 %v4726_v43, %v4678_v48  ;;  %4872 = vmatmul.bf16.gmra.mxu0 %v13744_v16  ;;  %v8151_v43 = vld [vmem:[%s13251_s1 + $0x6c4] sm:$0xf]  ;;  %v7264_v16 = vld [vmem:[%s13251_s1 + $0x6c8] sm:$0xf0] }
 0x43e   : > { %4921 = vmatmul.bf16.gmra.mxu1 %v13745_v38  ;;  %5156 = vmatpush.bf16.msrb.mxu2 %v7331_v57 }
 0x43f   : > { %4970 = vmatmul.bf16.gmra.mxu2 %v13726_v62  ;;  %v7392_v62 = vld [vmem:[%s13251_s1 + $0x7c8] sm:$0xf0] }
 0x440   : > { %5019 = vmatmul.bf16.gmra.mxu3 %v13727_v12  ;;  %v8183_v12 = vld [vmem:[%s13251_s1 + $0x7c4] sm:$0xf] }
 0x441   : > { %v7395_v0 = vor.u32 %v8183_v12, %v7392_v62 }
 0x442   : > { %v4775_v5 = vpop.f32.mrf.mxu2  ;;  %v4679_v34 = vpop.f32.mrf.mxu0 }
 0x443   : > { %v4776_v29 = vadd.f32 %v4775_v5, %v4727_v63  ;;  %v4824_v23 = vpop.f32.mrf.mxu3  ;;  %v4680_v32 = vadd.f32 %v4679_v34, %v11493_v36  ;;  %v4728_v45 = vpop.f32.mrf.mxu1  ;;  %5205 = vmatpush.bf16.msrb.mxu3 %v7395_v0  ;;  %v7267_v63 = vor.u32 %v8151_v43, %v7264_v16  ;;  %v13746_v5 = vld [vmem:[#allocation56_spill] sm:$0xff]  ;;  %v7192_v34 = vld [vmem:[%s13251_s1 + $0x638] sm:$0xf0] }
 0x444   : > { %v8165_v0 = vld [vmem:[%s13251_s1 + $0x734] sm:$0xf] }
 0x445   : > { %v11756_v48 = vadd.f32 %v4824_v23, %v4776_v29  ;;  %v4729_v38 = vadd.f32 %v4728_v45, %v4680_v32  ;;  %5107 = vmatpush.bf16.msrb.mxu1 %v7267_v63  ;;  %v8133_v29 = vld [vmem:[%s13251_s1 + $0x634] sm:$0xf] }
 0x446   : > { %v7195_v45 = vor.u32 %v8133_v29, %v7192_v34 }
 0x448   : > { %5059 = vmatpush.bf16.msrb.mxu0 %v7195_v45  ;;  %v13751_v45 = vld [vmem:[#allocation61_spill] sm:$0xff] }
 0x44a   : > { %v4777_v9 = vpop.f32.mrf.mxu2  ;;  %v4682_v36 = vpop.f32.mrf.mxu0 }
 0x44b   : > { %v4778_v27 = vadd.f32 %v4777_v9, %v4729_v38  ;;  %v4826_v19 = vpop.f32.mrf.mxu3  ;;  %v4683_v57 = vadd.f32 %v4682_v36, %v11518_v11  ;;  %v4731_v54 = vpop.f32.mrf.mxu1  ;;  %v7320_v11 = vld [vmem:[%s13251_s1 + $0x738] sm:$0xf0]  ;;  %v8149_v36 = vld [vmem:[%s13251_s1 + $0x6b4] sm:$0xf] }
 0x44c   : > { %v7323_v23 = vor.u32 %v8165_v0, %v7320_v11 }
 0x44d   : > { %v11765_v12 = vadd.f32 %v4826_v19, %v4778_v27  ;;  %v4732_v62 = vadd.f32 %v4731_v54, %v4683_v57  ;;  %4877 = vmatmul.bf16.gmra.mxu0 %v13746_v5  ;;  %v7256_v57 = vld [vmem:[%s13251_s1 + $0x6b8] sm:$0xf0] }
 0x44e   : > { %4926 = vmatmul.bf16.gmra.mxu1 %v13747_v22  ;;  %5157 = vmatpush.bf16.msrb.mxu2 %v7323_v23 }
 0x44f   : > { %4975 = vmatmul.bf16.gmra.mxu2 %v13730_v24  ;;  %v7384_v24 = vld [vmem:[%s13251_s1 + $0x7b8] sm:$0xf0] }
 0x450   : > { %5024 = vmatmul.bf16.gmra.mxu3 %v13731_v55  ;;  %v8181_v55 = vld [vmem:[%s13251_s1 + $0x7b4] sm:$0xf] }
 0x451   : > { %v7387_v43 = vor.u32 %v8181_v55, %v7384_v24  ;;  %v13748_v55 = vld [vmem:[#allocation58_spill] sm:$0xff]  ;;  %v13749_v24 = vld [vmem:[#allocation59_spill] sm:$0xff] }
 0x452   : > { %v4780_v32 = vpop.f32.mrf.mxu2  ;;  %v4684_v63 = vpop.f32.mrf.mxu0 }
 0x453   : > { %v4781_v16 = vadd.f32 %v4780_v32, %v4732_v62  ;;  %v4829_v38 = vpop.f32.mrf.mxu3  ;;  %v4685_v9 = vadd.f32 %v4684_v63, %v11527_v14  ;;  %v4733_v27 = vpop.f32.mrf.mxu1  ;;  %5206 = vmatpush.bf16.msrb.mxu3 %v7387_v43  ;;  %v7259_v62 = vor.u32 %v8149_v36, %v7256_v57  ;;  %v13750_v32 = vld [vmem:[#allocation60_spill] sm:$0xff]  ;;  %v8163_v43 = vld [vmem:[%s13251_s1 + $0x724] sm:$0xf]  ;;  %v7184_v63 = vld [vmem:[%s13251_s1 + $0x628] sm:$0xf0] }
 0x455   : > { %v11790_v19 = vadd.f32 %v4829_v38, %v4781_v16  ;;  %v4734_v54 = vadd.f32 %v4733_v27, %v4685_v9  ;;  %5108 = vmatpush.bf16.msrb.mxu1 %v7259_v62  ;;  %v8131_v16 = vld [vmem:[%s13251_s1 + $0x624] sm:$0xf]  ;;  %v7376_v27 = vld [vmem:[%s13251_s1 + $0x7a8] sm:$0xf0] }
 0x456   : > { %v8179_v9 = vld [vmem:[%s13251_s1 + $0x7a4] sm:$0xf]  ;;  %v7187_v57 = vor.u32 %v8131_v16, %v7184_v63 }
 0x458   : > { %5060 = vmatpush.bf16.msrb.mxu0 %v7187_v57  ;;  %v8129_v57 = vld [vmem:[%s13251_s1 + $0x614] sm:$0xf] }
 0x45a   : > { %v4782_v5 = vpop.f32.mrf.mxu2  ;;  %v4687_v14 = vpop.f32.mrf.mxu0 }
 0x45b   : > { %v4783_v22 = vadd.f32 %v4782_v5, %v4734_v54  ;;  %v4831_v0 = vpop.f32.mrf.mxu3  ;;  %v4688_v11 = vadd.f32 %v4687_v14, %v11552_v56  ;;  %v4736_v29 = vpop.f32.mrf.mxu1  ;;  %v7312_v56 = vld [vmem:[%s13251_s1 + $0x728] sm:$0xf0]  ;;  %v7379_v54 = vor.u32 %v8179_v9, %v7376_v27  ;;  %v13752_v9 = vld [vmem:[#allocation62_spill] sm:$0xff] }
 0x45c   : > { %v7315_v38 = vor.u32 %v8163_v43, %v7312_v56  ;;  %v13753_v27 = vld [vmem:[#allocation63_spill] sm:$0xff] }
 0x45d   : > { %v11799_v23 = vadd.f32 %v4831_v0, %v4783_v22  ;;  %v4737_v34 = vadd.f32 %v4736_v29, %v4688_v11  ;;  %4882 = vmatmul.bf16.gmra.mxu0 %v13748_v55  ;;  %5207 = vmatpush.bf16.msrb.mxu3 %v7379_v54  ;;  %v8147_v29 = vld [vmem:[%s13251_s1 + $0x6a4] sm:$0xf]  ;;  %v7248_v55 = vld [vmem:[%s13251_s1 + $0x6a8] sm:$0xf0] }
 0x45e   : > { %4931 = vmatmul.bf16.gmra.mxu1 %v13749_v24  ;;  %5158 = vmatpush.bf16.msrb.mxu2 %v7315_v38 }
 0x45f   : > { %4980 = vmatmul.bf16.gmra.mxu2 %v13750_v32 }
 0x460   : > { %5029 = vmatmul.bf16.gmra.mxu3 %v13751_v45 }
 0x462   : > { %v4785_v36 = vpop.f32.mrf.mxu2  ;;  %v4689_v22 = vpop.f32.mrf.mxu0 }
 0x463   : > { %v4786_v62 = vadd.f32 %v4785_v36, %v4737_v34  ;;  %v4834_v5 = vpop.f32.mrf.mxu3  ;;  %v4690_v0 = vadd.f32 %v4689_v22, %v11561_v46  ;;  %v4738_v14 = vpop.f32.mrf.mxu1  ;;  %v7251_v34 = vor.u32 %v8147_v29, %v7248_v55  ;;  %v8161_v36 = vld [vmem:[%s13251_s1 + $0x714] sm:$0xf] }
 0x465   : > { %v11824_v11 = vadd.f32 %v4834_v5, %v4786_v62  ;;  %v4739_v24 = vadd.f32 %v4738_v14, %v4690_v0  ;;  %5109 = vmatpush.bf16.msrb.mxu1 %v7251_v34  ;;  %v7176_v62 = vld [vmem:[%s13251_s1 + $0x618] sm:$0xf0] }
 0x466   : > { %v7179_v22 = vor.u32 %v8129_v57, %v7176_v62  ;;  %v13755_v62 = vld [vmem:[#allocation65_spill] sm:$0xff] }
 0x468   : > { %5061 = vmatpush.bf16.msrb.mxu0 %v7179_v22  ;;  %v7168_v22 = vld [vmem:[%s13251_s1 + $0x608] sm:$0xf0] }
 0x46a   : > { %v4787_v32 = vpop.f32.mrf.mxu2  ;;  %v4692_v46 = vpop.f32.mrf.mxu0 }
 0x46b   : > { %v4788_v45 = vadd.f32 %v4787_v32, %v4739_v24  ;;  %v4836_v43 = vpop.f32.mrf.mxu3  ;;  %v4693_v56 = vadd.f32 %v4692_v46, %v11586_v25  ;;  %v4741_v16 = vpop.f32.mrf.mxu1  ;;  %v7304_v25 = vld [vmem:[%s13251_s1 + $0x718] sm:$0xf0] }
 0x46c   : > { %v7307_v54 = vor.u32 %v8161_v36, %v7304_v25 }
 0x46d   : > { %v11833_v38 = vadd.f32 %v4836_v43, %v4788_v45  ;;  %v4742_v63 = vadd.f32 %v4741_v16, %v4693_v56  ;;  %4887 = vmatmul.bf16.gmra.mxu0 %v13752_v9  ;;  %v8145_v45 = vld [vmem:[%s13251_s1 + $0x694] sm:$0xf]  ;;  %v7240_v43 = vld [vmem:[%s13251_s1 + $0x698] sm:$0xf0] }
 0x46e   : > { %4936 = vmatmul.bf16.gmra.mxu1 %v13753_v27  ;;  %5159 = vmatpush.bf16.msrb.mxu2 %v7307_v54  ;;  %v7243_v56 = vor.u32 %v8145_v45, %v7240_v43  ;;  %v13754_v54 = vld [vmem:[#allocation64_spill] sm:$0xff] }
 0x46f   : > { %4985 = vmatmul.bf16.gmra.mxu2 %v13734_v17  ;;  %v8177_v17 = vld [vmem:[%s13251_s1 + $0x794] sm:$0xf] }
 0x470   : > { %5034 = vmatmul.bf16.gmra.mxu3 %v13735_v7  ;;  %v7368_v7 = vld [vmem:[%s13251_s1 + $0x798] sm:$0xf0]  ;;  %5110 = vmatpush.bf16.msrb.mxu1 %v7243_v56  ;;  %v8143_v56 = vld [vmem:[%s13251_s1 + $0x684] sm:$0xf] }
 0x471   : > { %v7371_v0 = vor.u32 %v8177_v17, %v7368_v7  ;;  %v8159_v17 = vld [vmem:[%s13251_s1 + $0x704] sm:$0xf] }
 0x472   : > { %v4790_v5 = vpop.f32.mrf.mxu2  ;;  %v4694_v55 = vpop.f32.mrf.mxu0  ;;  %v8127_v7 = vld [vmem:[%s13251_s1 + $0x604] sm:$0xf] }
 0x473   : > { %v4791_v14 = vadd.f32 %v4790_v5, %v4742_v63  ;;  %v4839_v29 = vpop.f32.mrf.mxu3  ;;  %v4695_v24 = vadd.f32 %v4694_v55, %v11595_v18  ;;  %v4743_v34 = vpop.f32.mrf.mxu1  ;;  %5208 = vmatpush.bf16.msrb.mxu3 %v7371_v0 }
 0x475   : > { %v11858_v32 = vadd.f32 %v4839_v29, %v4791_v14  ;;  %v4744_v46 = vadd.f32 %v4743_v34, %v4695_v24  ;;  %v7171_v14 = vor.u32 %v8127_v7, %v7168_v22  ;;  %v13757_v7 = vld [vmem:[#allocation67_spill] sm:$0xff]  ;;  %v8205_v22 = vld [vmem:[%s13251_s1 + $0x874] sm:$0xf] }
 0x477   : > { %5062 = vmatpush.bf16.msrb.mxu0 %v7171_v14 }
 0x47a   : > { %v4792_v16 = vpop.f32.mrf.mxu2  ;;  %v4697_v18 = vpop.f32.mrf.mxu0 }
 0x47b   : > { %v4793_v63 = vadd.f32 %v4792_v16, %v4744_v46  ;;  %v4841_v9 = vpop.f32.mrf.mxu3  ;;  %v4698_v27 = vadd.f32 %v4697_v18, %v11620_v2  ;;  %v4746_v36 = vpop.f32.mrf.mxu1  ;;  %v7296_v2 = vld [vmem:[%s13251_s1 + $0x708] sm:$0xf0] }
 0x47c   : > { %v7299_v5 = vor.u32 %v8159_v17, %v7296_v2  ;;  %v7232_v16 = vld [vmem:[%s13251_s1 + $0x688] sm:$0xf0]  ;;  %v13756_v2 = vld [vmem:[#allocation66_spill] sm:$0xff] }
 0x47d   : > { %v11867_v25 = vadd.f32 %v4841_v9, %v4793_v63  ;;  %v4747_v57 = vadd.f32 %v4746_v36, %v4698_v27  ;;  %4892 = vmatmul.bf16.gmra.mxu0 %v13754_v54  ;;  %v7235_v9 = vor.u32 %v8143_v56, %v7232_v16  ;;  %v8221_v16 = vld [vmem:[%s13251_s1 + $0x8f4] sm:$0xf] }
 0x47e   : > { %4941 = vmatmul.bf16.gmra.mxu1 %v13755_v62  ;;  %5160 = vmatpush.bf16.msrb.mxu2 %v7299_v5  ;;  %v8237_v5 = vld [vmem:[%s13251_s1 + $0x974] sm:$0xf] }
 0x47f   : > { %4990 = vmatmul.bf16.gmra.mxu2 %v13736_v50  ;;  %v7360_v50 = vld [vmem:[%s13251_s1 + $0x788] sm:$0xf0]  ;;  %5111 = vmatpush.bf16.msrb.mxu1 %v7235_v9 }
 0x480   : > { %5039 = vmatmul.bf16.gmra.mxu3 %v13737_v6  ;;  %v8175_v6 = vld [vmem:[%s13251_s1 + $0x784] sm:$0xf] }
 0x481   : > { %v7363_v29 = vor.u32 %v8175_v6, %v7360_v50  ;;  %v7480_v50 = vld [vmem:[%s13251_s1 + $0x878] sm:$0xf0] }
 0x482   : > { %v4795_v0 = vpop.f32.mrf.mxu2  ;;  %v4699_v34 = vpop.f32.mrf.mxu0  ;;  %v7483_v14 = vor.u32 %v8205_v22, %v7480_v50  ;;  %v13761_v22 = vld [vmem:[#allocation71_spill] sm:$0xff]  ;;  %v8203_v50 = vld [vmem:[%s13251_s1 + $0x864] sm:$0xf] }
 0x483   : > { %v4796_v55 = vadd.f32 %v4795_v0, %v4747_v57  ;;  %v4844_v24 = vpop.f32.mrf.mxu3  ;;  %v4700_v45 = vadd.f32 %v4699_v34, %v11629_v30  ;;  %v4748_v43 = vpop.f32.mrf.mxu1  ;;  %5209 = vmatpush.bf16.msrb.mxu3 %v7363_v29 }
 0x484   : > { %5251 = vmatpush.bf16.msra.mxu0 %v7483_v14  ;;  %v7664_v14 = vld [vmem:[%s13251_s1 + $0x9e8] sm:$0xf0] }
 0x485   : > { %v11892_v46 = vadd.f32 %v4844_v24, %v4796_v55  ;;  %v4749_v63 = vadd.f32 %v4748_v43, %v4700_v45 }
 0x48a   : > { %v4797_v18 = vpop.f32.mrf.mxu2  ;;  %v4702_v30 = vpop.f32.mrf.mxu0 }
 0x48b   : > { %v4798_v27 = vadd.f32 %v4797_v18, %v4749_v63  ;;  %v4846_v36 = vpop.f32.mrf.mxu3  ;;  %v4703_v57 = vadd.f32 %v4702_v30, %v11654_v52  ;;  %v4751_v54 = vpop.f32.mrf.mxu1  ;;  %v7608_v52 = vld [vmem:[%s13251_s1 + $0x978] sm:$0xf0] }
 0x48c   : > { %v7611_v6 = vor.u32 %v8237_v5, %v7608_v52  ;;  %v7544_v63 = vld [vmem:[%s13251_s1 + $0x8f8] sm:$0xf0]  ;;  %v13760_v52 = vld [vmem:[#allocation70_spill] sm:$0xff] }
 0x48d   : > { %v11901_v62 = vadd.f32 %v4846_v36, %v4798_v27  ;;  %v4752_v17 = vadd.f32 %v4751_v54, %v4703_v57  ;;  %4897 = vmatmul.bf16.gmra.mxu0 %v13756_v2  ;;  %v7547_v18 = vor.u32 %v8221_v16, %v7544_v63  ;;  %v13759_v5 = vld [vmem:[#allocation69_spill] sm:$0xff] }
 0x48e   : > { %4946 = vmatmul.bf16.gmra.mxu1 %v13757_v7  ;;  %5349 = vmatpush.bf16.msra.mxu2 %v7611_v6  ;;  %v13758_v7 = vld [vmem:[#allocation68_spill] sm:$0xff]  ;;  %v8235_v6 = vld [vmem:[%s13251_s1 + $0x964] sm:$0xf] }
 0x48f   : > { %4995 = vmatmul.bf16.gmra.mxu2 %v13740_v59  ;;  %v8253_v59 = vld [vmem:[%s13251_s1 + $0x9f4] sm:$0xf]  ;;  %5300 = vmatpush.bf16.msra.mxu1 %v7547_v18  ;;  %v8219_v18 = vld [vmem:[%s13251_s1 + $0x8e4] sm:$0xf] }
 0x490   : > { %5044 = vmatmul.bf16.gmra.mxu3 %v13741_v13  ;;  %v7672_v13 = vld [vmem:[%s13251_s1 + $0x9f8] sm:$0xf0] }
 0x491   : > { %v7675_v29 = vor.u32 %v8253_v59, %v7672_v13  ;;  %v7472_v13 = vld [vmem:[%s13251_s1 + $0x868] sm:$0xf0] }
 0x492   : > { %v4800_v0 = vpop.f32.mrf.mxu2  ;;  %v4704_v34 = vpop.f32.mrf.mxu0 }
 0x493   : > { %v4801_v55 = vadd.f32 %v4800_v0, %v4752_v17  ;;  %v4849_v24 = vpop.f32.mrf.mxu3  ;;  %v4705_v45 = vadd.f32 %v4704_v34, %v11663_v28  ;;  %v4753_v43 = vpop.f32.mrf.mxu1  ;;  %5398 = vmatpush.bf16.msra.mxu3 %v7675_v29  ;;  %v8251_v0 = vld [vmem:[%s13251_s1 + $0x9e4] sm:$0xf] }
 0x495   : > { %v11926_v56 = vadd.f32 %v4849_v24, %v4801_v55  ;;  %v4754_v9 = vadd.f32 %v4753_v43, %v4705_v45  ;;  %v7475_v55 = vor.u32 %v8203_v50, %v7472_v13  ;;  %v7667_v24 = vor.u32 %v8251_v0, %v7664_v14  ;;  %v13765_v50 = vld [vmem:[#allocation75_spill] sm:$0xff]  ;;  %v8201_v13 = vld [vmem:[%s13251_s1 + $0x854] sm:$0xf]  ;;  %v7464_v14 = vld [vmem:[%s13251_s1 + $0x858] sm:$0xf0] }
 0x497   : > { %5252 = vmatpush.bf16.msra.mxu0 %v7475_v55  ;;  %5399 = vmatpush.bf16.msra.mxu3 %v7667_v24  ;;  %v7656_v55 = vld [vmem:[%s13251_s1 + $0x9d8] sm:$0xf0] }
 0x49a   : > { %v4802_v27 = vpop.f32.mrf.mxu2  ;;  %v4707_v28 = vpop.f32.mrf.mxu0 }
 0x49b   : > { %v4803_v36 = vadd.f32 %v4802_v27, %v4754_v9  ;;  %v4851_v30 = vpop.f32.mrf.mxu3  ;;  %v4708_v57 = vadd.f32 %v4707_v28, %v11688_v31  ;;  %v4756_v54 = vpop.f32.mrf.mxu1  ;;  %v7600_v31 = vld [vmem:[%s13251_s1 + $0x968] sm:$0xf0] }
 0x49c   : > { %v7603_v59 = vor.u32 %v8235_v6, %v7600_v31  ;;  %v7536_v27 = vld [vmem:[%s13251_s1 + $0x8e8] sm:$0xf0]  ;;  %v13763_v6 = vld [vmem:[#allocation73_spill] sm:$0xff]  ;;  %v13764_v31 = vld [vmem:[#allocation74_spill] sm:$0xff] }
 0x49d   : > { %v11935_v17 = vadd.f32 %v4851_v30, %v4803_v36  ;;  %v4757_v2 = vadd.f32 %v4756_v54, %v4708_v57  ;;  %4902 = vmatmul.bf16.gmra.mxu0 %v13758_v7  ;;  %v7539_v30 = vor.u32 %v8219_v18, %v7536_v27 }
 0x49e   : > { %4951 = vmatmul.bf16.gmra.mxu1 %v13759_v5  ;;  %5350 = vmatpush.bf16.msra.mxu2 %v7603_v59  ;;  %v8233_v59 = vld [vmem:[%s13251_s1 + $0x954] sm:$0xf] }
 0x49f   : > { %5000 = vmatmul.bf16.gmra.mxu2 %v13760_v52  ;;  %5301 = vmatpush.bf16.msra.mxu1 %v7539_v30  ;;  %v8217_v30 = vld [vmem:[%s13251_s1 + $0x8d4] sm:$0xf] }
 0x4a0   : > { %5049 = vmatmul.bf16.gmra.mxu3 %v13761_v22  ;;  %v13762_v22 = vld [vmem:[#allocation72_spill] sm:$0xff] }
 0x4a2   : > { %v4805_v29 = vpop.f32.mrf.mxu2  ;;  %v4709_v43 = vpop.f32.mrf.mxu0 }
 0x4a3   : > { %v4806_v34 = vadd.f32 %v4805_v29, %v4757_v2  ;;  %v4854_v45 = vpop.f32.mrf.mxu3  ;;  %v4710_v16 = vadd.f32 %v4709_v43, %v11697_v39  ;;  %v4758_v63 = vpop.f32.mrf.mxu1  ;;  %v8249_v29 = vld [vmem:[%s13251_s1 + $0x9d4] sm:$0xf] }
 0x4a5   : > { %v11960_v9 = vadd.f32 %v4854_v45, %v4806_v34  ;;  %v4759_v36 = vadd.f32 %v4758_v63, %v4710_v16  ;;  %v7467_v34 = vor.u32 %v8201_v13, %v7464_v14  ;;  %v7659_v45 = vor.u32 %v8249_v29, %v7656_v55  ;;  %v13769_v13 = vld [vmem:[#allocation79_spill] sm:$0xff]  ;;  %v8199_v14 = vld [vmem:[%s13251_s1 + $0x844] sm:$0xf] }
 0x4a6   : > { %v7456_v55 = vld [vmem:[%s13251_s1 + $0x848] sm:$0xf0] }
 0x4a7   : > { %5253 = vmatpush.bf16.msra.mxu0 %v7467_v34  ;;  %5400 = vmatpush.bf16.msra.mxu3 %v7659_v45  ;;  %v7648_v34 = vld [vmem:[%s13251_s1 + $0x9c8] sm:$0xf0] }
 0x4aa   : > { %v4807_v28 = vpop.f32.mrf.mxu2  ;;  %v4868_v39 = vpop.f32.mrf.mxu0 }
 0x4ab   : > { %v4808_v57 = vadd.f32 %v4807_v28, %v4759_v36  ;;  %v4856_v54 = vpop.f32.mrf.mxu3  ;;  %v4869_v2 = vadd.f32 %v4868_v39, %v11722_v61  ;;  %v4917_v7 = vpop.f32.mrf.mxu1  ;;  %v7592_v61 = vld [vmem:[%s13251_s1 + $0x958] sm:$0xf0] }
 0x4ac   : > { %v7595_v0 = vor.u32 %v8233_v59, %v7592_v61  ;;  %v7528_v28 = vld [vmem:[%s13251_s1 + $0x8d8] sm:$0xf0]  ;;  %v13768_v61 = vld [vmem:[#allocation78_spill] sm:$0xff] }
 0x4ad   : > { %v11969_v5 = vadd.f32 %v4856_v54, %v4808_v57  ;;  %v4918_v52 = vadd.f32 %v4917_v7, %v4869_v2  ;;  %5063 = vmatmul.bf16.vlgmr.msrb.gmra.mxu0 %v13762_v22  ;;  %v7531_v54 = vor.u32 %v8217_v30, %v7528_v28  ;;  %v13767_v59 = vld [vmem:[#allocation77_spill] sm:$0xff] }
 0x4ae   : > { %5112 = vmatmul.bf16.vlgmr.msrb.gmra.mxu1 %v13763_v6  ;;  %5351 = vmatpush.bf16.msra.mxu2 %v7595_v0  ;;  %v8231_v0 = vld [vmem:[%s13251_s1 + $0x944] sm:$0xf] }
 0x4af   : > { %5161 = vmatmul.bf16.vlgmr.msrb.gmra.mxu2 %v13764_v31  ;;  %5302 = vmatpush.bf16.msra.mxu1 %v7531_v54  ;;  %v8215_v54 = vld [vmem:[%s13251_s1 + $0x8c4] sm:$0xf] }
 0x4b0   : > { %5210 = vmatmul.bf16.vlgmr.msrb.gmra.mxu3 %v13765_v50  ;;  %v13766_v50 = vld [vmem:[#allocation76_spill] sm:$0xff] }
 0x4b2   : > { %v4966_v24 = vpop.f32.mrf.mxu2  ;;  %v4870_v63 = vpop.f32.mrf.mxu0 }
 0x4b3   : > { %v4967_v43 = vadd.f32 %v4966_v24, %v4918_v52  ;;  %v5015_v16 = vpop.f32.mrf.mxu3  ;;  %v4871_v18 = vadd.f32 %v4870_v63, %v11731_v42  ;;  %v4919_v27 = vpop.f32.mrf.mxu1  ;;  %v8247_v24 = vld [vmem:[%s13251_s1 + $0x9c4] sm:$0xf] }
 0x4b5   : > { %v11994_v36 = vadd.f32 %v5015_v16, %v4967_v43  ;;  %v4920_v57 = vadd.f32 %v4919_v27, %v4871_v18  ;;  %v7459_v43 = vor.u32 %v8199_v14, %v7456_v55  ;;  %v7651_v16 = vor.u32 %v8247_v24, %v7648_v34  ;;  %v13771_v14 = vld [vmem:[#allocation81_spill] sm:$0xff]  ;;  %v13773_v55 = vld [vmem:[#allocation83_spill] sm:$0xff]  ;;  %v8229_v24 = vld [vmem:[%s13251_s1 + $0x934] sm:$0xf] }
 0x4b6   : > { %v8197_v34 = vld [vmem:[%s13251_s1 + $0x834] sm:$0xf] }
 0x4b7   : > { %5254 = vmatpush.bf16.msra.mxu0 %v7459_v43  ;;  %5401 = vmatpush.bf16.msra.mxu3 %v7651_v16  ;;  %v7448_v43 = vld [vmem:[%s13251_s1 + $0x838] sm:$0xf0]  ;;  %v8245_v16 = vld [vmem:[%s13251_s1 + $0x9b4] sm:$0xf] }
 0x4ba   : > { %v4968_v39 = vpop.f32.mrf.mxu2  ;;  %v4873_v42 = vpop.f32.mrf.mxu0 }
 0x4bb   : > { %v4969_v2 = vadd.f32 %v4968_v39, %v4920_v57  ;;  %v5017_v7 = vpop.f32.mrf.mxu3  ;;  %v4874_v52 = vadd.f32 %v4873_v42, %v11756_v48  ;;  %v4922_v22 = vpop.f32.mrf.mxu1  ;;  %v7584_v48 = vld [vmem:[%s13251_s1 + $0x948] sm:$0xf0] }
 0x4bc   : > { %v7587_v29 = vor.u32 %v8231_v0, %v7584_v48  ;;  %v7520_v39 = vld [vmem:[%s13251_s1 + $0x8c8] sm:$0xf0]  ;;  %v13770_v48 = vld [vmem:[#allocation80_spill] sm:$0xff] }
 0x4bd   : > { %v12003_v6 = vadd.f32 %v5017_v7, %v4969_v2  ;;  %v4923_v31 = vadd.f32 %v4922_v22, %v4874_v52  ;;  %5068 = vmatmul.bf16.gmra.mxu0 %v13766_v50  ;;  %v7523_v7 = vor.u32 %v8215_v54, %v7520_v39 }
 0x4be   : > { %5117 = vmatmul.bf16.gmra.mxu1 %v13767_v59  ;;  %5352 = vmatpush.bf16.msra.mxu2 %v7587_v29  ;;  %v13772_v29 = vld [vmem:[#allocation82_spill] sm:$0xff] }
 0x4bf   : > { %5166 = vmatmul.bf16.gmra.mxu2 %v13768_v61  ;;  %5303 = vmatpush.bf16.msra.mxu1 %v7523_v7 }
 0x4c0   : > { %5215 = vmatmul.bf16.gmra.mxu3 %v13769_v13 }
 0x4c2   : > { %v4971_v45 = vpop.f32.mrf.mxu2  ;;  %v4875_v27 = vpop.f32.mrf.mxu0 }
 0x4c3   : > { %v4972_v63 = vadd.f32 %v4971_v45, %v4923_v31  ;;  %v5020_v18 = vpop.f32.mrf.mxu3  ;;  %v4876_v30 = vadd.f32 %v4875_v27, %v11765_v12  ;;  %v4924_v28 = vpop.f32.mrf.mxu1  ;;  %v7451_v27 = vor.u32 %v8197_v34, %v7448_v43  ;;  %v13775_v43 = vld [vmem:[#allocation85_spill] sm:$0xff] }
 0x4c5   : > { %v12028_v57 = vadd.f32 %v5020_v18, %v4972_v63  ;;  %v4925_v2 = vadd.f32 %v4924_v28, %v4876_v30  ;;  %v7640_v63 = vld [vmem:[%s13251_s1 + $0x9b8] sm:$0xf0]  ;;  %5255 = vmatpush.bf16.msra.mxu0 %v7451_v27  ;;  %v8195_v27 = vld [vmem:[%s13251_s1 + $0x824] sm:$0xf] }
 0x4c6   : > { %v7643_v30 = vor.u32 %v8245_v16, %v7640_v63  ;;  %v13776_v16 = vld [vmem:[#allocation86_spill] sm:$0xff]  ;;  %v13777_v63 = vld [vmem:[#allocation87_spill] sm:$0xff] }
 0x4c8   : > { %5402 = vmatpush.bf16.msra.mxu3 %v7643_v30 }
 0x4ca   : > { %v4973_v42 = vpop.f32.mrf.mxu2  ;;  %v4878_v12 = vpop.f32.mrf.mxu0 }
 0x4cb   : > { %v4974_v52 = vadd.f32 %v4973_v42, %v4925_v2  ;;  %v5022_v22 = vpop.f32.mrf.mxu3  ;;  %v4879_v31 = vadd.f32 %v4878_v12, %v11790_v19  ;;  %v4927_v61 = vpop.f32.mrf.mxu1  ;;  %v7576_v19 = vld [vmem:[%s13251_s1 + $0x938] sm:$0xf0] }
 0x4cc   : > { %v7579_v45 = vor.u32 %v8229_v24, %v7576_v19 }
 0x4cd   : > { %v12037_v13 = vadd.f32 %v5022_v22, %v4974_v52  ;;  %v4928_v0 = vadd.f32 %v4927_v61, %v4879_v31  ;;  %5073 = vmatmul.bf16.gmra.mxu0 %v13770_v48  ;;  %v8213_v52 = vld [vmem:[%s13251_s1 + $0x8b4] sm:$0xf]  ;;  %v7512_v22 = vld [vmem:[%s13251_s1 + $0x8b8] sm:$0xf0] }
 0x4ce   : > { %5122 = vmatmul.bf16.gmra.mxu1 %v13771_v14  ;;  %5353 = vmatpush.bf16.msra.mxu2 %v7579_v45  ;;  %v7515_v31 = vor.u32 %v8213_v52, %v7512_v22  ;;  %v13774_v45 = vld [vmem:[#allocation84_spill] sm:$0xff] }
 0x4cf   : > { %5171 = vmatmul.bf16.gmra.mxu2 %v13772_v29 }
 0x4d0   : > { %5220 = vmatmul.bf16.gmra.mxu3 %v13773_v55  ;;  %5304 = vmatpush.bf16.msra.mxu1 %v7515_v31 }
 0x4d2   : > { %v4976_v18 = vpop.f32.mrf.mxu2  ;;  %v4880_v39 = vpop.f32.mrf.mxu0 }
 0x4d3   : > { %v4977_v28 = vadd.f32 %v4976_v18, %v4928_v0  ;;  %v5025_v54 = vpop.f32.mrf.mxu3  ;;  %v4881_v2 = vadd.f32 %v4880_v39, %v11799_v23  ;;  %v4929_v7 = vpop.f32.mrf.mxu1  ;;  %v8227_v18 = vld [vmem:[%s13251_s1 + $0x924] sm:$0xf]  ;;  %v7632_v39 = vld [vmem:[%s13251_s1 + $0x9a8] sm:$0xf0] }
 0x4d5   : > { %v12062_v42 = vadd.f32 %v5025_v54, %v4977_v28  ;;  %v4930_v12 = vadd.f32 %v4929_v7, %v4881_v2  ;;  %v7440_v28 = vld [vmem:[%s13251_s1 + $0x828] sm:$0xf0]  ;;  %v8243_v54 = vld [vmem:[%s13251_s1 + $0x9a4] sm:$0xf] }
 0x4d6   : > { %v7443_v7 = vor.u32 %v8195_v27, %v7440_v28  ;;  %v7635_v52 = vor.u32 %v8243_v54, %v7632_v39  ;;  %v13778_v54 = vld [vmem:[#allocation88_spill] sm:$0xff]  ;;  %v13779_v39 = vld [vmem:[#allocation89_spill] sm:$0xff] }
 0x4d8   : > { %5256 = vmatpush.bf16.msra.mxu0 %v7443_v7  ;;  %5403 = vmatpush.bf16.msra.mxu3 %v7635_v52  ;;  %v13781_v7 = vld [vmem:[#allocation91_spill] sm:$0xff]  ;;  %v8225_v52 = vld [vmem:[%s13251_s1 + $0x914] sm:$0xf] }
 0x4da   : > { %v4978_v61 = vpop.f32.mrf.mxu2  ;;  %v4883_v23 = vpop.f32.mrf.mxu0 }
 0x4db   : > { %v4979_v0 = vadd.f32 %v4978_v61, %v4930_v12  ;;  %v5027_v29 = vpop.f32.mrf.mxu3  ;;  %v4884_v55 = vadd.f32 %v4883_v23, %v11824_v11  ;;  %v4932_v24 = vpop.f32.mrf.mxu1  ;;  %v7568_v11 = vld [vmem:[%s13251_s1 + $0x928] sm:$0xf0]  ;;  %v8211_v23 = vld [vmem:[%s13251_s1 + $0x8a4] sm:$0xf] }
 0x4dc   : > { %v7571_v30 = vor.u32 %v8227_v18, %v7568_v11 }
 0x4dd   : > { %v12071_v19 = vadd.f32 %v5027_v29, %v4979_v0  ;;  %v4933_v34 = vadd.f32 %v4932_v24, %v4884_v55  ;;  %5078 = vmatmul.bf16.gmra.mxu0 %v13774_v45  ;;  %v7504_v55 = vld [vmem:[%s13251_s1 + $0x8a8] sm:$0xf0] }
 0x4de   : > { %5127 = vmatmul.bf16.gmra.mxu1 %v13775_v43  ;;  %5354 = vmatpush.bf16.msra.mxu2 %v7571_v30 }
 0x4df   : > { %5176 = vmatmul.bf16.gmra.mxu2 %v13776_v16 }
 0x4e0   : > { %5225 = vmatmul.bf16.gmra.mxu3 %v13777_v63 }
 0x4e2   : > { %v4981_v2 = vpop.f32.mrf.mxu2  ;;  %v4885_v31 = vpop.f32.mrf.mxu0 }
 0x4e3   : > { %v4982_v22 = vadd.f32 %v4981_v2, %v4933_v34  ;;  %v5030_v12 = vpop.f32.mrf.mxu3  ;;  %v4886_v61 = vadd.f32 %v4885_v31, %v11833_v38  ;;  %v4934_v0 = vpop.f32.mrf.mxu1  ;;  %v7507_v34 = vor.u32 %v8211_v23, %v7504_v55  ;;  %v13780_v2 = vld [vmem:[#allocation90_spill] sm:$0xff]  ;;  %v7432_v31 = vld [vmem:[%s13251_s1 + $0x818] sm:$0xf0] }
 0x4e5   : > { %v12096_v29 = vadd.f32 %v5030_v12, %v4982_v22  ;;  %v4935_v24 = vadd.f32 %v4934_v0, %v4886_v61  ;;  %5305 = vmatpush.bf16.msra.mxu1 %v7507_v34  ;;  %v8193_v22 = vld [vmem:[%s13251_s1 + $0x814] sm:$0xf]  ;;  %v7624_v0 = vld [vmem:[%s13251_s1 + $0x998] sm:$0xf0] }
 0x4e6   : > { %v8241_v61 = vld [vmem:[%s13251_s1 + $0x994] sm:$0xf]  ;;  %v7435_v55 = vor.u32 %v8193_v22, %v7432_v31 }
 0x4e8   : > { %5257 = vmatpush.bf16.msra.mxu0 %v7435_v55  ;;  %v13785_v55 = vld [vmem:[#allocation95_spill] sm:$0xff] }
 0x4ea   : > { %v4983_v16 = vpop.f32.mrf.mxu2  ;;  %v4888_v38 = vpop.f32.mrf.mxu0 }
 0x4eb   : > { %v4984_v63 = vadd.f32 %v4983_v16, %v4935_v24  ;;  %v5032_v18 = vpop.f32.mrf.mxu3  ;;  %v4889_v11 = vadd.f32 %v4888_v38, %v11858_v32  ;;  %v4937_v27 = vpop.f32.mrf.mxu1  ;;  %v7560_v32 = vld [vmem:[%s13251_s1 + $0x918] sm:$0xf0]  ;;  %v7627_v24 = vor.u32 %v8241_v61, %v7624_v0  ;;  %v13782_v61 = vld [vmem:[#allocation92_spill] sm:$0xff] }
 0x4ec   : > { %v7563_v12 = vor.u32 %v8225_v52, %v7560_v32  ;;  %v13783_v0 = vld [vmem:[#allocation93_spill] sm:$0xff] }
 0x4ed   : > { %v12105_v30 = vadd.f32 %v5032_v18, %v4984_v63  ;;  %v4938_v28 = vadd.f32 %v4937_v27, %v4889_v11  ;;  %5083 = vmatmul.bf16.gmra.mxu0 %v13778_v54  ;;  %5404 = vmatpush.bf16.msra.mxu3 %v7627_v24  ;;  %v8209_v27 = vld [vmem:[%s13251_s1 + $0x894] sm:$0xf]  ;;  %v7496_v54 = vld [vmem:[%s13251_s1 + $0x898] sm:$0xf0]  ;;  %v8223_v24 = vld [vmem:[%s13251_s1 + $0x904] sm:$0xf] }
 0x4ee   : > { %5132 = vmatmul.bf16.gmra.mxu1 %v13779_v39  ;;  %5355 = vmatpush.bf16.msra.mxu2 %v7563_v12 }
 0x4ef   : > { %5181 = vmatmul.bf16.gmra.mxu2 %v13780_v2 }
 0x4f0   : > { %5230 = vmatmul.bf16.gmra.mxu3 %v13781_v7 }
 0x4f2   : > { %v4986_v23 = vpop.f32.mrf.mxu2  ;;  %v4890_v63 = vpop.f32.mrf.mxu0 }
 0x4f3   : > { %v4987_v34 = vadd.f32 %v4986_v23, %v4938_v28  ;;  %v5035_v16 = vpop.f32.mrf.mxu3  ;;  %v4891_v18 = vadd.f32 %v4890_v63, %v11867_v25  ;;  %v4939_v38 = vpop.f32.mrf.mxu1  ;;  %v7499_v28 = vor.u32 %v8209_v27, %v7496_v54  ;;  %v13784_v23 = vld [vmem:[#allocation94_spill] sm:$0xff]  ;;  %v7424_v63 = vld [vmem:[%s13251_s1 + $0x808] sm:$0xf0] }
 0x4f5   : > { %v12130_v11 = vadd.f32 %v5035_v16, %v4987_v34  ;;  %v4940_v39 = vadd.f32 %v4939_v38, %v4891_v18  ;;  %5306 = vmatpush.bf16.msra.mxu1 %v7499_v28  ;;  %v8191_v34 = vld [vmem:[%s13251_s1 + $0x804] sm:$0xf]  ;;  %v7616_v38 = vld [vmem:[%s13251_s1 + $0x988] sm:$0xf0] }
 0x4f6   : > { %v8239_v18 = vld [vmem:[%s13251_s1 + $0x984] sm:$0xf]  ;;  %v7427_v54 = vor.u32 %v8191_v34, %v7424_v63 }
 0x4f8   : > { %5258 = vmatpush.bf16.msra.mxu0 %v7427_v54  ;;  %v13787_v54 = vld [vmem:[#allocation97_spill] sm:$0xff] }
 0x4fa   : > { %v4988_v2 = vpop.f32.mrf.mxu2  ;;  %v4893_v25 = vpop.f32.mrf.mxu0 }
 0x4fb   : > { %v4989_v7 = vadd.f32 %v4988_v2, %v4940_v39  ;;  %v5037_v52 = vpop.f32.mrf.mxu3  ;;  %v4894_v32 = vadd.f32 %v4893_v25, %v11892_v46  ;;  %v4942_v22 = vpop.f32.mrf.mxu1  ;;  %v7552_v46 = vld [vmem:[%s13251_s1 + $0x908] sm:$0xf0]  ;;  %v7619_v39 = vor.u32 %v8239_v18, %v7616_v38 }
 0x4fc   : > { %v7555_v16 = vor.u32 %v8223_v24, %v7552_v46 }
 0x4fd   : > { %v12139_v12 = vadd.f32 %v5037_v52, %v4989_v7  ;;  %v4943_v31 = vadd.f32 %v4942_v22, %v4894_v32  ;;  %5088 = vmatmul.bf16.gmra.mxu0 %v13782_v61  ;;  %5405 = vmatpush.bf16.msra.mxu3 %v7619_v39  ;;  %v8207_v22 = vld [vmem:[%s13251_s1 + $0x884] sm:$0xf] }
 0x4fe   : > { %5137 = vmatmul.bf16.gmra.mxu1 %v13783_v0  ;;  %5356 = vmatpush.bf16.msra.mxu2 %v7555_v16  ;;  %v13788_v39 = vld [vmem:[#allocation98_spill] sm:$0xff] }
 0x4ff   : > { %5186 = vmatmul.bf16.gmra.mxu2 %v13784_v23  ;;  %v7488_v23 = vld [vmem:[%s13251_s1 + $0x888] sm:$0xf0] }
 0x500   : > { %5235 = vmatmul.bf16.gmra.mxu3 %v13785_v55 }
 0x502   : > { %v4991_v27 = vpop.f32.mrf.mxu2  ;;  %v4895_v7 = vpop.f32.mrf.mxu0 }
 0x503   : > { %v4992_v28 = vadd.f32 %v4991_v27, %v4943_v31  ;;  %v5040_v2 = vpop.f32.mrf.mxu3  ;;  %v4896_v52 = vadd.f32 %v4895_v7, %v11901_v62  ;;  %v4944_v25 = vpop.f32.mrf.mxu1  ;;  %v7491_v31 = vor.u32 %v8207_v22, %v7488_v23  ;;  %v13786_v27 = vld [vmem:[#allocation96_spill] sm:$0xff]  ;;  %v7928_v23 = vld [vmem:[%s13251_s1 + $0xbf8] sm:$0xf0] }
 0x504   : > { %v8269_v7 = vld [vmem:[%s13251_s1 + $0xa74] sm:$0xf] }
 0x505   : > { %v12164_v32 = vadd.f32 %v5040_v2, %v4992_v28  ;;  %v4945_v55 = vadd.f32 %v4944_v25, %v4896_v52  ;;  %5307 = vmatpush.bf16.msra.mxu1 %v7491_v31  ;;  %v13789_v28 = vld [vmem:[#allocation99_spill] sm:$0xff]  ;;  %v8301_v2 = vld [vmem:[%s13251_s1 + $0xb74] sm:$0xf]  ;;  %v7736_v25 = vld [vmem:[%s13251_s1 + $0xa78] sm:$0xf0] }
 0x506   : > { %v8317_v22 = vld [vmem:[%s13251_s1 + $0xbf4] sm:$0xf]  ;;  %v7739_v31 = vor.u32 %v8269_v7, %v7736_v25 }
 0x508   : > { %5447 = vmatpush.bf16.msrb.mxu0 %v7739_v31 }
 0x50a   : > { %v4993_v24 = vpop.f32.mrf.mxu2  ;;  %v4898_v62 = vpop.f32.mrf.mxu0 }
 0x50b   : > { %v4994_v46 = vadd.f32 %v4993_v24, %v4945_v55  ;;  %v5042_v34 = vpop.f32.mrf.mxu3  ;;  %v4899_v16 = vadd.f32 %v4898_v62, %v11926_v56  ;;  %v4947_v63 = vpop.f32.mrf.mxu1  ;;  %v7864_v56 = vld [vmem:[%s13251_s1 + $0xb78] sm:$0xf0]  ;;  %v7931_v24 = vor.u32 %v8317_v22, %v7928_v23 }
 0x50c   : > { %v7867_v52 = vor.u32 %v8301_v2, %v7864_v56  ;;  %v7800_v2 = vld [vmem:[%s13251_s1 + $0xaf8] sm:$0xf0] }
 0x50d   : > { %v12173_v18 = vadd.f32 %v5042_v34, %v4994_v46  ;;  %v4948_v38 = vadd.f32 %v4947_v63, %v4899_v16  ;;  %5093 = vmatmul.bf16.gmra.mxu0 %v13786_v27  ;;  %5594 = vmatpush.bf16.msrb.mxu3 %v7931_v24  ;;  %v13790_v24 = vld [vmem:[#allocation100_spill] sm:$0xff] }
 0x50e   : > { %5142 = vmatmul.bf16.gmra.mxu1 %v13787_v54  ;;  %5545 = vmatpush.bf16.msrb.mxu2 %v7867_v52 }
 0x50f   : > { %5191 = vmatmul.bf16.gmra.mxu2 %v13788_v39 }
 0x510   : > { %5240 = vmatmul.bf16.gmra.mxu3 %v13789_v28  ;;  %v8285_v28 = vld [vmem:[%s13251_s1 + $0xaf4] sm:$0xf] }
 0x512   : > { %v4996_v55 = vpop.f32.mrf.mxu2  ;;  %v4900_v62 = vpop.f32.mrf.mxu0 }
 0x513   : > { %v4997_v46 = vadd.f32 %v4996_v55, %v4948_v38  ;;  %v5045_v34 = vpop.f32.mrf.mxu3  ;;  %v4901_v16 = vadd.f32 %v4900_v62, %v11935_v17  ;;  %v4949_v63 = vpop.f32.mrf.mxu1  ;;  %v7803_v38 = vor.u32 %v8285_v28, %v7800_v2  ;;  %v13793_v62 = vld [vmem:[#allocation103_spill] sm:$0xff] }
 0x514   : > { %v7728_v2 = vld [vmem:[%s13251_s1 + $0xa68] sm:$0xf0] }
 0x515   : > { %v12198_v39 = vadd.f32 %v5045_v34, %v4997_v46  ;;  %v4950_v56 = vadd.f32 %v4949_v63, %v4901_v16  ;;  %5496 = vmatpush.bf16.msrb.mxu1 %v7803_v38  ;;  %v13791_v46 = vld [vmem:[#allocation101_spill] sm:$0xff]  ;;  %v13792_v34 = vld [vmem:[#allocation102_spill] sm:$0xff]  ;;  %v7920_v38 = vld [vmem:[%s13251_s1 + $0xbe8] sm:$0xf0] }
 0x516   : > { %v8299_v16 = vld [vmem:[%s13251_s1 + $0xb64] sm:$0xf] }
 0x517   : > { %v8267_v63 = vld [vmem:[%s13251_s1 + $0xa64] sm:$0xf] }
 0x51a   : > { %v4998_v7 = vpop.f32.mrf.mxu2  ;;  %v4903_v17 = vpop.f32.mrf.mxu0 }
 0x51b   : > { %v4999_v52 = vadd.f32 %v4998_v7, %v4950_v56  ;;  %v5047_v25 = vpop.f32.mrf.mxu3  ;;  %v4904_v22 = vadd.f32 %v4903_v17, %v11960_v9  ;;  %v4952_v23 = vpop.f32.mrf.mxu1  ;;  %v7856_v9 = vld [vmem:[%s13251_s1 + $0xb68] sm:$0xf0]  ;;  %v8315_v56 = vld [vmem:[%s13251_s1 + $0xbe4] sm:$0xf] }
 0x51c   : > { %v7859_v28 = vor.u32 %v8299_v16, %v7856_v9  ;;  %v8283_v9 = vld [vmem:[%s13251_s1 + $0xae4] sm:$0xf] }
 0x51d   : > { %v12207_v55 = vadd.f32 %v5047_v25, %v4999_v52  ;;  %v4953_v31 = vadd.f32 %v4952_v23, %v4904_v22  ;;  %5098 = vmatmul.bf16.gmra.mxu0 %v13790_v24  ;;  %v7731_v52 = vor.u32 %v8267_v63, %v7728_v2  ;;  %v7923_v25 = vor.u32 %v8315_v56, %v7920_v38  ;;  %v7792_v63 = vld [vmem:[%s13251_s1 + $0xae8] sm:$0xf0] }
 0x51e   : > { %5147 = vmatmul.bf16.gmra.mxu1 %v13791_v46  ;;  %5546 = vmatpush.bf16.msrb.mxu2 %v7859_v28 }
 0x51f   : > { %5196 = vmatmul.bf16.gmra.mxu2 %v13792_v34  ;;  %5448 = vmatpush.bf16.msrb.mxu0 %v7731_v52 }
 0x520   : > { %5245 = vmatmul.bf16.gmra.mxu3 %v13793_v62 }
 0x521   : > { %5595 = vmatpush.bf16.msrb.mxu3 %v7923_v25 }
 0x522   : > { %v5001_v7 = vpop.f32.mrf.mxu2  ;;  %v4905_v23 = vpop.f32.mrf.mxu0 }
 0x523   : > { %v5002_v17 = vadd.f32 %v5001_v7, %v4953_v31  ;;  %v5050_v22 = vpop.f32.mrf.mxu3  ;;  %v4906_v34 = vadd.f32 %v4905_v23, %v11969_v5  ;;  %v4954_v62 = vpop.f32.mrf.mxu1  ;;  %v7795_v31 = vor.u32 %v8283_v9, %v7792_v63  ;;  %v13795_v23 = vld [vmem:[#allocation105_spill] sm:$0xff] }
 0x524   : > { %v7912_v63 = vld [vmem:[%s13251_s1 + $0xbd8] sm:$0xf0] }
 0x525   : > { %v12232_v16 = vadd.f32 %v5050_v22, %v5002_v17  ;;  %v4955_v2 = vadd.f32 %v4954_v62, %v4906_v34  ;;  %5497 = vmatpush.bf16.msrb.mxu1 %v7795_v31  ;;  %v13794_v22 = vld [vmem:[#allocation104_spill] sm:$0xff] }
 0x526   : > { %v8297_v34 = vld [vmem:[%s13251_s1 + $0xb54] sm:$0xf] }
 0x527   : > { %v8265_v62 = vld [vmem:[%s13251_s1 + $0xa54] sm:$0xf] }
 0x52a   : > { %v5003_v56 = vpop.f32.mrf.mxu2  ;;  %v5064_v5 = vpop.f32.mrf.mxu0 }
 0x52b   : > { %v5004_v28 = vadd.f32 %v5003_v56, %v4955_v2  ;;  %v5052_v38 = vpop.f32.mrf.mxu3  ;;  %v5065_v7 = vadd.f32 %v5064_v5, %v11994_v36  ;;  %v5113_v52 = vpop.f32.mrf.mxu1  ;;  %v7848_v36 = vld [vmem:[%s13251_s1 + $0xb58] sm:$0xf0] }
 0x52c   : > { %v7851_v9 = vor.u32 %v8297_v34, %v7848_v36  ;;  %v7784_v34 = vld [vmem:[%s13251_s1 + $0xad8] sm:$0xf0] }
 0x52d   : > { %v12241_v25 = vadd.f32 %v5052_v38, %v5004_v28  ;;  %v5114_v17 = vadd.f32 %v5113_v52, %v5065_v7  ;;  %5259 = vmatmul.bf16.vlgmr.msra.gmra.mxu0 %v13766_v50  ;;  %v7720_v50 = vld [vmem:[%s13251_s1 + $0xa58] sm:$0xf0] }
 0x52e   : > { %5308 = vmatmul.bf16.vlgmr.msra.gmra.mxu1 %v13767_v59  ;;  %v8313_v59 = vld [vmem:[%s13251_s1 + $0xbd4] sm:$0xf]  ;;  %v7723_v31 = vor.u32 %v8265_v62, %v7720_v50  ;;  %5547 = vmatpush.bf16.msrb.mxu2 %v7851_v9 }
 0x52f   : > { %5357 = vmatmul.bf16.vlgmr.msra.gmra.mxu2 %v13794_v22  ;;  %v7915_v56 = vor.u32 %v8313_v59, %v7912_v63 }
 0x530   : > { %5406 = vmatmul.bf16.vlgmr.msra.gmra.mxu3 %v13795_v23  ;;  %5449 = vmatpush.bf16.msrb.mxu0 %v7723_v31  ;;  %v8281_v23 = vld [vmem:[%s13251_s1 + $0xad4] sm:$0xf] }
 0x531   : > { %5596 = vmatpush.bf16.msrb.mxu3 %v7915_v56  ;;  %v8295_v56 = vld [vmem:[%s13251_s1 + $0xb44] sm:$0xf] }
 0x532   : > { %v5162_v2 = vpop.f32.mrf.mxu2  ;;  %v5066_v5 = vpop.f32.mrf.mxu0 }
 0x533   : > { %v5163_v28 = vadd.f32 %v5162_v2, %v5114_v17  ;;  %v5211_v38 = vpop.f32.mrf.mxu3  ;;  %v5067_v7 = vadd.f32 %v5066_v5, %v12003_v6  ;;  %v5115_v52 = vpop.f32.mrf.mxu1  ;;  %v7787_v17 = vor.u32 %v8281_v23, %v7784_v34  ;;  %v7904_v5 = vld [vmem:[%s13251_s1 + $0xbc8] sm:$0xf0] }
 0x535   : > { %v12266_v22 = vadd.f32 %v5211_v38, %v5163_v28  ;;  %v5116_v36 = vadd.f32 %v5115_v52, %v5067_v7  ;;  %5498 = vmatpush.bf16.msrb.mxu1 %v7787_v17  ;;  %v8263_v28 = vld [vmem:[%s13251_s1 + $0xa44] sm:$0xf] }
 0x53a   : > { %v5164_v62 = vpop.f32.mrf.mxu2  ;;  %v5069_v6 = vpop.f32.mrf.mxu0 }
 0x53b   : > { %v5165_v9 = vadd.f32 %v5164_v62, %v5116_v36  ;;  %v5213_v50 = vpop.f32.mrf.mxu3  ;;  %v5070_v59 = vadd.f32 %v5069_v6, %v12028_v57  ;;  %v5118_v63 = vpop.f32.mrf.mxu1  ;;  %v7840_v57 = vld [vmem:[%s13251_s1 + $0xb48] sm:$0xf0]  ;;  %v8279_v6 = vld [vmem:[%s13251_s1 + $0xac4] sm:$0xf] }
 0x53c   : > { %v7843_v38 = vor.u32 %v8295_v56, %v7840_v57 }
 0x53d   : > { %v12275_v2 = vadd.f32 %v5213_v50, %v5165_v9  ;;  %v5119_v31 = vadd.f32 %v5118_v63, %v5070_v59  ;;  %5264 = vmatmul.bf16.gmra.mxu0 %v13770_v48  ;;  %v7712_v48 = vld [vmem:[%s13251_s1 + $0xa48] sm:$0xf0] }
 0x53e   : > { %5313 = vmatmul.bf16.gmra.mxu1 %v13771_v14  ;;  %v8311_v14 = vld [vmem:[%s13251_s1 + $0xbc4] sm:$0xf]  ;;  %v7715_v52 = vor.u32 %v8263_v28, %v7712_v48  ;;  %5548 = vmatpush.bf16.msrb.mxu2 %v7843_v38  ;;  %v7776_v59 = vld [vmem:[%s13251_s1 + $0xac8] sm:$0xf0] }
 0x53f   : > { %5362 = vmatmul.bf16.gmra.mxu2 %v10365_v26  ;;  %v7907_v23 = vor.u32 %v8311_v14, %v7904_v5 }
 0x540   : > { %5411 = vmatmul.bf16.gmra.mxu3 %v10372_v4  ;;  %5450 = vmatpush.bf16.msrb.mxu0 %v7715_v52  ;;  %v8261_v52 = vld [vmem:[%s13251_s1 + $0xa34] sm:$0xf] }
 0x541   : > { %5597 = vmatpush.bf16.msrb.mxu3 %v7907_v23 }
 0x542   : > { %v5167_v7 = vpop.f32.mrf.mxu2  ;;  %v5071_v17 = vpop.f32.mrf.mxu0 }
 0x543   : > { %v5168_v34 = vadd.f32 %v5167_v7, %v5119_v31  ;;  %v5216_v36 = vpop.f32.mrf.mxu3  ;;  %v5072_v62 = vadd.f32 %v5071_v17, %v12037_v13  ;;  %v5120_v9 = vpop.f32.mrf.mxu1  ;;  %v7779_v31 = vor.u32 %v8279_v6, %v7776_v59  ;;  %v8293_v7 = vld [vmem:[%s13251_s1 + $0xb34] sm:$0xf] }
 0x545   : > { %v12300_v50 = vadd.f32 %v5216_v36, %v5168_v34  ;;  %v5121_v63 = vadd.f32 %v5120_v9, %v5072_v62  ;;  %5499 = vmatpush.bf16.msrb.mxu1 %v7779_v31  ;;  %v7896_v34 = vld [vmem:[%s13251_s1 + $0xbb8] sm:$0xf0] }
 0x54a   : > { %v5169_v56 = vpop.f32.mrf.mxu2  ;;  %v5074_v13 = vpop.f32.mrf.mxu0 }
 0x54b   : > { %v5170_v57 = vadd.f32 %v5169_v56, %v5121_v63  ;;  %v5218_v28 = vpop.f32.mrf.mxu3  ;;  %v5075_v38 = vadd.f32 %v5074_v13, %v12062_v42  ;;  %v5123_v48 = vpop.f32.mrf.mxu1  ;;  %v7832_v42 = vld [vmem:[%s13251_s1 + $0xb38] sm:$0xf0] }
 0x54c   : > { %v7835_v23 = vor.u32 %v8293_v7, %v7832_v42 }
 0x54d   : > { %v12309_v14 = vadd.f32 %v5218_v28, %v5170_v57  ;;  %v5124_v5 = vadd.f32 %v5123_v48, %v5075_v38  ;;  %5269 = vmatmul.bf16.gmra.mxu0 %v13774_v45  ;;  %v7704_v45 = vld [vmem:[%s13251_s1 + $0xa38] sm:$0xf0]  ;;  %v8277_v57 = vld [vmem:[%s13251_s1 + $0xab4] sm:$0xf] }
 0x54e   : > { %5318 = vmatmul.bf16.gmra.mxu1 %v13775_v43  ;;  %v8309_v43 = vld [vmem:[%s13251_s1 + $0xbb4] sm:$0xf]  ;;  %v7707_v17 = vor.u32 %v8261_v52, %v7704_v45  ;;  %5549 = vmatpush.bf16.msrb.mxu2 %v7835_v23  ;;  %v7768_v28 = vld [vmem:[%s13251_s1 + $0xab8] sm:$0xf0] }
 0x54f   : > { %5367 = vmatmul.bf16.gmra.mxu2 %v10421_v8  ;;  %v7899_v62 = vor.u32 %v8309_v43, %v7896_v34  ;;  %v7771_v38 = vor.u32 %v8277_v57, %v7768_v28  ;;  %v13796_v43 = vld [vmem:[#allocation106_spill] sm:$0xff]  ;;  %v13797_v34 = vld [vmem:[#allocation107_spill] sm:$0xff] }
 0x550   : > { %5416 = vmatmul.bf16.gmra.mxu3 %v10428_v33  ;;  %5451 = vmatpush.bf16.msrb.mxu0 %v7707_v17  ;;  %v8259_v17 = vld [vmem:[%s13251_s1 + $0xa24] sm:$0xf] }
 0x551   : > { %5598 = vmatpush.bf16.msrb.mxu3 %v7899_v62  ;;  %5500 = vmatpush.bf16.msrb.mxu1 %v7771_v38 }
 0x552   : > { %v5172_v36 = vpop.f32.mrf.mxu2  ;;  %v5076_v59 = vpop.f32.mrf.mxu0 }
 0x553   : > { %v5173_v9 = vadd.f32 %v5172_v36, %v5124_v5  ;;  %v5221_v6 = vpop.f32.mrf.mxu3  ;;  %v5077_v63 = vadd.f32 %v5076_v59, %v12071_v19  ;;  %v5125_v31 = vpop.f32.mrf.mxu1  ;;  %v8291_v36 = vld [vmem:[%s13251_s1 + $0xb24] sm:$0xf]  ;;  %v7888_v59 = vld [vmem:[%s13251_s1 + $0xba8] sm:$0xf0] }
 0x555   : > { %v12334_v56 = vadd.f32 %v5221_v6, %v5173_v9  ;;  %v5126_v13 = vadd.f32 %v5125_v31, %v5077_v63  ;;  %v7696_v9 = vld [vmem:[%s13251_s1 + $0xa28] sm:$0xf0]  ;;  %v8307_v6 = vld [vmem:[%s13251_s1 + $0xba4] sm:$0xf] }
 0x556   : > { %v7699_v31 = vor.u32 %v8259_v17, %v7696_v9  ;;  %v7891_v57 = vor.u32 %v8307_v6, %v7888_v59  ;;  %v13798_v6 = vld [vmem:[#allocation108_spill] sm:$0xff]  ;;  %v13799_v59 = vld [vmem:[#allocation109_spill] sm:$0xff] }
 0x558   : > { %5452 = vmatpush.bf16.msrb.mxu0 %v7699_v31  ;;  %5599 = vmatpush.bf16.msrb.mxu3 %v7891_v57  ;;  %v8257_v31 = vld [vmem:[%s13251_s1 + $0xa14] sm:$0xf] }
 0x55a   : > { %v5174_v48 = vpop.f32.mrf.mxu2  ;;  %v5079_v19 = vpop.f32.mrf.mxu0 }
 0x55b   : > { %v5175_v5 = vadd.f32 %v5174_v48, %v5126_v13  ;;  %v5223_v7 = vpop.f32.mrf.mxu3  ;;  %v5080_v42 = vadd.f32 %v5079_v19, %v12096_v29  ;;  %v5128_v52 = vpop.f32.mrf.mxu1  ;;  %v7824_v29 = vld [vmem:[%s13251_s1 + $0xb28] sm:$0xf0]  ;;  %v8275_v19 = vld [vmem:[%s13251_s1 + $0xaa4] sm:$0xf] }
 0x55c   : > { %v7827_v62 = vor.u32 %v8291_v36, %v7824_v29 }
 0x55d   : > { %v12343_v23 = vadd.f32 %v5223_v7, %v5175_v5  ;;  %v5129_v45 = vadd.f32 %v5128_v52, %v5080_v42  ;;  %5274 = vmatmul.bf16.gmra.mxu0 %v13796_v43  ;;  %v7760_v42 = vld [vmem:[%s13251_s1 + $0xaa8] sm:$0xf0] }
 0x55e   : > { %5323 = vmatmul.bf16.gmra.mxu1 %v13797_v34  ;;  %5550 = vmatpush.bf16.msrb.mxu2 %v7827_v62 }
 0x55f   : > { %5372 = vmatmul.bf16.gmra.mxu2 %v10490_v10 }
 0x560   : > { %5421 = vmatmul.bf16.gmra.mxu3 %v10497_v1 }
 0x562   : > { %v5177_v63 = vpop.f32.mrf.mxu2  ;;  %v5081_v38 = vpop.f32.mrf.mxu0 }
 0x563   : > { %v5178_v28 = vadd.f32 %v5177_v63, %v5129_v45  ;;  %v5226_v13 = vpop.f32.mrf.mxu3  ;;  %v5082_v48 = vadd.f32 %v5081_v38, %v12105_v30  ;;  %v5130_v5 = vpop.f32.mrf.mxu1  ;;  %v7763_v45 = vor.u32 %v8275_v19, %v7760_v42  ;;  %v8289_v63 = vld [vmem:[%s13251_s1 + $0xb14] sm:$0xf] }
 0x565   : > { %v12368_v7 = vadd.f32 %v5226_v13, %v5178_v28  ;;  %v5131_v52 = vadd.f32 %v5130_v5, %v5082_v48  ;;  %5501 = vmatpush.bf16.msrb.mxu1 %v7763_v45  ;;  %v7880_v28 = vld [vmem:[%s13251_s1 + $0xb98] sm:$0xf0] }
 0x56a   : > { %v5179_v43 = vpop.f32.mrf.mxu2  ;;  %v5084_v30 = vpop.f32.mrf.mxu0 }
 0x56b   : > { %v5180_v34 = vadd.f32 %v5179_v43, %v5131_v52  ;;  %v5228_v36 = vpop.f32.mrf.mxu3  ;;  %v5085_v29 = vadd.f32 %v5084_v30, %v12130_v11  ;;  %v5133_v17 = vpop.f32.mrf.mxu1  ;;  %v7816_v11 = vld [vmem:[%s13251_s1 + $0xb18] sm:$0xf0] }
 0x56c   : > { %v7819_v57 = vor.u32 %v8289_v63, %v7816_v11 }
 0x56d   : > { %v12377_v62 = vadd.f32 %v5228_v36, %v5180_v34  ;;  %v5134_v9 = vadd.f32 %v5133_v17, %v5085_v29  ;;  %5279 = vmatmul.bf16.gmra.mxu0 %v13782_v61  ;;  %v7688_v61 = vld [vmem:[%s13251_s1 + $0xa18] sm:$0xf0]  ;;  %v8273_v34 = vld [vmem:[%s13251_s1 + $0xa94] sm:$0xf] }
 0x56e   : > { %5328 = vmatmul.bf16.gmra.mxu1 %v13783_v0  ;;  %v8305_v0 = vld [vmem:[%s13251_s1 + $0xb94] sm:$0xf]  ;;  %v7691_v38 = vor.u32 %v8257_v31, %v7688_v61  ;;  %5551 = vmatpush.bf16.msrb.mxu2 %v7819_v57  ;;  %v7752_v36 = vld [vmem:[%s13251_s1 + $0xa98] sm:$0xf0]  ;;  %v8287_v57 = vld [vmem:[%s13251_s1 + $0xb04] sm:$0xf] }
 0x56f   : > { %5377 = vmatmul.bf16.gmra.mxu2 %v13798_v6  ;;  %v7883_v48 = vor.u32 %v8305_v0, %v7880_v28  ;;  %v7755_v29 = vor.u32 %v8273_v34, %v7752_v36  ;;  %v8255_v61 = vld [vmem:[%s13251_s1 + $0xa04] sm:$0xf]  ;;  %v7872_v28 = vld [vmem:[%s13251_s1 + $0xb88] sm:$0xf0] }
 0x570   : > { %5426 = vmatmul.bf16.gmra.mxu3 %v13799_v59  ;;  %5453 = vmatpush.bf16.msrb.mxu0 %v7691_v38  ;;  %v8271_v36 = vld [vmem:[%s13251_s1 + $0xa84] sm:$0xf] }
 0x571   : > { %5600 = vmatpush.bf16.msrb.mxu3 %v7883_v48  ;;  %5502 = vmatpush.bf16.msrb.mxu1 %v7755_v29 }
 0x572   : > { %v5182_v13 = vpop.f32.mrf.mxu2  ;;  %v5086_v42 = vpop.f32.mrf.mxu0 }
 0x573   : > { %v5183_v5 = vadd.f32 %v5182_v13, %v5134_v9  ;;  %v5231_v19 = vpop.f32.mrf.mxu3  ;;  %v5087_v52 = vadd.f32 %v5086_v42, %v12139_v12  ;;  %v5135_v45 = vpop.f32.mrf.mxu1 }
 0x575   : > { %v12402_v43 = vadd.f32 %v5231_v19, %v5183_v5  ;;  %v5136_v30 = vadd.f32 %v5135_v45, %v5087_v52 }
 0x57a   : > { %v5184_v17 = vpop.f32.mrf.mxu2  ;;  %v5089_v12 = vpop.f32.mrf.mxu0 }
 0x57b   : > { %v5185_v9 = vadd.f32 %v5184_v17, %v5136_v30  ;;  %v5233_v6 = vpop.f32.mrf.mxu3  ;;  %v5090_v59 = vadd.f32 %v5089_v12, %v12164_v32  ;;  %v5138_v63 = vpop.f32.mrf.mxu1  ;;  %v7808_v32 = vld [vmem:[%s13251_s1 + $0xb08] sm:$0xf0] }
 0x57c   : > { %v7811_v0 = vor.u32 %v8287_v57, %v7808_v32  ;;  %v7744_v30 = vld [vmem:[%s13251_s1 + $0xa88] sm:$0xf0] }
 0x57d   : > { %v12411_v11 = vadd.f32 %v5233_v6, %v5185_v9  ;;  %v5139_v31 = vadd.f32 %v5138_v63, %v5090_v59  ;;  %5284 = vmatmul.bf16.gmra.mxu0 %v13786_v27  ;;  %v7680_v27 = vld [vmem:[%s13251_s1 + $0xa08] sm:$0xf0]  ;;  %v7747_v17 = vor.u32 %v8271_v36, %v7744_v30 }
 0x57e   : > { %5333 = vmatmul.bf16.gmra.mxu1 %v13787_v54  ;;  %v8303_v54 = vld [vmem:[%s13251_s1 + $0xb84] sm:$0xf]  ;;  %v7683_v38 = vor.u32 %v8255_v61, %v7680_v27  ;;  %5552 = vmatpush.bf16.msrb.mxu2 %v7811_v0 }
 0x57f   : > { %5382 = vmatmul.bf16.gmra.mxu2 %v10602_v21  ;;  %v7875_v48 = vor.u32 %v8303_v54, %v7872_v28  ;;  %5503 = vmatpush.bf16.msrb.mxu1 %v7747_v17 }
 0x580   : > { %5431 = vmatmul.bf16.gmra.mxu3 %v10609_v15  ;;  %5454 = vmatpush.bf16.msrb.mxu0 %v7683_v38 }
 0x581   : > { %5601 = vmatpush.bf16.msrb.mxu3 %v7875_v48 }
 0x582   : > { %v5187_v13 = vpop.f32.mrf.mxu2  ;;  %v5091_v42 = vpop.f32.mrf.mxu0 }
 0x583   : > { %v5188_v5 = vadd.f32 %v5187_v13, %v5139_v31  ;;  %v5236_v19 = vpop.f32.mrf.mxu3  ;;  %v5092_v52 = vadd.f32 %v5091_v42, %v12173_v18  ;;  %v5140_v45 = vpop.f32.mrf.mxu1 }
 0x585   : > { %v12436_v34 = vadd.f32 %v5236_v19, %v5188_v5  ;;  %v5141_v29 = vadd.f32 %v5140_v45, %v5092_v52 }
 0x58a   : > { %v5189_v9 = vpop.f32.mrf.mxu2  ;;  %v5094_v18 = vpop.f32.mrf.mxu0 }
 0x58b   : > { %v5190_v6 = vadd.f32 %v5189_v9, %v5141_v29  ;;  %v5238_v12 = vpop.f32.mrf.mxu3  ;;  %v5095_v59 = vadd.f32 %v5094_v18, %v12198_v39  ;;  %v5143_v63 = vpop.f32.mrf.mxu1 }
 0x58d   : > { %v12445_v31 = vadd.f32 %v5238_v12, %v5190_v6  ;;  %v5144_v57 = vadd.f32 %v5143_v63, %v5095_v59  ;;  %5289 = vmatmul.bf16.gmra.mxu0 %v13790_v24 }
 0x58e   : > { %5338 = vmatmul.bf16.gmra.mxu1 %v13791_v46 }
 0x58f   : > { %5387 = vmatmul.bf16.gmra.mxu2 %v10662_v44 }
 0x590   : > { %5436 = vmatmul.bf16.gmra.mxu3 %v10669_v53 }
 0x592   : > { %v5192_v32 = vpop.f32.mrf.mxu2  ;;  %v5096_v27 = vpop.f32.mrf.mxu0 }
 0x593   : > { %v5193_v61 = vadd.f32 %v5192_v32, %v5144_v57  ;;  %v5241_v0 = vpop.f32.mrf.mxu3  ;;  %v5097_v54 = vadd.f32 %v5096_v27, %v12207_v55  ;;  %v5145_v28 = vpop.f32.mrf.mxu1 }
 0x595   : > { %v12452_v39 = vadd.f32 %v5241_v0, %v5193_v61  ;;  %v5146_v13 = vadd.f32 %v5145_v28, %v5097_v54 }
 0x59a   : > { %v5194_v38 = vpop.f32.mrf.mxu2  ;;  %v5099_v24 = vpop.f32.mrf.mxu0 }
 0x59b   : > { %v5195_v48 = vadd.f32 %v5194_v38, %v5146_v13  ;;  %v5243_v5 = vpop.f32.mrf.mxu3  ;;  %v5100_v46 = vadd.f32 %v5099_v24, %v12232_v16  ;;  %v5148_v19 = vpop.f32.mrf.mxu1 }
 0x59d   : > { %v12455_v42 = vadd.f32 %v5243_v5, %v5195_v48  ;;  %v5149_v52 = vadd.f32 %v5148_v19, %v5100_v46  ;;  %5294 = vmatmul.bf16.gmra.mxu0 %v10723_v41 }
 0x59e   : > { %5343 = vmatmul.bf16.gmra.mxu1 %v10727_v3 }
 0x59f   : > { %5392 = vmatmul.bf16.gmra.mxu2 %v10733_v37 }
 0x5a0   : > { %5441 = vmatmul.bf16.gmra.mxu3 %v10740_v47 }
 0x5a2   : > { %v5197_v55 = vpop.f32.mrf.mxu2  ;;  %v5101_v30 = vpop.f32.mrf.mxu0 }
 0x5a3   : > { %v5198_v45 = vadd.f32 %v5197_v55, %v5149_v52  ;;  %v5246_v36 = vpop.f32.mrf.mxu3  ;;  %v5102_v29 = vadd.f32 %v5101_v30, %v12241_v25  ;;  %v5150_v17 = vpop.f32.mrf.mxu1 }
 0x5a5   : > { %v12462_v16 = vadd.f32 %v5246_v36, %v5198_v45  ;;  %v5151_v9 = vadd.f32 %v5150_v17, %v5102_v29 }
 0x5aa   : > { %v5199_v6 = vpop.f32.mrf.mxu2  ;;  %v5260_v41 = vpop.f32.mrf.mxu0 }
 0x5ab   : > { %v5200_v12 = vadd.f32 %v5199_v6, %v5151_v9  ;;  %v5248_v18 = vpop.f32.mrf.mxu3  ;;  %v5261_v3 = vadd.f32 %v5260_v41, %v12266_v22  ;;  %v5309_v59 = vpop.f32.mrf.mxu1  ;;  %v13800_v9 = vld [vmem:[#allocation110_spill] sm:$0xff]  ;;  %v13801_v6 = vld [vmem:[#allocation111_spill] sm:$0xff] }
 0x5ad   : > { %v12465_v63 = vadd.f32 %v5248_v18, %v5200_v12  ;;  %v5310_v57 = vadd.f32 %v5309_v59, %v5261_v3  ;;  %5455 = vmatmul.bf16.vlgmr.msrb.gmra.mxu0 %v10279_v20 }
 0x5ae   : > { %5504 = vmatmul.bf16.vlgmr.msrb.gmra.mxu1 %v10283_v35 }
 0x5af   : > { %5553 = vmatmul.bf16.vlgmr.msrb.gmra.mxu2 %v10365_v26 }
 0x5b0   : > { %5602 = vmatmul.bf16.vlgmr.msrb.gmra.mxu3 %v10372_v4 }
 0x5b2   : > { %v5358_v25 = vpop.f32.mrf.mxu2  ;;  %v5262_v0 = vpop.f32.mrf.mxu0 }
 0x5b3   : > { %v5359_v32 = vadd.f32 %v5358_v25, %v5310_v57  ;;  %v5407_v61 = vpop.f32.mrf.mxu3  ;;  %v5263_v27 = vadd.f32 %v5262_v0, %v12275_v2  ;;  %v5311_v54 = vpop.f32.mrf.mxu1 }
 0x5b5   : > { %v12472_v22 = vadd.f32 %v5407_v61, %v5359_v32  ;;  %v5312_v28 = vadd.f32 %v5311_v54, %v5263_v27 }
 0x5ba   : > { %v5360_v13 = vpop.f32.mrf.mxu2  ;;  %v5265_v20 = vpop.f32.mrf.mxu0 }
 0x5bb   : > { %v5361_v38 = vadd.f32 %v5360_v13, %v5312_v28  ;;  %v5409_v48 = vpop.f32.mrf.mxu3  ;;  %v5266_v35 = vadd.f32 %v5265_v20, %v12300_v50  ;;  %v5314_v5 = vpop.f32.mrf.mxu1 }
 0x5bd   : > { %v12475_v26 = vadd.f32 %v5409_v48, %v5361_v38  ;;  %v5315_v4 = vadd.f32 %v5314_v5, %v5266_v35  ;;  %5460 = vmatmul.bf16.gmra.mxu0 %v10813_v58 }
 0x5be   : > { %5509 = vmatmul.bf16.gmra.mxu1 %v10819_v60 }
 0x5bf   : > { %5558 = vmatmul.bf16.gmra.mxu2 %v10421_v8 }
 0x5c0   : > { %5607 = vmatmul.bf16.gmra.mxu3 %v10428_v33 }
 0x5c2   : > { %v5363_v2 = vpop.f32.mrf.mxu2  ;;  %v5267_v19 = vpop.f32.mrf.mxu0 }
 0x5c3   : > { %v5364_v24 = vadd.f32 %v5363_v2, %v5315_v4  ;;  %v5412_v46 = vpop.f32.mrf.mxu3  ;;  %v5268_v52 = vadd.f32 %v5267_v19, %v12309_v14  ;;  %v5316_v55 = vpop.f32.mrf.mxu1  ;;  %v13803_v19 = vld [vmem:[#allocation113_spill] sm:$0xff] }
 0x5c5   : > { %v12482_v50 = vadd.f32 %v5412_v46, %v5364_v24  ;;  %v5317_v45 = vadd.f32 %v5316_v55, %v5268_v52  ;;  %v13804_v52 = vld [vmem:[#allocation114_spill] sm:$0xff]  ;;  %v5793_v55 = vld [vmem:[%s13255_s5 + $0xf8] sm:$0xff] }
 0x5c6   : > { %5866 = vmatpush.msra.mxu2 %v5793_v55 }
 0x5ca   : > { %v5365_v36 = vpop.f32.mrf.mxu2  ;;  %v5270_v58 = vpop.f32.mrf.mxu0 }
 0x5cb   : > { %v5366_v30 = vadd.f32 %v5365_v36, %v5317_v45  ;;  %v5414_v29 = vpop.f32.mrf.mxu3  ;;  %v5271_v60 = vadd.f32 %v5270_v58, %v12334_v56  ;;  %v5319_v17 = vpop.f32.mrf.mxu1  ;;  %v13805_v45 = vld [vmem:[#allocation3_spill] sm:$0xff] }
 0x5cc   : > { %v5687_v36 = vmul.f32 %v13805_v45, %v13805_v45 }
 0x5cd   : > { %v12485_v8 = vadd.f32 %v5414_v29, %v5366_v30  ;;  %v5320_v33 = vadd.f32 %v5319_v17, %v5271_v60  ;;  %5465 = vmatmul.bf16.gmra.mxu0 %v13800_v9  ;;  %v13806_v29 = vld [vmem:[#allocation2_spill] sm:$0xff]  ;;  %v13807_v60 = vld [vmem:[#allocation4_spill] sm:$0xff] }
 0x5ce   : > { %5514 = vmatmul.bf16.gmra.mxu1 %v13801_v6  ;;  %v5685_v58 = vmul.f32 %v13806_v29, %v13806_v29  ;;  %v5689_v17 = vmul.f32 %v13807_v60, %v13807_v60 }
 0x5cf   : > { %5563 = vmatmul.bf16.gmra.mxu2 %v10490_v10 }
 0x5d0   : > { %5612 = vmatmul.bf16.gmra.mxu3 %v10497_v1 }
 0x5d2   : > { %v5368_v14 = vpop.f32.mrf.mxu2  ;;  %v5272_v41 = vpop.f32.mrf.mxu0 }
 0x5d3   : > { %v5369_v12 = vadd.f32 %v5368_v14, %v5320_v33  ;;  %v5417_v18 = vpop.f32.mrf.mxu3  ;;  %v5273_v3 = vadd.f32 %v5272_v41, %v12343_v23  ;;  %v5321_v59 = vpop.f32.mrf.mxu1  ;;  %v13802_v23 = vld [vmem:[#allocation112_spill] sm:$0xff]  ;;  %v5789_v41 = vld [vmem:[%s13255_s5 + $0xd8] sm:$0xff] }
 0x5d5   : > { %v12492_v56 = vadd.f32 %v5417_v18, %v5369_v12  ;;  %v5322_v57 = vadd.f32 %v5321_v59, %v5273_v3  ;;  %v5788_v18 = vld [vmem:[%s13255_s5 + $0xd0] sm:$0xff]  ;;  %v5717_v3 = vadd.f32 %v5687_v36, %v5685_v58  ;;  %v13808_v59 = vld [vmem:[#allocation5_spill] sm:$0xff] }
 0x5d6   : > { %v5780_v36 = vld [vmem:[%s13255_s5 + $0x90] sm:$0xff] }
 0x5da   : > { %v5370_v25 = vpop.f32.mrf.mxu2  ;;  %v5275_v0 = vpop.f32.mrf.mxu0 }
 0x5db   : > { %v5371_v32 = vadd.f32 %v5370_v25, %v5322_v57  ;;  %v5419_v61 = vpop.f32.mrf.mxu3  ;;  %v5276_v27 = vadd.f32 %v5275_v0, %v12368_v7  ;;  %v5324_v54 = vpop.f32.mrf.mxu1  ;;  %v5691_v57 = vmul.f32 %v13808_v59, %v13808_v59  ;;  %v5643_v25 = vadd.f32 %v13805_v45, %v13806_v29  ;;  %v5784_v0 = vld [vmem:[%s13255_s5 + $0xb0] sm:$0xff] }
 0x5dd   : > { %v12495_v10 = vadd.f32 %v5419_v61, %v5371_v32  ;;  %v5325_v1 = vadd.f32 %v5324_v54, %v5276_v27  ;;  %5470 = vmatmul.bf16.gmra.mxu0 %v10913_v40  ;;  %v5787_v61 = vld [vmem:[%s13255_s5 + $0xc8] sm:$0xff]  ;;  %v5718_v27 = vadd.f32 %v5717_v3, %v5689_v17  ;;  %v13809_v54 = vld [vmem:[#allocation6_spill] sm:$0xff] }
 0x5de   : > { %5519 = vmatmul.bf16.gmra.mxu1 %v10917_v49 }
 0x5df   : > { %5568 = vmatmul.bf16.gmra.mxu2 %v10919_v51 }
 0x5e0   : > { %5617 = vmatmul.bf16.gmra.mxu3 %v13802_v23  ;;  %v5785_v23 = vld [vmem:[%s13255_s5 + $0xb8] sm:$0xff] }
 0x5e2   : > { %v5373_v28 = vpop.f32.mrf.mxu2  ;;  %v5277_v48 = vpop.f32.mrf.mxu0 }
 0x5e3   : > { %v5374_v13 = vadd.f32 %v5373_v28, %v5325_v1  ;;  %v5422_v38 = vpop.f32.mrf.mxu3  ;;  %v5278_v20 = vadd.f32 %v5277_v48, %v12377_v62  ;;  %v5326_v35 = vpop.f32.mrf.mxu1  ;;  %v5792_v62 = vld [vmem:[%s13255_s5 + $0xf0] sm:$0xff]  ;;  %v5693_v1 = vmul.f32 %v13809_v54, %v13809_v54  ;;  %v5644_v28 = vadd.f32 %v5643_v25, %v13807_v60 }
 0x5e4   : > { %5826 = vmatpush.msra.mxu0 %v5792_v62  ;;  %v5776_v25 = vld [vmem:[%s13255_s5 + $0x70] sm:$0xff] }
 0x5e5   : > { %v12502_v7 = vadd.f32 %v5422_v38, %v5374_v13  ;;  %v5327_v5 = vadd.f32 %v5326_v35, %v5278_v20  ;;  %v5719_v13 = vadd.f32 %v5718_v27, %v5691_v57  ;;  %v13810_v38 = vld [vmem:[#allocation7_spill] sm:$0xff]  ;;  %v5645_v20 = vadd.f32 %v5644_v28, %v13808_v59  ;;  %v13815_v57 = vld [vmem:[#allocation116_spill] sm:$0xff] }
 0x5e6   : > { %v5695_v48 = vmul.f32 %v13810_v38, %v13810_v38 }
 0x5ea   : > { %v5375_v4 = vpop.f32.mrf.mxu2  ;;  %v5280_v40 = vpop.f32.mrf.mxu0 }
 0x5eb   : > { %v5376_v2 = vadd.f32 %v5375_v4, %v5327_v5  ;;  %v5424_v24 = vpop.f32.mrf.mxu3  ;;  %v5329_v46 = vpop.f32.mrf.mxu1  ;;  %v5281_v51 = vadd.f32 %v5280_v40, %v12402_v43  ;;  %v5782_v5 = vld [vmem:[%s13255_s5 + $0xa0] sm:$0xff]  ;;  %v5783_v4 = vld [vmem:[%s13255_s5 + $0xa8] sm:$0xff] }
 0x5ed   : > { %v12504_v49 = vadd.f32 %v5424_v24, %v5376_v2  ;;  %5475 = vmatmul.bf16.gmra.mxu0 %v13803_v19  ;;  %v5330_v43 = vadd.f32 %v5329_v46, %v5281_v51  ;;  %v5720_v2 = vadd.f32 %v5719_v13, %v5693_v1  ;;  %v13811_v24 = vld [vmem:[#allocation8_spill] sm:$0xff] }
 0x5ee   : > { %5524 = vmatmul.bf16.gmra.mxu1 %v13804_v52  ;;  %v5697_v40 = vmul.f32 %v13811_v24, %v13811_v24  ;;  %v5646_v52 = vadd.f32 %v5645_v20, %v13809_v54  ;;  %v13817_v13 = vld [vmem:[#allocation12_spill] sm:$0xff] }
 0x5ef   : > { %5573 = vmatmul.bf16.gmra.mxu2 %v10602_v21  ;;  %v5790_v21 = vld [vmem:[%s13255_s5 + $0xe0] sm:$0xff] }
 0x5f0   : > { %5622 = vmatmul.bf16.gmra.mxu3 %v10609_v15  ;;  %v5791_v15 = vld [vmem:[%s13255_s5 + $0xe8] sm:$0xff]  ;;  %5827 = vmatpush.msra.mxu0 %v5790_v21  ;;  %v13812_v21 = vld [vmem:[#allocation9_spill] sm:$0xff] }
 0x5f1   : > { %5867 = vmatpush.msra.mxu2 %v5791_v15  ;;  %v5699_v15 = vmul.f32 %v13812_v21, %v13812_v21 }
 0x5f2   : > { %v5378_v30 = vpop.f32.mrf.mxu2  ;;  %v5282_v6 = vpop.f32.mrf.mxu0  ;;  %5828 = vmatpush.msra.mxu0 %v5788_v18 }
 0x5f3   : > { %v12529_v33 = vadd.f32 %v5378_v30, %v5330_v43  ;;  %v12531_v9 = vpop.f32.mrf.mxu3  ;;  %v5283_v14 = vadd.f32 %v5282_v6, %v12411_v11  ;;  %v5331_v12 = vpop.f32.mrf.mxu1  ;;  %5868 = vmatpush.msra.mxu2 %v5789_v41  ;;  %v5786_v11 = vld [vmem:[%s13255_s5 + $0xc0] sm:$0xff]  ;;  %v5781_v43 = vld [vmem:[%s13255_s5 + $0x98] sm:$0xff]  ;;  %v5721_v30 = vadd.f32 %v5720_v2, %v5695_v48  ;;  %v13813_v6 = vld [vmem:[#allocation115_spill] sm:$0xff]  ;;  %v5705_v48 = vmul.f32 %v13817_v13, %v13817_v13 }
 0x5f4   : > { %5829 = vmatpush.msra.mxu0 %v5786_v11  ;;  %v13814_v41 = vld [vmem:[#allocation10_spill] sm:$0xff] }
 0x5f5   : > { %v5332_v32 = vadd.f32 %v5331_v12, %v5283_v14  ;;  %5869 = vmatpush.msra.mxu2 %v5787_v61  ;;  %v5779_v14 = vld [vmem:[%s13255_s5 + $0x88] sm:$0xff]  ;;  %v5647_v12 = vadd.f32 %v5646_v52, %v13810_v38  ;;  %v5722_v18 = vadd.f32 %v5721_v30, %v5697_v40  ;;  %v5701_v3 = vmul.f32 %v13814_v41, %v13814_v41  ;;  %v5772_v40 = vld [vmem:[%s13255_s5 + $0x50] sm:$0xff]  ;;  %v13818_v52 = vld [vmem:[#allocation13_spill] sm:$0xff] }
 0x5f6   : > { %5830 = vmatpush.msra.mxu0 %v5784_v0  ;;  %v13816_v0 = vld [vmem:[#allocation11_spill] sm:$0xff] }
 0x5f7   : > { %5870 = vmatpush.msra.mxu2 %v5785_v23  ;;  %v5648_v11 = vadd.f32 %v5647_v12, %v13811_v24  ;;  %v5723_v61 = vadd.f32 %v5722_v18, %v5699_v15  ;;  %v5703_v27 = vmul.f32 %v13816_v0, %v13816_v0 }
 0x5f8   : > { %5831 = vmatpush.msra.mxu0 %v5782_v5 }
 0x5f9   : > { %5871 = vmatpush.msra.mxu2 %v5783_v4  ;;  %v5649_v23 = vadd.f32 %v5648_v11, %v13812_v21  ;;  %v5724_v28 = vadd.f32 %v5723_v61, %v5701_v3  ;;  %v13820_v3 = vld [vmem:[#allocation15_spill] sm:$0xff] }
 0x5fa   : > { %v5380_v35 = vpop.f32.mrf.mxu2  ;;  %v5285_v19 = vpop.f32.mrf.mxu0  ;;  %5832 = vmatpush.msra.mxu0 %v5780_v36  ;;  %v5770_v36 = vld [vmem:[%s13255_s5 + $0x40] sm:$0xff]  ;;  %v5767_v11 = vld [vmem:[%s13255_s5 + $0x28] sm:$0xff] }
 0x5fb   : > { %v5381_v46 = vadd.f32 %v5380_v35, %v5332_v32  ;;  %v5429_v51 = vpop.f32.mrf.mxu3  ;;  %v5286_v62 = vadd.f32 %v5285_v19, %v12436_v34  ;;  %v5334_v55 = vpop.f32.mrf.mxu1  ;;  %5872 = vmatpush.msra.mxu2 %v5781_v43  ;;  %v5778_v34 = vld [vmem:[%s13255_s5 + $0x80] sm:$0xff]  ;;  %v5777_v32 = vld [vmem:[%s13255_s5 + $0x78] sm:$0xff]  ;;  %v5725_v19 = vadd.f32 %v5724_v28, %v5703_v27  ;;  %v5771_v43 = vld [vmem:[%s13255_s5 + $0x48] sm:$0xff] }
 0x5fc   : > { %5833 = vmatpush.msra.mxu0 %v5778_v34  ;;  %v5768_v34 = vld [vmem:[%s13255_s5 + $0x30] sm:$0xff] }
 0x5fd   : > { %v12580_v58 = vadd.f32 %v5429_v51, %v5381_v46  ;;  %v5335_v17 = vadd.f32 %v5334_v55, %v5286_v62  ;;  %5480 = vmatmul.bf16.gmra.mxu0 %v13813_v6  ;;  %5873 = vmatpush.msra.mxu2 %v5779_v14  ;;  %v5773_v46 = vld [vmem:[%s13255_s5 + $0x58] sm:$0xff]  ;;  %v5650_v51 = vadd.f32 %v5649_v23, %v13814_v41 }
 0x5fe   : > { %5529 = vmatmul.bf16.gmra.mxu1 %v13815_v57  ;;  %5834 = vmatpush.msra.mxu0 %v5776_v25  ;;  %v5707_v62 = vmul.f32 %v13818_v52, %v13818_v52  ;;  %v5726_v15 = vadd.f32 %v5725_v19, %v5705_v48  ;;  %v5769_v14 = vld [vmem:[%s13255_s5 + $0x38] sm:$0xff]  ;;  %v5711_v57 = vmul.f32 %v13820_v3, %v13820_v3 }
 0x5ff   : > { %5578 = vmatmul.bf16.gmra.mxu2 %v10662_v44  ;;  %v5774_v44 = vld [vmem:[%s13255_s5 + $0x60] sm:$0xff]  ;;  %v5651_v30 = vadd.f32 %v5650_v51, %v13816_v0  ;;  %v13823_v19 = vld [vmem:[#allocation117_spill] sm:$0xff] }
 0x600   : > { %5627 = vmatmul.bf16.gmra.mxu3 %v10669_v53  ;;  %v5775_v53 = vld [vmem:[%s13255_s5 + $0x68] sm:$0xff]  ;;  %5874 = vmatpush.msra.mxu2 %v5777_v32  ;;  %v5727_v18 = vadd.f32 %v5726_v15, %v5707_v62  ;;  %v5766_v32 = vld [vmem:[%s13255_s5 + $0x20] sm:$0xff] }
 0x601   : > { %5835 = vmatpush.msra.mxu0 %v5774_v44  ;;  %v5652_v12 = vadd.f32 %v5651_v30, %v13817_v13  ;;  %v5763_v30 = vld [vmem:[%s13255_s5 + $0x8] sm:$0xff] }
 0x602   : > { %v5383_v1 = vpop.f32.mrf.mxu2  ;;  %v5287_v5 = vpop.f32.mrf.mxu0  ;;  %5875 = vmatpush.msra.mxu2 %v5775_v53 }
 0x603   : > { %v5384_v20 = vadd.f32 %v5383_v1, %v5335_v17  ;;  %v5432_v35 = vpop.f32.mrf.mxu3  ;;  %v5288_v4 = vadd.f32 %v5287_v5, %v12445_v31  ;;  %v5336_v2 = vpop.f32.mrf.mxu1  ;;  %5836 = vmatpush.msra.mxu0 %v5772_v40  ;;  %v13819_v17 = vld [vmem:[#allocation14_spill] sm:$0xff]  ;;  %v5653_v61 = vadd.f32 %v5652_v12, %v13818_v52  ;;  %v13821_v1 = vld [vmem:[#allocation16_spill] sm:$0xff] }
 0x604   : > { %v5709_v6 = vmul.f32 %v13819_v17, %v13819_v17  ;;  %5876 = vmatpush.msra.mxu2 %v5773_v46  ;;  %v5713_v44 = vmul.f32 %v13821_v1, %v13821_v1  ;;  %v5764_v46 = vld [vmem:[%s13255_s5 + $0x10] sm:$0xff] }
 0x605   : > { %v12623_v55 = vadd.f32 %v5432_v35, %v5384_v20  ;;  %v5337_v31 = vadd.f32 %v5336_v2, %v5288_v4  ;;  %5837 = vmatpush.msra.mxu0 %v5770_v36  ;;  %v5654_v35 = vadd.f32 %v5653_v61, %v13819_v17  ;;  %v13822_v4 = vld [vmem:[#allocation17_spill] sm:$0xff]  ;;  %v13824_v36 = vld [vmem:[#allocation118_spill] sm:$0xff]  ;;  %v5428_v17 = vadd.f32 %v12531_v9, %v12529_v33 }
 0x606   : > { %5877 = vmatpush.msra.mxu2 %v5771_v43  ;;  %v5728_v27 = vadd.f32 %v5727_v18, %v5709_v6  ;;  %v5715_v2 = vmul.f32 %v13822_v4, %v13822_v4  ;;  %v5762_v43 = vld [vmem:[%s13255_s5] sm:$0xff] }
 0x607   : > { %5838 = vmatpush.msra.mxu0 %v5768_v34  ;;  %v5655_v62 = vadd.f32 %v5654_v35, %v13820_v3 }
 0x608   : > { %5878 = vmatpush.msra.mxu2 %v5769_v14  ;;  %v5729_v5 = vadd.f32 %v5728_v27, %v5711_v57 }
 0x609   : > { %5839 = vmatpush.msra.mxu0 %v5766_v32  ;;  %v5656_v15 = vadd.f32 %v5655_v62, %v13821_v1  ;;  %v13828_v62 = vld [vmem:[#allocation122_spill] sm:$0xff] }
 0x60a   : > { %v5385_v25 = vpop.f32.mrf.mxu2  ;;  %v5290_v28 = vpop.f32.mrf.mxu0  ;;  %5879 = vmatpush.msra.mxu2 %v5767_v11 }
 0x60b   : > { %v5386_v53 = vadd.f32 %v5385_v25, %v5337_v31  ;;  %v5434_v23 = vpop.f32.mrf.mxu3  ;;  %v5291_v48 = vadd.f32 %v5290_v28, %v12452_v39  ;;  %v5339_v20 = vpop.f32.mrf.mxu1  ;;  %v5765_v39 = vld [vmem:[%s13255_s5 + $0x18] sm:$0xff]  ;;  %v5730_v31 = vadd.f32 %v5729_v5, %v5713_v44  ;;  %5840 = vmatpush.msra.mxu0 %v5764_v46  ;;  %v5657_v14 = vadd.f32 %v5656_v15, %v13822_v4 }
 0x60c   : > { %5880 = vmatpush.msra.mxu2 %v5765_v39  ;;  %v13827_v39 = vld [vmem:[#allocation121_spill] sm:$0xff] }
 0x60d   : > { %v12656_v40 = vadd.f32 %v5434_v23, %v5386_v53  ;;  %v5340_v51 = vadd.f32 %v5339_v20, %v5291_v48  ;;  %5485 = vmatmul.bf16.gmra.mxu0 %v13823_v19  ;;  %v5731_v6 = vadd.f32 %v5730_v31, %v5715_v2  ;;  %v5658_v61 = vrot.slane %v5657_v14, 4  ;;  %v13826_v19 = vld [vmem:[#allocation120_spill] sm:$0xff] }
 0x60e   : > { %5534 = vmatmul.bf16.gmra.mxu1 %v13824_v36  ;;  %5841 = vmatpush.msra.mxu0 %v5762_v43  ;;  %v5825_v36 = vld [vmem:[%s13255_s5 + $0x1f8] sm:$0xff] }
 0x60f   : > { %5583 = vmatmul.bf16.gmra.mxu2 %v10733_v37  ;;  %v5732_v25 = vrot.slane %v5731_v6, 4  ;;  %v5659_v53 = vadd.f32 %v5658_v61, %v5657_v14  ;;  %5886 = vmatpush.msra.mxu3 %v5825_v36 }
 0x610   : > { %5632 = vmatmul.bf16.gmra.mxu3 %v10740_v47  ;;  %5881 = vmatpush.msra.mxu2 %v5763_v30 }
 0x611   : > { %v5733_v27 = vadd.f32 %v5732_v25, %v5731_v6  ;;  %v5824_v25 = vld [vmem:[%s13255_s5 + $0x1f0] sm:$0xff] }
 0x612   : > { %v5388_v34 = vpop.f32.mrf.mxu2  ;;  %v5292_v18 = vpop.f32.mrf.mxu0  ;;  %5846 = vmatpush.msra.mxu1 %v5824_v25 }
 0x613   : > { %v5389_v37 = vadd.f32 %v5388_v34, %v5340_v51  ;;  %v5437_v12 = vpop.f32.mrf.mxu3  ;;  %v5293_v57 = vadd.f32 %v5292_v18, %v12455_v42  ;;  %v5341_v47 = vpop.f32.mrf.mxu1  ;;  %v5734_v5 = vrot.slane %v5733_v27, 2  ;;  %v13825_v42 = vld [vmem:[#allocation119_spill] sm:$0xff]  ;;  %v5660_v51 = vrot.slane %v5659_v53, 2 }
 0x615   : > { %v12678_v32 = vadd.f32 %v5437_v12, %v5389_v37  ;;  %v5342_v11 = vadd.f32 %v5341_v47, %v5293_v57  ;;  %v5735_v31 = vadd.f32 %v5734_v5, %v5733_v27  ;;  %v5661_v43 = vadd.f32 %v5660_v51, %v5659_v53  ;;  %v5822_v5 = vld [vmem:[%s13255_s5 + $0x1e0] sm:$0xff] }
 0x616   : > { %5847 = vmatpush.msra.mxu1 %v5822_v5 }
 0x617   : > { %v5736_v12 = vrot.slane %v5735_v31, 1  ;;  %v5662_v57 = vrot.slane %v5661_v43, 1 }
 0x619   : > { %v5737_v47 = vadd.f32 %v5736_v12, %v5735_v31  ;;  %v5663_v53 = vadd.f32 %v5662_v57, %v5661_v43  ;;  %v5819_v43 = vld [vmem:[%s13255_s5 + $0x1c8] sm:$0xff]  ;;  %v5818_v57 = vld [vmem:[%s13255_s5 + $0x1c0] sm:$0xff] }
 0x61a   : > { %v5390_v44 = vpop.f32.mrf.mxu2  ;;  %v5295_v48 = vpop.f32.mrf.mxu0 }
 0x61b   : > { %v5391_v23 = vadd.f32 %v5390_v44, %v5342_v11  ;;  %v5439_v28 = vpop.f32.mrf.mxu3  ;;  %v5296_v20 = vadd.f32 %v5295_v48, %v12462_v16  ;;  %v5344_v35 = vpop.f32.mrf.mxu1  ;;  %v5823_v11 = vld [vmem:[%s13255_s5 + $0x1e8] sm:$0xff] }
 0x61c   : > { %5887 = vmatpush.msra.mxu3 %v5823_v11 }
 0x61d   : > { %v12681_v2 = vadd.f32 %v5439_v28, %v5391_v23  ;;  %v5345_v46 = vadd.f32 %v5344_v35, %v5296_v20  ;;  %5490 = vmatmul.bf16.gmra.mxu0 %v13825_v42  ;;  %v5760_v20 = vsel %vm5759_vm1, %v5663_v53, %v5737_v47  ;;  %v5817_v47 = vld [vmem:[%s13255_s5 + $0x1b8] sm:$0xff] }
 0x61e   : > { %5539 = vmatmul.bf16.gmra.mxu1 %v13826_v19 }
 0x61f   : > { %5588 = vmatmul.bf16.gmra.mxu2 %v13827_v39 }
 0x620   : > { %5637 = vmatmul.bf16.gmra.mxu3 %v13828_v62 }
 0x622   : > { %v5393_v16 = vpop.f32.mrf.mxu2  ;;  %v5297_v6 = vpop.f32.mrf.mxu0 }
 0x623   : > { %v5394_v30 = vadd.f32 %v5393_v16, %v5345_v46  ;;  %v5442_v15 = vpop.f32.mrf.mxu3  ;;  %v5298_v34 = vadd.f32 %v5297_v6, %v12465_v63  ;;  %v5346_v14 = vpop.f32.mrf.mxu1  ;;  %v5821_v46 = vld [vmem:[%s13255_s5 + $0x1d8] sm:$0xff]  ;;  %v5820_v16 = vld [vmem:[%s13255_s5 + $0x1d0] sm:$0xff] }
 0x624   : > { %5888 = vmatpush.msra.mxu3 %v5821_v46  ;;  %5848 = vmatpush.msra.mxu1 %v5820_v16 }
 0x625   : > { %v12691_v37 = vadd.f32 %v5442_v15, %v5394_v30  ;;  %v5347_v18 = vadd.f32 %v5346_v14, %v5298_v34 }
 0x626   : > { %5889 = vmatpush.msra.mxu3 %v5819_v43  ;;  %5849 = vmatpush.msra.mxu1 %v5818_v57  ;;  %v5810_v57 = vld [vmem:[%s13255_s5 + $0x180] sm:$0xff] }
 0x628   : > { %5890 = vmatpush.msra.mxu3 %v5817_v47  ;;  %v5809_v47 = vld [vmem:[%s13255_s5 + $0x178] sm:$0xff] }
 0x62a   : > { %v5395_v61 = vpop.f32.mrf.mxu2  ;;  %v5456_v44 = vpop.f32.mrf.mxu0 }
 0x62b   : > { %v5396_v63 = vadd.f32 %v5395_v61, %v5347_v18  ;;  %v5444_v27 = vpop.f32.mrf.mxu3  ;;  %v5457_v23 = vadd.f32 %v5456_v44, %v12472_v22  ;;  %v5505_v28 = vpop.f32.mrf.mxu1 }
 0x62d   : > { %v12700_v48 = vadd.f32 %v5444_v27, %v5396_v63  ;;  %v5506_v35 = vadd.f32 %v5505_v28, %v5457_v23  ;;  %5842 = vmatmul.f32.vlgmr.msra.gmra.mxu0 %v5760_v20  ;;  %v5816_v23 = vld [vmem:[%s13255_s5 + $0x1b0] sm:$0xff]  ;;  %v5815_v28 = vld [vmem:[%s13255_s5 + $0x1a8] sm:$0xff] }
 0x62e   : > { %5850 = vmatpush.msra.mxu1 %v5816_v23  ;;  %5891 = vmatpush.msra.mxu3 %v5815_v28 }
 0x62f   : > { %5882 = vmatmul.f32.vlgmr.msra.gmra.mxu2 %v5760_v20 }
 0x632   : > { %v5554_v42 = vpop.f32.mrf.mxu2  ;;  %v5458_v19 = vpop.f32.mrf.mxu0 }
 0x633   : > { %v5555_v22 = vadd.f32 %v5554_v42, %v5506_v35  ;;  %v5603_v51 = vpop.f32.mrf.mxu3  ;;  %v5459_v39 = vadd.f32 %v5458_v19, %v12475_v26  ;;  %v5507_v62 = vpop.f32.mrf.mxu1  ;;  %v5814_v19 = vld [vmem:[%s13255_s5 + $0x1a0] sm:$0xff] }
 0x634   : > { %5851 = vmatpush.msra.mxu1 %v5814_v19  ;;  %v5804_v19 = vld [vmem:[%s13255_s5 + $0x150] sm:$0xff] }
 0x635   : > { %v12710_v31 = vadd.f32 %v5603_v51, %v5555_v22  ;;  %v5508_v36 = vadd.f32 %v5507_v62, %v5459_v39  ;;  %v5813_v39 = vld [vmem:[%s13255_s5 + $0x198] sm:$0xff] }
 0x636   : > { %5892 = vmatpush.msra.mxu3 %v5813_v39  ;;  %v5803_v39 = vld [vmem:[%s13255_s5 + $0x148] sm:$0xff] }
 0x63a   : > { %v5556_v30 = vpop.f32.mrf.mxu2  ;;  %v5461_v34 = vpop.f32.mrf.mxu0 }
 0x63b   : > { %v5557_v15 = vadd.f32 %v5556_v30, %v5508_v36  ;;  %v5605_v6 = vpop.f32.mrf.mxu3  ;;  %v5462_v26 = vadd.f32 %v5461_v34, %v12482_v50  ;;  %v5510_v14 = vpop.f32.mrf.mxu1 }
 0x63d   : > { %v12719_v12 = vadd.f32 %v5605_v6, %v5557_v15  ;;  %v5511_v18 = vadd.f32 %v5510_v14, %v5462_v26  ;;  %v5812_v15 = vld [vmem:[%s13255_s5 + $0x190] sm:$0xff]  ;;  %v5811_v6 = vld [vmem:[%s13255_s5 + $0x188] sm:$0xff] }
 0x63e   : > { %5852 = vmatpush.msra.mxu1 %v5812_v15  ;;  %5893 = vmatpush.msra.mxu3 %v5811_v6  ;;  %v5802_v6 = vld [vmem:[%s13255_s5 + $0x140] sm:$0xff] }
 0x640   : > { %5853 = vmatpush.msra.mxu1 %v5810_v57  ;;  %5894 = vmatpush.msra.mxu3 %v5809_v47  ;;  %v5801_v57 = vld [vmem:[%s13255_s5 + $0x138] sm:$0xff] }
 0x642   : > { %v5559_v25 = vpop.f32.mrf.mxu2  ;;  %v5463_v63 = vpop.f32.mrf.mxu0 }
 0x643   : > { %v5560_v11 = vadd.f32 %v5559_v25, %v5511_v18  ;;  %v5608_v61 = vpop.f32.mrf.mxu3  ;;  %v5464_v50 = vadd.f32 %v5463_v63, %v12485_v8  ;;  %v5512_v27 = vpop.f32.mrf.mxu1 }
 0x645   : > { %v12728_v44 = vadd.f32 %v5608_v61, %v5560_v11  ;;  %v5513_v53 = vadd.f32 %v5512_v27, %v5464_v50  ;;  %v5808_v50 = vld [vmem:[%s13255_s5 + $0x170] sm:$0xff]  ;;  %v5807_v27 = vld [vmem:[%s13255_s5 + $0x168] sm:$0xff] }
 0x646   : > { %5854 = vmatpush.msra.mxu1 %v5808_v50  ;;  %5895 = vmatpush.msra.mxu3 %v5807_v27 }
 0x64a   : > { %v5561_v20 = vpop.f32.mrf.mxu2  ;;  %v5466_v46 = vpop.f32.mrf.mxu0 }
 0x64b   : > { %v5562_v35 = vadd.f32 %v5561_v20, %v5513_v53  ;;  %v5610_v5 = vpop.f32.mrf.mxu3  ;;  %v5467_v8 = vadd.f32 %v5466_v46, %v12492_v56  ;;  %v5515_v42 = vpop.f32.mrf.mxu1 }
 0x64d   : > { %v12737_v22 = vadd.f32 %v5610_v5, %v5562_v35  ;;  %v5516_v51 = vadd.f32 %v5515_v42, %v5467_v8  ;;  %v5806_v35 = vld [vmem:[%s13255_s5 + $0x160] sm:$0xff]  ;;  %v5805_v5 = vld [vmem:[%s13255_s5 + $0x158] sm:$0xff] }
 0x64e   : > { %5855 = vmatpush.msra.mxu1 %v5806_v35  ;;  %5896 = vmatpush.msra.mxu3 %v5805_v5  ;;  %v5800_v5 = vld [vmem:[%s13255_s5 + $0x130] sm:$0xff] }
 0x650   : > { %5856 = vmatpush.msra.mxu1 %v5804_v19  ;;  %5897 = vmatpush.msra.mxu3 %v5803_v39  ;;  %v5799_v19 = vld [vmem:[%s13255_s5 + $0x128] sm:$0xff] }
 0x652   : > { %v5564_v62 = vpop.f32.mrf.mxu2  ;;  %v5468_v43 = vpop.f32.mrf.mxu0  ;;  %5857 = vmatpush.msra.mxu1 %v5802_v6  ;;  %5898 = vmatpush.msra.mxu3 %v5801_v57 }
 0x653   : > { %v5565_v36 = vadd.f32 %v5564_v62, %v5516_v51  ;;  %v5613_v16 = vpop.f32.mrf.mxu3  ;;  %v5517_v30 = vpop.f32.mrf.mxu1  ;;  %v5469_v39 = vadd.f32 %v5468_v43, %v12495_v10  ;;  %v5688_v10 = vmul.f32 %v12719_v12, %v12719_v12 }
 0x654   : > { %5858 = vmatpush.msra.mxu1 %v5800_v5  ;;  %5899 = vmatpush.msra.mxu3 %v5799_v19  ;;  %v5686_v19 = vmul.f32 %v12710_v31, %v12710_v31 }
 0x655   : > { %v12745_v56 = vadd.f32 %v5613_v16, %v5565_v36  ;;  %v5518_v52 = vadd.f32 %v5517_v30, %v5469_v39 }
 0x656   : > { %v5738_v9 = vadd.f32 %v5688_v10, %v5686_v19 }
 0x65a   : > { %v5566_v34 = vpop.f32.mrf.mxu2  ;;  %v5471_v14 = vpop.f32.mrf.mxu0 }
 0x65b   : > { %v12753_v26 = vpop.f32.mrf.mxu3  ;;  %v5520_v18 = vpop.f32.mrf.mxu1  ;;  %v5472_v1 = vadd.f32 %v5471_v14, %v12502_v7  ;;  %v5567_v43 = vadd.f32 %v5566_v34, %v5518_v52  ;;  %v5690_v7 = vmul.f32 %v12728_v44, %v12728_v44 }
 0x65d   : > { %v5521_v0 = vadd.f32 %v5520_v18, %v5472_v1  ;;  %v12828_v1 = vadd.f32 %v12753_v26, %v5567_v43 }
 0x662   : > { %v5569_v25 = vpop.f32.mrf.mxu2  ;;  %v5473_v61 = vpop.f32.mrf.mxu0 }
 0x663   : > { %v12761_v11 = vpop.f32.mrf.mxu3  ;;  %v5522_v63 = vpop.f32.mrf.mxu1  ;;  %v5474_v13 = vadd.f32 %v5473_v61, %v12504_v49  ;;  %v5570_v14 = vadd.f32 %v5569_v25, %v5521_v0  ;;  %v5664_v49 = vadd.f32 %v12719_v12, %v12710_v31  ;;  %v5694_v61 = vmul.f32 %v12745_v56, %v12745_v56 }
 0x665   : > { %v5523_v41 = vadd.f32 %v5522_v63, %v5474_v13  ;;  %v5665_v13 = vadd.f32 %v5664_v49, %v12728_v44  ;;  %v12835_v63 = vadd.f32 %v12761_v11, %v5570_v14 }
 0x667   : > { %v5666_v39 = vadd.f32 %v5665_v13, %v12737_v22 }
 0x66a   : > { %v5571_v53 = vpop.f32.mrf.mxu2  ;;  %v5476_v28 = vpop.f32.mrf.mxu0 }
 0x66b   : > { %v12769_v23 = vpop.f32.mrf.mxu3  ;;  %v5525_v20 = vpop.f32.mrf.mxu1  ;;  %v5477_v5 = vadd.f32 %v5476_v28, %v5428_v17  ;;  %v5692_v17 = vmul.f32 %v12737_v22, %v12737_v22  ;;  %v5572_v34 = vadd.f32 %v5571_v53, %v5523_v41  ;;  %v5696_v53 = vmul.f32 %v12828_v1, %v12828_v1 }
 0x66d   : > { %v5526_v18 = vadd.f32 %v5525_v20, %v5477_v5  ;;  %v12842_v20 = vadd.f32 %v12769_v23, %v5572_v34 }
 0x66f   : > { %v5700_v49 = vmul.f32 %v12842_v20, %v12842_v20 }
 0x672   : > { %v5574_v46 = vpop.f32.mrf.mxu2  ;;  %v5478_v42 = vpop.f32.mrf.mxu0 }
 0x673   : > { %v12777_v8 = vpop.f32.mrf.mxu3  ;;  %v5527_v51 = vpop.f32.mrf.mxu1  ;;  %v5479_v21 = vadd.f32 %v5478_v42, %v12580_v58  ;;  %v5739_v58 = vadd.f32 %v5738_v9, %v5690_v7  ;;  %v5575_v28 = vadd.f32 %v5574_v46, %v5526_v18  ;;  %v5796_v46 = vld [vmem:[%s13255_s5 + $0x110] sm:$0xff] }
 0x675   : > { %v5528_v42 = vadd.f32 %v5527_v51, %v5479_v21  ;;  %v5740_v41 = vadd.f32 %v5739_v58, %v5692_v17  ;;  %v5798_v21 = vld [vmem:[%s13255_s5 + $0x120] sm:$0xff]  ;;  %v5698_v51 = vmul.f32 %v12835_v63, %v12835_v63 }
 0x676   : > { %5859 = vmatpush.msra.mxu1 %v5798_v21 }
 0x677   : > { %v5741_v23 = vadd.f32 %v5740_v41, %v5694_v61 }
 0x678   : > { %5860 = vmatpush.msra.mxu1 %v5796_v46 }
 0x679   : > { %v5742_v14 = vadd.f32 %v5741_v23, %v5696_v53 }
 0x67a   : > { %v5576_v62 = vpop.f32.mrf.mxu2  ;;  %v5481_v16 = vpop.f32.mrf.mxu0 }
 0x67b   : > { %v12785_v36 = vpop.f32.mrf.mxu3  ;;  %v5530_v15 = vpop.f32.mrf.mxu1  ;;  %v5482_v25 = vadd.f32 %v5481_v16, %v12623_v55  ;;  %v5577_v55 = vadd.f32 %v5576_v62, %v5528_v42  ;;  %v5667_v16 = vadd.f32 %v5666_v39, %v12745_v56  ;;  %v12858_v62 = vadd.f32 %v12777_v8, %v5575_v28  ;;  %v5794_v8 = vld [vmem:[%s13255_s5 + $0x100] sm:$0xff] }
 0x67c   : > { %v5743_v17 = vadd.f32 %v5742_v14, %v5698_v51  ;;  %5861 = vmatpush.msra.mxu1 %v5794_v8 }
 0x67d   : > { %v5531_v10 = vadd.f32 %v5530_v15, %v5482_v25  ;;  %v5795_v15 = vld [vmem:[%s13255_s5 + $0x108] sm:$0xff]  ;;  %v12872_v9 = vadd.f32 %v12785_v36, %v5577_v55  ;;  %v5702_v34 = vmul.f32 %v12858_v62, %v12858_v62 }
 0x67e   : > { %v5744_v61 = vadd.f32 %v5743_v17, %v5700_v49 }
 0x680   : > { %v5745_v39 = vadd.f32 %v5744_v61, %v5702_v34 }
 0x682   : > { %v12793_v47 = vpop.f32.mrf.mxu2  ;;  %v5483_v27 = vpop.f32.mrf.mxu0 }
 0x683   : > { %v12795_v50 = vpop.f32.mrf.mxu3  ;;  %v5532_v35 = vpop.f32.mrf.mxu1  ;;  %v5484_v26 = vadd.f32 %v5483_v27, %v12656_v40  ;;  %v5797_v40 = vld [vmem:[%s13255_s5 + $0x118] sm:$0xff]  ;;  %v5668_v27 = vadd.f32 %v5667_v16, %v12828_v1 }
 0x684   : > { %5900 = vmatpush.msra.mxu3 %v5797_v40 }
 0x685   : > { %v5533_v43 = vadd.f32 %v5532_v35, %v5484_v26 }
 0x686   : > { %5901 = vmatpush.msra.mxu3 %v5795_v15 }
 0x68a   : > { %v12804_v4 = vpop.f32.mrf.mxu2  ;;  %v5486_v57 = vpop.f32.mrf.mxu0 }
 0x68b   : > { %v12806_v6 = vpop.f32.mrf.mxu3  ;;  %v12809_v3 = vpop.f32.mrf.mxu1  ;;  %v5487_v11 = vadd.f32 %v5486_v57, %v12678_v32  ;;  %v5580_v57 = vadd.f32 %v12793_v47, %v5531_v10  ;;  %v5669_v47 = vadd.f32 %v5668_v27, %v12835_v63  ;;  %v5582_v35 = vadd.f32 %v12804_v4, %v5533_v43 }
 0x68c   : > { %v5704_v4 = vmul.f32 %v12872_v9, %v12872_v9 }
 0x68d   : > { %v5670_v13 = vadd.f32 %v5669_v47, %v12842_v20  ;;  %v12882_v36 = vadd.f32 %v12795_v50, %v5580_v57 }
 0x68e   : > { %v5746_v16 = vadd.f32 %v5745_v39, %v5704_v4 }
 0x68f   : > { %v5706_v50 = vmul.f32 %v12882_v36, %v12882_v36 }
 0x691   : > { %v5747_v40 = vadd.f32 %v5746_v16, %v5706_v50 }
 0x692   : > { %v5584_v33 = vpop.f32.mrf.mxu2  ;;  %v5488_v52 = vpop.f32.mrf.mxu0 }
 0x693   : > { %v12823_v30 = vpop.f32.mrf.mxu3  ;;  %v5537_v0 = vpop.f32.mrf.mxu1  ;;  %v5489_v5 = vadd.f32 %v5488_v52, %v12681_v2  ;;  %v5536_v2 = vadd.f32 %v12809_v3, %v5487_v11  ;;  %v5671_v3 = vadd.f32 %v5670_v13, %v12858_v62 }
 0x695   : > { %v5585_v58 = vadd.f32 %v5584_v33, %v5536_v2  ;;  %v5538_v25 = vadd.f32 %v5537_v0, %v5489_v5  ;;  %v5672_v41 = vadd.f32 %v5671_v3, %v12872_v9 }
 0x697   : > { %v12894_v33 = vadd.f32 %v12823_v30, %v5585_v58  ;;  %v5673_v10 = vadd.f32 %v5672_v41, %v12882_v36 }
 0x699   : > { %v5710_v30 = vmul.f32 %v12894_v33, %v12894_v33 }
 0x69a   : > { %v5586_v32 = vpop.f32.mrf.mxu2  ;;  %v5491_v7 = vpop.f32.mrf.mxu0 }
 0x69b   : > { %v5635_v19 = vpop.f32.mrf.mxu3  ;;  %v5492_v52 = vadd.f32 %v5491_v7, %v12691_v37  ;;  %v5540_v18 = vpop.f32.mrf.mxu1  ;;  %v12888_v37 = vadd.f32 %v12806_v6, %v5582_v35  ;;  %v5587_v28 = vadd.f32 %v5586_v32, %v5538_v25 }
 0x69d   : > { %v5541_v42 = vadd.f32 %v5540_v18, %v5492_v52  ;;  %v5708_v6 = vmul.f32 %v12888_v37, %v12888_v37  ;;  %v12899_v11 = vadd.f32 %v5635_v19, %v5587_v28  ;;  %v5674_v46 = vadd.f32 %v5673_v10, %v12888_v37 }
 0x69f   : > { %v5748_v32 = vadd.f32 %v5747_v40, %v5708_v6  ;;  %v5675_v15 = vadd.f32 %v5674_v46, %v12894_v33  ;;  %v5712_v27 = vmul.f32 %v12899_v11, %v12899_v11 }
 0x6a1   : > { %v5749_v5 = vadd.f32 %v5748_v32, %v5710_v30 }
 0x6a2   : > { %v5589_v26 = vpop.f32.mrf.mxu2  ;;  %v5493_v55 = vpop.f32.mrf.mxu0 }
 0x6a3   : > { %v5590_v0 = vadd.f32 %v5589_v26, %v5541_v42  ;;  %v5638_v53 = vpop.f32.mrf.mxu3  ;;  %v5494_v21 = vadd.f32 %v5493_v55, %v12700_v48  ;;  %v5542_v51 = vpop.f32.mrf.mxu1  ;;  %v5676_v48 = vadd.f32 %v5675_v15, %v12899_v11  ;;  %v5750_v14 = vadd.f32 %v5749_v5, %v5712_v27 }
 0x6a5   : > { %v12905_v23 = vadd.f32 %v5638_v53, %v5590_v0  ;;  %v5543_v57 = vadd.f32 %v5542_v51, %v5494_v21 }
 0x6a7   : > { %v5714_v19 = vmul.f32 %v12905_v23, %v12905_v23  ;;  %v5677_v49 = vadd.f32 %v5676_v48, %v12905_v23 }
 0x6a9   : > { %v5751_v35 = vadd.f32 %v5750_v14, %v5714_v19 }
 0x6aa   : > { %v5591_v43 = vpop.f32.mrf.mxu2  ;;  %v5843_v50 = vpop.f32.mrf.mxu0 }
 0x6ab   : > { %v5592_v7 = vadd.f32 %v5591_v43, %v5543_v57  ;;  %v5640_v8 = vpop.f32.mrf.mxu3 }
 0x6ad   : > { %v12914_v47 = vadd.f32 %v5640_v8, %v5592_v7 }
 0x6af   : > { %v5678_v2 = vadd.f32 %v5677_v49, %v12914_v47  ;;  %v5716_v52 = vmul.f32 %v12914_v47, %v12914_v47 }
 0x6b1   : > { %v5679_v17 = vrot.slane %v5678_v2, 4  ;;  %v5752_v34 = vadd.f32 %v5751_v35, %v5716_v52  ;;  %v5940_v35 = vld [vmem:[%s13253_s3] sm:$0x3] }
 0x6b2   : > { %v5883_v10 = vpop.f32.mrf.mxu2 }
 0x6b3   : > { %v5680_v18 = vadd.f32 %v5679_v17, %v5678_v2  ;;  %v5753_v13 = vrot.slane %v5752_v34, 4  ;;  %v5942_v17 = vperm.slane %v5940_v35, 0 }
 0x6b5   : > { %v5681_v58 = vrot.slane %v5680_v18, 2  ;;  %v5754_v25 = vadd.f32 %v5753_v13, %v5752_v34 }
 0x6b7   : > { %v5682_v61 = vadd.f32 %v5681_v58, %v5680_v18  ;;  %v5755_v4 = vrot.slane %v5754_v25, 2 }
 0x6b9   : > { %v5683_v3 = vrot.slane %v5682_v61, 1  ;;  %v5756_v28 = vadd.f32 %v5755_v4, %v5754_v25  ;;  %v5943_v25 = vperm.slane %v5940_v35, 1 }
 0x6bb   : > { %v5757_v42 = vrot.slane %v5756_v28, 1  ;;  %v5684_v39 = vadd.f32 %v5683_v3, %v5682_v61 }
 0x6bd   : > { %v5758_v26 = vadd.f32 %v5757_v42, %v5756_v28 }
 0x6bf   : > { %v5761_v41 = vsel %vm5759_vm1, %v5684_v39, %v5758_v26 }
 0x6c0   : > { %5862 = vmatmul.f32.vlgmr.msra.gmra.mxu1 %v5761_v41  ;;  %5902 = vmatmul.f32.vlgmr.msra.gmra.mxu3 %v5761_v41 }
 0x73d   : > { %v5863_v0 = vpop.f32.mrf.mxu1 }
 0x73e   : > { %v5864_v53 = vadd.f32 %v5863_v0, %v5843_v50 }
 0x740   : > { %v5906_v55 = vmul.f32 %v5864_v53, %v5864_v53 }
 0x742   : > { %v5910_v16 = vrot.slane %v5906_v55, 7 }
 0x743   : > { %v5903_v6 = vpop.f32.mrf.mxu3 }
 0x744   : > { %v5914_v21 = vsub.f32 %v5864_v53, %v5910_v16  ;;  %v5904_v40 = vadd.f32 %v5903_v6, %v5883_v10 }
 0x746   : > { %v5916_v46 = vmax.f32 %v5914_v21, 0.0  ;;  %v5907_v30 = vmul.f32 %v5904_v40, %v5904_v40 }
 0x748   : > { %v5918_v51 = vadd.f32 1e-05, %v5916_v46  ;;  %v5911_v32 = vrot.slane %v5907_v30, 7  ;;  %v13829_v46 = vld [vmem:[#allocation9_spill] sm:$0xff] }
 0x74a   : > { %8328 = vrsqrt.f32 %v5918_v51  ;;  %v5915_v15 = vsub.f32 %v5904_v40, %v5911_v32  ;;  %vm5926_vm3 = vweird.f32 %v5918_v51  ;;  %v13831_v32 = vld [vmem:[#allocation11_spill] sm:$0xff] }
 0x74c   : > { %v5917_v27 = vmax.f32 %v5915_v15, 0.0  ;;  %v13832_v15 = vld [vmem:[#allocation12_spill] sm:$0xff] }
 0x74e   : > { %v5919_v57 = vadd.f32 1e-05, %v5917_v27  ;;  %v13833_v27 = vld [vmem:[#allocation13_spill] sm:$0xff] }
 0x750   : > { %v8329_v43 = vpop.eup %8328  ;;  %8330 = vrsqrt.f32 %v5919_v57  ;;  %vm5936_vm6 = vweird.f32 %v5919_v57 }
 0x751   : > { %v5921_v5 = vmul.f32 %v8329_v43, %v5918_v51  ;;  %vm5927_vm2 = vweird.f32 %v8329_v43  ;;  %v13830_v51 = vld [vmem:[#allocation10_spill] sm:$0xff] }
 0x752   : > { %vm5928_vm4 = vmor %vm5926_vm3, %vm5927_vm2 }
 0x753   : > { %v5922_v48 = vmul.f32 %v8329_v43, %v5921_v5 }
 0x755   : > { %v5923_v19 = vmul.f32 0.5, %v5922_v48  ;;  %v13837_v48 = vld [vmem:[#allocation17_spill] sm:$0xff] }
 0x756   : > { %v8331_v7 = vpop.eup %8330 }
 0x757   : > { %v5924_v8 = vsub.f32 1.5, %v5923_v19  ;;  %v5931_v14 = vmul.f32 %v8331_v7, %v5919_v57  ;;  %vm5937_vm5 = vweird.f32 %v8331_v7 }
 0x758   : > { %vm5938_vm7 = vmor %vm5936_vm6, %vm5937_vm5 }
 0x759   : > { %v5925_v49 = vmul.f32 %v8329_v43, %v5924_v8  ;;  %v5932_v2 = vmul.f32 %v8331_v7, %v5931_v14 }
 0x75b   : > { %v5933_v52 = vmul.f32 0.5, %v5932_v2  ;;  %v5929_v34 = vsel %vm5928_vm4, %v8329_v43, %v5925_v49 }
 0x75c   : > { %v5946_v13 = vmul.f32 %v5942_v17, %v5929_v34 }
 0x75d   : > { %v5934_v18 = vsub.f32 1.5, %v5933_v52 }
 0x75e   : > { %v5951_v61 = vrot.slane %v5946_v13, 1  ;;  %v5963_v4 = vperm.slane %v5946_v13, 1 }
 0x75f   : > { %v5935_v58 = vmul.f32 %v8331_v7, %v5934_v18 }
 0x760   : > { %v5955_v39 = vmul.f32 %v5951_v61, %v5864_v53  ;;  %v5965_v26 = vmul.f32 %v5963_v4, %v13806_v29  ;;  %v5967_v41 = vmul.f32 %v5963_v4, %v13805_v45  ;;  %v5969_v50 = vmul.f32 %v5963_v4, %v13807_v60 }
 0x761   : > { %v5939_v3 = vsel %vm5938_vm7, %v8331_v7, %v5935_v58  ;;  %v5971_v0 = vmul.f32 %v5963_v4, %v13808_v59  ;;  %v5973_v55 = vmul.f32 %v5963_v4, %v13809_v54  ;;  %v5975_v6 = vmul.f32 %v5963_v4, %v13810_v38  ;;  %v5948_v59 = vld [vmem:[%s13254_s4] sm:$0x3]  ;;  %v13835_v38 = vld [vmem:[#allocation15_spill] sm:$0xff] }
 0x762   : > { %v5947_v28 = vmul.f32 %v5943_v25, %v5939_v3  ;;  %v5977_v21 = vmul.f32 %v5963_v4, %v13811_v24  ;;  %v5979_v30 = vmul.f32 %v5963_v4, %v13829_v46  ;;  %v5981_v53 = vmul.f32 %v5963_v4, %v13830_v51  ;;  %v13836_v24 = vld [vmem:[#allocation16_spill] sm:$0xff] }
 0x763   : > { %v5983_v29 = vmul.f32 %v5963_v4, %v13831_v32  ;;  %v5985_v45 = vmul.f32 %v5963_v4, %v13832_v15  ;;  %v5987_v60 = vmul.f32 %v5963_v4, %v13833_v27  ;;  %v5991_v43 = vmul.f32 %v5963_v4, %v13835_v38 }
 0x764   : > { %v5952_v42 = vrot.slane %v5947_v28, 1  ;;  %v5964_v10 = vperm.slane %v5947_v28, 1  ;;  %v5993_v5 = vmul.f32 %v5963_v4, %v13836_v24  ;;  %v5995_v19 = vmul.f32 %v5963_v4, %v13837_v48 }
 0x766   : > { %v5956_v16 = vmul.f32 %v5952_v42, %v5904_v40  ;;  %v13834_v40 = vld [vmem:[#allocation14_spill] sm:$0xff]  ;;  %v5966_v8 = vmul.f32 %v5964_v10, %v12710_v31  ;;  %v5968_v14 = vmul.f32 %v5964_v10, %v12719_v12  ;;  %v5970_v49 = vmul.f32 %v5964_v10, %v12728_v44 }
 0x767   : > { %v5989_v57 = vmul.f32 %v5963_v4, %v13834_v40  ;;  %v5972_v2 = vmul.f32 %v5964_v10, %v12737_v22  ;;  %v5974_v52 = vmul.f32 %v5964_v10, %v12745_v56  ;;  %v5976_v17 = vmul.f32 %v5964_v10, %v12828_v1 }
 0x768   : > { %v5959_v54 = vrot.slane %v5956_v16, 7  ;;  %v5978_v34 = vmul.f32 %v5964_v10, %v12835_v63  ;;  %v5980_v18 = vmul.f32 %v5964_v10, %v12842_v20  ;;  %v5982_v13 = vmul.f32 %v5964_v10, %v12858_v62 }
 0x769   : > { %v5984_v58 = vmul.f32 %v5964_v10, %v12872_v9  ;;  %v5986_v31 = vmul.f32 %v5964_v10, %v12882_v36  ;;  %v5988_v12 = vmul.f32 %v5964_v10, %v12888_v37  ;;  %v5990_v22 = vmul.f32 %v5964_v10, %v12894_v33 }
 0x76a   : > { %v5960_v7 = vsel %vm5759_vm1, %v5955_v39, %v5959_v54  ;;  %v5992_v56 = vmul.f32 %v5964_v10, %v12899_v11  ;;  %v5994_v1 = vmul.f32 %v5964_v10, %v12905_v23  ;;  %v5996_v63 = vmul.f32 %v5964_v10, %v12914_v47 }
 0x76b   : > { %v5962_v35 = vsub.f32 %v5948_v59, %v5960_v7 }
 0x76d   : > { %v5998_v44 = vperm.slane %v5962_v35, 0  ;;  %v5999_v25 = vperm.slane %v5962_v35, 1 }
 0x76f   : > { %v12959_v61 = vadd.f32 %v5998_v44, %v5965_v26  ;;  %v12961_v20 = vadd.f32 %v5999_v25, %v5966_v8  ;;  %v12963_v62 = vadd.f32 %v5998_v44, %v5967_v41  ;;  %v12965_v9 = vadd.f32 %v5999_v25, %v5968_v14 }
 0x770   : > { %v12967_v36 = vadd.f32 %v5998_v44, %v5969_v50  ;;  %v12969_v37 = vadd.f32 %v5999_v25, %v5970_v49  ;;  %v12971_v4 = vadd.f32 %v5998_v44, %v5971_v0  ;;  %v12973_v33 = vadd.f32 %v5999_v25, %v5972_v2 }
 0x771   : > { %v12975_v11 = vadd.f32 %v5998_v44, %v5973_v55  ;;  %v12977_v23 = vadd.f32 %v5999_v25, %v5974_v52  ;;  %v12979_v47 = vadd.f32 %v5998_v44, %v5975_v6  ;;  %v12981_v3 = vadd.f32 %v5999_v25, %v5976_v17 }
 0x772   : > { %v12983_v28 = vadd.f32 %v5998_v44, %v5977_v21  ;;  %v12985_v42 = vadd.f32 %v5999_v25, %v5978_v34  ;;  %v12987_v39 = vadd.f32 %v5998_v44, %v5979_v30  ;;  %v12989_v26 = vadd.f32 %v5999_v25, %v5980_v18 }
 0x773   : > { %v12991_v41 = vadd.f32 %v5998_v44, %v5981_v53  ;;  %v12993_v50 = vadd.f32 %v5999_v25, %v5982_v13  ;;  %v12995_v0 = vadd.f32 %v5998_v44, %v5983_v29  ;;  %v12997_v55 = vadd.f32 %v5999_v25, %v5984_v58 }
 0x774   : > { %v12999_v16 = vadd.f32 %v5998_v44, %v5985_v45  ;;  %v13001_v10 = vadd.f32 %v5999_v25, %v5986_v31  ;;  %v13003_v6 = vadd.f32 %v5998_v44, %v5987_v60  ;;  %v13005_v21 = vadd.f32 %v5999_v25, %v5988_v12 }
 0x775   : > { %v13007_v46 = vadd.f32 %v5998_v44, %v5989_v57  ;;  %v13009_v30 = vadd.f32 %v5999_v25, %v5990_v22  ;;  %v13011_v51 = vadd.f32 %v5998_v44, %v5991_v43  ;;  %v13013_v53 = vadd.f32 %v5999_v25, %v5992_v56 }
 0x776   : > { %v13015_v32 = vadd.f32 %v5998_v44, %v5993_v5  ;;  %v13017_v29 = vadd.f32 %v5999_v25, %v5994_v1  ;;  %v13019_v15 = vadd.f32 %v5998_v44, %v5995_v19  ;;  %v13021_v45 = vadd.f32 %v5999_v25, %v5996_v63 }
 0x777   : > { %v6034_v27 = vmax.f32 %v12959_v61, 0.0  ;;  %v6035_v60 = vmax.f32 %v12961_v20, 0.0  ;;  %v6036_v59 = vmax.f32 %v12963_v62, 0.0  ;;  %v6037_v54 = vmax.f32 %v12965_v9, 0.0 }
 0x778   : > { %v6038_v40 = vmax.f32 %v12967_v36, 0.0  ;;  %v6039_v57 = vmax.f32 %v12969_v37, 0.0  ;;  %v6040_v38 = vmax.f32 %v12971_v4, 0.0  ;;  %v6041_v43 = vmax.f32 %v12973_v33, 0.0 }
 0x779   : > { %v6042_v24 = vmax.f32 %v12975_v11, 0.0  ;;  %v6043_v5 = vmax.f32 %v12977_v23, 0.0  ;;  %v6044_v48 = vmax.f32 %v12979_v47, 0.0  ;;  %v6045_v19 = vmax.f32 %v12981_v3, 0.0 }
 0x77a   : > { %v6066_v61 = vrot.slane %v6034_v27, 4  ;;  %v6072_v20 = vrot.slane %v6035_v60, 4  ;;  %v6078_v62 = vrot.slane %v6036_v59, 4  ;;  %v6084_v9 = vrot.slane %v6037_v54, 4 }
 0x77b   : > { %v6090_v36 = vrot.slane %v6038_v40, 4  ;;  %v6096_v37 = vrot.slane %v6039_v57, 4  ;;  %v6102_v4 = vrot.slane %v6040_v38, 4  ;;  %v6108_v33 = vrot.slane %v6041_v43, 4 }
 0x77c   : > { %v6067_v12 = vmax.f32 %v6034_v27, %v6066_v61  ;;  %v6073_v44 = vmax.f32 %v6035_v60, %v6072_v20  ;;  %v6079_v31 = vmax.f32 %v6036_v59, %v6078_v62  ;;  %v6085_v25 = vmax.f32 %v6037_v54, %v6084_v9 }
 0x77d   : > { %v6091_v58 = vmax.f32 %v6038_v40, %v6090_v36  ;;  %v6097_v22 = vmax.f32 %v6039_v57, %v6096_v37  ;;  %v6103_v13 = vmax.f32 %v6040_v38, %v6102_v4  ;;  %v6109_v56 = vmax.f32 %v6041_v43, %v6108_v33 }
 0x77e   : > { %v6068_v18 = vrot.slane %v6067_v12, 2  ;;  %v6074_v1 = vrot.slane %v6073_v44, 2  ;;  %v6080_v34 = vrot.slane %v6079_v31, 2  ;;  %v6086_v63 = vrot.slane %v6085_v25, 2 }
 0x77f   : > { %v6092_v17 = vrot.slane %v6091_v58, 2  ;;  %v6098_v52 = vrot.slane %v6097_v22, 2  ;;  %v6104_v2 = vrot.slane %v6103_v13, 2  ;;  %v6110_v35 = vrot.slane %v6109_v56, 2 }
 0x780   : > { %v6069_v49 = vmax.f32 %v6067_v12, %v6068_v18  ;;  %v6075_v14 = vmax.f32 %v6073_v44, %v6074_v1  ;;  %v6081_v8 = vmax.f32 %v6079_v31, %v6080_v34  ;;  %v6087_v7 = vmax.f32 %v6085_v25, %v6086_v63 }
 0x781   : > { %v6093_v27 = vmax.f32 %v6091_v58, %v6092_v17  ;;  %v6099_v60 = vmax.f32 %v6097_v22, %v6098_v52  ;;  %v6105_v59 = vmax.f32 %v6103_v13, %v6104_v2  ;;  %v6111_v54 = vmax.f32 %v6109_v56, %v6110_v35 }
 0x782   : > { %v6070_v40 = vrot.slane %v6069_v49, 1  ;;  %v6076_v57 = vrot.slane %v6075_v14, 1  ;;  %v6082_v38 = vrot.slane %v6081_v8, 1  ;;  %v6088_v43 = vrot.slane %v6087_v7, 1 }
 0x783   : > { %v6094_v61 = vrot.slane %v6093_v27, 1  ;;  %v6100_v20 = vrot.slane %v6099_v60, 1  ;;  %v6106_v62 = vrot.slane %v6105_v59, 1  ;;  %v6112_v9 = vrot.slane %v6111_v54, 1 }
 0x784   : > { %v13055_v36 = vmax.f32 %v6069_v49, %v6070_v40  ;;  %v13057_v37 = vmax.f32 %v6075_v14, %v6076_v57  ;;  %v13059_v18 = vmax.f32 %v6081_v8, %v6082_v38  ;;  %v13061_v34 = vmax.f32 %v6087_v7, %v6088_v43 }
 0x785   : > { %v13063_v17 = vmax.f32 %v6093_v27, %v6094_v61  ;;  %v13065_v2 = vmax.f32 %v6099_v60, %v6100_v20  ;;  %v13067_v35 = vmax.f32 %v6105_v59, %v6106_v62  ;;  %v13069_v52 = vmax.f32 %v6111_v54, %v6112_v9 }
 0x786   : > { %v6114_v13 = vrot.slane %v6042_v24, 4  ;;  %v6120_v49 = vrot.slane %v6043_v5, 4  ;;  %v6126_v8 = vrot.slane %v6044_v48, 4  ;;  %v6132_v7 = vrot.slane %v6045_v19, 4 }
 0x787   : > { %v13838_v14 = vmax.f32 %v12983_v28, 0.0  ;;  %v13839_v31 = vmax.f32 %v12985_v42, 0.0  ;;  %v13840_v44 = vmax.f32 %v12987_v39, 0.0  ;;  %v13841_v22 = vmax.f32 %v12989_v26, 0.0 }
 0x788   : > { %v6115_v1 = vmax.f32 %v6042_v24, %v6114_v13  ;;  %v6121_v63 = vmax.f32 %v6043_v5, %v6120_v49  ;;  %v6127_v4 = vmax.f32 %v6044_v48, %v6126_v8  ;;  %v6133_v33 = vmax.f32 %v6045_v19, %v6132_v7 }
 0x789   : > { %v6138_v58 = vrot.slane %v13838_v14, 4  ;;  %v6144_v12 = vrot.slane %v13839_v31, 4  ;;  %v6150_v25 = vrot.slane %v13840_v44, 4  ;;  %v6156_v56 = vrot.slane %v13841_v22, 4 }
 0x78a   : > { %v13842_v27 = vmov %v13838_v14  ;;  %v13843_v59 = vmov %v13839_v31  ;;  %v13844_v40 = vmov %v13840_v44  ;;  %v13845_v11 = vmov %v13841_v22 }
 0x78b   : > { %v6139_v60 = vmax.f32 %v13842_v27, %v6138_v58  ;;  %v6145_v54 = vmax.f32 %v13843_v59, %v6144_v12  ;;  %v6151_v57 = vmax.f32 %v13844_v40, %v6150_v25  ;;  %v6157_v24 = vmax.f32 %v13845_v11, %v6156_v56 }
 0x78c   : > { %v6116_v23 = vrot.slane %v6115_v1, 2  ;;  %v6122_v5 = vrot.slane %v6121_v63, 2  ;;  %v6128_v38 = vrot.slane %v6127_v4, 2  ;;  %v6134_v47 = vrot.slane %v6133_v33, 2 }
 0x78d   : > { %v6140_v48 = vrot.slane %v6139_v60, 2  ;;  %v6146_v43 = vrot.slane %v6145_v54, 2  ;;  %v6152_v3 = vrot.slane %v6151_v57, 2  ;;  %v6158_v19 = vrot.slane %v6157_v24, 2 }
 0x78e   : > { %v6117_v61 = vmax.f32 %v6115_v1, %v6116_v23  ;;  %v6123_v28 = vmax.f32 %v6121_v63, %v6122_v5  ;;  %v6129_v20 = vmax.f32 %v6127_v4, %v6128_v38  ;;  %v6135_v62 = vmax.f32 %v6133_v33, %v6134_v47 }
 0x78f   : > { %v6141_v42 = vmax.f32 %v6139_v60, %v6140_v48  ;;  %v6147_v9 = vmax.f32 %v6145_v54, %v6146_v43  ;;  %v6153_v13 = vmax.f32 %v6151_v57, %v6152_v3  ;;  %v6159_v39 = vmax.f32 %v6157_v24, %v6158_v19 }
 0x790   : > { %v6118_v49 = vrot.slane %v6117_v61, 1  ;;  %v6124_v8 = vrot.slane %v6123_v28, 1  ;;  %v6130_v26 = vrot.slane %v6129_v20, 1  ;;  %v6136_v7 = vrot.slane %v6135_v62, 1 }
 0x791   : > { %v6142_v14 = vrot.slane %v6141_v42, 1  ;;  %v6148_v58 = vrot.slane %v6147_v9, 1  ;;  %v6154_v31 = vrot.slane %v6153_v13, 1  ;;  %v6160_v12 = vrot.slane %v6159_v39, 1 }
 0x792   : > { %v13103_v44 = vmax.f32 %v6117_v61, %v6118_v49  ;;  %v13105_v25 = vmax.f32 %v6123_v28, %v6124_v8  ;;  %v13107_v22 = vmax.f32 %v6129_v20, %v6130_v26  ;;  %v13109_v56 = vmax.f32 %v6135_v62, %v6136_v7 }
 0x793   : > { %v13111_v1 = vmax.f32 %v6141_v42, %v6142_v14  ;;  %v13113_v63 = vmax.f32 %v6147_v9, %v6148_v58  ;;  %v13115_v4 = vmax.f32 %v6153_v13, %v6154_v31  ;;  %v13117_v33 = vmax.f32 %v6159_v39, %v6160_v12 }
 0x794   : > { %v13846_v27 = vmax.f32 %v12991_v41, 0.0  ;;  %v13847_v59 = vmax.f32 %v12993_v50, 0.0  ;;  %v13848_v40 = vmax.f32 %v12995_v0, 0.0  ;;  %v13849_v11 = vmax.f32 %v12997_v55, 0.0 }
 0x795   : > { %v13850_v23 = vmax.f32 %v12999_v16, 0.0  ;;  %v13851_v38 = vmax.f32 %v13001_v10, 0.0  ;;  %v13852_v48 = vmax.f32 %v13003_v6, 0.0  ;;  %v13853_v3 = vmax.f32 %v13005_v21, 0.0 }
 0x796   : > { %v6162_v60 = vrot.slane %v13846_v27, 4  ;;  %v6168_v54 = vrot.slane %v13847_v59, 4  ;;  %v6174_v57 = vrot.slane %v13848_v40, 4  ;;  %v6180_v24 = vrot.slane %v13849_v11, 4 }
 0x797   : > { %v6186_v5 = vrot.slane %v13850_v23, 4  ;;  %v6192_v47 = vrot.slane %v13851_v38, 4  ;;  %v6198_v43 = vrot.slane %v13852_v48, 4  ;;  %v6204_v19 = vrot.slane %v13853_v3, 4 }
 0x798   : > { %v13854_v61 = vmov %v13846_v27  ;;  %v13855_v20 = vmov %v13847_v59  ;;  %v13856_v42 = vmov %v13848_v40  ;;  %v13857_v13 = vmov %v13849_v11 }
 0x799   : > { %v6163_v28 = vmax.f32 %v13854_v61, %v6162_v60  ;;  %v6169_v62 = vmax.f32 %v13855_v20, %v6168_v54  ;;  %v6175_v9 = vmax.f32 %v13856_v42, %v6174_v57  ;;  %v6181_v39 = vmax.f32 %v13857_v13, %v6180_v24 }
 0x79a   : > { %v13858_v49 = vmov %v13850_v23  ;;  %v13859_v26 = vmov %v13851_v38  ;;  %v13860_v14 = vmov %v13852_v48  ;;  %v13861_v41 = vmov %v13853_v3 }
 0x79b   : > { %v6187_v8 = vmax.f32 %v13858_v49, %v6186_v5  ;;  %v6193_v7 = vmax.f32 %v13859_v26, %v6192_v47  ;;  %v6199_v58 = vmax.f32 %v13860_v14, %v6198_v43  ;;  %v6205_v31 = vmax.f32 %v13861_v41, %v6204_v19 }
 0x79c   : > { %v6164_v50 = vrot.slane %v6163_v28, 2  ;;  %v6170_v12 = vrot.slane %v6169_v62, 2  ;;  %v6176_v27 = vrot.slane %v6175_v9, 2  ;;  %v6182_v0 = vrot.slane %v6181_v39, 2 }
 0x79d   : > { %v6188_v60 = vrot.slane %v6187_v8, 2  ;;  %v6194_v59 = vrot.slane %v6193_v7, 2  ;;  %v6200_v55 = vrot.slane %v6199_v58, 2  ;;  %v6206_v54 = vrot.slane %v6205_v31, 2 }
 0x79e   : > { %v6165_v40 = vmax.f32 %v6163_v28, %v6164_v50  ;;  %v6171_v16 = vmax.f32 %v6169_v62, %v6170_v12  ;;  %v6177_v57 = vmax.f32 %v6175_v9, %v6176_v27  ;;  %v6183_v11 = vmax.f32 %v6181_v39, %v6182_v0 }
 0x79f   : > { %v6189_v10 = vmax.f32 %v6187_v8, %v6188_v60  ;;  %v6195_v24 = vmax.f32 %v6193_v7, %v6194_v59  ;;  %v6201_v23 = vmax.f32 %v6199_v58, %v6200_v55  ;;  %v6207_v6 = vmax.f32 %v6205_v31, %v6206_v54 }
 0x7a0   : > { %v6166_v5 = vrot.slane %v6165_v40, 1  ;;  %v6172_v38 = vrot.slane %v6171_v16, 1  ;;  %v6178_v21 = vrot.slane %v6177_v57, 1  ;;  %v6184_v47 = vrot.slane %v6183_v11, 1 }
 0x7a1   : > { %v6190_v48 = vrot.slane %v6189_v10, 1  ;;  %v6196_v43 = vrot.slane %v6195_v24, 1  ;;  %v6202_v3 = vrot.slane %v6201_v23, 1  ;;  %v6208_v19 = vrot.slane %v6207_v6, 1 }
 0x7a2   : > { %v13151_v61 = vmax.f32 %v6165_v40, %v6166_v5  ;;  %v13153_v20 = vmax.f32 %v6171_v16, %v6172_v38  ;;  %v13155_v28 = vmax.f32 %v6177_v57, %v6178_v21  ;;  %v13157_v62 = vmax.f32 %v6183_v11, %v6184_v47 }
 0x7a3   : > { %v13159_v42 = vmax.f32 %v6189_v10, %v6190_v48  ;;  %v13161_v9 = vmax.f32 %v6195_v24, %v6196_v43  ;;  %v13163_v13 = vmax.f32 %v6201_v23, %v6202_v3  ;;  %v13165_v39 = vmax.f32 %v6207_v6, %v6208_v19 }
 0x7a4   : > { %v13862_v49 = vmax.f32 %v13007_v46, 0.0  ;;  %v13863_v26 = vmax.f32 %v13009_v30, 0.0  ;;  %v13864_v14 = vmax.f32 %v13011_v51, 0.0  ;;  %v13865_v41 = vmax.f32 %v13013_v53, 0.0 }
 0x7a5   : > { %v13866_v50 = vmax.f32 %v13015_v32, 0.0  ;;  %v13867_v27 = vmax.f32 %v13017_v29, 0.0  ;;  %v13868_v60 = vmax.f32 %v13019_v15, 0.0  ;;  %v13869_v55 = vmax.f32 %v13021_v45, 0.0 }
 0x7a6   : > { %v6210_v8 = vrot.slane %v13862_v49, 4  ;;  %v6216_v7 = vrot.slane %v13863_v26, 4  ;;  %v6222_v58 = vrot.slane %v13864_v14, 4  ;;  %v6228_v31 = vrot.slane %v13865_v41, 4 }
 0x7a7   : > { %v6234_v12 = vrot.slane %v13866_v50, 4  ;;  %v6240_v0 = vrot.slane %v13867_v27, 4  ;;  %v6246_v59 = vrot.slane %v13868_v60, 4  ;;  %v6252_v54 = vrot.slane %v13869_v55, 4 }
 0x7a8   : > { %v13870_v40 = vmov %v13862_v49  ;;  %v13871_v57 = vmov %v13863_v26  ;;  %v13872_v10 = vmov %v13864_v14  ;;  %v13873_v23 = vmov %v13865_v41 }
 0x7a9   : > { %v6211_v16 = vmax.f32 %v13870_v40, %v6210_v8  ;;  %v6217_v11 = vmax.f32 %v13871_v57, %v6216_v7  ;;  %v6223_v24 = vmax.f32 %v13872_v10, %v6222_v58  ;;  %v6229_v6 = vmax.f32 %v13873_v23, %v6228_v31 }
 0x7aa   : > { %v13874_v5 = vmov %v13866_v50  ;;  %v13875_v21 = vmov %v13867_v27  ;;  %v13876_v48 = vmov %v13868_v60  ;;  %v13877_v46 = vmov %v13869_v55 }
 0x7ab   : > { %v6235_v38 = vmax.f32 %v13874_v5, %v6234_v12  ;;  %v6241_v47 = vmax.f32 %v13875_v21, %v6240_v0  ;;  %v6247_v43 = vmax.f32 %v13876_v48, %v6246_v59  ;;  %v6253_v3 = vmax.f32 %v13877_v46, %v6252_v54 }
 0x7ac   : > { %v6212_v30 = vrot.slane %v6211_v16, 2  ;;  %v6218_v19 = vrot.slane %v6217_v11, 2  ;;  %v6224_v49 = vrot.slane %v6223_v24, 2  ;;  %v6230_v51 = vrot.slane %v6229_v6, 2 }
 0x7ad   : > { %v6236_v8 = vrot.slane %v6235_v38, 2  ;;  %v6242_v26 = vrot.slane %v6241_v47, 2  ;;  %v6248_v53 = vrot.slane %v6247_v43, 2  ;;  %v6254_v7 = vrot.slane %v6253_v3, 2 }
 0x7ae   : > { %v6213_v14 = vmax.f32 %v6211_v16, %v6212_v30  ;;  %v6219_v32 = vmax.f32 %v6217_v11, %v6218_v19  ;;  %v6225_v58 = vmax.f32 %v6223_v24, %v6224_v49  ;;  %v6231_v41 = vmax.f32 %v6229_v6, %v6230_v51 }
 0x7af   : > { %v6237_v29 = vmax.f32 %v6235_v38, %v6236_v8  ;;  %v6243_v31 = vmax.f32 %v6241_v47, %v6242_v26  ;;  %v6249_v50 = vmax.f32 %v6247_v43, %v6248_v53  ;;  %v6255_v15 = vmax.f32 %v6253_v3, %v6254_v7 }
 0x7b0   : > { %v6214_v12 = vrot.slane %v6213_v14, 1  ;;  %v6220_v27 = vrot.slane %v6219_v32, 1  ;;  %v6226_v45 = vrot.slane %v6225_v58, 1  ;;  %v6232_v0 = vrot.slane %v6231_v41, 1 }
 0x7b1   : > { %v6238_v60 = vrot.slane %v6237_v29, 1  ;;  %v6244_v59 = vrot.slane %v6243_v31, 1  ;;  %v6250_v55 = vrot.slane %v6249_v50, 1  ;;  %v6256_v54 = vrot.slane %v6255_v15, 1 }
 0x7b2   : > { %v6215_v40 = vmax.f32 %v6213_v14, %v6214_v12  ;;  %v6221_v57 = vmax.f32 %v6219_v32, %v6220_v27  ;;  %v6227_v10 = vmax.f32 %v6225_v58, %v6226_v45  ;;  %v6233_v16 = vmax.f32 %v6231_v41, %v6232_v0 }
 0x7b3   : > { %v6239_v11 = vmax.f32 %v6237_v29, %v6238_v60  ;;  %v6245_v24 = vmax.f32 %v6243_v31, %v6244_v59  ;;  %v6251_v23 = vmax.f32 %v6249_v50, %v6250_v55  ;;  %v6257_v6 = vmax.f32 %v6255_v15, %v6256_v54 }
 0x7b4   : > { %v6291_v5 = vsel %vm6290_vm8, %v13059_v18, %v13055_v36  ;;  %v6304_v21 = vsel %vm6290_vm8, %v13061_v34, %v13057_v37  ;;  %v6311_v47 = vsel %vm6290_vm8, %v13155_v28, %v13151_v61  ;;  %v6318_v48 = vsel %vm6290_vm8, %v13157_v62, %v13153_v20 }
 0x7b5   : > { %v6293_v38 = vsel %vm6292_vm9, %v13063_v17, %v6291_v5  ;;  %v6305_v36 = vsel %vm6292_vm9, %v13065_v2, %v6304_v21  ;;  %v6312_v18 = vsel %vm6292_vm9, %v13159_v42, %v6311_v47  ;;  %v6319_v46 = vsel %vm6292_vm9, %v13161_v9, %v6318_v48 }
 0x7b6   : > { %v6295_v43 = vsel %vm6294_vm10, %v13067_v35, %v6293_v38  ;;  %v6306_v37 = vsel %vm6294_vm10, %v13069_v52, %v6305_v36  ;;  %v6313_v34 = vsel %vm6294_vm10, %v13163_v13, %v6312_v18  ;;  %v6320_v61 = vsel %vm6294_vm10, %v13165_v39, %v6319_v46 }
 0x7b7   : > { %v6297_v17 = vsel %vm6296_vm11, %v13103_v44, %v6295_v43  ;;  %v6307_v35 = vsel %vm6296_vm11, %v13105_v25, %v6306_v37  ;;  %v6314_v44 = vsel %vm6296_vm11, %v6215_v40, %v6313_v34  ;;  %v6321_v52 = vsel %vm6296_vm11, %v6221_v57, %v6320_v61 }
 0x7b8   : > { %v6299_v2 = vsel %vm6298_vm12, %v13107_v22, %v6297_v17  ;;  %v6308_v28 = vsel %vm6298_vm12, %v13109_v56, %v6307_v35  ;;  %v6315_v62 = vsel %vm6298_vm12, %v6227_v10, %v6314_v44  ;;  %v6322_v42 = vsel %vm6298_vm12, %v6233_v16, %v6321_v52 }
 0x7b9   : > { %v6301_v20 = vsel %vm6300_vm13, %v13111_v1, %v6299_v2  ;;  %v6309_v25 = vsel %vm6300_vm13, %v13113_v63, %v6308_v28  ;;  %v6316_v9 = vsel %vm6300_vm13, %v6239_v11, %v6315_v62  ;;  %v6323_v13 = vsel %vm6300_vm13, %v6245_v24, %v6322_v42 }
 0x7ba   : > { %v6303_v22 = vsel %vm6302_vm14, %v13115_v4, %v6301_v20  ;;  %v6310_v1 = vsel %vm6302_vm14, %v13117_v33, %v6309_v25  ;;  %v6317_v39 = vsel %vm6302_vm14, %v6251_v23, %v6316_v9  ;;  %v6324_v56 = vsel %vm6302_vm14, %v6257_v6, %v6323_v13 }
 0x7bb   : > { %6329 = vst [vmem:[%s251_s18] sm:$0xff] %v6303_v22 }
 0x7bc   : > { %6330 = vst [vmem:[%s251_s18 + $0x8] sm:$0xff] %v6310_v1 }
 0x7bd   : > { %6331 = vst [vmem:[%s251_s18 + $0x10] sm:$0xff] %v6317_v39 }
 0x7be   : > { %6332 = vst [vmem:[%s251_s18 + $0x18] sm:$0xff] %v6324_v56 }
 0x7bf PF: > { %s16_s21 = sadd.s32 1, %s8339_s21  }
 0x7c0   : > { %p13_p4 = scmp.ge.s32.totalorder %s16_s21, 4  }
 0x7c2   :  { %15 = sbr.rel (!%p13_p4) target bundleno = 1 (0x1), region = 74 }

</bundles_post_ra>
